<compile_context>
chip_gen: v7x
topology: tpu7x:2x2x1
jax: 0.10.0
libtpu: 0.0.40
codegen_flags: <defaults>
</compile_context>

<pallas_src>
import numpy as np
import jax
import jax.numpy as jnp
from jax.experimental import pallas as pl
from jax.experimental.pallas import tpu as pltpu

# ----------------------- module hyper-parameters -----------------------
QK_HDIM = 32          # qk_hdim
V_HDIM = 16           # v_hdim (== channel count of x)
NUMS = 32             # nums_pattern_mode
K_TOP = 10            # k
THRESHOLD = 0.5
MOVING_AVG = 0.999
MAX_LEN = 37          # AdaptivePositionEmbedding max_length
SLAB_W = 128          # lane-dense output width of the fused proj+query kernel
TN_MAX = 2048         # max tokens per grid step


def _l2norm(v, eps=1e-12):
    # F.normalize(v, dim=1): v / max(||v||_2, eps)  ==  v * rsqrt(max(||v||^2, eps^2))
    ss = jnp.sum(v * v, axis=-1, keepdims=True)
    return v * jax.lax.rsqrt(jnp.maximum(ss, eps * eps))


# ----------------------------- Pallas kernels -----------------------------
def _score_argmax(qn, mn):
    """cosine score matrix + (max, first-occurrence argmax, onehot)."""
    score = jax.lax.dot_general(qn, mn, (((1,), (1,)), ((), ())),
                                preferred_element_type=jnp.float32)
    top1 = jnp.max(score, axis=1, keepdims=True)
    ids = jax.lax.broadcasted_iota(jnp.int32, score.shape, 1)
    idx = jnp.min(jnp.where(score == top1, ids, score.shape[1]),
                  axis=1, keepdims=True)
    onehot = (ids == idx).astype(jnp.float32)
    return top1, idx, onehot


def proj_query_kernel(e_ref, x_ref, w1_ref, b1_ref, w2_ref, b2_ref,
                      mn_ref, vn_ref, slab_ref):
    """Fused: q = fc2(GELU(fc1(freq+pos))) ; cosine query vs old memory ;
    pattern agreement.  Single lane-dense (TN, 128) output slab."""
    tn = slab_ref.shape[0]
    dk = w2_ref.shape[1]

    # ---- q = proj(freq_embed + pos_embed), exact (erf) GELU ----
    e = e_ref[...]
    h = jnp.dot(e, w1_ref[...], preferred_element_type=jnp.float32) + b1_ref[...]
    h = 0.5 * h * (1.0 + jax.lax.erf(h * 0.7071067811865476))
    q = jnp.dot(h, w2_ref[...], preferred_element_type=jnp.float32) + b2_ref[...]

    # ---- cosine scores vs (pre-normalized) old memory ----
    qn = _l2norm(q)
    top1, idx, onehot = _score_argmax(qn, mn_ref[...])

    # ---- agreement of x with the selected (pre-normalized) pattern ----
    vsel_n = jnp.dot(onehot, vn_ref[...], preferred_element_type=jnp.float32)
    xn = _l2norm(x_ref[...])
    ps = jnp.sum(xn * vsel_n, axis=1, keepdims=True)

    # ---- pack into one lane-dense (TN, 128) slab ----
    # cols [0,dk): q | col dk: top1 score | col dk+1: argmax idx (f32) | col dk+2: ps
    r = jax.lax.broadcasted_iota(jnp.int32, (dk, SLAB_W), 0)
    c = jax.lax.broadcasted_iota(jnp.int32, (dk, SLAB_W), 1)
    put_q = (r == c).astype(jnp.float32)                       # (dk, 128) "identity pad"
    slab = jnp.dot(q, put_q, preferred_element_type=jnp.float32)
    lane = jax.lax.broadcasted_iota(jnp.int32, (tn, SLAB_W), 1)
    slab = jnp.where(lane == dk, top1, slab)
    slab = jnp.where(lane == dk + 1, idx.astype(jnp.float32), slab)
    slab = jnp.where(lane == dk + 2, ps, slab)
    slab_ref[...] = slab


def read_kernel(q_ref, mn_ref, vpad_ref, out_ref):
    """reading(): score vs updated memory, onehot(argmax) @ updated pattern
    (pattern pre-padded to 128 lanes -> lane-dense output)."""
    qn = _l2norm(q_ref[...])
    _, _, onehot = _score_argmax(qn, mn_ref[...])
    out_ref[...] = jnp.dot(onehot, vpad_ref[...], preferred_element_type=jnp.float32)


# ----------------------------- Pallas wrappers -----------------------------
def _token_tiling(n):
    """Pick token tile TN and padded token count (multiple of TN, TN % 8 == 0)."""
    n8 = ((n + 7) // 8) * 8
    if n8 <= TN_MAX:
        return n8, n8
    npad = ((n + TN_MAX - 1) // TN_MAX) * TN_MAX
    return TN_MAX, npad


def proj_query(e, x_flat, w1t, b1, w2t, b2, mn, vn, tn):
    npad, dk = e.shape
    dv = x_flat.shape[1]
    nums = mn.shape[0]
    return pl.pallas_call(
        proj_query_kernel,
        out_shape=jax.ShapeDtypeStruct((npad, SLAB_W), jnp.float32),
        grid=(npad // tn,),
        in_specs=[
            pl.BlockSpec((tn, dk), lambda i: (i, 0)),
            pl.BlockSpec((tn, dv), lambda i: (i, 0)),
            pl.BlockSpec((dk, dk), lambda i: (0, 0)),
            pl.BlockSpec((1, dk), lambda i: (0, 0)),
            pl.BlockSpec((dk, dk), lambda i: (0, 0)),
            pl.BlockSpec((1, dk), lambda i: (0, 0)),
            pl.BlockSpec((nums, dk), lambda i: (0, 0)),
            pl.BlockSpec((nums, dv), lambda i: (0, 0)),
        ],
        out_specs=pl.BlockSpec((tn, SLAB_W), lambda i: (i, 0)),
        compiler_params=pltpu.CompilerParams(dimension_semantics=("parallel",)),
    )(e, x_flat, w1t, b1, w2t, b2, mn, vn)


def memory_read(q, mn, vpad, tn):
    npad, dk = q.shape
    nums, wv = vpad.shape
    return pl.pallas_call(
        read_kernel,
        out_shape=jax.ShapeDtypeStruct((npad, wv), jnp.float32),
        grid=(npad // tn,),
        in_specs=[
            pl.BlockSpec((tn, dk), lambda i: (i, 0)),
            pl.BlockSpec((nums, dk), lambda i: (0, 0)),
            pl.BlockSpec((nums, wv), lambda i: (0, 0)),
        ],
        out_specs=pl.BlockSpec((tn, wv), lambda i: (i, 0)),
        compiler_params=pltpu.CompilerParams(dimension_semantics=("parallel",)),
    )(q, mn, vpad)


# ------------------------- plain-JAX glue (on device) -------------------------
def _pool_matrix(L, out_len):
    """AdaptiveAvgPool1d(out_len) as an (out_len, L) averaging matrix (trace-time const)."""
    w = np.zeros((out_len, L), np.float32)
    for i in range(out_len):
        s = (i * L) // out_len
        e = -((-(i + 1) * L) // out_len)   # ceil((i+1)*L/out_len)
        w[i, s:e] = 1.0 / (e - s)
    return jnp.asarray(w)


def adaptive_position_embed(pos_embed, size, depths_pos):
    """AdaptivePositionEmbedding.forward((h, w), depths_pos) -> (b*h*w, D)."""
    h, w = size
    pe = pos_embed[0]                                                  # (MAX_LEN, D)
    rows_pe = (_pool_matrix(MAX_LEN, h) @ pe) if h < MAX_LEN else pe   # (h, D)
    cols_pe = (_pool_matrix(MAX_LEN, w) @ pe) if w < MAX_LEN else pe   # (w, D)
    rows_dir = jnp.tile(rows_pe, (h, 1))                               # 'b l d -> b (n l) d'
    cols_dir = jnp.repeat(cols_pe, w, axis=0)                          # 'b l d -> b (l n) d'
    plane = rows_dir + cols_dir                                        # (h*w, D), batch-invariant
    depth_sel = pe[depths_pos[:, 0]]                                   # (b, D) gather along length
    out = plane[None, :, :] + depth_sel[:, None, :]                    # (b, h*w, D)
    return out.reshape(-1, pos_embed.shape[-1])


def memory_update_device(x_flat, q, top1_score, top1_idx, score_pattern,
                         m_old, v_old, age, valid):
    """memory_update() bookkeeping (eval semantics: persistent buffers untouched),
    entirely on-device with fixed shapes."""
    n = q.shape[0]
    hit = score_pattern > THRESHOLD
    mask = hit & valid
    not_mask = jnp.logical_not(hit) & valid
    maskf = mask.astype(jnp.float32)

    # ---- moving-average update of slots hit by confident tokens ----
    onehot = jax.nn.one_hot(top1_idx, NUMS, dtype=jnp.float32)          # (n, NUMS)
    onehot_sum = (onehot * maskf[:, None]).sum(axis=0)                  # (NUMS,)
    embed_sum = (q * maskf[:, None]).T @ onehot                         # (Dk, NUMS)
    nz = onehot_sum > 0
    embed_mean = embed_sum / jnp.where(nz, onehot_sum, 1.0)
    parameters = jnp.where(nz[:, None],
                           m_old * MOVING_AVG + embed_mean.T * (1.0 - MOVING_AVG),
                           m_old)

    # ---- replace the oldest slots with (a subset of) the non-matching tokens ----
    # TODO(synk): torch.topk tie-breaking order is backend-defined; we use stable
    # argsort for a deterministic (but possibly different) tie order.
    n_not = not_mask.sum()
    is_small = n_not < NUMS                      # reference branch: len(not_mask) < nums
    i_range = jnp.arange(NUMS)

    # case A: write-slot i sources the i-th not-masked token (in token order)
    rank = jnp.cumsum(not_mask.astype(jnp.int32)) - 1
    sel_a = (not_mask[None, :] & (rank[None, :] == i_range[:, None])).astype(jnp.float32)

    # case B: the K_TOP not-masked tokens with the smallest top1 score
    key_b = jnp.where(not_mask, top1_score, jnp.inf)
    order_b = jnp.argsort(key_b)[:NUMS]
    sel_b = jax.nn.one_hot(order_b, n, dtype=jnp.float32)               # (NUMS, n)

    sel = jnp.where(is_small, sel_a, sel_b)
    n_write = jnp.where(is_small, n_not, jnp.minimum(n_not, K_TOP))
    write_flag = (i_range < n_write).astype(jnp.float32)                # (NUMS,)

    rows_q = sel @ q                                                    # (NUMS, Dk)
    rows_x = sel @ x_flat                                               # (NUMS, Dv)

    old_order = jnp.argsort(-age)                                       # oldest slots first
    slot_of = jax.nn.one_hot(old_order, NUMS, dtype=jnp.float32)        # (write i, slot s)
    slot_rows_q = slot_of.T @ (rows_q * write_flag[:, None])
    slot_rows_x = slot_of.T @ (rows_x * write_flag[:, None])
    slot_written = (slot_of.T @ write_flag) > 0.5

    parameters = jnp.where(slot_written[:, None], slot_rows_q, parameters)
    pattern = jnp.where(slot_written[:, None], slot_rows_x, v_old)
    return parameters, pattern


# ------------------------------ parameters ------------------------------
def init_params(key):
    ks = jax.random.split(key, 4)

    def tn(k, shape, std):
        return (std * jax.random.truncated_normal(k, -2.0, 2.0, shape)).astype(jnp.float32)

    return {
        "pos_embed": tn(ks[0], (1, MAX_LEN, QK_HDIM), 0.02),           # trunc_normal std=0.02
        "freq_w": tn(ks[1], (QK_HDIM, 1), 0.01),                       # nn.Linear(1, qk_hdim)
        "freq_b": jnp.zeros((QK_HDIM,), jnp.float32),
        "fc1_w": tn(ks[2], (QK_HDIM, QK_HDIM), 0.01),                  # proj.fc1 (out, in)
        "fc1_b": jnp.zeros((QK_HDIM,), jnp.float32),
        "fc2_w": tn(ks[3], (QK_HDIM, QK_HDIM), 0.01),                  # proj.fc2 (out, in)
        "fc2_b": jnp.zeros((QK_HDIM,), jnp.float32),
        "parameter_feature": jnp.zeros((NUMS, QK_HDIM), jnp.float32),  # zero init (as in __init__)
        "pattern": jnp.zeros((NUMS, V_HDIM), jnp.float32),             # zero init (as in __init__)
        "age": jnp.zeros((NUMS,), jnp.float32),
    }


# -------------------------------- forward --------------------------------
def pattern_memory_block_forward(params, x, freq=None, depths_pos=None):
    b, c, h, w = x.shape
    assert c == V_HDIM and h == w
    if freq is None:
        freq = jnp.zeros((b, 1), jnp.float32)
    if depths_pos is None:
        depths_pos = jnp.zeros((b, 1), jnp.int32)

    n = b * h * w
    tn, npad = _token_tiling(n)

    # frequency + adaptive position embedding (small XLA glue; batch-broadcast add,
    # no (N, Dk) repeat stream into the kernel)
    fe = freq @ params["freq_w"].T + params["freq_b"]                   # (b, Dk)
    pe = adaptive_position_embed(params["pos_embed"], (h, w), depths_pos)
    e = (pe.reshape(b, h * w, QK_HDIM) + fe[:, None, :]).reshape(n, QK_HDIM)

    # token-major x (matches x.permute(0,2,3,1).reshape(-1, c))
    x_flat = jnp.transpose(x, (0, 2, 3, 1)).reshape(n, c)

    # pad token dim to the tile multiple; padded rows are masked out of the update
    if npad != n:
        e = jnp.pad(e, ((0, npad - n), (0, 0)))
        x_pad = jnp.pad(x_flat, ((0, npad - n), (0, 0)))
    else:
        x_pad = x_flat
    valid = jnp.arange(npad) < n

    m_old = params["parameter_feature"]
    v_old = params["pattern"]
    mn_old = _l2norm(m_old)          # normalize grid-invariant operands ONCE
    vn_old = _l2norm(v_old)

    # Pallas kernel 1 (fused): q = proj(freq+pos), scores vs OLD memory, pattern
    # agreement — one lane-dense (N, 128) output slab.
    slab = proj_query(e, x_pad,
                      params["fc1_w"].T, params["fc1_b"][None, :],
                      params["fc2_w"].T, params["fc2_b"][None, :],
                      mn_old, vn_old, tn)
    q = slab[:, :QK_HDIM]
    top1_score = slab[:, QK_HDIM]
    top1_idx = slab[:, QK_HDIM + 1].astype(jnp.int32)
    score_pattern = slab[:, QK_HDIM + 2]

    # on-device memory update (no host round trip)
    m_new, v_new = memory_update_device(x_pad, q, top1_score, top1_idx,
                                        score_pattern, m_old, v_old,
                                        params["age"], valid)

    # Pallas kernel 2: reading() vs updated memory, lane-dense padded pattern table
    mn_new = _l2norm(m_new)
    v_pad = jnp.pad(v_new, ((0, 0), (0, SLAB_W - V_HDIM)))
    out = memory_read(q, mn_new, v_pad, tn)[:n, :V_HDIM]                # (N, Dv)

    # back to NCHW
    return out.reshape(b, h, w, c).transpose(0, 3, 1, 2)


if __name__ == "__main__":
    key = jax.random.PRNGKey(0)
    pkey, xkey = jax.random.split(key)
    params = init_params(pkey)

    b, c, h, w = 2, V_HDIM, 16, 16                  # N = b*h*w = 512 tokens
    x = jax.random.normal(xkey, (b, c, h, w), dtype=jnp.float32)

    fwd = jax.jit(pattern_memory_block_forward)
    out = fwd(params, x)
    out = jax.block_until_ready(out)
    assert out.shape == (b, V_HDIM, h, w)
    assert bool(jnp.all(jnp.isfinite(out)))
    print("KERNEL_OK")
</pallas_src>

<mosaic_0001>
module attributes {stable_mosaic.version = 11 : i64} {
  func.func @proj_query_kernel(%arg0: i32, %arg1: memref<512x32xf32, #tpu.memory_space<vmem>>, %arg2: memref<512x16xf32, #tpu.memory_space<vmem>>, %arg3: memref<32x32xf32, #tpu.memory_space<vmem>>, %arg4: memref<1x32xf32, #tpu.memory_space<vmem>>, %arg5: memref<32x32xf32, #tpu.memory_space<vmem>>, %arg6: memref<1x32xf32, #tpu.memory_space<vmem>>, %arg7: memref<32x32xf32, #tpu.memory_space<vmem>>, %arg8: memref<32x16xf32, #tpu.memory_space<vmem>>, %arg9: memref<512x128xf32, #tpu.memory_space<vmem>>) attributes {dimension_semantics = [#tpu.dimension_semantics<parallel>], iteration_bounds = array<i64: 1>, scalar_prefetch = 0 : i64, scratch_operands = 0 : i64, tpu.core_type = #tpu.core_type<tc>, window_params = [{transform_indices = @transform_0, window_bounds = array<i64: 512, 32>}, {transform_indices = @transform_1, window_bounds = array<i64: 512, 16>}, {pipeline_mode = #tpu.pipeline_mode<synchronous>, transform_indices = @transform_2, window_bounds = array<i64: 32, 32>}, {pipeline_mode = #tpu.pipeline_mode<synchronous>, transform_indices = @transform_3, window_bounds = array<i64: 1, 32>}, {pipeline_mode = #tpu.pipeline_mode<synchronous>, transform_indices = @transform_4, window_bounds = array<i64: 32, 32>}, {pipeline_mode = #tpu.pipeline_mode<synchronous>, transform_indices = @transform_5, window_bounds = array<i64: 1, 32>}, {pipeline_mode = #tpu.pipeline_mode<synchronous>, transform_indices = @transform_6, window_bounds = array<i64: 32, 32>}, {pipeline_mode = #tpu.pipeline_mode<synchronous>, transform_indices = @transform_7, window_bounds = array<i64: 32, 16>}, {transform_indices = @transform_8, window_bounds = array<i64: 512, 128>}]} {
    %c0 = arith.constant 0 : index
    %c0_0 = arith.constant 0 : index
    %0 = vector.load %arg1[%c0, %c0_0] : memref<512x32xf32, #tpu.memory_space<vmem>>, vector<512x32xf32>
    %c0_1 = arith.constant 0 : index
    %c0_2 = arith.constant 0 : index
    %1 = vector.load %arg3[%c0_1, %c0_2] : memref<32x32xf32, #tpu.memory_space<vmem>>, vector<32x32xf32>
    %cst = arith.constant dense<0.000000e+00> : vector<512x32xf32>
    %2 = tpu.matmul %0, %1, %cst {dimension_numbers = #tpu.dot_dimension_numbers<[1], [0], [0], [1], [0, 0, 1, 1], [], []>} : vector<512x32xf32>, vector<32x32xf32>, vector<512x32xf32> -> vector<512x32xf32>
    %c0_3 = arith.constant 0 : index
    %c0_4 = arith.constant 0 : index
    %3 = vector.load %arg4[%c0_3, %c0_4] : memref<1x32xf32, #tpu.memory_space<vmem>>, vector<1x32xf32>
    %4 = vector.broadcast %3 : vector<1x32xf32> to vector<512x32xf32>
    %5 = arith.addf %2, %4 : vector<512x32xf32>
    %cst_5 = arith.constant 5.000000e-01 : f32
    %6 = vector.broadcast %cst_5 : f32 to vector<512x32xf32>
    %7 = arith.mulf %6, %5 : vector<512x32xf32>
    %cst_6 = arith.constant 0.707106769 : f32
    %8 = vector.broadcast %cst_6 : f32 to vector<512x32xf32>
    %9 = arith.mulf %5, %8 : vector<512x32xf32>
    %10 = math.erf %9 : vector<512x32xf32>
    %cst_7 = arith.constant 1.000000e+00 : f32
    %11 = vector.broadcast %cst_7 : f32 to vector<512x32xf32>
    %12 = arith.addf %11, %10 : vector<512x32xf32>
    %13 = arith.mulf %7, %12 : vector<512x32xf32>
    %c0_8 = arith.constant 0 : index
    %c0_9 = arith.constant 0 : index
    %14 = vector.load %arg5[%c0_8, %c0_9] : memref<32x32xf32, #tpu.memory_space<vmem>>, vector<32x32xf32>
    %cst_10 = arith.constant dense<0.000000e+00> : vector<512x32xf32>
    %15 = tpu.matmul %13, %14, %cst_10 {dimension_numbers = #tpu.dot_dimension_numbers<[1], [0], [0], [1], [0, 0, 1, 1], [], []>} : vector<512x32xf32>, vector<32x32xf32>, vector<512x32xf32> -> vector<512x32xf32>
    %c0_11 = arith.constant 0 : index
    %c0_12 = arith.constant 0 : index
    %16 = vector.load %arg6[%c0_11, %c0_12] : memref<1x32xf32, #tpu.memory_space<vmem>>, vector<1x32xf32>
    %17 = vector.broadcast %16 : vector<1x32xf32> to vector<512x32xf32>
    %18 = arith.addf %15, %17 : vector<512x32xf32>
    %19 = arith.mulf %18, %18 : vector<512x32xf32>
    %cst_13 = arith.constant dense<0.000000e+00> : vector<512xf32>
    %20 = vector.multi_reduction <add>, %19, %cst_13 [1] : vector<512x32xf32> to vector<512xf32>
    %21 = vector.shape_cast %20 : vector<512xf32> to vector<512x1xf32>
    %cst_14 = arith.constant 1.000000e-24 : f32
    %22 = vector.broadcast %cst_14 : f32 to vector<512x1xf32>
    %23 = arith.maximumf %21, %22 : vector<512x1xf32>
    %24 = math.rsqrt %23 : vector<512x1xf32>
    %25 = vector.broadcast %24 : vector<512x1xf32> to vector<512x32xf32>
    %26 = arith.mulf %18, %25 : vector<512x32xf32>
    %c0_15 = arith.constant 0 : index
    %c0_16 = arith.constant 0 : index
    %27 = vector.load %arg7[%c0_15, %c0_16] : memref<32x32xf32, #tpu.memory_space<vmem>>, vector<32x32xf32>
    %cst_17 = arith.constant dense<0.000000e+00> : vector<512x32xf32>
    %28 = tpu.matmul %26, %27, %cst_17 {dimension_numbers = #tpu.dot_dimension_numbers<[1], [1], [0], [0], [0, 0, 1, 0], [], []>} : vector<512x32xf32>, vector<32x32xf32>, vector<512x32xf32> -> vector<512x32xf32>
    %cst_18 = arith.constant dense<0xFF800000> : vector<512xf32>
    %29 = vector.multi_reduction <maximumf>, %28, %cst_18 [1] : vector<512x32xf32> to vector<512xf32>
    %30 = vector.shape_cast %29 : vector<512xf32> to vector<512x1xf32>
    %31 = tpu.iota {dimensions = array<i32: 1>} : vector<512x32xi32>
    %32 = vector.broadcast %30 : vector<512x1xf32> to vector<512x32xf32>
    %33 = arith.cmpf oeq, %28, %32 : vector<512x32xf32>
    %c32_i32 = arith.constant 32 : i32
    %34 = vector.broadcast %c32_i32 : i32 to vector<512x32xi32>
    %35 = arith.select %33, %31, %34 : vector<512x32xi1>, vector<512x32xi32>
    %cst_19 = arith.constant dense<2147483647> : vector<512xi32>
    %36 = vector.multi_reduction <minsi>, %35, %cst_19 [1] : vector<512x32xi32> to vector<512xi32>
    %37 = vector.shape_cast %36 : vector<512xi32> to vector<512x1xi32>
    %38 = vector.broadcast %37 : vector<512x1xi32> to vector<512x32xi32>
    %39 = arith.cmpi eq, %31, %38 : vector<512x32xi32>
    %40 = arith.extui %39 : vector<512x32xi1> to vector<512x32xi32>
    %41 = arith.sitofp %40 : vector<512x32xi32> to vector<512x32xf32>
    %c0_20 = arith.constant 0 : index
    %c0_21 = arith.constant 0 : index
    %42 = vector.load %arg8[%c0_20, %c0_21] : memref<32x16xf32, #tpu.memory_space<vmem>>, vector<32x16xf32>
    %cst_22 = arith.constant dense<0.000000e+00> : vector<512x16xf32>
    %43 = tpu.matmul %41, %42, %cst_22 {dimension_numbers = #tpu.dot_dimension_numbers<[1], [0], [0], [1], [0, 0, 1, 1], [], []>} : vector<512x32xf32>, vector<32x16xf32>, vector<512x16xf32> -> vector<512x16xf32>
    %c0_23 = arith.constant 0 : index
    %c0_24 = arith.constant 0 : index
    %44 = vector.load %arg2[%c0_23, %c0_24] : memref<512x16xf32, #tpu.memory_space<vmem>>, vector<512x16xf32>
    %45 = arith.mulf %44, %44 : vector<512x16xf32>
    %cst_25 = arith.constant dense<0.000000e+00> : vector<512xf32>
    %46 = vector.multi_reduction <add>, %45, %cst_25 [1] : vector<512x16xf32> to vector<512xf32>
    %47 = vector.shape_cast %46 : vector<512xf32> to vector<512x1xf32>
    %cst_26 = arith.constant 1.000000e-24 : f32
    %48 = vector.broadcast %cst_26 : f32 to vector<512x1xf32>
    %49 = arith.maximumf %47, %48 : vector<512x1xf32>
    %50 = math.rsqrt %49 : vector<512x1xf32>
    %51 = vector.broadcast %50 : vector<512x1xf32> to vector<512x16xf32>
    %52 = arith.mulf %44, %51 : vector<512x16xf32>
    %53 = arith.mulf %52, %43 : vector<512x16xf32>
    %cst_27 = arith.constant dense<0.000000e+00> : vector<512xf32>
    %54 = vector.multi_reduction <add>, %53, %cst_27 [1] : vector<512x16xf32> to vector<512xf32>
    %55 = vector.shape_cast %54 : vector<512xf32> to vector<512x1xf32>
    %56 = tpu.iota {dimensions = array<i32: 0>} : vector<32x128xi32>
    %57 = tpu.iota {dimensions = array<i32: 1>} : vector<32x128xi32>
    %58 = arith.cmpi eq, %56, %57 : vector<32x128xi32>
    %59 = arith.extui %58 : vector<32x128xi1> to vector<32x128xi32>
    %60 = arith.sitofp %59 : vector<32x128xi32> to vector<32x128xf32>
    %cst_28 = arith.constant dense<0.000000e+00> : vector<512x128xf32>
    %61 = tpu.matmul %18, %60, %cst_28 {dimension_numbers = #tpu.dot_dimension_numbers<[1], [0], [0], [1], [0, 0, 1, 1], [], []>} : vector<512x32xf32>, vector<32x128xf32>, vector<512x128xf32> -> vector<512x128xf32>
    %62 = tpu.iota {dimensions = array<i32: 1>} : vector<512x128xi32>
    %c32_i32_29 = arith.constant 32 : i32
    %63 = vector.broadcast %c32_i32_29 : i32 to vector<512x128xi32>
    %64 = arith.cmpi eq, %62, %63 : vector<512x128xi32>
    %65 = vector.shape_cast %30 : vector<512x1xf32> to vector<512x1xf32>
    %66 = vector.broadcast %65 : vector<512x1xf32> to vector<512x128xf32>
    %67 = arith.select %64, %66, %61 : vector<512x128xi1>, vector<512x128xf32>
    %c33_i32 = arith.constant 33 : i32
    %68 = vector.broadcast %c33_i32 : i32 to vector<512x128xi32>
    %69 = arith.cmpi eq, %62, %68 : vector<512x128xi32>
    %70 = arith.sitofp %37 : vector<512x1xi32> to vector<512x1xf32>
    %71 = vector.shape_cast %70 : vector<512x1xf32> to vector<512x1xf32>
    %72 = vector.broadcast %71 : vector<512x1xf32> to vector<512x128xf32>
    %73 = arith.select %69, %72, %67 : vector<512x128xi1>, vector<512x128xf32>
    %c34_i32 = arith.constant 34 : i32
    %74 = vector.broadcast %c34_i32 : i32 to vector<512x128xi32>
    %75 = arith.cmpi eq, %62, %74 : vector<512x128xi32>
    %76 = vector.shape_cast %55 : vector<512x1xf32> to vector<512x1xf32>
    %77 = vector.broadcast %76 : vector<512x1xf32> to vector<512x128xf32>
    %78 = arith.select %75, %77, %73 : vector<512x128xi1>, vector<512x128xf32>
    %c0_30 = arith.constant 0 : index
    %c0_31 = arith.constant 0 : index
    %79 = vector.load %arg9[%c0_30, %c0_31] : memref<512x128xf32, #tpu.memory_space<vmem>>, vector<512x128xf32>
    tpu.vector_store %arg9[%c0_30, %c0_31], %78 {strides = array<i32>} : memref<512x128xf32, #tpu.memory_space<vmem>>, vector<512x128xf32>,
    return
  }
  func.func @transform_0(%arg0: i32) -> (i32, i32) {
    %c0_i32 = arith.constant 0 : i32
    %c0_i32_0 = arith.constant 0 : i32
    return %arg0, %c0_i32 : i32, i32
  }
  func.func @transform_1(%arg0: i32) -> (i32, i32) {
    %c0_i32 = arith.constant 0 : i32
    %c0_i32_0 = arith.constant 0 : i32
    return %arg0, %c0_i32 : i32, i32
  }
  func.func @transform_2(%arg0: i32) -> (i32, i32) {
    %c0_i32 = arith.constant 0 : i32
    %c0_i32_0 = arith.constant 0 : i32
    %c0_i32_1 = arith.constant 0 : i32
    return %c0_i32, %c0_i32_0 : i32, i32
  }
  func.func @transform_3(%arg0: i32) -> (i32, i32) {
    %c0_i32 = arith.constant 0 : i32
    %c0_i32_0 = arith.constant 0 : i32
    %c0_i32_1 = arith.constant 0 : i32
    return %c0_i32, %c0_i32_0 : i32, i32
  }
  func.func @transform_4(%arg0: i32) -> (i32, i32) {
    %c0_i32 = arith.constant 0 : i32
    %c0_i32_0 = arith.constant 0 : i32
    %c0_i32_1 = arith.constant 0 : i32
    return %c0_i32, %c0_i32_0 : i32, i32
  }
  func.func @transform_5(%arg0: i32) -> (i32, i32) {
    %c0_i32 = arith.constant 0 : i32
    %c0_i32_0 = arith.constant 0 : i32
    %c0_i32_1 = arith.constant 0 : i32
    return %c0_i32, %c0_i32_0 : i32, i32
  }
  func.func @transform_6(%arg0: i32) -> (i32, i32) {
    %c0_i32 = arith.constant 0 : i32
    %c0_i32_0 = arith.constant 0 : i32
    %c0_i32_1 = arith.constant 0 : i32
    return %c0_i32, %c0_i32_0 : i32, i32
  }
  func.func @transform_7(%arg0: i32) -> (i32, i32) {
    %c0_i32 = arith.constant 0 : i32
    %c0_i32_0 = arith.constant 0 : i32
    %c0_i32_1 = arith.constant 0 : i32
    return %c0_i32, %c0_i32_0 : i32, i32
  }
  func.func @transform_8(%arg0: i32) -> (i32, i32) {
    %c0_i32 = arith.constant 0 : i32
    %c0_i32_0 = arith.constant 0 : i32
    return %arg0, %c0_i32 : i32, i32
  }
}

module attributes {stable_mosaic.version = 11 : i64} {
  func.func @read_kernel(%arg0: i32, %arg1: memref<512x32xf32, #tpu.memory_space<vmem>>, %arg2: memref<32x32xf32, #tpu.memory_space<vmem>>, %arg3: memref<32x128xf32, #tpu.memory_space<vmem>>, %arg4: memref<512x128xf32, #tpu.memory_space<vmem>>) attributes {dimension_semantics = [#tpu.dimension_semantics<parallel>], iteration_bounds = array<i64: 1>, scalar_prefetch = 0 : i64, scratch_operands = 0 : i64, tpu.core_type = #tpu.core_type<tc>, window_params = [{transform_indices = @transform_0, window_bounds = array<i64: 512, 32>}, {pipeline_mode = #tpu.pipeline_mode<synchronous>, transform_indices = @transform_1, window_bounds = array<i64: 32, 32>}, {pipeline_mode = #tpu.pipeline_mode<synchronous>, transform_indices = @transform_2, window_bounds = array<i64: 32, 128>}, {transform_indices = @transform_3, window_bounds = array<i64: 512, 128>}]} {
    %c0 = arith.constant 0 : index
    %c0_0 = arith.constant 0 : index
    %0 = vector.load %arg1[%c0, %c0_0] : memref<512x32xf32, #tpu.memory_space<vmem>>, vector<512x32xf32>
    %1 = arith.mulf %0, %0 : vector<512x32xf32>
    %cst = arith.constant dense<0.000000e+00> : vector<512xf32>
    %2 = vector.multi_reduction <add>, %1, %cst [1] : vector<512x32xf32> to vector<512xf32>
    %3 = vector.shape_cast %2 : vector<512xf32> to vector<512x1xf32>
    %cst_1 = arith.constant 1.000000e-24 : f32
    %4 = vector.broadcast %cst_1 : f32 to vector<512x1xf32>
    %5 = arith.maximumf %3, %4 : vector<512x1xf32>
    %6 = math.rsqrt %5 : vector<512x1xf32>
    %7 = vector.broadcast %6 : vector<512x1xf32> to vector<512x32xf32>
    %8 = arith.mulf %0, %7 : vector<512x32xf32>
    %c0_2 = arith.constant 0 : index
    %c0_3 = arith.constant 0 : index
    %9 = vector.load %arg2[%c0_2, %c0_3] : memref<32x32xf32, #tpu.memory_space<vmem>>, vector<32x32xf32>
    %cst_4 = arith.constant dense<0.000000e+00> : vector<512x32xf32>
    %10 = tpu.matmul %8, %9, %cst_4 {dimension_numbers = #tpu.dot_dimension_numbers<[1], [1], [0], [0], [0, 0, 1, 0], [], []>} : vector<512x32xf32>, vector<32x32xf32>, vector<512x32xf32> -> vector<512x32xf32>
    %cst_5 = arith.constant dense<0xFF800000> : vector<512xf32>
    %11 = vector.multi_reduction <maximumf>, %10, %cst_5 [1] : vector<512x32xf32> to vector<512xf32>
    %12 = vector.shape_cast %11 : vector<512xf32> to vector<512x1xf32>
    %13 = tpu.iota {dimensions = array<i32: 1>} : vector<512x32xi32>
    %14 = vector.broadcast %12 : vector<512x1xf32> to vector<512x32xf32>
    %15 = arith.cmpf oeq, %10, %14 : vector<512x32xf32>
    %c32_i32 = arith.constant 32 : i32
    %16 = vector.broadcast %c32_i32 : i32 to vector<512x32xi32>
    %17 = arith.select %15, %13, %16 : vector<512x32xi1>, vector<512x32xi32>
    %cst_6 = arith.constant dense<2147483647> : vector<512xi32>
    %18 = vector.multi_reduction <minsi>, %17, %cst_6 [1] : vector<512x32xi32> to vector<512xi32>
    %19 = vector.shape_cast %18 : vector<512xi32> to vector<512x1xi32>
    %20 = vector.broadcast %19 : vector<512x1xi32> to vector<512x32xi32>
    %21 = arith.cmpi eq, %13, %20 : vector<512x32xi32>
    %22 = arith.extui %21 : vector<512x32xi1> to vector<512x32xi32>
    %23 = arith.sitofp %22 : vector<512x32xi32> to vector<512x32xf32>
    %c0_7 = arith.constant 0 : index
    %c0_8 = arith.constant 0 : index
    %24 = vector.load %arg3[%c0_7, %c0_8] : memref<32x128xf32, #tpu.memory_space<vmem>>, vector<32x128xf32>
    %cst_9 = arith.constant dense<0.000000e+00> : vector<512x128xf32>
    %25 = tpu.matmul %23, %24, %cst_9 {dimension_numbers = #tpu.dot_dimension_numbers<[1], [0], [0], [1], [0, 0, 1, 1], [], []>} : vector<512x32xf32>, vector<32x128xf32>, vector<512x128xf32> -> vector<512x128xf32>
    %c0_10 = arith.constant 0 : index
    %c0_11 = arith.constant 0 : index
    %26 = vector.load %arg4[%c0_10, %c0_11] : memref<512x128xf32, #tpu.memory_space<vmem>>, vector<512x128xf32>
    tpu.vector_store %arg4[%c0_10, %c0_11], %25 {strides = array<i32>} : memref<512x128xf32, #tpu.memory_space<vmem>>, vector<512x128xf32>,
    return
  }
  func.func @transform_0(%arg0: i32) -> (i32, i32) {
    %c0_i32 = arith.constant 0 : i32
    %c0_i32_0 = arith.constant 0 : i32
    return %arg0, %c0_i32 : i32, i32
  }
  func.func @transform_1(%arg0: i32) -> (i32, i32) {
    %c0_i32 = arith.constant 0 : i32
    %c0_i32_0 = arith.constant 0 : i32
    %c0_i32_1 = arith.constant 0 : i32
    return %c0_i32, %c0_i32_0 : i32, i32
  }
  func.func @transform_2(%arg0: i32) -> (i32, i32) {
    %c0_i32 = arith.constant 0 : i32
    %c0_i32_0 = arith.constant 0 : i32
    %c0_i32_1 = arith.constant 0 : i32
    return %c0_i32, %c0_i32_0 : i32, i32
  }
  func.func @transform_3(%arg0: i32) -> (i32, i32) {
    %c0_i32 = arith.constant 0 : i32
    %c0_i32_0 = arith.constant 0 : i32
    return %arg0, %c0_i32 : i32, i32
  }
}

</mosaic_0001>

<bundles_post_ra>
// kernel: neg.1
= control target key start
LH: loop header
LB: loop body
LE: loop exit
PB: predicated region body
PF: predicated region fallthrough
CT: control target
= control target key end

     0   :  { %s24_s0 = inlined_call_operand.vmem [shape: f32[32], index: 0, kind: input, shape index: {}]   ;;  %s25_s1 = inlined_call_operand.vmem [shape: f32[32], index: 1, kind: output, shape index: {}]  }
   0x1   :  { %v2_v0 = vld [vmem:[%s24_s0] sm:$0x1] }
   0x2   :  { %v5_v1 = vxor.u32 2147483648, %v2_v0 }
   0x4   :  { %7 = vst [vmem:[%s25_s1] sm:$0x1] %v5_v1 }

// kernel: pattern_memory_block_forward.2
= control target key start
LH: loop header
LB: loop body
LE: loop exit
PB: predicated region body
PF: predicated region fallthrough
CT: control target
= control target key end

     0   :  { %vm104_vm0 = vcmask 261120   ;;  %s13352_s2 = inlined_call_operand.vmem [shape: f32[32,32], index: 2, kind: input, shape index: {}]   ;;  %s13353_s0 = inlined_call_operand.vmem [shape: f32[512,32], index: 0, kind: input, shape index: {}]   ;;  %s13354_s4 = inlined_call_operand.vmem [shape: f32[32,32], index: 4, kind: input, shape index: {}]   ;;  %s13355_s3 = inlined_call_operand.vmem [shape: f32[1,32], index: 3, kind: input, shape index: {}]   ;;  %s13356_s6 = inlined_call_operand.vmem [shape: f32[32,32], index: 6, kind: input, shape index: {}]   ;;  %s13357_s5 = inlined_call_operand.vmem [shape: f32[1,32], index: 5, kind: input, shape index: {}]   ;;  %s13358_s7 = inlined_call_operand.vmem [shape: f32[32,16], index: 7, kind: input, shape index: {}]   ;;  %s13359_s1 = inlined_call_operand.vmem [shape: f32[512,16], index: 1, kind: input, shape index: {}]   ;;  %s13360_s8 = inlined_call_operand.vmem [shape: f32[512,128], index: 8, kind: output, shape index: {}]  }
   0x1   :  { %v93_v0 = vld [vmem:[%s13352_s2] sm:$0xff]  ;;  %v94_v1 = vld [vmem:[%s13352_s2 + $0x8] sm:$0xff]  ;;  %v95_v2 = vld [vmem:[%s13352_s2 + $0x10] sm:$0xff] }
   0x2   :  { %v7634_v3 = vpack.c.bf16 %v94_v1, %v93_v0  ;;  %v96_v4 = vld [vmem:[%s13352_s2 + $0x18] sm:$0xff]  ;;  %v29_v5 = vld [vmem:[%s13353_s0] sm:$0xff]  ;;  %v30_v7 = vld [vmem:[%s13353_s0 + $0x8] sm:$0xff] }
   0x3   :  { %v7638_v6 = vpack.c.bf16 %v96_v4, %v95_v2  ;;  %7122 = vmatprep.mubr.msk.f32.mxu0 %vm104_vm0, %v29_v5  ;;  %v31_v8 = vld [vmem:[%s13353_s0 + $0x10] sm:$0xff]  ;;  %v61_v9 = vld [vmem:[%s13353_s0 + $0x100] sm:$0xff]  ;;  %v62_v10 = vld [vmem:[%s13353_s0 + $0x108] sm:$0xff] }
   0x4   :  { %7635 = vmatprep.subr.bf16.mxu0 %v7634_v3  ;;  %7678 = vmatprep.subr.bf16.mxu1 %v7634_v3  ;;  %v32_v11 = vld [vmem:[%s13353_s0 + $0x18] sm:$0xff]  ;;  %v63_v12 = vld [vmem:[%s13353_s0 + $0x110] sm:$0xff]  ;;  %v33_v13 = vld [vmem:[%s13353_s0 + $0x20] sm:$0xff] }
   0x5   :  { %7637 = vmatpush3.bf16.msra.mxu0 %v7634_v3  ;;  %7680 = vmatpush3.bf16.msra.mxu1 %v7634_v3  ;;  %v64_v14 = vld [vmem:[%s13353_s0 + $0x118] sm:$0xff]  ;;  %v65_v15 = vld [vmem:[%s13353_s0 + $0x120] sm:$0xff]  ;;  %v34_v16 = vld [vmem:[%s13353_s0 + $0x28] sm:$0xff] }
   0x6   :  { %7639 = vmatprep.subr.bf16.mxu0 %v7638_v6  ;;  %7679 = vmatprep.subr.bf16.mxu1 %v7638_v6  ;;  %v35_v17 = vld [vmem:[%s13353_s0 + $0x30] sm:$0xff]  ;;  %v66_v18 = vld [vmem:[%s13353_s0 + $0x128] sm:$0xff]  ;;  %v36_v20 = vld [vmem:[%s13353_s0 + $0x38] sm:$0xff] }
   0x7   :  { %7170 = vmatprep.mubr.msk.f32.mxu1 %vm104_vm0, %v61_v9  ;;  %v67_v19 = vld [vmem:[%s13353_s0 + $0x130] sm:$0xff]  ;;  %v37_v21 = vld [vmem:[%s13353_s0 + $0x40] sm:$0xff]  ;;  %v68_v22 = vld [vmem:[%s13353_s0 + $0x138] sm:$0xff] }
   0x8   :  { %v69_v23 = vld [vmem:[%s13353_s0 + $0x140] sm:$0xff]  ;;  %v1003_v25 = vld [vmem:[%s13354_s4 + $0x8] sm:$0xff]  ;;  %v1004_v26 = vld [vmem:[%s13354_s4 + $0x10] sm:$0xff] }
   0x9   :  { %7641 = vmatpush3.bf16.msra.mxu0 %v7638_v6  ;;  %7681 = vmatpush3.bf16.msra.mxu1 %v7638_v6  ;;  %v1002_v24 = vld [vmem:[%s13354_s4] sm:$0xff]  ;;  %v1005_v27 = vld [vmem:[%s13354_s4 + $0x18] sm:$0xff]  ;;  %v38_v28 = vld [vmem:[%s13353_s0 + $0x48] sm:$0xff] }
   0xa   :  { %v7642_v29 = vpack.c.bf16 %v1003_v25, %v1002_v24  ;;  %v39_v30 = vld [vmem:[%s13353_s0 + $0x50] sm:$0xff]  ;;  %v70_v31 = vld [vmem:[%s13353_s0 + $0x148] sm:$0xff]  ;;  %v7646_v32 = vpack.c.bf16 %v1005_v27, %v1004_v26  ;;  %v40_v34 = vld [vmem:[%s13353_s0 + $0x58] sm:$0xff] }
   0xb   :  { %v71_v33 = vld [vmem:[%s13353_s0 + $0x150] sm:$0xff]  ;;  %v41_v35 = vld [vmem:[%s13353_s0 + $0x60] sm:$0xff]  ;;  %v72_v36 = vld [vmem:[%s13353_s0 + $0x158] sm:$0xff] }
   0xc   :  { %7123 = vmatmul.mubr.msk.f32.vlgmr.msra.gmra.mrb[0].mxu0 %vm104_vm0, %v30_v7  ;;  %7171 = vmatmul.mubr.msk.f32.vlgmr.msra.gmra.mrb[0].mxu1 %vm104_vm0, %v62_v10  ;;  %v73_v37 = vld [vmem:[%s13353_s0 + $0x160] sm:$0xff]  ;;  %v42_v38 = vld [vmem:[%s13353_s0 + $0x68] sm:$0xff]  ;;  %v43_v39 = vld [vmem:[%s13353_s0 + $0x70] sm:$0xff] }
   0xd   :  { %7125 = vmatprep.mubr.msk.f32.mxu0 %vm104_vm0, %v31_v8  ;;  %7173 = vmatprep.mubr.msk.f32.mxu1 %vm104_vm0, %v63_v12  ;;  %v74_v40 = vld [vmem:[%s13353_s0 + $0x168] sm:$0xff]  ;;  %v75_v41 = vld [vmem:[%s13353_s0 + $0x170] sm:$0xff]  ;;  %v44_v42 = vld [vmem:[%s13353_s0 + $0x78] sm:$0xff] }
   0xe   :  { %7643 = vmatprep.subr.bf16.mxu1 %v7642_v29  ;;  %v45_v43 = vld [vmem:[%s13353_s0 + $0x80] sm:$0xff]  ;;  %v76_v44 = vld [vmem:[%s13353_s0 + $0x178] sm:$0xff]  ;;  %v46_v46 = vld [vmem:[%s13353_s0 + $0x88] sm:$0xff] }
   0xf   :  { %7645 = vmatpush3.bf16.msra.mxu1 %v7642_v29  ;;  %v77_v45 = vld [vmem:[%s13353_s0 + $0x180] sm:$0xff]  ;;  %v47_v47 = vld [vmem:[%s13353_s0 + $0x90] sm:$0xff]  ;;  %v78_v48 = vld [vmem:[%s13353_s0 + $0x188] sm:$0xff] }
  0x10   :  { %7126 = vmatmul.mubr.msk.f32.gmra.mrb[2].mxu0 %vm104_vm0, %v32_v11  ;;  %7174 = vmatmul.mubr.msk.f32.gmra.mrb[2].mxu1 %vm104_vm0, %v64_v14  ;;  %v79_v49 = vld [vmem:[%s13353_s0 + $0x190] sm:$0xff]  ;;  %v48_v50 = vld [vmem:[%s13353_s0 + $0x98] sm:$0xff]  ;;  %v49_v51 = vld [vmem:[%s13353_s0 + $0xa0] sm:$0xff] }
  0x11   :  { %7128 = vmatprep.mubr.msk.f32.mxu0 %vm104_vm0, %v33_v13  ;;  %7176 = vmatprep.mubr.msk.f32.mxu1 %vm104_vm0, %v65_v15  ;;  %v80_v52 = vld [vmem:[%s13353_s0 + $0x198] sm:$0xff]  ;;  %v81_v53 = vld [vmem:[%s13353_s0 + $0x1a0] sm:$0xff]  ;;  %v50_v54 = vld [vmem:[%s13353_s0 + $0xa8] sm:$0xff] }
  0x12   :  { %7647 = vmatprep.subr.bf16.mxu1 %v7646_v32  ;;  %v51_v55 = vld [vmem:[%s13353_s0 + $0xb0] sm:$0xff]  ;;  %v82_v56 = vld [vmem:[%s13353_s0 + $0x1a8] sm:$0xff]  ;;  %v52_v58 = vld [vmem:[%s13353_s0 + $0xb8] sm:$0xff] }
  0x13   :  { %7649 = vmatpush3.bf16.msra.mxu1 %v7646_v32  ;;  %v83_v57 = vld [vmem:[%s13353_s0 + $0x1b0] sm:$0xff]  ;;  %v53_v59 = vld [vmem:[%s13353_s0 + $0xc0] sm:$0xff]  ;;  %v84_v60 = vld [vmem:[%s13353_s0 + $0x1b8] sm:$0xff] }
  0x14   :  { %7129 = vmatmul.mubr.msk.f32.gmra.mrb[4].mxu0 %vm104_vm0, %v34_v16  ;;  %7177 = vmatmul.mubr.msk.f32.gmra.mrb[4].mxu1 %vm104_vm0, %v66_v18  ;;  %v85_v61 = vld [vmem:[%s13353_s0 + $0x1c0] sm:$0xff]  ;;  %v54_v62 = vld [vmem:[%s13353_s0 + $0xc8] sm:$0xff]  ;;  %v55_v63 = vld [vmem:[%s13353_s0 + $0xd0] sm:$0xff] }
  0x15   :  { %7131 = vmatprep.mubr.msk.f32.mxu0 %vm104_vm0, %v35_v17  ;;  %7179 = vmatprep.mubr.msk.f32.mxu1 %vm104_vm0, %v67_v19  ;;  %v86_v0 = vld [vmem:[%s13353_s0 + $0x1c8] sm:$0xff]  ;;  %v87_v1 = vld [vmem:[%s13353_s0 + $0x1d0] sm:$0xff]  ;;  %v56_v2 = vld [vmem:[%s13353_s0 + $0xd8] sm:$0xff] }
  0x16   :  { %v57_v3 = vld [vmem:[%s13353_s0 + $0xe0] sm:$0xff]  ;;  %v88_v4 = vld [vmem:[%s13353_s0 + $0x1d8] sm:$0xff]  ;;  %v58_v6 = vld [vmem:[%s13353_s0 + $0xe8] sm:$0xff] }
  0x17   :  { %v89_v5 = vld [vmem:[%s13353_s0 + $0x1e0] sm:$0xff]  ;;  %v59_v7 = vld [vmem:[%s13353_s0 + $0xf0] sm:$0xff]  ;;  %v90_v8 = vld [vmem:[%s13353_s0 + $0x1e8] sm:$0xff] }
  0x18   :  { %7132 = vmatmul.mubr.msk.f32.gmra.mrb[6].mxu0 %vm104_vm0, %v36_v20  ;;  %7180 = vmatmul.mubr.msk.f32.gmra.mrb[6].mxu1 %vm104_vm0, %v68_v22  ;;  %v91_v9 = vld [vmem:[%s13353_s0 + $0x1f0] sm:$0xff]  ;;  %v60_v10 = vld [vmem:[%s13353_s0 + $0xf8] sm:$0xff]  ;;  %v8463_v12 = vld [vmem:[%s13355_s3] ss:$0 sm:$0xff] }
  0x19   :  { %7134 = vmatprep.mubr.msk.f32.mxu0 %vm104_vm0, %v37_v21  ;;  %7182 = vmatprep.mubr.msk.f32.mxu1 %vm104_vm0, %v69_v23  ;;  %v92_v11 = vld [vmem:[%s13353_s0 + $0x1f8] sm:$0xff]  ;;  %vm8931_vm1 = vmpackc.low %vm104_vm0, %vm104_vm0 }
  0x1c   :  { %7135 = vmatmul.mubr.msk.f32.gmra.mrb[8].mxu0 %vm104_vm0, %v38_v28  ;;  %7183 = vmatmul.mubr.msk.f32.gmra.mrb[8].mxu1 %vm104_vm0, %v70_v31 }
  0x1d   :  { %7137 = vmatprep.mubr.msk.f32.mxu0 %vm104_vm0, %v39_v30  ;;  %7185 = vmatprep.mubr.msk.f32.mxu1 %vm104_vm0, %v71_v33 }
  0x20   :  { %7138 = vmatmul.mubr.msk.f32.gmra.mrb[10].mxu0 %vm104_vm0, %v40_v34  ;;  %7186 = vmatmul.mubr.msk.f32.gmra.mrb[10].mxu1 %vm104_vm0, %v72_v36 }
  0x21   :  { %7140 = vmatprep.mubr.msk.f32.mxu0 %vm104_vm0, %v41_v35  ;;  %7188 = vmatprep.mubr.msk.f32.mxu1 %vm104_vm0, %v73_v37 }
  0x24   :  { %7141 = vmatmul.mubr.msk.f32.gmra.mrb[12].mxu0 %vm104_vm0, %v42_v38  ;;  %7189 = vmatmul.mubr.msk.f32.gmra.mrb[12].mxu1 %vm104_vm0, %v74_v40 }
  0x25   :  { %7143 = vmatprep.mubr.msk.f32.mxu0 %vm104_vm0, %v43_v39  ;;  %7191 = vmatprep.mubr.msk.f32.mxu1 %vm104_vm0, %v75_v41 }
  0x28   :  { %7144 = vmatmul.mubr.msk.f32.gmra.mrb[14].mxu0 %vm104_vm0, %v44_v42  ;;  %7192 = vmatmul.mubr.msk.f32.gmra.mrb[14].mxu1 %vm104_vm0, %v76_v44 }
  0x29   :  { %7146 = vmatprep.mubr.msk.f32.mxu0 %vm104_vm0, %v45_v43  ;;  %7194 = vmatprep.mubr.msk.f32.mxu1 %vm104_vm0, %v77_v45 }
  0x2c   :  { %7147 = vmatmul.mubr.msk.f32.gmra.mrb[16].mxu0 %vm104_vm0, %v46_v46  ;;  %7195 = vmatmul.mubr.msk.f32.gmra.mrb[16].mxu1 %vm104_vm0, %v78_v48 }
  0x2d   :  { %7149 = vmatprep.mubr.msk.f32.mxu0 %vm104_vm0, %v47_v47  ;;  %7197 = vmatprep.mubr.msk.f32.mxu1 %vm104_vm0, %v79_v49 }
  0x30   :  { %7150 = vmatmul.mubr.msk.f32.gmra.mrb[18].mxu0 %vm104_vm0, %v48_v50  ;;  %7198 = vmatmul.mubr.msk.f32.gmra.mrb[18].mxu1 %vm104_vm0, %v80_v52 }
  0x31   :  { %7152 = vmatprep.mubr.msk.f32.mxu0 %vm104_vm0, %v49_v51  ;;  %7200 = vmatprep.mubr.msk.f32.mxu1 %vm104_vm0, %v81_v53 }
  0x34   :  { %7153 = vmatmul.mubr.msk.f32.gmra.mrb[20].mxu0 %vm104_vm0, %v50_v54  ;;  %7201 = vmatmul.mubr.msk.f32.gmra.mrb[20].mxu1 %vm104_vm0, %v82_v56 }
  0x35   :  { %7155 = vmatprep.mubr.msk.f32.mxu0 %vm104_vm0, %v51_v55  ;;  %7203 = vmatprep.mubr.msk.f32.mxu1 %vm104_vm0, %v83_v57 }
  0x38   :  { %7156 = vmatmul.mubr.msk.f32.gmra.mrb[22].mxu0 %vm104_vm0, %v52_v58  ;;  %7204 = vmatmul.mubr.msk.f32.gmra.mrb[22].mxu1 %vm104_vm0, %v84_v60 }
  0x39   :  { %7158 = vmatprep.mubr.msk.f32.mxu0 %vm104_vm0, %v53_v59  ;;  %7206 = vmatprep.mubr.msk.f32.mxu1 %vm104_vm0, %v85_v61 }
  0x3c   :  { %7159 = vmatmul.mubr.msk.f32.gmra.mrb[24].mxu0 %vm104_vm0, %v54_v62  ;;  %7207 = vmatmul.mubr.msk.f32.gmra.mrb[24].mxu1 %vm104_vm0, %v86_v0 }
  0x3d   :  { %7161 = vmatprep.mubr.msk.f32.mxu0 %vm104_vm0, %v55_v63  ;;  %7209 = vmatprep.mubr.msk.f32.mxu1 %vm104_vm0, %v87_v1 }
  0x40   :  { %7162 = vmatmul.mubr.msk.f32.gmra.mrb[26].mxu0 %vm104_vm0, %v56_v2  ;;  %7210 = vmatmul.mubr.msk.f32.gmra.mrb[26].mxu1 %vm104_vm0, %v88_v4 }
  0x41   :  { %7164 = vmatprep.mubr.msk.f32.mxu0 %vm104_vm0, %v57_v3  ;;  %7212 = vmatprep.mubr.msk.f32.mxu1 %vm104_vm0, %v89_v5 }
  0x44   :  { %7165 = vmatmul.mubr.msk.f32.gmra.mrb[28].mxu0 %vm104_vm0, %v58_v6  ;;  %7213 = vmatmul.mubr.msk.f32.gmra.mrb[28].mxu1 %vm104_vm0, %v90_v8 }
  0x45   :  { %7167 = vmatprep.mubr.msk.f32.mxu0 %vm104_vm0, %v59_v7  ;;  %7215 = vmatprep.mubr.msk.f32.mxu1 %vm104_vm0, %v91_v9 }
  0x48   :  { %7168 = vmatmul.mubr.msk.f32.gmra.mrb[30].mxu0 %vm104_vm0, %v60_v10  ;;  %7216 = vmatmul.mubr.msk.f32.gmra.mrb[30].mxu1 %vm104_vm0, %v92_v11 }
  0xdf   :  { %v7124_v13 = vpop.f32.mrb[0].mxu0  ;;  %v8466_v16 = vpop.f32.mrb[0].mxu1 }
  0xe0   :  { %v369_v14 = vadd.f32 %v7124_v13, %v8463_v12  ;;  %v363_v15 = vpop.f32.mrb[1].mxu0  ;;  %v8469_v18 = vpop.f32.mrb[1].mxu1 }
  0xe1   :  { %v364_v17 = vadd.f32 %v8463_v12, %v363_v15 }
  0xe2   :  { %v747_v19 = vmul.f32 0.70710677, %v369_v14  ;;  %v683_v54 = vmul.f32 0.5, %v369_v14 }
  0xe3   :  { %v746_v20 = vmul.f32 0.70710677, %v364_v17  ;;  %v7127_v21 = vpop.f32.mrb[2].mxu0  ;;  %v8472_v24 = vpop.f32.mrb[2].mxu1  ;;  %v682_v49 = vmul.f32 0.5, %v364_v17 }
  0xe4   :  { %7684 = verf.f32 %v747_v19  ;;  %v379_v22 = vadd.f32 %v7127_v21, %v8463_v12  ;;  %v373_v23 = vpop.f32.mrb[3].mxu0  ;;  %v8475_v26 = vpop.f32.mrb[3].mxu1 }
  0xe5   :  { %7686 = verf.f32 %v746_v20  ;;  %v374_v25 = vadd.f32 %v8463_v12, %v373_v23 }
  0xe6   :  { %v749_v27 = vmul.f32 0.70710677, %v379_v22  ;;  %v685_v6 = vmul.f32 0.5, %v379_v22 }
  0xe7   :  { %v748_v28 = vmul.f32 0.70710677, %v374_v25  ;;  %v7130_v29 = vpop.f32.mrb[4].mxu0  ;;  %v8480_v32 = vpop.f32.mrb[4].mxu1  ;;  %v684_v1 = vmul.f32 0.5, %v374_v25 }
  0xe8   :  { %7688 = verf.f32 %v749_v27  ;;  %v8478_v30 = vadd.f32 %v7130_v29, %v8463_v12  ;;  %v383_v31 = vpop.f32.mrb[5].mxu0  ;;  %v8483_v34 = vpop.f32.mrb[5].mxu1 }
  0xe9   :  { %7690 = verf.f32 %v748_v28  ;;  %v384_v33 = vadd.f32 %v8463_v12, %v383_v31 }
  0xea   :  { %v751_v35 = vmul.f32 0.70710677, %v8478_v30  ;;  %v687_v27 = vmul.f32 0.5, %v8478_v30 }
  0xeb   :  { %v750_v36 = vmul.f32 0.70710677, %v384_v33  ;;  %v7133_v37 = vpop.f32.mrb[6].mxu0  ;;  %v8489_v40 = vpop.f32.mrb[6].mxu1  ;;  %v686_v20 = vmul.f32 0.5, %v384_v33 }
  0xec   :  { %7692 = verf.f32 %v751_v35  ;;  %v8487_v38 = vadd.f32 %v7133_v37, %v8463_v12  ;;  %v393_v39 = vpop.f32.mrb[7].mxu0  ;;  %v8494_v42 = vpop.f32.mrb[7].mxu1 }
  0xed   :  { %7694 = verf.f32 %v750_v36  ;;  %v8492_v41 = vadd.f32 %v8463_v12, %v393_v39 }
  0xee   :  { %v7685_v43 = vpop.eup %7684  ;;  %v753_v44 = vmul.f32 0.70710677, %v8487_v38 }
  0xef   :  { %v7687_v45 = vpop.eup %7686  ;;  %v875_v46 = vadd.f32 1.0, %v7685_v43  ;;  %v752_v47 = vmul.f32 0.70710677, %v8492_v41  ;;  %v7136_v48 = vpop.f32.mrb[8].mxu0  ;;  %v688_v30 = vmul.f32 0.5, %v8492_v41 }
  0xf0   :  { %v874_v50 = vadd.f32 1.0, %v7687_v45  ;;  %7696 = verf.f32 %v753_v44  ;;  %v8499_v51 = vadd.f32 %v7136_v48, %v8463_v12  ;;  %v403_v52 = vpop.f32.mrb[9].mxu0  ;;  %v8501_v53 = vpop.f32.mrb[8].mxu1 }
  0xf1   :  { %7698 = verf.f32 %v752_v47  ;;  %v8504_v55 = vadd.f32 %v8463_v12, %v403_v52  ;;  %v8506_v56 = vpop.f32.mrb[9].mxu1  ;;  %v939_v61 = vmul.f32 %v875_v46, %v683_v54 }
  0xf2   :  { %v7689_v57 = vpop.eup %7688  ;;  %v938_v58 = vmul.f32 %v874_v50, %v682_v49  ;;  %v755_v59 = vmul.f32 0.70710677, %v8499_v51  ;;  %v689_v49 = vmul.f32 0.5, %v8487_v38 }
  0xf3   :  { %v7691_v60 = vpop.eup %7690  ;;  %v877_v62 = vadd.f32 1.0, %v7689_v57  ;;  %v754_v63 = vmul.f32 0.70710677, %v8504_v55  ;;  %v7139_v0 = vpop.f32.mrb[10].mxu0  ;;  %v690_v38 = vmul.f32 0.5, %v8504_v55 }
  0xf4   :  { %v876_v2 = vadd.f32 1.0, %v7691_v60  ;;  %7700 = verf.f32 %v755_v59  ;;  %v8511_v3 = vadd.f32 %v7139_v0, %v8463_v12  ;;  %v413_v4 = vpop.f32.mrb[11].mxu0  ;;  %7226 = vmatprep.mubr.msk.f32.mxu1 %vm104_vm0, %v938_v58  ;;  %v8514_v5 = vpop.f32.mrb[10].mxu1 }
  0xf5   :  { %7702 = verf.f32 %v754_v63  ;;  %v8517_v7 = vadd.f32 %v8463_v12, %v413_v4  ;;  %7227 = vmatmul.mubr.msk.f32.vlgmr.msra.gmra.mrb[32].mxu1 %vm104_vm0, %v939_v61  ;;  %v8520_v8 = vpop.f32.mrb[11].mxu1  ;;  %v941_v14 = vmul.f32 %v877_v62, %v685_v6  ;;  %v691_v4 = vmul.f32 0.5, %v8499_v51 }
  0xf6   :  { %v7693_v9 = vpop.eup %7692  ;;  %v940_v10 = vmul.f32 %v876_v2, %v684_v1  ;;  %v757_v11 = vmul.f32 0.70710677, %v8511_v3 }
  0xf7   :  { %v7695_v13 = vpop.eup %7694  ;;  %v879_v15 = vadd.f32 1.0, %v7693_v9  ;;  %v756_v17 = vmul.f32 0.70710677, %v8517_v7  ;;  %v7142_v19 = vpop.f32.mrb[12].mxu0  ;;  %v692_v51 = vmul.f32 0.5, %v8517_v7 }
  0xf8   :  { %v878_v21 = vadd.f32 1.0, %v7695_v13  ;;  %7704 = verf.f32 %v757_v11  ;;  %v8525_v22 = vadd.f32 %v7142_v19, %v8463_v12  ;;  %v423_v23 = vpop.f32.mrb[13].mxu0  ;;  %7229 = vmatprep.mubr.msk.f32.mxu1 %vm104_vm0, %v940_v10  ;;  %v8528_v25 = vpop.f32.mrb[12].mxu1 }
  0xf9   :  { %7706 = verf.f32 %v756_v17  ;;  %v8532_v28 = vadd.f32 %v8463_v12, %v423_v23  ;;  %7230 = vmatmul.mubr.msk.f32.gmra.mrb[34].mxu1 %vm104_vm0, %v941_v14  ;;  %v8535_v29 = vpop.f32.mrb[13].mxu1  ;;  %v943_v37 = vmul.f32 %v879_v15, %v687_v27 }
  0xfa   :  { %v7697_v31 = vpop.eup %7696  ;;  %v942_v33 = vmul.f32 %v878_v21, %v686_v20  ;;  %v759_v35 = vmul.f32 0.70710677, %v8525_v22 }
  0xfb   :  { %v7699_v36 = vpop.eup %7698  ;;  %v881_v39 = vadd.f32 1.0, %v7697_v31  ;;  %v758_v43 = vmul.f32 0.70710677, %v8532_v28  ;;  %v7145_v44 = vpop.f32.mrb[14].mxu0  ;;  %v693_v31 = vmul.f32 0.5, %v8511_v3  ;;  %v694_v3 = vmul.f32 0.5, %v8532_v28 }
  0xfc   :  { %v880_v45 = vadd.f32 1.0, %v7699_v36  ;;  %7708 = verf.f32 %v759_v35  ;;  %v8541_v46 = vadd.f32 %v7145_v44, %v8463_v12  ;;  %v433_v47 = vpop.f32.mrb[15].mxu0  ;;  %7232 = vmatprep.mubr.msk.f32.mxu1 %vm104_vm0, %v942_v33  ;;  %v8544_v48 = vpop.f32.mrb[14].mxu1 }
  0xfd   :  { %7710 = verf.f32 %v758_v43  ;;  %v8548_v50 = vadd.f32 %v8463_v12, %v433_v47  ;;  %7233 = vmatmul.mubr.msk.f32.gmra.mrb[36].mxu1 %vm104_vm0, %v943_v37  ;;  %v8551_v52 = vpop.f32.mrb[15].mxu1  ;;  %v945_v59 = vmul.f32 %v881_v39, %v689_v49 }
  0xfe   :  { %v7701_v41 = vpop.eup %7700  ;;  %v944_v54 = vmul.f32 %v880_v45, %v688_v30  ;;  %v761_v57 = vmul.f32 0.70710677, %v8541_v46 }
  0xff   :  { %v7703_v58 = vpop.eup %7702  ;;  %v883_v60 = vadd.f32 1.0, %v7701_v41  ;;  %v760_v61 = vmul.f32 0.70710677, %v8548_v50  ;;  %v7148_v62 = vpop.f32.mrb[16].mxu0 }
 0x100   :  { %v882_v63 = vadd.f32 1.0, %v7703_v58  ;;  %7712 = verf.f32 %v761_v57  ;;  %v8557_v0 = vadd.f32 %v7148_v62, %v8463_v12  ;;  %v443_v1 = vpop.f32.mrb[17].mxu0  ;;  %7235 = vmatprep.mubr.msk.f32.mxu1 %vm104_vm0, %v944_v54  ;;  %v8560_v2 = vpop.f32.mrb[16].mxu1  ;;  %v695_v57 = vmul.f32 0.5, %v8525_v22 }
 0x101   :  { %7714 = verf.f32 %v760_v61  ;;  %v8564_v6 = vadd.f32 %v8463_v12, %v443_v1  ;;  %7236 = vmatmul.mubr.msk.f32.gmra.mrb[38].mxu1 %vm104_vm0, %v945_v59  ;;  %v8567_v9 = vpop.f32.mrb[17].mxu1  ;;  %v947_v14 = vmul.f32 %v883_v60, %v691_v4  ;;  %v696_v22 = vmul.f32 0.5, %v8548_v50 }
 0x102   :  { %v7705_v55 = vpop.eup %7704  ;;  %v946_v10 = vmul.f32 %v882_v63, %v690_v38  ;;  %v763_v11 = vmul.f32 0.70710677, %v8557_v0 }
 0x103   :  { %v7707_v13 = vpop.eup %7706  ;;  %v885_v15 = vadd.f32 1.0, %v7705_v55  ;;  %v762_v17 = vmul.f32 0.70710677, %v8564_v6  ;;  %v7151_v19 = vpop.f32.mrb[18].mxu0 }
 0x104   :  { %v884_v20 = vadd.f32 1.0, %v7707_v13  ;;  %7716 = verf.f32 %v763_v11  ;;  %v8573_v21 = vadd.f32 %v7151_v19, %v8463_v12  ;;  %v453_v23 = vpop.f32.mrb[19].mxu0  ;;  %7238 = vmatprep.mubr.msk.f32.mxu1 %vm104_vm0, %v946_v10  ;;  %v8576_v27 = vpop.f32.mrb[18].mxu1 }
 0x105   :  { %7718 = verf.f32 %v762_v17  ;;  %v8580_v33 = vadd.f32 %v8463_v12, %v453_v23  ;;  %7239 = vmatmul.mubr.msk.f32.gmra.mrb[40].mxu1 %vm104_vm0, %v947_v14  ;;  %v8583_v35 = vpop.f32.mrb[19].mxu1  ;;  %v949_v43 = vmul.f32 %v885_v15, %v693_v31  ;;  %v697_v14 = vmul.f32 0.5, %v8541_v46 }
 0x106   :  { %v7709_v7 = vpop.eup %7708  ;;  %v948_v36 = vmul.f32 %v884_v20, %v692_v51  ;;  %v765_v37 = vmul.f32 0.70710677, %v8573_v21  ;;  %v698_v46 = vmul.f32 0.5, %v8564_v6 }
 0x107   :  { %v7711_v39 = vpop.eup %7710  ;;  %v887_v44 = vadd.f32 1.0, %v7709_v7  ;;  %v764_v30 = vmul.f32 0.70710677, %v8580_v33  ;;  %v7154_v45 = vpop.f32.mrb[20].mxu0 }
 0x108   :  { %v886_v47 = vadd.f32 1.0, %v7711_v39  ;;  %7720 = verf.f32 %v765_v37  ;;  %v8589_v49 = vadd.f32 %v7154_v45, %v8463_v12  ;;  %v463_v41 = vpop.f32.mrb[21].mxu0  ;;  %7241 = vmatprep.mubr.msk.f32.mxu1 %vm104_vm0, %v948_v36  ;;  %v8592_v54 = vpop.f32.mrb[20].mxu1 }
 0x109   :  { %7722 = verf.f32 %v764_v30  ;;  %v8596_v58 = vadd.f32 %v8463_v12, %v463_v41  ;;  %7242 = vmatmul.mubr.msk.f32.gmra.mrb[42].mxu1 %vm104_vm0, %v949_v43  ;;  %v8599_v59 = vpop.f32.mrb[21].mxu1  ;;  %v951_v38 = vmul.f32 %v887_v44, %v695_v57  ;;  %v699_v30 = vmul.f32 0.5, %v8557_v0 }
 0x10a   :  { %v7713_v28 = vpop.eup %7712  ;;  %v950_v60 = vmul.f32 %v886_v47, %v694_v3  ;;  %v767_v61 = vmul.f32 0.70710677, %v8589_v49  ;;  %v700_v0 = vmul.f32 0.5, %v8580_v33 }
 0x10b   :  { %v7715_v62 = vpop.eup %7714  ;;  %v889_v63 = vadd.f32 1.0, %v7713_v28  ;;  %v766_v1 = vmul.f32 0.70710677, %v8596_v58  ;;  %v7157_v4 = vpop.f32.mrb[22].mxu0 }
 0x10c   :  { %v888_v55 = vadd.f32 1.0, %v7715_v62  ;;  %7724 = verf.f32 %v767_v61  ;;  %v8605_v10 = vadd.f32 %v7157_v4, %v8463_v12  ;;  %v473_v11 = vpop.f32.mrb[23].mxu0  ;;  %7244 = vmatprep.mubr.msk.f32.mxu1 %vm104_vm0, %v950_v60  ;;  %v8608_v13 = vpop.f32.mrb[22].mxu1 }
 0x10d   :  { %7726 = verf.f32 %v766_v1  ;;  %v8612_v15 = vadd.f32 %v8463_v12, %v473_v11  ;;  %7245 = vmatmul.mubr.msk.f32.gmra.mrb[44].mxu1 %vm104_vm0, %v951_v38  ;;  %v8615_v17 = vpop.f32.mrb[23].mxu1  ;;  %v953_v23 = vmul.f32 %v889_v63, %v697_v14 }
 0x10e   :  { %v7717_v50 = vpop.eup %7716  ;;  %v952_v19 = vmul.f32 %v888_v55, %v696_v22  ;;  %v769_v51 = vmul.f32 0.70710677, %v8605_v10  ;;  %v701_v22 = vmul.f32 0.5, %v8573_v21 }
 0x10f   :  { %v7719_v20 = vpop.eup %7718  ;;  %v891_v31 = vadd.f32 1.0, %v7717_v50  ;;  %v768_v7 = vmul.f32 0.70710677, %v8612_v15  ;;  %v7160_v36 = vpop.f32.mrb[24].mxu0 }
 0x110   :  { %v890_v37 = vadd.f32 1.0, %v7719_v20  ;;  %7728 = verf.f32 %v769_v51  ;;  %v8621_v39 = vadd.f32 %v7160_v36, %v8463_v12  ;;  %v483_v43 = vpop.f32.mrb[25].mxu0  ;;  %7247 = vmatprep.mubr.msk.f32.mxu1 %vm104_vm0, %v952_v19  ;;  %v8624_v44 = vpop.f32.mrb[24].mxu1  ;;  %v8652_v19 = vadd.f32 %v8463_v12, %v8469_v18 }
 0x111   :  { %7730 = verf.f32 %v768_v7  ;;  %v8628_v45 = vadd.f32 %v8463_v12, %v483_v43  ;;  %7248 = vmatmul.mubr.msk.f32.gmra.mrb[46].mxu1 %vm104_vm0, %v953_v23  ;;  %v8631_v3 = vpop.f32.mrb[25].mxu1  ;;  %v955_v28 = vmul.f32 %v891_v31, %v699_v30  ;;  %v8657_v31 = vadd.f32 %v8466_v16, %v8463_v12 }
 0x112   :  { %v7721_v6 = vpop.eup %7720  ;;  %v954_v47 = vmul.f32 %v890_v37, %v698_v46  ;;  %v771_v41 = vmul.f32 0.70710677, %v8621_v39  ;;  %v702_v36 = vmul.f32 0.5, %v8596_v58  ;;  %v703_v30 = vmul.f32 0.5, %v8589_v49 }
 0x113   :  { %v7723_v57 = vpop.eup %7722  ;;  %v893_v60 = vadd.f32 1.0, %v7721_v6  ;;  %v770_v61 = vmul.f32 0.70710677, %v8628_v45  ;;  %v7163_v62 = vpop.f32.mrb[26].mxu0 }
 0x114   :  { %v892_v38 = vadd.f32 1.0, %v7723_v57  ;;  %7732 = verf.f32 %v771_v41  ;;  %v8637_v63 = vadd.f32 %v7163_v62, %v8463_v12  ;;  %v493_v1 = vpop.f32.mrb[27].mxu0  ;;  %7250 = vmatprep.mubr.msk.f32.mxu1 %vm104_vm0, %v954_v47  ;;  %v8640_v4 = vpop.f32.mrb[26].mxu1  ;;  %v778_v41 = vmul.f32 0.70710677, %v8652_v19 }
 0x115   :  { %7734 = verf.f32 %v770_v61  ;;  %v8644_v55 = vadd.f32 %v8463_v12, %v493_v1  ;;  %7251 = vmatmul.mubr.msk.f32.gmra.mrb[48].mxu1 %vm104_vm0, %v955_v28  ;;  %v8647_v11 = vpop.f32.mrb[27].mxu1  ;;  %v957_v20 = vmul.f32 %v893_v60, %v701_v22  ;;  %v8677_v28 = vadd.f32 %v8463_v12, %v8475_v26 }
 0x116   :  { %v7725_v33 = vpop.eup %7724  ;;  %v956_v14 = vmul.f32 %v892_v38, %v700_v0  ;;  %v773_v50 = vmul.f32 0.70710677, %v8637_v63  ;;  %v779_v62 = vmul.f32 0.70710677, %v8657_v31  ;;  %v704_v1 = vmul.f32 0.5, %v8612_v15 }
 0x117   :  { %v7727_v51 = vpop.eup %7726  ;;  %v895_v23 = vadd.f32 1.0, %v7725_v33  ;;  %v772_v21 = vmul.f32 0.70710677, %v8644_v55  ;;  %v7166_v7 = vpop.f32.mrb[28].mxu0 }
 0x118   :  { %v894_v46 = vadd.f32 1.0, %v7727_v51  ;;  %7736 = verf.f32 %v773_v50  ;;  %v8661_v37 = vadd.f32 %v7166_v7, %v8463_v12  ;;  %v503_v43 = vpop.f32.mrb[29].mxu0  ;;  %7253 = vmatprep.mubr.msk.f32.mxu1 %vm104_vm0, %v956_v14  ;;  %v8664_v18 = vpop.f32.mrb[28].mxu1  ;;  %v705_v50 = vmul.f32 0.5, %v8605_v10 }
 0x119   :  { %7738 = verf.f32 %v772_v21  ;;  %v8668_v6 = vadd.f32 %v8463_v12, %v503_v43  ;;  %7254 = vmatmul.mubr.msk.f32.gmra.mrb[50].mxu1 %vm104_vm0, %v957_v20  ;;  %v8671_v16 = vpop.f32.mrb[29].mxu1  ;;  %v959_v49 = vmul.f32 %v895_v23, %v703_v30  ;;  %v8691_v51 = vadd.f32 %v8472_v24, %v8463_v12 }
 0x11a   :  { %v7729_v58 = vpop.eup %7728  ;;  %v958_v47 = vmul.f32 %v894_v46, %v702_v36  ;;  %v775_v57 = vmul.f32 0.70710677, %v8661_v37  ;;  %v780_v7 = vmul.f32 0.70710677, %v8677_v28  ;;  %v8704_v30 = vadd.f32 %v8463_v12, %v8483_v34 }
 0x11b   :  { %v7731_v60 = vpop.eup %7730  ;;  %v897_v61 = vadd.f32 1.0, %v7729_v58  ;;  %v774_v0 = vmul.f32 0.70710677, %v8668_v6  ;;  %v7169_v38 = vpop.f32.mrb[30].mxu0  ;;  %v706_v58 = vmul.f32 0.5, %v8628_v45  ;;  %v8717_v45 = vadd.f32 %v8463_v12, %v8494_v42 }
 0x11c   :  { %v896_v22 = vadd.f32 1.0, %v7731_v60  ;;  %7740 = verf.f32 %v775_v57  ;;  %v8683_v33 = vadd.f32 %v7169_v38, %v8463_v12  ;;  %v513_v14 = vpop.f32.mrb[31].mxu0  ;;  %7256 = vmatprep.mubr.msk.f32.mxu1 %vm104_vm0, %v958_v47  ;;  %v8686_v26 = vpop.f32.mrb[30].mxu1  ;;  %v8711_v57 = vadd.f32 %v8480_v32, %v8463_v12 }
 0x11d   :  { %7742 = verf.f32 %v774_v0  ;;  %v8694_v20 = vadd.f32 %v8463_v12, %v513_v14  ;;  %7257 = vmatmul.mubr.msk.f32.gmra.mrb[52].mxu1 %vm104_vm0, %v959_v49  ;;  %v8697_v15 = vpop.f32.mrb[31].mxu1  ;;  %v961_v46 = vmul.f32 %v897_v61, %v705_v50  ;;  %v781_v34 = vmul.f32 0.70710677, %v8691_v51 }
 0x11e   :  { %v7733_v23 = vpop.eup %7732  ;;  %v960_v21 = vmul.f32 %v896_v22, %v704_v1  ;;  %7744 = verf.f32 %v778_v41  ;;  %v777_v36 = vmul.f32 0.70710677, %v8683_v33  ;;  %v707_v41 = vmul.f32 0.5, %v8621_v39 }
 0x11f   :  { %v7735_v10 = vpop.eup %7734  ;;  %v899_v43 = vadd.f32 1.0, %v7733_v23  ;;  %v776_v24 = vmul.f32 0.70710677, %v8694_v20  ;;  %v782_v39 = vmul.f32 0.70710677, %v8704_v30  ;;  %v708_v32 = vmul.f32 0.5, %v8644_v55 }
 0x120   :  { %v898_v47 = vadd.f32 1.0, %v7735_v10  ;;  %7746 = verf.f32 %v777_v36  ;;  %7259 = vmatprep.mubr.msk.f32.mxu1 %vm104_vm0, %v960_v21  ;;  %v709_v22 = vmul.f32 0.5, %v8637_v63  ;;  %v8727_v50 = vadd.f32 %v8489_v40, %v8463_v12 }
 0x121   :  { %7748 = verf.f32 %v776_v24  ;;  %7260 = vmatmul.mubr.msk.f32.gmra.mrb[54].mxu1 %vm104_vm0, %v961_v46  ;;  %v963_v0 = vmul.f32 %v899_v43, %v707_v41  ;;  %v784_v23 = vmul.f32 0.70710677, %v8717_v45  ;;  %v8732_v63 = vadd.f32 %v8463_v12, %v8506_v56 }
 0x122   :  { %v7737_v60 = vpop.eup %7736  ;;  %v962_v49 = vmul.f32 %v898_v47, %v706_v58  ;;  %7750 = verf.f32 %v779_v62  ;;  %v783_v62 = vmul.f32 0.70710677, %v8711_v57  ;;  %v710_v10 = vmul.f32 0.5, %v8668_v6 }
 0x123   :  { %v7739_v61 = vpop.eup %7738  ;;  %v901_v38 = vadd.f32 1.0, %v7737_v60  ;;  %7752 = verf.f32 %v780_v7  ;;  %v711_v43 = vmul.f32 0.5, %v8661_v37  ;;  %v785_v58 = vmul.f32 0.70710677, %v8727_v50 }
 0x124   :  { %v900_v1 = vadd.f32 1.0, %v7739_v61  ;;  %7262 = vmatprep.mubr.msk.f32.mxu1 %vm104_vm0, %v962_v49  ;;  %7754 = verf.f32 %v781_v34  ;;  %v8741_v56 = vadd.f32 %v8501_v53, %v8463_v12  ;;  %v786_v60 = vmul.f32 0.70710677, %v8732_v63 }
 0x125   :  { %7263 = vmatmul.mubr.msk.f32.gmra.mrb[56].mxu1 %vm104_vm0, %v963_v0  ;;  %v965_v55 = vmul.f32 %v901_v38, %v709_v22  ;;  %7756 = verf.f32 %v782_v39  ;;  %v8746_v37 = vadd.f32 %v8463_v12, %v8520_v8  ;;  %v714_v34 = vmul.f32 0.5, %v8652_v19 }
 0x126   :  { %v7741_v14 = vpop.eup %7740  ;;  %v964_v42 = vmul.f32 %v900_v1, %v708_v32  ;;  %7758 = verf.f32 %v783_v62  ;;  %v712_v0 = vmul.f32 0.5, %v8694_v20  ;;  %v715_v39 = vmul.f32 0.5, %v8657_v31 }
 0x127   :  { %v7743_v21 = vpop.eup %7742  ;;  %v903_v7 = vadd.f32 1.0, %v7741_v14  ;;  %7760 = verf.f32 %v784_v23  ;;  %v713_v32 = vmul.f32 0.5, %v8683_v33  ;;  %v8756_v8 = vadd.f32 %v8463_v12, %v8535_v29 }
 0x128   :  { %v7745_v36 = vpop.eup %7744  ;;  %v902_v46 = vadd.f32 1.0, %v7743_v21  ;;  %7265 = vmatprep.mubr.msk.f32.mxu1 %vm104_vm0, %v964_v42  ;;  %7762 = verf.f32 %v785_v58  ;;  %v787_v19 = vmul.f32 0.70710677, %v8741_v56  ;;  %v8761_v20 = vadd.f32 %v8514_v5, %v8463_v12 }
 0x129   :  { %7266 = vmatmul.mubr.msk.f32.gmra.mrb[58].mxu1 %vm104_vm0, %v965_v55  ;;  %v967_v41 = vmul.f32 %v903_v7, %v711_v43  ;;  %v906_v61 = vadd.f32 1.0, %v7745_v36  ;;  %7764 = verf.f32 %v786_v60  ;;  %v788_v31 = vmul.f32 0.70710677, %v8746_v37 }
 0x12a   :  { %v7747_v40 = vpop.eup %7746  ;;  %v966_v24 = vmul.f32 %v902_v46, %v710_v10  ;;  %v716_v42 = vmul.f32 0.5, %v8677_v28  ;;  %v790_v21 = vmul.f32 0.70710677, %v8756_v8  ;;  %v8770_v5 = vadd.f32 %v8463_v12, %v8551_v52 }
 0x12b   :  { %v7749_v47 = vpop.eup %7748  ;;  %v905_v6 = vadd.f32 1.0, %v7747_v40  ;;  %v970_v14 = vmul.f32 %v906_v61, %v714_v34  ;;  %7766 = verf.f32 %v787_v19  ;;  %v789_v55 = vmul.f32 0.70710677, %v8761_v20 }
 0x12c   :  { %v7751_v49 = vpop.eup %7750  ;;  %v904_v38 = vadd.f32 1.0, %v7749_v47  ;;  %7268 = vmatprep.mubr.msk.f32.mxu1 %vm104_vm0, %v966_v24  ;;  %v8776_v28 = vadd.f32 %v8528_v25, %v8463_v12  ;;  %v717_v10 = vmul.f32 0.5, %v8691_v51  ;;  %7768 = verf.f32 %v788_v31 }
 0x12d   :  { %v7753_v53 = vpop.eup %7752  ;;  %7269 = vmatmul.mubr.msk.f32.gmra.mrb[60].mxu1 %vm104_vm0, %v967_v41  ;;  %v907_v22 = vadd.f32 1.0, %v7751_v49  ;;  %v969_v62 = vmul.f32 %v905_v6, %v713_v32  ;;  %v718_v52 = vmul.f32 0.5, %v8704_v30  ;;  %v8782_v58 = vadd.f32 %v8544_v48, %v8463_v12 }
 0x12e   :  { %v968_v1 = vmul.f32 %v904_v38, %v712_v0  ;;  %v7755_v33 = vpop.eup %7754  ;;  %v908_v23 = vadd.f32 1.0, %v7753_v53  ;;  %7770 = verf.f32 %v790_v21  ;;  %v792_v25 = vmul.f32 0.70710677, %v8770_v5 }
 0x12f   :  { %v7757_v29 = vpop.eup %7756  ;;  %v971_v36 = vmul.f32 %v907_v22, %v715_v39  ;;  %v909_v46 = vadd.f32 1.0, %v7755_v33  ;;  %v8788_v47 = vadd.f32 %v8463_v12, %v8567_v9  ;;  %7772 = verf.f32 %v789_v55 }
 0x130   :  { %7271 = vmatprep.mubr.msk.f32.mxu1 %vm104_vm0, %v968_v1  ;;  %v7759_v7 = vpop.eup %7758  ;;  %v972_v40 = vmul.f32 %v908_v23, %v716_v42  ;;  %v910_v24 = vadd.f32 1.0, %v7757_v29  ;;  %v791_v51 = vmul.f32 0.70710677, %v8776_v28  ;;  %v719_v41 = vmul.f32 0.5, %v8711_v57 }
 0x131   :  { %7272 = vmatmul.mubr.msk.f32.gmra.mrb[62].mxu1 %vm104_vm0, %v969_v62  ;;  %v7761_v43 = vpop.eup %7760  ;;  %v973_v30 = vmul.f32 %v909_v46, %v717_v10  ;;  %v911_v6 = vadd.f32 1.0, %v7759_v7  ;;  %v8795_v48 = vadd.f32 %v8560_v2, %v8463_v12  ;;  %v720_v34 = vmul.f32 0.5, %v8717_v45 }
 0x132   :  { %7274 = vmatprep.mubr.msk.f32.mxu1 %vm104_vm0, %v970_v14  ;;  %v7763_v60 = vpop.eup %7762  ;;  %v974_v49 = vmul.f32 %v910_v24, %v718_v52  ;;  %v912_v61 = vadd.f32 1.0, %v7761_v43  ;;  %v793_v9 = vmul.f32 0.70710677, %v8782_v58  ;;  %7774 = verf.f32 %v792_v25 }
 0x133   :  { %v7765_v0 = vpop.eup %7764  ;;  %v794_v38 = vmul.f32 0.70710677, %v8788_v47  ;;  %v8803_v57 = vadd.f32 %v8463_v12, %v8583_v35  ;;  %v721_v2 = vmul.f32 0.5, %v8727_v50  ;;  %7776 = verf.f32 %v791_v51 }
 0x134   :  { %v975_v53 = vmul.f32 %v911_v6, %v719_v41  ;;  %v913_v45 = vadd.f32 1.0, %v7763_v60  ;;  %v722_v39 = vmul.f32 0.5, %v8732_v63  ;;  %v795_v32 = vmul.f32 0.70710677, %v8795_v48 }
 0x135   :  { %7275 = vmatmul.mubr.msk.f32.gmra.mrb[64].mxu1 %vm104_vm0, %v971_v36  ;;  %v7767_v1 = vpop.eup %7766  ;;  %v976_v19 = vmul.f32 %v912_v61, %v720_v34  ;;  %v914_v22 = vadd.f32 1.0, %v7765_v0  ;;  %7778 = verf.f32 %v793_v9  ;;  %v8811_v62 = vadd.f32 %v8576_v27, %v8463_v12 }
 0x136   :  { %7277 = vmatprep.mubr.msk.f32.mxu1 %vm104_vm0, %v972_v40  ;;  %v7769_v35 = vpop.eup %7768  ;;  %7780 = verf.f32 %v794_v38  ;;  %v796_v50 = vmul.f32 0.70710677, %v8803_v57  ;;  %v8817_v31 = vadd.f32 %v8463_v12, %v8599_v59  ;;  %v723_v63 = vmul.f32 0.5, %v8741_v56 }
 0x137   :  { %v977_v14 = vmul.f32 %v913_v45, %v721_v2  ;;  %v915_v42 = vadd.f32 1.0, %v7767_v1  ;;  %v724_v27 = vmul.f32 0.5, %v8746_v37  ;;  %7782 = verf.f32 %v795_v32 }
 0x138   :  { %v7771_v33 = vpop.eup %7770  ;;  %v978_v29 = vmul.f32 %v914_v22, %v722_v39  ;;  %v916_v21 = vadd.f32 1.0, %v7769_v35  ;;  %v797_v55 = vmul.f32 0.70710677, %v8811_v62  ;;  %v8825_v7 = vadd.f32 %v8592_v54, %v8463_v12 }
 0x139   :  { %7278 = vmatmul.mubr.msk.f32.gmra.mrb[66].mxu1 %vm104_vm0, %v973_v30  ;;  %v7773_v23 = vpop.eup %7772  ;;  %7784 = verf.f32 %v796_v50  ;;  %v798_v59 = vmul.f32 0.70710677, %v8817_v31  ;;  %v8831_v56 = vadd.f32 %v8463_v12, %v8615_v17  ;;  %v726_v37 = vmul.f32 0.5, %v8756_v8 }
 0x13a   :  { %7280 = vmatprep.mubr.msk.f32.mxu1 %vm104_vm0, %v974_v49  ;;  %v918_v36 = vadd.f32 1.0, %v7771_v33  ;;  %v979_v46 = vmul.f32 %v915_v42, %v723_v63  ;;  %v725_v43 = vmul.f32 0.5, %v8761_v20  ;;  %v917_v54 = vadd.f32 1.0, %v7773_v23 }
 0x13b   :  { %v980_v52 = vmul.f32 %v916_v21, %v724_v27  ;;  %7786 = verf.f32 %v797_v55  ;;  %v799_v24 = vmul.f32 0.70710677, %v8825_v7  ;;  %v8839_v25 = vadd.f32 %v8608_v13, %v8463_v12 }
 0x13c   :  { %v7775_v10 = vpop.eup %7774  ;;  %7788 = verf.f32 %v798_v59  ;;  %v800_v17 = vmul.f32 0.70710677, %v8831_v56  ;;  %v8845_v8 = vadd.f32 %v8463_v12, %v8631_v3  ;;  %v982_v51 = vmul.f32 %v918_v36, %v726_v37  ;;  %v8068_v37 = vld [vmem:[%s13355_s3] ss:$0 sm:$0xff] }
 0x13d   :  { %7281 = vmatmul.mubr.msk.f32.gmra.mrb[68].mxu1 %vm104_vm0, %v975_v53  ;;  %v7777_v40 = vpop.eup %7776  ;;  %v728_v30 = vmul.f32 0.5, %v8770_v5  ;;  %v920_v41 = vadd.f32 1.0, %v7775_v10  ;;  %v981_v60 = vmul.f32 %v917_v54, %v725_v43  ;;  %v727_v13 = vmul.f32 0.5, %v8776_v28 }
 0x13e   :  { %7283 = vmatprep.mubr.msk.f32.mxu1 %vm104_vm0, %v976_v19  ;;  %v919_v49 = vadd.f32 1.0, %v7777_v40  ;;  %v729_v34 = vmul.f32 0.5, %v8782_v58  ;;  %7790 = verf.f32 %v799_v24  ;;  %v801_v61 = vmul.f32 0.70710677, %v8839_v25 }
 0x13f   :  { %v7779_v20 = vpop.eup %7778  ;;  %v8854_v3 = vadd.f32 %v8624_v44, %v8463_v12  ;;  %7792 = verf.f32 %v800_v17  ;;  %v802_v5 = vmul.f32 0.70710677, %v8845_v8  ;;  %v8860_v28 = vadd.f32 %v8463_v12, %v8647_v11 }
 0x140   :  { %v7781_v6 = vpop.eup %7780  ;;  %v921_v0 = vadd.f32 1.0, %v7779_v20  ;;  %v984_v38 = vmul.f32 %v920_v41, %v728_v30  ;;  %v730_v58 = vmul.f32 0.5, %v8788_v47  ;;  %v983_v44 = vmul.f32 %v919_v49, %v727_v13 }
 0x141   :  { %7284 = vmatmul.mubr.msk.f32.gmra.mrb[70].mxu1 %vm104_vm0, %v977_v14  ;;  %v7783_v9 = vpop.eup %7782  ;;  %v922_v2 = vadd.f32 1.0, %v7781_v6  ;;  %v731_v45 = vmul.f32 0.5, %v8795_v48  ;;  %7794 = verf.f32 %v801_v61  ;;  %v803_v32 = vmul.f32 0.70710677, %v8854_v3 }
 0x142   :  { %7286 = vmatprep.mubr.msk.f32.mxu1 %vm104_vm0, %v978_v29  ;;  %v923_v39 = vadd.f32 1.0, %v7783_v9  ;;  %v8868_v1 = vadd.f32 %v8640_v4, %v8463_v12  ;;  %v985_v11 = vmul.f32 %v921_v0, %v729_v34  ;;  %7796 = verf.f32 %v802_v5 }
 0x143   :  { %v7785_v53 = vpop.eup %7784  ;;  %v804_v47 = vmul.f32 0.70710677, %v8860_v28  ;;  %v8874_v19 = vadd.f32 %v8463_v12, %v8671_v16  ;;  %v986_v48 = vmul.f32 %v922_v2, %v730_v58  ;;  %v732_v35 = vmul.f32 0.5, %v8803_v57 }
 0x144   :  { %v924_v50 = vadd.f32 1.0, %v7785_v53  ;;  %v733_v4 = vmul.f32 0.5, %v8811_v62  ;;  %v987_v33 = vmul.f32 %v923_v39, %v731_v45  ;;  %7798 = verf.f32 %v803_v32 }
 0x145   :  { %7287 = vmatmul.mubr.msk.f32.gmra.mrb[72].mxu1 %vm104_vm0, %v979_v46  ;;  %v7787_v22 = vpop.eup %7786  ;;  %v805_v14 = vmul.f32 0.70710677, %v8868_v1  ;;  %v8882_v42 = vadd.f32 %v8664_v18, %v8463_v12  ;;  %7800 = verf.f32 %v804_v47  ;;  %v806_v57 = vmul.f32 0.70710677, %v8874_v19 }
 0x146   :  { %7289 = vmatprep.mubr.msk.f32.mxu1 %vm104_vm0, %v980_v52  ;;  %v7789_v63 = vpop.eup %7788  ;;  %v925_v16 = vadd.f32 1.0, %v7787_v22  ;;  %v8888_v27 = vadd.f32 %v8463_v12, %v8697_v15  ;;  %v988_v62 = vmul.f32 %v924_v50, %v732_v35  ;;  %v734_v29 = vmul.f32 0.5, %v8817_v31  ;;  %v2038_v35 = vld [vmem:[%s13356_s6] sm:$0xff]  ;;  %v2039_v50 = vld [vmem:[%s13356_s6 + $0x8] sm:$0xff] }
 0x147   :  { %v926_v21 = vadd.f32 1.0, %v7789_v63  ;;  %v735_v18 = vmul.f32 0.5, %v8825_v7  ;;  %7802 = verf.f32 %v805_v14  ;;  %v807_v59 = vmul.f32 0.70710677, %v8882_v42 }
 0x148   :  { %v7791_v23 = vpop.eup %7790  ;;  %v679_v12 = vadd.f32 %v8068_v37, %v8686_v26  ;;  %v989_v15 = vmul.f32 %v925_v16, %v733_v4  ;;  %7804 = verf.f32 %v806_v57  ;;  %v808_v31 = vmul.f32 0.70710677, %v8888_v27 }
 0x149   :  { %7290 = vmatmul.mubr.msk.f32.gmra.mrb[74].mxu1 %vm104_vm0, %v981_v60  ;;  %v7793_v55 = vpop.eup %7792  ;;  %v927_v36 = vadd.f32 1.0, %v7791_v23  ;;  %v990_v46 = vmul.f32 %v926_v21, %v734_v29  ;;  %v736_v7 = vmul.f32 0.5, %v8831_v56  ;;  %7806 = verf.f32 %v807_v59  ;;  %v2041_v23 = vld [vmem:[%s13356_s6 + $0x18] sm:$0xff] }
 0x14a   :  { %7292 = vmatprep.mubr.msk.f32.mxu1 %vm104_vm0, %v982_v51  ;;  %v928_v43 = vadd.f32 1.0, %v7793_v55  ;;  %v809_v40 = vmul.f32 0.70710677, %v679_v12  ;;  %v737_v26 = vmul.f32 0.5, %v8839_v25  ;;  %7808 = verf.f32 %v808_v31 }
 0x14b   :  { %v7795_v10 = vpop.eup %7794  ;;  %v991_v52 = vmul.f32 %v927_v36, %v735_v18  ;;  %v738_v51 = vmul.f32 0.5, %v8845_v8  ;;  %v739_v6 = vmul.f32 0.5, %v8854_v3  ;;  %v740_v49 = vmul.f32 0.5, %v8860_v28 }
 0x14c   :  { %v7797_v54 = vpop.eup %7796  ;;  %v929_v24 = vadd.f32 1.0, %v7795_v10  ;;  %v992_v20 = vmul.f32 %v928_v43, %v736_v7  ;;  %7810 = verf.f32 %v809_v40  ;;  %v741_v9 = vmul.f32 0.5, %v8868_v1 }
 0x14d   :  { %7293 = vmatmul.mubr.msk.f32.gmra.mrb[76].mxu1 %vm104_vm0, %v983_v44  ;;  %v930_v30 = vadd.f32 1.0, %v7797_v54  ;;  %v742_v3 = vmul.f32 0.5, %v8874_v19  ;;  %v743_v28 = vmul.f32 0.5, %v8882_v42  ;;  %v744_v32 = vmul.f32 0.5, %v8888_v27  ;;  %v2040_v27 = vld [vmem:[%s13356_s6 + $0x10] sm:$0xff] }
 0x14e   :  { %7295 = vmatprep.mubr.msk.f32.mxu1 %vm104_vm0, %v984_v38  ;;  %v7799_v17 = vpop.eup %7798  ;;  %v993_v41 = vmul.f32 %v929_v24, %v737_v26  ;;  %v745_v47 = vmul.f32 0.5, %v679_v12  ;;  %v7650_v4 = vpack.c.bf16 %v2039_v50, %v2038_v35  ;;  %v7656_v21 = vpack.c.bf16 %v2041_v23, %v2040_v27 }
 0x14f   :  { %v7801_v56 = vpop.eup %7800  ;;  %v931_v60 = vadd.f32 1.0, %v7799_v17  ;;  %v994_v13 = vmul.f32 %v930_v30, %v738_v51 }
 0x150   :  { %v932_v34 = vadd.f32 1.0, %v7801_v56  ;;  %7652 = vmatprep.subr.msk.bf16.mxu0 %vm8931_vm1, %v7650_v4 }
 0x151   :  { %7296 = vmatmul.mubr.msk.f32.gmra.mrb[78].mxu1 %vm104_vm0, %v985_v11  ;;  %v7803_v25 = vpop.eup %7802  ;;  %v995_v8 = vmul.f32 %v931_v60, %v739_v6  ;;  %7655 = vmatpush3.bf16.xpose.msk.msra.mxu0 %vm8931_vm1, %v7650_v4 }
 0x152   :  { %7298 = vmatprep.mubr.msk.f32.mxu1 %vm104_vm0, %v986_v48  ;;  %v7805_v61 = vpop.eup %7804  ;;  %v933_v0 = vadd.f32 1.0, %v7803_v25  ;;  %v996_v38 = vmul.f32 %v932_v34, %v740_v49  ;;  %7658 = vmatprep.subr.msk.bf16.mxu0 %vm8931_vm1, %v7656_v21 }
 0x153   :  { %v7807_v5 = vpop.eup %7806  ;;  %v934_v58 = vadd.f32 1.0, %v7805_v61 }
 0x154   :  { %v7809_v2 = vpop.eup %7808  ;;  %v997_v53 = vmul.f32 %v933_v0, %v741_v9  ;;  %v935_v44 = vadd.f32 1.0, %v7807_v5 }
 0x155   :  { %7299 = vmatmul.mubr.msk.f32.gmra.mrb[80].mxu1 %vm104_vm0, %v987_v33  ;;  %v998_v39 = vmul.f32 %v934_v58, %v742_v3  ;;  %v936_v1 = vadd.f32 1.0, %v7809_v2  ;;  %v8942_v33 = vld [vmem:[%s13357_s5] ss:$0 sm:$0xff] }
 0x156   :  { %7301 = vmatprep.mubr.msk.f32.mxu1 %vm104_vm0, %v988_v62  ;;  %v7811_v45 = vpop.eup %7810  ;;  %v999_v11 = vmul.f32 %v935_v44, %v743_v28 }
 0x157   :  { %v937_v19 = vadd.f32 1.0, %v7811_v45  ;;  %v1000_v22 = vmul.f32 %v936_v1, %v744_v32 }
 0x159   :  { %7302 = vmatmul.mubr.msk.f32.gmra.mrb[82].mxu1 %vm104_vm0, %v989_v15  ;;  %v1001_v48 = vmul.f32 %v937_v19, %v745_v47  ;;  %7661 = vmatpush3.bf16.xpose.msk.msra.mxu0 %vm8931_vm1, %v7656_v21 }
 0x15a   :  { %7304 = vmatprep.mubr.msk.f32.mxu1 %vm104_vm0, %v990_v46 }
 0x15d   :  { %7305 = vmatmul.mubr.msk.f32.gmra.mrb[84].mxu1 %vm104_vm0, %v991_v52 }
 0x15e   :  { %7307 = vmatprep.mubr.msk.f32.mxu1 %vm104_vm0, %v992_v20 }
 0x161   :  { %7308 = vmatmul.mubr.msk.f32.gmra.mrb[86].mxu1 %vm104_vm0, %v993_v41 }
 0x162   :  { %7310 = vmatprep.mubr.msk.f32.mxu1 %vm104_vm0, %v994_v13 }
 0x165   :  { %7311 = vmatmul.mubr.msk.f32.gmra.mrb[88].mxu1 %vm104_vm0, %v995_v8 }
 0x166   :  { %7313 = vmatprep.mubr.msk.f32.mxu1 %vm104_vm0, %v996_v38 }
 0x169   :  { %7314 = vmatmul.mubr.msk.f32.gmra.mrb[90].mxu1 %vm104_vm0, %v997_v53 }
 0x16a   :  { %7316 = vmatprep.mubr.msk.f32.mxu1 %vm104_vm0, %v998_v39 }
 0x16d   :  { %7317 = vmatmul.mubr.msk.f32.gmra.mrb[92].mxu1 %vm104_vm0, %v999_v11 }
 0x16e   :  { %7319 = vmatprep.mubr.msk.f32.mxu1 %vm104_vm0, %v1000_v22 }
 0x171   :  { %7320 = vmatmul.mubr.msk.f32.gmra.mrb[94].mxu1 %vm104_vm0, %v1001_v48 }
 0x1c8   :  { %v7228_v14 = vpop.f32.mrb[32].mxu1 }
 0x1c9   :  { %v8945_v42 = vadd.f32 %v7228_v14, %v8942_v33  ;;  %v1271_v16 = vpop.f32.mrb[33].mxu1 }
 0x1ca   :  { %v8948_v57 = vadd.f32 %v8942_v33, %v1271_v16 }
 0x1cb   :  { %v1591_v18 = vmul.f32 %v8945_v42, %v8945_v42 }
 0x1cc   :  { %v7231_v62 = vpop.f32.mrb[34].mxu1  ;;  %v1590_v29 = vmul.f32 %v8948_v57, %v8948_v57 }
 0x1cd   :  { %v1281_v55 = vpop.f32.mrb[35].mxu1  ;;  %v8961_v59 = vadd.f32 %v7231_v62, %v8942_v33  ;;  %v1657_v10 = vsel %vm104_vm0, %v1591_v18, 0.0 }
 0x1ce   :  { %v8964_v37 = vadd.f32 %v8942_v33, %v1281_v55  ;;  %v1654_v12 = vsel %vm104_vm0, %v1590_v29, 0.0 }
 0x1cf   :  { %1655 = vadd.xlane.f32.xlu0 %v1654_v12  ;;  %v1593_v54 = vmul.f32 %v8961_v59, %v8961_v59 }
 0x1d0   :  { %v7234_v15 = vpop.f32.mrb[36].mxu1  ;;  %v1592_v36 = vmul.f32 %v8964_v37, %v8964_v37 }
 0x1d1   :  { %v1291_v31 = vpop.f32.mrb[37].mxu1  ;;  %v8975_v46 = vadd.f32 %v7234_v15, %v8942_v33  ;;  %v1663_v20 = vsel %vm104_vm0, %v1593_v54, 0.0 }
 0x1d2   :  { %v8978_v7 = vadd.f32 %v8942_v33, %v1291_v31  ;;  %v1660_v43 = vsel %vm104_vm0, %v1592_v36, 0.0 }
 0x1d3   :  { %1661 = vadd.xlane.f32.xlu1 %v1660_v43  ;;  %1658 = vadd.xlane.f32.xlu0 %v1657_v10  ;;  %v1595_v30 = vmul.f32 %v8975_v46, %v8975_v46 }
 0x1d4   :  { %v7237_v40 = vpop.f32.mrb[38].mxu1  ;;  %v1594_v52 = vmul.f32 %v8978_v7, %v8978_v7 }
 0x1d5   :  { %v8986_v26 = vadd.f32 %v7237_v40, %v8942_v33  ;;  %v1301_v24 = vpop.f32.mrb[39].mxu1  ;;  %v1669_v49 = vsel %vm104_vm0, %v1595_v30, 0.0 }
 0x1d6   :  { %v8989_v17 = vadd.f32 %v8942_v33, %v1301_v24  ;;  %v1666_v51 = vsel %vm104_vm0, %v1594_v52, 0.0 }
 0x1d7   :  { %1664 = vadd.xlane.f32.xlu1 %v1663_v20  ;;  %1667 = vadd.xlane.f32.xlu0 %v1666_v51  ;;  %v1597_v60 = vmul.f32 %v8986_v26, %v8986_v26 }
 0x1d8   :  { %v7240_v56 = vpop.f32.mrb[40].mxu1  ;;  %v1596_v41 = vmul.f32 %v8989_v17, %v8989_v17 }
 0x1d9   :  { %v1311_v6 = vpop.f32.mrb[41].mxu1  ;;  %v9000_v25 = vadd.f32 %v7240_v56, %v8942_v33  ;;  %v1675_v0 = vsel %vm104_vm0, %v1597_v60, 0.0 }
 0x1da   :  { %v9003_v13 = vadd.f32 %v8942_v33, %v1311_v6  ;;  %v1672_v34 = vsel %vm104_vm0, %v1596_v41, 0.0 }
 0x1db   :  { %1670 = vadd.xlane.f32.xlu1 %v1669_v49  ;;  %1673 = vadd.xlane.f32.xlu0 %v1672_v34  ;;  %v1599_v58 = vmul.f32 %v9000_v25, %v9000_v25 }
 0x1dc   :  { %v7243_v61 = vpop.f32.mrb[42].mxu1  ;;  %v1598_v8 = vmul.f32 %v9003_v13, %v9003_v13 }
 0x1dd   :  { %v1321_v9 = vpop.f32.mrb[43].mxu1  ;;  %v9011_v5 = vadd.f32 %v7243_v61, %v8942_v33  ;;  %v1681_v39 = vsel %vm104_vm0, %v1599_v58, 0.0 }
 0x1de   :  { %v9014_v38 = vadd.f32 %v8942_v33, %v1321_v9  ;;  %v1678_v3 = vsel %vm104_vm0, %v1598_v8, 0.0 }
 0x1df   :  { %1676 = vadd.xlane.f32.xlu1 %v1675_v0  ;;  %1679 = vadd.xlane.f32.xlu0 %v1678_v3  ;;  %v1601_v1 = vmul.f32 %v9011_v5, %v9011_v5 }
 0x1e0   :  { %v7246_v2 = vpop.f32.mrb[44].mxu1  ;;  %v1600_v53 = vmul.f32 %v9014_v38, %v9014_v38 }
 0x1e1   :  { %v9022_v28 = vadd.f32 %v7246_v2, %v8942_v33  ;;  %v1331_v44 = vpop.f32.mrb[45].mxu1  ;;  %v1687_v50 = vsel %vm104_vm0, %v1601_v1, 0.0 }
 0x1e2   :  { %v9025_v45 = vadd.f32 %v8942_v33, %v1331_v44  ;;  %v1684_v32 = vsel %vm104_vm0, %v1600_v53, 0.0 }
 0x1e3   :  { %1682 = vadd.xlane.f32.xlu1 %v1681_v39  ;;  %1685 = vadd.xlane.f32.xlu0 %v1684_v32  ;;  %v1603_v22 = vmul.f32 %v9022_v28, %v9022_v28 }
 0x1e4   :  { %v7249_v11 = vpop.f32.mrb[46].mxu1  ;;  %v1602_v47 = vmul.f32 %v9025_v45, %v9025_v45 }
 0x1e5   :  { %v1341_v19 = vpop.f32.mrb[47].mxu1  ;;  %v9036_v48 = vadd.f32 %v7249_v11, %v8942_v33  ;;  %v1693_v27 = vsel %vm104_vm0, %v1603_v22, 0.0 }
 0x1e6   :  { %v9039_v35 = vadd.f32 %v8942_v33, %v1341_v19  ;;  %v1690_v63 = vsel %vm104_vm0, %v1602_v47, 0.0 }
 0x1e7   :  { %1688 = vadd.xlane.f32.xlu1 %v1687_v50  ;;  %1691 = vadd.xlane.f32.xlu0 %v1690_v63  ;;  %v1605_v21 = vmul.f32 %v9036_v48, %v9036_v48 }
 0x1e8   :  { %v7252_v4 = vpop.f32.mrb[48].mxu1  ;;  %v1604_v14 = vmul.f32 %v9039_v35, %v9039_v35 }
 0x1e9   :  { %v1351_v16 = vpop.f32.mrb[49].mxu1  ;;  %v9047_v23 = vadd.f32 %v7252_v4, %v8942_v33  ;;  %v1699_v31 = vsel %vm104_vm0, %v1605_v21, 0.0 }
 0x1ea   :  { %v9050_v62 = vadd.f32 %v8942_v33, %v1351_v16  ;;  %v1696_v29 = vsel %vm104_vm0, %v1604_v14, 0.0 }
 0x1eb   :  { %1694 = vadd.xlane.f32.xlu1 %v1693_v27  ;;  %1697 = vadd.xlane.f32.xlu0 %v1696_v29  ;;  %v1607_v43 = vmul.f32 %v9047_v23, %v9047_v23 }
 0x1ec   :  { %v7255_v55 = vpop.f32.mrb[50].mxu1  ;;  %v1606_v18 = vmul.f32 %v9050_v62, %v9050_v62 }
 0x1ed   :  { %v9058_v12 = vadd.f32 %v7255_v55, %v8942_v33  ;;  %v1361_v15 = vpop.f32.mrb[51].mxu1  ;;  %v1705_v30 = vsel %vm104_vm0, %v1607_v43, 0.0 }
 0x1ee   :  { %v9061_v36 = vadd.f32 %v8942_v33, %v1361_v15  ;;  %v1702_v10 = vsel %vm104_vm0, %v1606_v18, 0.0 }
 0x1ef   :  { %1700 = vadd.xlane.f32.xlu1 %v1699_v31  ;;  %1703 = vadd.xlane.f32.xlu0 %v1702_v10  ;;  %v1609_v24 = vmul.f32 %v9058_v12, %v9058_v12 }
 0x1f0   :  { %v7258_v54 = vpop.f32.mrb[52].mxu1  ;;  %v1608_v40 = vmul.f32 %v9061_v36, %v9061_v36 }
 0x1f1   :  { %v1371_v52 = vpop.f32.mrb[53].mxu1  ;;  %v9072_v20 = vadd.f32 %v7258_v54, %v8942_v33  ;;  %v1711_v49 = vsel %vm104_vm0, %v1609_v24, 0.0 }
 0x1f2   :  { %v9075_v51 = vadd.f32 %v8942_v33, %v1371_v52  ;;  %v1708_v56 = vsel %vm104_vm0, %v1608_v40, 0.0 }
 0x1f3   :  { %1706 = vadd.xlane.f32.xlu1 %v1705_v30  ;;  %1709 = vadd.xlane.f32.xlu0 %v1708_v56  ;;  %v1611_v9 = vmul.f32 %v9072_v20, %v9072_v20 }
 0x1f4   :  { %v7261_v41 = vpop.f32.mrb[54].mxu1  ;;  %v1610_v6 = vmul.f32 %v9075_v51, %v9075_v51 }
 0x1f5   :  { %v1381_v60 = vpop.f32.mrb[55].mxu1  ;;  %v9083_v34 = vadd.f32 %v7261_v41, %v8942_v33  ;;  %v1717_v44 = vsel %vm104_vm0, %v1611_v9, 0.0 }
 0x1f6   :  { %v9086_v61 = vadd.f32 %v8942_v33, %v1381_v60  ;;  %v1714_v8 = vsel %vm104_vm0, %v1610_v6, 0.0 }
 0x1f7   :  { %1712 = vadd.xlane.f32.xlu1 %v1711_v49  ;;  %1715 = vadd.xlane.f32.xlu0 %v1714_v8  ;;  %v1613_v32 = vmul.f32 %v9083_v34, %v9083_v34 }
 0x1f8   :  { %v7264_v0 = vpop.f32.mrb[56].mxu1  ;;  %v1612_v3 = vmul.f32 %v9086_v61, %v9086_v61 }
 0x1f9   :  { %v9094_v58 = vadd.f32 %v7264_v0, %v8942_v33  ;;  %v1391_v2 = vpop.f32.mrb[57].mxu1  ;;  %v1723_v63 = vsel %vm104_vm0, %v1613_v32, 0.0 }
 0x1fa   :  { %v9097_v53 = vadd.f32 %v8942_v33, %v1391_v2  ;;  %v1720_v39 = vsel %vm104_vm0, %v1612_v3, 0.0 }
 0x1fb   :  { %1718 = vadd.xlane.f32.xlu1 %v1717_v44  ;;  %1721 = vadd.xlane.f32.xlu0 %v1720_v39  ;;  %v1615_v19 = vmul.f32 %v9094_v58, %v9094_v58 }
 0x1fc   :  { %v7267_v1 = vpop.f32.mrb[58].mxu1  ;;  %v1614_v11 = vmul.f32 %v9097_v53, %v9097_v53 }
 0x1fd   :  { %v1401_v47 = vpop.f32.mrb[59].mxu1  ;;  %v9108_v22 = vadd.f32 %v7267_v1, %v8942_v33  ;;  %v1729_v29 = vsel %vm104_vm0, %v1615_v19, 0.0 }
 0x1fe   :  { %v9111_v50 = vadd.f32 %v8942_v33, %v1401_v47  ;;  %v1726_v4 = vsel %vm104_vm0, %v1614_v11, 0.0 }
 0x1ff   :  { %1724 = vadd.xlane.f32.xlu1 %v1723_v63  ;;  %1727 = vadd.xlane.f32.xlu0 %v1726_v4  ;;  %v1617_v15 = vmul.f32 %v9108_v22, %v9108_v22 }
 0x200   :  { %v7270_v14 = vpop.f32.mrb[60].mxu1  ;;  %v1616_v16 = vmul.f32 %v9111_v50, %v9111_v50 }
 0x201   :  { %v1411_v27 = vpop.f32.mrb[61].mxu1  ;;  %v9119_v21 = vadd.f32 %v7270_v14, %v8942_v33  ;;  %v1735_v52 = vsel %vm104_vm0, %v1617_v15, 0.0 }
 0x202   :  { %v9122_v55 = vadd.f32 %v8942_v33, %v1411_v27  ;;  %v1732_v18 = vsel %vm104_vm0, %v1616_v16, 0.0 }
 0x203   :  { %1730 = vadd.xlane.f32.xlu1 %v1729_v29  ;;  %1733 = vadd.xlane.f32.xlu0 %v1732_v18  ;;  %v1619_v30 = vmul.f32 %v9119_v21, %v9119_v21 }
 0x204   :  { %v7273_v31 = vpop.f32.mrb[62].mxu1  ;;  %v1618_v10 = vmul.f32 %v9122_v55, %v9122_v55 }
 0x205   :  { %v9130_v43 = vadd.f32 %v7273_v31, %v8942_v33  ;;  %v1421_v54 = vpop.f32.mrb[63].mxu1  ;;  %v1741_v9 = vsel %vm104_vm0, %v1619_v30, 0.0 }
 0x206   :  { %v9133_v40 = vadd.f32 %v8942_v33, %v1421_v54  ;;  %v1738_v24 = vsel %vm104_vm0, %v1618_v10, 0.0 }
 0x207   :  { %1736 = vadd.xlane.f32.xlu1 %v1735_v52  ;;  %1739 = vadd.xlane.f32.xlu0 %v1738_v24  ;;  %v1621_v60 = vmul.f32 %v9130_v43, %v9130_v43 }
 0x208   :  { %v7276_v56 = vpop.f32.mrb[64].mxu1  ;;  %v1620_v41 = vmul.f32 %v9133_v40, %v9133_v40 }
 0x209   :  { %v1431_v6 = vpop.f32.mrb[65].mxu1  ;;  %v9144_v49 = vadd.f32 %v7276_v56, %v8942_v33  ;;  %v1747_v39 = vsel %vm104_vm0, %v1621_v60, 0.0 }
 0x20a   :  { %v9147_v8 = vadd.f32 %v8942_v33, %v1431_v6  ;;  %v1744_v0 = vsel %vm104_vm0, %v1620_v41, 0.0 }
 0x20b   :  { %1742 = vadd.xlane.f32.xlu1 %v1741_v9  ;;  %1745 = vadd.xlane.f32.xlu0 %v1744_v0  ;;  %v1623_v47 = vmul.f32 %v9144_v49, %v9144_v49 }
 0x20c   :  { %v7279_v3 = vpop.f32.mrb[66].mxu1  ;;  %v1622_v2 = vmul.f32 %v9147_v8, %v9147_v8 }
 0x20d   :  { %v1441_v44 = vpop.f32.mrb[67].mxu1  ;;  %v9155_v32 = vadd.f32 %v7279_v3, %v8942_v33  ;;  %v1753_v27 = vsel %vm104_vm0, %v1623_v47, 0.0 }
 0x20e   :  { %v9158_v1 = vadd.f32 %v8942_v33, %v1441_v44  ;;  %v1750_v11 = vsel %vm104_vm0, %v1622_v2, 0.0 }
 0x20f   :  { %1748 = vadd.xlane.f32.xlu1 %v1747_v39  ;;  %1751 = vadd.xlane.f32.xlu0 %v1750_v11  ;;  %v1625_v18 = vmul.f32 %v9155_v32, %v9155_v32 }
 0x210   :  { %v7282_v19 = vpop.f32.mrb[68].mxu1  ;;  %v1624_v63 = vmul.f32 %v9158_v1, %v9158_v1 }
 0x211   :  { %v9166_v4 = vadd.f32 %v7282_v19, %v8942_v33  ;;  %v1451_v14 = vpop.f32.mrb[69].mxu1  ;;  %v1759_v30 = vsel %vm104_vm0, %v1625_v18, 0.0 }
 0x212   :  { %v9169_v16 = vadd.f32 %v8942_v33, %v1451_v14  ;;  %v1756_v29 = vsel %vm104_vm0, %v1624_v63, 0.0 }
 0x213   :  { %1754 = vadd.xlane.f32.xlu1 %v1753_v27  ;;  %1757 = vadd.xlane.f32.xlu0 %v1756_v29  ;;  %v1627_v54 = vmul.f32 %v9166_v4, %v9166_v4 }
 0x214   :  { %v7285_v15 = vpop.f32.mrb[70].mxu1  ;;  %v1626_v31 = vmul.f32 %v9169_v16, %v9169_v16 }
 0x215   :  { %v1461_v10 = vpop.f32.mrb[71].mxu1  ;;  %v9180_v52 = vadd.f32 %v7285_v15, %v8942_v33  ;;  %v1765_v9 = vsel %vm104_vm0, %v1627_v54, 0.0 }
 0x216   :  { %v9183_v24 = vadd.f32 %v8942_v33, %v1461_v10  ;;  %v1762_v56 = vsel %vm104_vm0, %v1626_v31, 0.0 }
 0x217   :  { %1760 = vadd.xlane.f32.xlu1 %v1759_v30  ;;  %1763 = vadd.xlane.f32.xlu0 %v1762_v56  ;;  %v1629_v44 = vmul.f32 %v9180_v52, %v9180_v52 }
 0x218   :  { %v7288_v41 = vpop.f32.mrb[72].mxu1  ;;  %v1628_v6 = vmul.f32 %v9183_v24, %v9183_v24 }
 0x219   :  { %v1471_v60 = vpop.f32.mrb[73].mxu1  ;;  %v9191_v0 = vadd.f32 %v7288_v41, %v8942_v33  ;;  %v1771_v14 = vsel %vm104_vm0, %v1629_v44, 0.0 }
 0x21a   :  { %v9194_v3 = vadd.f32 %v8942_v33, %v1471_v60  ;;  %v1768_v2 = vsel %vm104_vm0, %v1628_v6, 0.0 }
 0x21b   :  { %1766 = vadd.xlane.f32.xlu1 %v1765_v9  ;;  %1769 = vadd.xlane.f32.xlu0 %v1768_v2  ;;  %v1631_v29 = vmul.f32 %v9191_v0, %v9191_v0 }
 0x21c   :  { %v7291_v39 = vpop.f32.mrb[74].mxu1  ;;  %v1630_v11 = vmul.f32 %v9194_v3, %v9194_v3 }
 0x21d   :  { %v9202_v47 = vadd.f32 %v7291_v39, %v8942_v33  ;;  %v1481_v19 = vpop.f32.mrb[75].mxu1  ;;  %v1777_v56 = vsel %vm104_vm0, %v1631_v29, 0.0 }
 0x21e   :  { %v9205_v63 = vadd.f32 %v8942_v33, %v1481_v19  ;;  %v1774_v27 = vsel %vm104_vm0, %v1630_v11, 0.0 }
 0x21f   :  { %1772 = vadd.xlane.f32.xlu1 %v1771_v14  ;;  %1775 = vadd.xlane.f32.xlu0 %v1774_v27  ;;  %v1633_v10 = vmul.f32 %v9202_v47, %v9202_v47 }
 0x220   :  { %v7294_v18 = vpop.f32.mrb[76].mxu1  ;;  %v1632_v15 = vmul.f32 %v9205_v63, %v9205_v63 }
 0x221   :  { %v1491_v31 = vpop.f32.mrb[77].mxu1  ;;  %v9216_v54 = vadd.f32 %v7294_v18, %v8942_v33  ;;  %v1783_v2 = vsel %vm104_vm0, %v1633_v10, 0.0 }
 0x222   :  { %v9219_v30 = vadd.f32 %v8942_v33, %v1491_v31  ;;  %v1780_v41 = vsel %vm104_vm0, %v1632_v15, 0.0 }
 0x223   :  { %1778 = vadd.xlane.f32.xlu1 %v1777_v56  ;;  %1781 = vadd.xlane.f32.xlu0 %v1780_v41  ;;  %v1635_v19 = vmul.f32 %v9216_v54, %v9216_v54 }
 0x224   :  { %v7297_v6 = vpop.f32.mrb[78].mxu1  ;;  %v1634_v60 = vmul.f32 %v9219_v30, %v9219_v30 }
 0x225   :  { %v1501_v9 = vpop.f32.mrb[79].mxu1  ;;  %v9227_v44 = vadd.f32 %v7297_v6, %v8942_v33  ;;  %v1789_v31 = vsel %vm104_vm0, %v1635_v19, 0.0 }
 0x226   :  { %v9230_v39 = vadd.f32 %v8942_v33, %v1501_v9  ;;  %v1786_v11 = vsel %vm104_vm0, %v1634_v60, 0.0 }
 0x227   :  { %13601 = vst [vmem:[#allocation2_spill] sm:$0xff] %v9227_v44  ;;  %1784 = vadd.xlane.f32.xlu1 %v1783_v2  ;;  %1787 = vadd.xlane.f32.xlu0 %v1786_v11  ;;  %v1637_v56 = vmul.f32 %v9227_v44, %v9227_v44 }
 0x228   :  { %13602 = vst [vmem:[#allocation3_spill] sm:$0xff] %v9230_v39  ;;  %v7300_v14 = vpop.f32.mrb[80].mxu1  ;;  %v1636_v27 = vmul.f32 %v9230_v39, %v9230_v39 }
 0x229   :  { %v9238_v29 = vadd.f32 %v7300_v14, %v8942_v33  ;;  %v1511_v18 = vpop.f32.mrb[81].mxu1  ;;  %v1795_v19 = vsel %vm104_vm0, %v1637_v56, 0.0 }
 0x22a   :  { %v9241_v15 = vadd.f32 %v8942_v33, %v1511_v18  ;;  %v1792_v10 = vsel %vm104_vm0, %v1636_v27, 0.0 }
 0x22b   :  { %13603 = vst [vmem:[#allocation4_spill] sm:$0xff] %v9238_v29  ;;  %1790 = vadd.xlane.f32.xlu1 %v1789_v31  ;;  %1793 = vadd.xlane.f32.xlu0 %v1792_v10  ;;  %v1639_v60 = vmul.f32 %v9238_v29, %v9238_v29 }
 0x22c   :  { %13604 = vst [vmem:[#allocation5_spill] sm:$0xff] %v9241_v15  ;;  %v7303_v41 = vpop.f32.mrb[82].mxu1  ;;  %v1638_v6 = vmul.f32 %v9241_v15, %v9241_v15 }
 0x22d   :  { %v9252_v9 = vadd.f32 %v7303_v41, %v8942_v33  ;;  %v1521_v2 = vpop.f32.mrb[83].mxu1  ;;  %v1801_v18 = vsel %vm104_vm0, %v1639_v60, 0.0 }
 0x22e   :  { %v9255_v11 = vadd.f32 %v8942_v33, %v1521_v2  ;;  %v1798_v14 = vsel %vm104_vm0, %v1638_v6, 0.0 }
 0x22f   :  { %13605 = vst [vmem:[#allocation6_spill] sm:$0xff] %v9252_v9  ;;  %1796 = vadd.xlane.f32.xlu1 %v1795_v19  ;;  %1799 = vadd.xlane.f32.xlu0 %v1798_v14  ;;  %v1641_v10 = vmul.f32 %v9252_v9, %v9252_v9 }
 0x230   :  { %13606 = vst [vmem:[#allocation7_spill] sm:$0xff] %v9255_v11  ;;  %v7306_v27 = vpop.f32.mrb[84].mxu1  ;;  %v1640_v31 = vmul.f32 %v9255_v11, %v9255_v11 }
 0x231   :  { %v9265_v41 = vadd.f32 %v7306_v27, %v8942_v33  ;;  %v1531_v2 = vpop.f32.mrb[85].mxu1  ;;  %v1807_v60 = vsel %vm104_vm0, %v1641_v10, 0.0 }
 0x232   :  { %v9268_v29 = vadd.f32 %v8942_v33, %v1531_v2  ;;  %v1804_v56 = vsel %vm104_vm0, %v1640_v31, 0.0 }
 0x233   :  { %13607 = vst [vmem:[#allocation8_spill] sm:$0xff] %v9265_v41  ;;  %1802 = vadd.xlane.f32.xlu1 %v1801_v18  ;;  %1805 = vadd.xlane.f32.xlu0 %v1804_v56  ;;  %v1643_v14 = vmul.f32 %v9265_v41, %v9265_v41 }
 0x234   :  { %13608 = vst [vmem:[#allocation9_spill] sm:$0xff] %v9268_v29  ;;  %v7309_v6 = vpop.f32.mrb[86].mxu1  ;;  %v1642_v19 = vmul.f32 %v9268_v29, %v9268_v29 }
 0x235   :  { %v9277_v27 = vadd.f32 %v7309_v6, %v8942_v33  ;;  %v1541_v9 = vpop.f32.mrb[87].mxu1  ;;  %v1813_v10 = vsel %vm104_vm0, %v1643_v14, 0.0 }
 0x236   :  { %v9280_v2 = vadd.f32 %v8942_v33, %v1541_v9  ;;  %v1810_v31 = vsel %vm104_vm0, %v1642_v19, 0.0 }
 0x237   :  { %13609 = vst [vmem:[#allocation10_spill] sm:$0xff] %v9277_v27  ;;  %1808 = vadd.xlane.f32.xlu1 %v1807_v60  ;;  %1811 = vadd.xlane.f32.xlu0 %v1810_v31  ;;  %v1645_v41 = vmul.f32 %v9277_v27, %v9277_v27 }
 0x238   :  { %13610 = vst [vmem:[#allocation11_spill] sm:$0xff] %v9280_v2  ;;  %v7312_v18 = vpop.f32.mrb[88].mxu1  ;;  %v1644_v56 = vmul.f32 %v9280_v2, %v9280_v2 }
 0x239   :  { %v9289_v6 = vadd.f32 %v7312_v18, %v8942_v33  ;;  %v1551_v29 = vpop.f32.mrb[89].mxu1  ;;  %v1819_v14 = vsel %vm104_vm0, %v1645_v41, 0.0 }
 0x23a   :  { %v9292_v9 = vadd.f32 %v8942_v33, %v1551_v29  ;;  %v1816_v19 = vsel %vm104_vm0, %v1644_v56, 0.0 }
 0x23b   :  { %13611 = vst [vmem:[#allocation12_spill] sm:$0xff] %v9289_v6  ;;  %1814 = vadd.xlane.f32.xlu1 %v1813_v10  ;;  %1817 = vadd.xlane.f32.xlu0 %v1816_v19  ;;  %v1647_v27 = vmul.f32 %v9289_v6, %v9289_v6 }
 0x23c   :  { %13612 = vst [vmem:[#allocation13_spill] sm:$0xff] %v9292_v9  ;;  %v7315_v60 = vpop.f32.mrb[90].mxu1  ;;  %v1646_v31 = vmul.f32 %v9292_v9, %v9292_v9 }
 0x23d   :  { %v9301_v18 = vadd.f32 %v7315_v60, %v8942_v33  ;;  %v1561_v2 = vpop.f32.mrb[91].mxu1  ;;  %v1825_v41 = vsel %vm104_vm0, %v1647_v27, 0.0 }
 0x23e   :  { %v9304_v29 = vadd.f32 %v8942_v33, %v1561_v2  ;;  %v1822_v56 = vsel %vm104_vm0, %v1646_v31, 0.0 }
 0x23f   :  { %13613 = vst [vmem:[#allocation14_spill] sm:$0xff] %v9301_v18  ;;  %1820 = vadd.xlane.f32.xlu1 %v1819_v14  ;;  %1823 = vadd.xlane.f32.xlu0 %v1822_v56  ;;  %v1649_v6 = vmul.f32 %v9301_v18, %v9301_v18 }
 0x240   :  { %13614 = vst [vmem:[#allocation15_spill] sm:$0xff] %v9304_v29  ;;  %v7318_v10 = vpop.f32.mrb[92].mxu1  ;;  %v1648_v19 = vmul.f32 %v9304_v29, %v9304_v29 }
 0x241   :  { %v9313_v60 = vadd.f32 %v7318_v10, %v8942_v33  ;;  %v1571_v9 = vpop.f32.mrb[93].mxu1  ;;  %v1831_v27 = vsel %vm104_vm0, %v1649_v6, 0.0 }
 0x242   :  { %v9316_v2 = vadd.f32 %v8942_v33, %v1571_v9  ;;  %v1828_v31 = vsel %vm104_vm0, %v1648_v19, 0.0 }
 0x243   :  { %13615 = vst [vmem:[#allocation16_spill] sm:$0xff] %v9313_v60  ;;  %1826 = vadd.xlane.f32.xlu1 %v1825_v41  ;;  %1829 = vadd.xlane.f32.xlu0 %v1828_v31  ;;  %v1651_v18 = vmul.f32 %v9313_v60, %v9313_v60 }
 0x244   :  { %13616 = vst [vmem:[#allocation17_spill] sm:$0xff] %v9316_v2  ;;  %v7321_v14 = vpop.f32.mrb[94].mxu1  ;;  %v1650_v56 = vmul.f32 %v9316_v2, %v9316_v2  ;;  %v2823_v2 = vlaneseq }
 0x245   :  { %v9325_v10 = vadd.f32 %v7321_v14, %v8942_v33  ;;  %v1581_v29 = vpop.f32.mrb[95].mxu1  ;;  %v1837_v41 = vsel %vm104_vm0, %v1651_v18, 0.0 }
 0x246   :  { %v9328_v9 = vadd.f32 %v8942_v33, %v1581_v29  ;;  %v1834_v19 = vsel %vm104_vm0, %v1650_v56, 0.0 }
 0x247   :  { %13617 = vst [vmem:[#allocation18_spill] sm:$0xff] %v9325_v10  ;;  %1832 = vadd.xlane.f32.xlu1 %v1831_v27  ;;  %1835 = vadd.xlane.f32.xlu0 %v1834_v19  ;;  %v1653_v31 = vmul.f32 %v9325_v10, %v9325_v10 }
 0x248   :  { %13618 = vst [vmem:[#allocation19_spill] sm:$0xff] %v9328_v9  ;;  %v1652_v6 = vmul.f32 %v9328_v9, %v9328_v9  ;;  %v5456_v9 = vshrl.u32 %v2823_v2, 7 }
 0x249   :  { %v1843_v14 = vsel %vm104_vm0, %v1653_v31, 0.0 }
 0x24a   :  { %v1840_v60 = vsel %vm104_vm0, %v1652_v6, 0.0 }
 0x24b   :  { %1838 = vadd.xlane.f32.xlu1 %v1837_v41  ;;  %1841 = vadd.xlane.f32.xlu0 %v1840_v60  ;;  %v9338_v41 = vand.u32 127, %v2823_v2  ;;  %v5457_v60 = vadd.s32 8, %v5456_v9  ;;  %v5458_v2 = vadd.s32 16, %v5456_v9 }
 0x24d   :  { %13619 = vst [vmem:[#allocation20_spill] sm:$0xff] %v9338_v41  ;;  %vm5460_vm2 = vcmp.eq.s32.totalorder %v5456_v9, %v9338_v41  ;;  %vm5461_vm3 = vcmp.eq.s32.totalorder %v5457_v60, %v9338_v41  ;;  %vm5462_vm5 = vcmp.eq.s32.totalorder %v5458_v2, %v9338_v41 }
 0x24e   :  { %vm9342_vm4 = vmpackc.low %vm5461_vm3, %vm5460_vm2 }
 0x24f   :  { %1844 = vadd.xlane.f32.xlu1 %v1843_v14 }
 0x25c   :  { %v1656_v33 = vpop.xlane.xlu0 %1655 }
 0x25d   :  { %v1846_v29 = vmax.f32 %v1656_v33, 1e-24 }
 0x25f   :  { %7812 = vrsqrt.f32 %v1846_v29 }
 0x260   :  { %v1662_v27 = vpop.xlane.xlu1 %1661  ;;  %v1659_v56 = vpop.xlane.xlu0 %1658 }
 0x261   :  { %v1848_v19 = vmax.f32 %v1662_v27, 1e-24  ;;  %v1847_v18 = vmax.f32 %v1659_v56, 1e-24 }
 0x263   :  { %7814 = vrsqrt.f32 %v1848_v19 }
 0x264   :  { %7816 = vrsqrt.f32 %v1847_v18  ;;  %v1665_v11 = vpop.xlane.xlu1 %1664  ;;  %v1668_v10 = vpop.xlane.xlu0 %1667 }
 0x265   :  { %v1849_v15 = vmax.f32 %v1665_v11, 1e-24  ;;  %v1850_v6 = vmax.f32 %v1668_v10, 1e-24  ;;  %v8133_v11 = vmov 1.0|1.0  }
 0x266   :  { %7671 = vmatprep.subr.msk.bf16.mxu0 %vm9342_vm4, %v8133_v11 }
 0x267   :  { %7818 = vrsqrt.f32 %v1849_v15  ;;  %v5459_v15 = vadd.s32 24, %v5456_v9 }
 0x268   :  { %7820 = vrsqrt.f32 %v1850_v6  ;;  %v1671_v31 = vpop.xlane.xlu1 %1670  ;;  %v1674_v14 = vpop.xlane.xlu0 %1673 }
 0x269   :  { %v7813_v29 = vpop.eup %7812  ;;  %v1851_v27 = vmax.f32 %v1671_v31, 1e-24  ;;  %v1852_v56 = vmax.f32 %v1674_v14, 1e-24  ;;  %vm5463_vm6 = vcmp.eq.s32.totalorder %v5459_v15, %v9338_v41 }
 0x26a   :  { %v1974_v10 = vmul.f32 %v7813_v29, %v8948_v57  ;;  %vm9354_vm7 = vmpackc.low %vm5463_vm6, %vm5462_vm5 }
 0x26b   :  { %7822 = vrsqrt.f32 %v1851_v27 }
 0x26c   :  { %7824 = vrsqrt.f32 %v1852_v56  ;;  %v1677_v19 = vpop.xlane.xlu1 %1676  ;;  %7330 = vmatprep.mubr.msk.f32.mxu0 %vm104_vm0, %v1974_v10  ;;  %v1680_v18 = vpop.xlane.xlu0 %1679 }
 0x26d   :  { %v7815_v6 = vpop.eup %7814  ;;  %v1853_v60 = vmax.f32 %v1677_v19, 1e-24  ;;  %v1854_v44 = vmax.f32 %v1680_v18, 1e-24 }
 0x26e   :  { %v7817_v31 = vpop.eup %7816  ;;  %v1976_v14 = vmul.f32 %v7815_v6, %v8964_v37 }
 0x26f   :  { %v1975_v9 = vmul.f32 %v7817_v31, %v8945_v42  ;;  %7826 = vrsqrt.f32 %v1853_v60 }
 0x270   :  { %7828 = vrsqrt.f32 %v1854_v44  ;;  %v1683_v29 = vpop.xlane.xlu1 %1682  ;;  %v1686_v27 = vpop.xlane.xlu0 %1685 }
 0x271   :  { %v7819_v10 = vpop.eup %7818  ;;  %v1855_v19 = vmax.f32 %v1683_v29, 1e-24  ;;  %7331 = vmatmul.mubr.msk.f32.vlgmr.msra.gmra.mrb[32].mxu0 %vm104_vm0, %v1975_v9  ;;  %v1856_v2 = vmax.f32 %v1686_v27, 1e-24 }
 0x272   :  { %v7821_v18 = vpop.eup %7820  ;;  %7333 = vmatprep.mubr.msk.f32.mxu0 %vm104_vm0, %v1976_v14  ;;  %v1977_v15 = vmul.f32 %v7819_v10, %v8961_v59  ;;  %7673 = vmatpush3.bf16.msk.msra.mxu0 %vm9342_vm4, %v8133_v11 }
 0x273   :  { %7830 = vrsqrt.f32 %v1855_v19  ;;  %v1978_v44 = vmul.f32 %v7821_v18, %v8978_v7  ;;  %7675 = vmatprep.subr.msk.bf16.mxu0 %vm9354_vm7, %v8133_v11 }
 0x274   :  { %7832 = vrsqrt.f32 %v1856_v2  ;;  %v1689_v6 = vpop.xlane.xlu1 %1688  ;;  %v1692_v60 = vpop.xlane.xlu0 %1691 }
 0x275   :  { %v7823_v31 = vpop.eup %7822  ;;  %v1857_v9 = vmax.f32 %v1689_v6, 1e-24  ;;  %7334 = vmatmul.mubr.msk.f32.gmra.mrb[34].mxu0 %vm104_vm0, %v1977_v15  ;;  %v1858_v29 = vmax.f32 %v1692_v60, 1e-24 }
 0x276   :  { %v7825_v14 = vpop.eup %7824  ;;  %7336 = vmatprep.mubr.msk.f32.mxu0 %vm104_vm0, %v1978_v44  ;;  %v1979_v33 = vmul.f32 %v7823_v31, %v8975_v46  ;;  %7677 = vmatpush3.bf16.msk.msra.mxu0 %vm9354_vm7, %v8133_v11 }
 0x277   :  { %7834 = vrsqrt.f32 %v1857_v9  ;;  %v1980_v27 = vmul.f32 %v7825_v14, %v8989_v17 }
 0x278   :  { %7836 = vrsqrt.f32 %v1858_v29  ;;  %v1695_v10 = vpop.xlane.xlu1 %1694  ;;  %v1698_v19 = vpop.xlane.xlu0 %1697 }
 0x279   :  { %v7827_v2 = vpop.eup %7826  ;;  %v1859_v18 = vmax.f32 %v1695_v10, 1e-24  ;;  %7337 = vmatmul.mubr.msk.f32.gmra.mrb[36].mxu0 %vm104_vm0, %v1979_v33  ;;  %v1860_v15 = vmax.f32 %v1698_v19, 1e-24 }
 0x27a   :  { %v7829_v6 = vpop.eup %7828  ;;  %7339 = vmatprep.mubr.msk.f32.mxu0 %vm104_vm0, %v1980_v27  ;;  %v1981_v44 = vmul.f32 %v7827_v2, %v8986_v26 }
 0x27b   :  { %7838 = vrsqrt.f32 %v1859_v18  ;;  %v1982_v56 = vmul.f32 %v7829_v6, %v9003_v13 }
 0x27c   :  { %7840 = vrsqrt.f32 %v1860_v15  ;;  %v1701_v11 = vpop.xlane.xlu1 %1700  ;;  %v1704_v60 = vpop.xlane.xlu0 %1703 }
 0x27d   :  { %v7831_v31 = vpop.eup %7830  ;;  %v1861_v9 = vmax.f32 %v1701_v11, 1e-24  ;;  %7340 = vmatmul.mubr.msk.f32.gmra.mrb[38].mxu0 %vm104_vm0, %v1981_v44  ;;  %v1862_v29 = vmax.f32 %v1704_v60, 1e-24 }
 0x27e   :  { %v7833_v14 = vpop.eup %7832  ;;  %7342 = vmatprep.mubr.msk.f32.mxu0 %vm104_vm0, %v1982_v56  ;;  %v1983_v33 = vmul.f32 %v7831_v31, %v9000_v25 }
 0x27f   :  { %7842 = vrsqrt.f32 %v1861_v9  ;;  %v1984_v27 = vmul.f32 %v7833_v14, %v9014_v38 }
 0x280   :  { %7844 = vrsqrt.f32 %v1862_v29  ;;  %v1707_v10 = vpop.xlane.xlu1 %1706  ;;  %v1710_v19 = vpop.xlane.xlu0 %1709 }
 0x281   :  { %v7835_v2 = vpop.eup %7834  ;;  %v1863_v18 = vmax.f32 %v1707_v10, 1e-24  ;;  %7343 = vmatmul.mubr.msk.f32.gmra.mrb[40].mxu0 %vm104_vm0, %v1983_v33  ;;  %v1864_v15 = vmax.f32 %v1710_v19, 1e-24 }
 0x282   :  { %v7837_v6 = vpop.eup %7836  ;;  %7345 = vmatprep.mubr.msk.f32.mxu0 %vm104_vm0, %v1984_v27  ;;  %v1985_v44 = vmul.f32 %v7835_v2, %v9011_v5 }
 0x283   :  { %7846 = vrsqrt.f32 %v1863_v18  ;;  %v1986_v56 = vmul.f32 %v7837_v6, %v9025_v45 }
 0x284   :  { %7848 = vrsqrt.f32 %v1864_v15  ;;  %v1713_v11 = vpop.xlane.xlu1 %1712  ;;  %v1716_v60 = vpop.xlane.xlu0 %1715 }
 0x285   :  { %v7839_v31 = vpop.eup %7838  ;;  %v1865_v9 = vmax.f32 %v1713_v11, 1e-24  ;;  %7346 = vmatmul.mubr.msk.f32.gmra.mrb[42].mxu0 %vm104_vm0, %v1985_v44  ;;  %v1866_v29 = vmax.f32 %v1716_v60, 1e-24 }
 0x286   :  { %v7841_v14 = vpop.eup %7840  ;;  %7348 = vmatprep.mubr.msk.f32.mxu0 %vm104_vm0, %v1986_v56  ;;  %v1987_v33 = vmul.f32 %v7839_v31, %v9022_v28 }
 0x287   :  { %7850 = vrsqrt.f32 %v1865_v9  ;;  %v1988_v27 = vmul.f32 %v7841_v14, %v9039_v35 }
 0x288   :  { %7852 = vrsqrt.f32 %v1866_v29  ;;  %v1719_v10 = vpop.xlane.xlu1 %1718  ;;  %v1722_v19 = vpop.xlane.xlu0 %1721 }
 0x289   :  { %v7843_v2 = vpop.eup %7842  ;;  %v1867_v18 = vmax.f32 %v1719_v10, 1e-24  ;;  %7349 = vmatmul.mubr.msk.f32.gmra.mrb[44].mxu0 %vm104_vm0, %v1987_v33  ;;  %v1868_v15 = vmax.f32 %v1722_v19, 1e-24 }
 0x28a   :  { %v7845_v6 = vpop.eup %7844  ;;  %7351 = vmatprep.mubr.msk.f32.mxu0 %vm104_vm0, %v1988_v27  ;;  %v1989_v44 = vmul.f32 %v7843_v2, %v9036_v48 }
 0x28b   :  { %7854 = vrsqrt.f32 %v1867_v18  ;;  %v1990_v56 = vmul.f32 %v7845_v6, %v9050_v62 }
 0x28c   :  { %7856 = vrsqrt.f32 %v1868_v15  ;;  %v1725_v11 = vpop.xlane.xlu1 %1724  ;;  %v1728_v60 = vpop.xlane.xlu0 %1727 }
 0x28d   :  { %v7847_v31 = vpop.eup %7846  ;;  %v1869_v9 = vmax.f32 %v1725_v11, 1e-24  ;;  %7352 = vmatmul.mubr.msk.f32.gmra.mrb[46].mxu0 %vm104_vm0, %v1989_v44  ;;  %v1870_v29 = vmax.f32 %v1728_v60, 1e-24 }
 0x28e   :  { %v7849_v14 = vpop.eup %7848  ;;  %7354 = vmatprep.mubr.msk.f32.mxu0 %vm104_vm0, %v1990_v56  ;;  %v1991_v33 = vmul.f32 %v7847_v31, %v9047_v23 }
 0x28f   :  { %7858 = vrsqrt.f32 %v1869_v9  ;;  %v1992_v27 = vmul.f32 %v7849_v14, %v9061_v36 }
 0x290   :  { %7860 = vrsqrt.f32 %v1870_v29  ;;  %v1731_v10 = vpop.xlane.xlu1 %1730  ;;  %v1734_v19 = vpop.xlane.xlu0 %1733 }
 0x291   :  { %v7851_v2 = vpop.eup %7850  ;;  %v1871_v18 = vmax.f32 %v1731_v10, 1e-24  ;;  %7355 = vmatmul.mubr.msk.f32.gmra.mrb[48].mxu0 %vm104_vm0, %v1991_v33  ;;  %v1872_v15 = vmax.f32 %v1734_v19, 1e-24 }
 0x292   :  { %v7853_v6 = vpop.eup %7852  ;;  %7357 = vmatprep.mubr.msk.f32.mxu0 %vm104_vm0, %v1992_v27  ;;  %v1993_v44 = vmul.f32 %v7851_v2, %v9058_v12 }
 0x293   :  { %7862 = vrsqrt.f32 %v1871_v18  ;;  %v1994_v56 = vmul.f32 %v7853_v6, %v9075_v51 }
 0x294   :  { %7864 = vrsqrt.f32 %v1872_v15  ;;  %v1737_v11 = vpop.xlane.xlu1 %1736  ;;  %v1740_v60 = vpop.xlane.xlu0 %1739 }
 0x295   :  { %v7855_v31 = vpop.eup %7854  ;;  %v1873_v9 = vmax.f32 %v1737_v11, 1e-24  ;;  %7358 = vmatmul.mubr.msk.f32.gmra.mrb[50].mxu0 %vm104_vm0, %v1993_v44  ;;  %v1874_v29 = vmax.f32 %v1740_v60, 1e-24 }
 0x296   :  { %v7857_v14 = vpop.eup %7856  ;;  %7360 = vmatprep.mubr.msk.f32.mxu0 %vm104_vm0, %v1994_v56  ;;  %v1995_v33 = vmul.f32 %v7855_v31, %v9072_v20 }
 0x297   :  { %7866 = vrsqrt.f32 %v1873_v9  ;;  %v1996_v27 = vmul.f32 %v7857_v14, %v9086_v61 }
 0x298   :  { %7868 = vrsqrt.f32 %v1874_v29  ;;  %v1743_v10 = vpop.xlane.xlu1 %1742  ;;  %v1746_v19 = vpop.xlane.xlu0 %1745 }
 0x299   :  { %v7859_v2 = vpop.eup %7858  ;;  %v1875_v18 = vmax.f32 %v1743_v10, 1e-24  ;;  %7361 = vmatmul.mubr.msk.f32.gmra.mrb[52].mxu0 %vm104_vm0, %v1995_v33  ;;  %v1876_v15 = vmax.f32 %v1746_v19, 1e-24 }
 0x29a   :  { %v7861_v6 = vpop.eup %7860  ;;  %7363 = vmatprep.mubr.msk.f32.mxu0 %vm104_vm0, %v1996_v27  ;;  %v1997_v44 = vmul.f32 %v7859_v2, %v9083_v34 }
 0x29b   :  { %7870 = vrsqrt.f32 %v1875_v18  ;;  %v1998_v56 = vmul.f32 %v7861_v6, %v9097_v53 }
 0x29c   :  { %7872 = vrsqrt.f32 %v1876_v15  ;;  %v1749_v11 = vpop.xlane.xlu1 %1748  ;;  %v1752_v60 = vpop.xlane.xlu0 %1751 }
 0x29d   :  { %v7863_v31 = vpop.eup %7862  ;;  %v1877_v9 = vmax.f32 %v1749_v11, 1e-24  ;;  %7364 = vmatmul.mubr.msk.f32.gmra.mrb[54].mxu0 %vm104_vm0, %v1997_v44  ;;  %v1878_v29 = vmax.f32 %v1752_v60, 1e-24 }
 0x29e   :  { %v7865_v14 = vpop.eup %7864  ;;  %7366 = vmatprep.mubr.msk.f32.mxu0 %vm104_vm0, %v1998_v56  ;;  %v1999_v33 = vmul.f32 %v7863_v31, %v9094_v58 }
 0x29f   :  { %7874 = vrsqrt.f32 %v1877_v9  ;;  %v2000_v27 = vmul.f32 %v7865_v14, %v9111_v50 }
 0x2a0   :  { %7876 = vrsqrt.f32 %v1878_v29  ;;  %v1755_v10 = vpop.xlane.xlu1 %1754  ;;  %v1758_v19 = vpop.xlane.xlu0 %1757 }
 0x2a1   :  { %v7867_v2 = vpop.eup %7866  ;;  %v1879_v18 = vmax.f32 %v1755_v10, 1e-24  ;;  %7367 = vmatmul.mubr.msk.f32.gmra.mrb[56].mxu0 %vm104_vm0, %v1999_v33  ;;  %v1880_v15 = vmax.f32 %v1758_v19, 1e-24 }
 0x2a2   :  { %v7869_v6 = vpop.eup %7868  ;;  %7369 = vmatprep.mubr.msk.f32.mxu0 %vm104_vm0, %v2000_v27  ;;  %v2001_v44 = vmul.f32 %v7867_v2, %v9108_v22 }
 0x2a3   :  { %7878 = vrsqrt.f32 %v1879_v18  ;;  %v2002_v56 = vmul.f32 %v7869_v6, %v9122_v55 }
 0x2a4   :  { %7880 = vrsqrt.f32 %v1880_v15  ;;  %v1761_v11 = vpop.xlane.xlu1 %1760  ;;  %v1764_v60 = vpop.xlane.xlu0 %1763 }
 0x2a5   :  { %v7871_v31 = vpop.eup %7870  ;;  %v1881_v9 = vmax.f32 %v1761_v11, 1e-24  ;;  %7370 = vmatmul.mubr.msk.f32.gmra.mrb[58].mxu0 %vm104_vm0, %v2001_v44  ;;  %v1882_v29 = vmax.f32 %v1764_v60, 1e-24 }
 0x2a6   :  { %v7873_v14 = vpop.eup %7872  ;;  %7372 = vmatprep.mubr.msk.f32.mxu0 %vm104_vm0, %v2002_v56  ;;  %v2003_v33 = vmul.f32 %v7871_v31, %v9119_v21 }
 0x2a7   :  { %7882 = vrsqrt.f32 %v1881_v9  ;;  %v2004_v27 = vmul.f32 %v7873_v14, %v9133_v40 }
 0x2a8   :  { %7884 = vrsqrt.f32 %v1882_v29  ;;  %v1767_v10 = vpop.xlane.xlu1 %1766  ;;  %v1770_v19 = vpop.xlane.xlu0 %1769 }
 0x2a9   :  { %v7875_v2 = vpop.eup %7874  ;;  %v1883_v18 = vmax.f32 %v1767_v10, 1e-24  ;;  %7373 = vmatmul.mubr.msk.f32.gmra.mrb[60].mxu0 %vm104_vm0, %v2003_v33  ;;  %v1884_v15 = vmax.f32 %v1770_v19, 1e-24 }
 0x2aa   :  { %v7877_v6 = vpop.eup %7876  ;;  %7375 = vmatprep.mubr.msk.f32.mxu0 %vm104_vm0, %v2004_v27  ;;  %v2005_v44 = vmul.f32 %v7875_v2, %v9130_v43 }
 0x2ab   :  { %7886 = vrsqrt.f32 %v1883_v18  ;;  %v2006_v56 = vmul.f32 %v7877_v6, %v9147_v8 }
 0x2ac   :  { %7888 = vrsqrt.f32 %v1884_v15  ;;  %v1773_v11 = vpop.xlane.xlu1 %1772  ;;  %v1776_v60 = vpop.xlane.xlu0 %1775 }
 0x2ad   :  { %v7879_v31 = vpop.eup %7878  ;;  %v1885_v9 = vmax.f32 %v1773_v11, 1e-24  ;;  %7376 = vmatmul.mubr.msk.f32.gmra.mrb[62].mxu0 %vm104_vm0, %v2005_v44  ;;  %v1886_v29 = vmax.f32 %v1776_v60, 1e-24 }
 0x2ae   :  { %v7881_v14 = vpop.eup %7880  ;;  %7378 = vmatprep.mubr.msk.f32.mxu0 %vm104_vm0, %v2006_v56  ;;  %v2007_v33 = vmul.f32 %v7879_v31, %v9144_v49 }
 0x2af   :  { %7890 = vrsqrt.f32 %v1885_v9  ;;  %v2008_v27 = vmul.f32 %v7881_v14, %v9158_v1 }
 0x2b0   :  { %7892 = vrsqrt.f32 %v1886_v29  ;;  %v1779_v10 = vpop.xlane.xlu1 %1778  ;;  %v1782_v19 = vpop.xlane.xlu0 %1781 }
 0x2b1   :  { %v7883_v2 = vpop.eup %7882  ;;  %v1887_v18 = vmax.f32 %v1779_v10, 1e-24  ;;  %7379 = vmatmul.mubr.msk.f32.gmra.mrb[64].mxu0 %vm104_vm0, %v2007_v33  ;;  %v1888_v15 = vmax.f32 %v1782_v19, 1e-24 }
 0x2b2   :  { %v7885_v6 = vpop.eup %7884  ;;  %7381 = vmatprep.mubr.msk.f32.mxu0 %vm104_vm0, %v2008_v27  ;;  %v2009_v44 = vmul.f32 %v7883_v2, %v9155_v32 }
 0x2b3   :  { %7894 = vrsqrt.f32 %v1887_v18  ;;  %v2010_v56 = vmul.f32 %v7885_v6, %v9169_v16 }
 0x2b4   :  { %7896 = vrsqrt.f32 %v1888_v15  ;;  %v1785_v11 = vpop.xlane.xlu1 %1784  ;;  %v1788_v60 = vpop.xlane.xlu0 %1787 }
 0x2b5   :  { %v7887_v31 = vpop.eup %7886  ;;  %v1889_v9 = vmax.f32 %v1785_v11, 1e-24  ;;  %7382 = vmatmul.mubr.msk.f32.gmra.mrb[66].mxu0 %vm104_vm0, %v2009_v44  ;;  %v1890_v29 = vmax.f32 %v1788_v60, 1e-24 }
 0x2b6   :  { %v7889_v14 = vpop.eup %7888  ;;  %7384 = vmatprep.mubr.msk.f32.mxu0 %vm104_vm0, %v2010_v56  ;;  %v2011_v33 = vmul.f32 %v7887_v31, %v9166_v4 }
 0x2b7   :  { %7898 = vrsqrt.f32 %v1889_v9  ;;  %v2012_v27 = vmul.f32 %v7889_v14, %v9183_v24 }
 0x2b8   :  { %7900 = vrsqrt.f32 %v1890_v29  ;;  %v1791_v10 = vpop.xlane.xlu1 %1790  ;;  %v1794_v19 = vpop.xlane.xlu0 %1793 }
 0x2b9   :  { %v7891_v2 = vpop.eup %7890  ;;  %v1891_v18 = vmax.f32 %v1791_v10, 1e-24  ;;  %7385 = vmatmul.mubr.msk.f32.gmra.mrb[68].mxu0 %vm104_vm0, %v2011_v33  ;;  %v1892_v15 = vmax.f32 %v1794_v19, 1e-24 }
 0x2ba   :  { %v7893_v6 = vpop.eup %7892  ;;  %7387 = vmatprep.mubr.msk.f32.mxu0 %vm104_vm0, %v2012_v27  ;;  %v2013_v44 = vmul.f32 %v7891_v2, %v9180_v52 }
 0x2bb   :  { %7902 = vrsqrt.f32 %v1891_v18  ;;  %v2014_v56 = vmul.f32 %v7893_v6, %v9194_v3 }
 0x2bc   :  { %7904 = vrsqrt.f32 %v1892_v15  ;;  %v1797_v11 = vpop.xlane.xlu1 %1796  ;;  %v1800_v60 = vpop.xlane.xlu0 %1799 }
 0x2bd   :  { %v7895_v31 = vpop.eup %7894  ;;  %v1893_v9 = vmax.f32 %v1797_v11, 1e-24  ;;  %7388 = vmatmul.mubr.msk.f32.gmra.mrb[70].mxu0 %vm104_vm0, %v2013_v44  ;;  %v1894_v29 = vmax.f32 %v1800_v60, 1e-24 }
 0x2be   :  { %v7897_v14 = vpop.eup %7896  ;;  %7390 = vmatprep.mubr.msk.f32.mxu0 %vm104_vm0, %v2014_v56  ;;  %v2015_v33 = vmul.f32 %v7895_v31, %v9191_v0 }
 0x2bf   :  { %7906 = vrsqrt.f32 %v1893_v9  ;;  %v2016_v27 = vmul.f32 %v7897_v14, %v9205_v63 }
 0x2c0   :  { %7908 = vrsqrt.f32 %v1894_v29  ;;  %v1803_v10 = vpop.xlane.xlu1 %1802  ;;  %v1806_v19 = vpop.xlane.xlu0 %1805 }
 0x2c1   :  { %v7899_v2 = vpop.eup %7898  ;;  %v1895_v18 = vmax.f32 %v1803_v10, 1e-24  ;;  %7391 = vmatmul.mubr.msk.f32.gmra.mrb[72].mxu0 %vm104_vm0, %v2015_v33  ;;  %v1896_v15 = vmax.f32 %v1806_v19, 1e-24 }
 0x2c2   :  { %v7901_v6 = vpop.eup %7900  ;;  %7393 = vmatprep.mubr.msk.f32.mxu0 %vm104_vm0, %v2016_v27  ;;  %v2017_v44 = vmul.f32 %v7899_v2, %v9202_v47 }
 0x2c3   :  { %7910 = vrsqrt.f32 %v1895_v18  ;;  %v2018_v56 = vmul.f32 %v7901_v6, %v9219_v30 }
 0x2c4   :  { %7912 = vrsqrt.f32 %v1896_v15  ;;  %v1809_v11 = vpop.xlane.xlu1 %1808  ;;  %v1812_v60 = vpop.xlane.xlu0 %1811 }
 0x2c5   :  { %v7903_v31 = vpop.eup %7902  ;;  %v1897_v9 = vmax.f32 %v1809_v11, 1e-24  ;;  %7394 = vmatmul.mubr.msk.f32.gmra.mrb[74].mxu0 %vm104_vm0, %v2017_v44  ;;  %v1898_v29 = vmax.f32 %v1812_v60, 1e-24  ;;  %v13624_v44 = vld [vmem:[#allocation2_spill] sm:$0xff] }
 0x2c6   :  { %v7905_v14 = vpop.eup %7904  ;;  %7396 = vmatprep.mubr.msk.f32.mxu0 %vm104_vm0, %v2018_v56  ;;  %v2019_v33 = vmul.f32 %v7903_v31, %v9216_v54  ;;  %v13625_v56 = vld [vmem:[#allocation5_spill] sm:$0xff] }
 0x2c7   :  { %7914 = vrsqrt.f32 %v1897_v9  ;;  %v2020_v27 = vmul.f32 %v7905_v14, %v9230_v39 }
 0x2c8   :  { %7916 = vrsqrt.f32 %v1898_v29  ;;  %v1815_v10 = vpop.xlane.xlu1 %1814  ;;  %v1818_v19 = vpop.xlane.xlu0 %1817 }
 0x2c9   :  { %v7907_v2 = vpop.eup %7906  ;;  %v1899_v18 = vmax.f32 %v1815_v10, 1e-24  ;;  %7397 = vmatmul.mubr.msk.f32.gmra.mrb[76].mxu0 %vm104_vm0, %v2019_v33  ;;  %v1900_v15 = vmax.f32 %v1818_v19, 1e-24  ;;  %v13626_v33 = vld [vmem:[#allocation4_spill] sm:$0xff] }
 0x2ca   :  { %v7909_v6 = vpop.eup %7908  ;;  %7399 = vmatprep.mubr.msk.f32.mxu0 %vm104_vm0, %v2020_v27  ;;  %v2021_v11 = vmul.f32 %v7907_v2, %v13624_v44  ;;  %v13627_v27 = vld [vmem:[#allocation7_spill] sm:$0xff] }
 0x2cb   :  { %7918 = vrsqrt.f32 %v1899_v18  ;;  %v2022_v60 = vmul.f32 %v7909_v6, %v13625_v56 }
 0x2cc   :  { %7920 = vrsqrt.f32 %v1900_v15  ;;  %v1821_v31 = vpop.xlane.xlu1 %1820  ;;  %v1824_v9 = vpop.xlane.xlu0 %1823 }
 0x2cd   :  { %v7911_v14 = vpop.eup %7910  ;;  %v1901_v29 = vmax.f32 %v1821_v31, 1e-24  ;;  %7400 = vmatmul.mubr.msk.f32.gmra.mrb[78].mxu0 %vm104_vm0, %v2021_v11  ;;  %v1902_v41 = vmax.f32 %v1824_v9, 1e-24  ;;  %v13628_v11 = vld [vmem:[#allocation6_spill] sm:$0xff] }
 0x2ce   :  { %v7913_v10 = vpop.eup %7912  ;;  %7402 = vmatprep.mubr.msk.f32.mxu0 %vm104_vm0, %v2022_v60  ;;  %v2023_v19 = vmul.f32 %v7911_v14, %v13626_v33  ;;  %v13629_v60 = vld [vmem:[#allocation9_spill] sm:$0xff] }
 0x2cf   :  { %7922 = vrsqrt.f32 %v1901_v29  ;;  %v2024_v39 = vmul.f32 %v7913_v10, %v13627_v27 }
 0x2d0   :  { %7924 = vrsqrt.f32 %v1902_v41  ;;  %v1827_v2 = vpop.xlane.xlu1 %1826  ;;  %v1830_v18 = vpop.xlane.xlu0 %1829 }
 0x2d1   :  { %v7915_v6 = vpop.eup %7914  ;;  %v1903_v15 = vmax.f32 %v1827_v2, 1e-24  ;;  %7403 = vmatmul.mubr.msk.f32.gmra.mrb[80].mxu0 %vm104_vm0, %v2023_v19  ;;  %v1904_v56 = vmax.f32 %v1830_v18, 1e-24  ;;  %v13630_v19 = vld [vmem:[#allocation8_spill] sm:$0xff] }
 0x2d2   :  { %v7917_v31 = vpop.eup %7916  ;;  %7405 = vmatprep.mubr.msk.f32.mxu0 %vm104_vm0, %v2024_v39  ;;  %v2025_v9 = vmul.f32 %v7915_v6, %v13628_v11  ;;  %v13631_v39 = vld [vmem:[#allocation11_spill] sm:$0xff] }
 0x2d3   :  { %7926 = vrsqrt.f32 %v1903_v15  ;;  %v2026_v44 = vmul.f32 %v7917_v31, %v13629_v60 }
 0x2d4   :  { %7928 = vrsqrt.f32 %v1904_v56  ;;  %v1833_v14 = vpop.xlane.xlu1 %1832  ;;  %v1836_v29 = vpop.xlane.xlu0 %1835 }
 0x2d5   :  { %v7919_v10 = vpop.eup %7918  ;;  %v1905_v41 = vmax.f32 %v1833_v14, 1e-24  ;;  %7406 = vmatmul.mubr.msk.f32.gmra.mrb[82].mxu0 %vm104_vm0, %v2025_v9  ;;  %v1906_v27 = vmax.f32 %v1836_v29, 1e-24  ;;  %v13632_v9 = vld [vmem:[#allocation10_spill] sm:$0xff] }
 0x2d6   :  { %v7921_v2 = vpop.eup %7920  ;;  %7408 = vmatprep.mubr.msk.f32.mxu0 %vm104_vm0, %v2026_v44  ;;  %v2027_v18 = vmul.f32 %v7919_v10, %v13630_v19  ;;  %v13633_v44 = vld [vmem:[#allocation13_spill] sm:$0xff] }
 0x2d7   :  { %7930 = vrsqrt.f32 %v1905_v41  ;;  %v2028_v33 = vmul.f32 %v7921_v2, %v13631_v39 }
 0x2d8   :  { %7932 = vrsqrt.f32 %v1906_v27  ;;  %v1839_v6 = vpop.xlane.xlu1 %1838  ;;  %v1842_v15 = vpop.xlane.xlu0 %1841 }
 0x2d9   :  { %v7923_v31 = vpop.eup %7922  ;;  %v1907_v56 = vmax.f32 %v1839_v6, 1e-24  ;;  %7409 = vmatmul.mubr.msk.f32.gmra.mrb[84].mxu0 %vm104_vm0, %v2027_v18  ;;  %v1908_v60 = vmax.f32 %v1842_v15, 1e-24  ;;  %v13634_v6 = vld [vmem:[#allocation12_spill] sm:$0xff]  ;;  %v13635_v15 = vld [vmem:[#allocation15_spill] sm:$0xff] }
 0x2da   :  { %v7925_v14 = vpop.eup %7924  ;;  %7411 = vmatprep.mubr.msk.f32.mxu0 %vm104_vm0, %v2028_v33  ;;  %v2029_v29 = vmul.f32 %v7923_v31, %v13632_v9 }
 0x2db   :  { %7934 = vrsqrt.f32 %v1907_v56  ;;  %v2030_v11 = vmul.f32 %v7925_v14, %v13633_v44  ;;  %v13637_v14 = vld [vmem:[#allocation17_spill] sm:$0xff] }
 0x2dc   :  { %7936 = vrsqrt.f32 %v1908_v60  ;;  %v1845_v10 = vpop.xlane.xlu1 %1844  ;;  %v13636_v60 = vld [vmem:[#allocation14_spill] sm:$0xff] }
 0x2dd   :  { %v7927_v41 = vpop.eup %7926  ;;  %v1909_v2 = vmax.f32 %v1845_v10, 1e-24  ;;  %7412 = vmatmul.mubr.msk.f32.gmra.mrb[86].mxu0 %vm104_vm0, %v2029_v29 }
 0x2de   :  { %v7929_v27 = vpop.eup %7928  ;;  %7414 = vmatprep.mubr.msk.f32.mxu0 %vm104_vm0, %v2030_v11  ;;  %v2031_v18 = vmul.f32 %v7927_v41, %v13634_v6  ;;  %v13638_v11 = vld [vmem:[#allocation16_spill] sm:$0xff] }
 0x2df   :  { %7938 = vrsqrt.f32 %v1909_v2  ;;  %v2032_v39 = vmul.f32 %v7929_v27, %v13635_v15  ;;  %v13639_v2 = vld [vmem:[#allocation19_spill] sm:$0xff] }
 0x2e1   :  { %v7931_v33 = vpop.eup %7930  ;;  %7415 = vmatmul.mubr.msk.f32.gmra.mrb[88].mxu0 %vm104_vm0, %v2031_v18 }
 0x2e2   :  { %v7933_v31 = vpop.eup %7932  ;;  %7417 = vmatprep.mubr.msk.f32.mxu0 %vm104_vm0, %v2032_v39  ;;  %v2033_v56 = vmul.f32 %v7931_v33, %v13636_v60  ;;  %v13640_v39 = vld [vmem:[#allocation18_spill] sm:$0xff] }
 0x2e3   :  { %v2034_v10 = vmul.f32 %v7933_v31, %v13637_v14 }
 0x2e5   :  { %v7935_v44 = vpop.eup %7934  ;;  %7418 = vmatmul.mubr.msk.f32.gmra.mrb[90].mxu0 %vm104_vm0, %v2033_v56 }
 0x2e6   :  { %v7937_v29 = vpop.eup %7936  ;;  %7420 = vmatprep.mubr.msk.f32.mxu0 %vm104_vm0, %v2034_v10  ;;  %v2035_v41 = vmul.f32 %v7935_v44, %v13638_v11 }
 0x2e7   :  { %v2036_v27 = vmul.f32 %v7937_v29, %v13639_v2 }
 0x2e9   :  { %v7939_v15 = vpop.eup %7938  ;;  %7421 = vmatmul.mubr.msk.f32.gmra.mrb[92].mxu0 %vm104_vm0, %v2035_v41 }
 0x2ea   :  { %7423 = vmatprep.mubr.msk.f32.mxu0 %vm104_vm0, %v2036_v27  ;;  %v2037_v18 = vmul.f32 %v7939_v15, %v13640_v39 }
 0x2ed   :  { %7424 = vmatmul.mubr.msk.f32.gmra.mrb[94].mxu0 %vm104_vm0, %v2037_v18 }
 0x2ee   :  { %7538 = vmatprep.mubr.msk.f32.mxu0 %vm104_vm0, %v8948_v57 }
 0x2f1   :  { %7539 = vmatmul.mubr.msk.f32.vlgmr.msra.gmra.mrb[96].mxu0 %vm104_vm0, %v8945_v42 }
 0x2f2   :  { %7541 = vmatprep.mubr.msk.f32.mxu0 %vm104_vm0, %v8964_v37 }
 0x2f5   :  { %7542 = vmatmul.mubr.msk.f32.gmra.mrb[98].mxu0 %vm104_vm0, %v8961_v59 }
 0x2f6   :  { %7544 = vmatprep.mubr.msk.f32.mxu0 %vm104_vm0, %v8978_v7 }
 0x2f9   :  { %7545 = vmatmul.mubr.msk.f32.gmra.mrb[100].mxu0 %vm104_vm0, %v8975_v46 }
 0x2fa   :  { %7547 = vmatprep.mubr.msk.f32.mxu0 %vm104_vm0, %v8989_v17  ;;  %v13641_v17 = vld [vmem:[#allocation3_spill] sm:$0xff] }
 0x2fd   :  { %7548 = vmatmul.mubr.msk.f32.gmra.mrb[102].mxu0 %vm104_vm0, %v8986_v26 }
 0x2fe   :  { %7550 = vmatprep.mubr.msk.f32.mxu0 %vm104_vm0, %v9003_v13 }
 0x301   :  { %7551 = vmatmul.mubr.msk.f32.gmra.mrb[104].mxu0 %vm104_vm0, %v9000_v25 }
 0x302   :  { %7553 = vmatprep.mubr.msk.f32.mxu0 %vm104_vm0, %v9014_v38  ;;  %v13642_v38 = vld [vmem:[#allocation2_spill] sm:$0xff] }
 0x305   :  { %7554 = vmatmul.mubr.msk.f32.gmra.mrb[106].mxu0 %vm104_vm0, %v9011_v5 }
 0x306   :  { %7556 = vmatprep.mubr.msk.f32.mxu0 %vm104_vm0, %v9025_v45  ;;  %v13643_v45 = vld [vmem:[#allocation5_spill] sm:$0xff] }
 0x309   :  { %7557 = vmatmul.mubr.msk.f32.gmra.mrb[108].mxu0 %vm104_vm0, %v9022_v28 }
 0x30a   :  { %7559 = vmatprep.mubr.msk.f32.mxu0 %vm104_vm0, %v9039_v35 }
 0x30d   :  { %7560 = vmatmul.mubr.msk.f32.gmra.mrb[110].mxu0 %vm104_vm0, %v9036_v48 }
 0x30e   :  { %7562 = vmatprep.mubr.msk.f32.mxu0 %vm104_vm0, %v9050_v62  ;;  %v13644_v62 = vld [vmem:[#allocation4_spill] sm:$0xff] }
 0x311   :  { %7563 = vmatmul.mubr.msk.f32.gmra.mrb[112].mxu0 %vm104_vm0, %v9047_v23 }
 0x312   :  { %7565 = vmatprep.mubr.msk.f32.mxu0 %vm104_vm0, %v9061_v36  ;;  %v13645_v36 = vld [vmem:[#allocation7_spill] sm:$0xff] }
 0x315   :  { %7566 = vmatmul.mubr.msk.f32.gmra.mrb[114].mxu0 %vm104_vm0, %v9058_v12 }
 0x316   :  { %7568 = vmatprep.mubr.msk.f32.mxu0 %vm104_vm0, %v9075_v51 }
 0x319   :  { %7569 = vmatmul.mubr.msk.f32.gmra.mrb[116].mxu0 %vm104_vm0, %v9072_v20 }
 0x31a   :  { %7571 = vmatprep.mubr.msk.f32.mxu0 %vm104_vm0, %v9086_v61  ;;  %v13646_v61 = vld [vmem:[#allocation6_spill] sm:$0xff] }
 0x31d   :  { %7572 = vmatmul.mubr.msk.f32.gmra.mrb[118].mxu0 %vm104_vm0, %v9083_v34 }
 0x31e   :  { %7574 = vmatprep.mubr.msk.f32.mxu0 %vm104_vm0, %v9097_v53  ;;  %v13647_v53 = vld [vmem:[#allocation9_spill] sm:$0xff] }
 0x321   :  { %7575 = vmatmul.mubr.msk.f32.gmra.mrb[120].mxu0 %vm104_vm0, %v9094_v58 }
 0x322   :  { %7577 = vmatprep.mubr.msk.f32.mxu0 %vm104_vm0, %v9111_v50 }
 0x325   :  { %7578 = vmatmul.mubr.msk.f32.gmra.mrb[122].mxu0 %vm104_vm0, %v9108_v22 }
 0x326   :  { %7580 = vmatprep.mubr.msk.f32.mxu0 %vm104_vm0, %v9122_v55 }
 0x329   :  { %7581 = vmatmul.mubr.msk.f32.gmra.mrb[124].mxu0 %vm104_vm0, %v9119_v21 }
 0x32a   :  { %7583 = vmatprep.mubr.msk.f32.mxu0 %vm104_vm0, %v9133_v40 }
 0x32d   :  { %7584 = vmatmul.mubr.msk.f32.gmra.mrb[126].mxu0 %vm104_vm0, %v9130_v43  ;;  %v13648_v43 = vld [vmem:[#allocation11_spill] sm:$0xff] }
 0x32e   :  { %7586 = vmatprep.mubr.msk.f32.mxu0 %vm104_vm0, %v9147_v8 }
 0x331   :  { %7587 = vmatmul.mubr.msk.f32.gmra.mrb[128].mxu0 %vm104_vm0, %v9144_v49 }
 0x332   :  { %7589 = vmatprep.mubr.msk.f32.mxu0 %vm104_vm0, %v9158_v1  ;;  %v13649_v1 = vld [vmem:[#allocation13_spill] sm:$0xff] }
 0x335   :  { %7590 = vmatmul.mubr.msk.f32.gmra.mrb[130].mxu0 %vm104_vm0, %v9155_v32 }
 0x336   :  { %7592 = vmatprep.mubr.msk.f32.mxu0 %vm104_vm0, %v9169_v16 }
 0x339   :  { %7593 = vmatmul.mubr.msk.f32.gmra.mrb[132].mxu0 %vm104_vm0, %v9166_v4 }
 0x33a   :  { %7595 = vmatprep.mubr.msk.f32.mxu0 %vm104_vm0, %v9183_v24 }
 0x33d   :  { %7596 = vmatmul.mubr.msk.f32.gmra.mrb[134].mxu0 %vm104_vm0, %v9180_v52 }
 0x33e   :  { %7598 = vmatprep.mubr.msk.f32.mxu0 %vm104_vm0, %v9194_v3 }
 0x341   :  { %7599 = vmatmul.mubr.msk.f32.gmra.mrb[136].mxu0 %vm104_vm0, %v9191_v0  ;;  %v13650_v0 = vld [vmem:[#allocation15_spill] sm:$0xff] }
 0x342   :  { %7601 = vmatprep.mubr.msk.f32.mxu0 %vm104_vm0, %v9205_v63 }
 0x344   :  { %v9574_v42 = vpop.f32.mrb[32].mxu0 }
 0x345   :  { %v9576_v57 = vpop.f32.mrb[33].mxu0  ;;  %7602 = vmatmul.mubr.msk.f32.gmra.mrb[138].mxu0 %vm104_vm0, %v9202_v47  ;;  %v2634_v59 = vsel %vm104_vm0, %v9574_v42, -inf }
 0x346   :  { %2635 = vmax.xlane.f32.xlu1 %v2634_v59  ;;  %7604 = vmatprep.mubr.msk.f32.mxu0 %vm104_vm0, %v9219_v30  ;;  %v2631_v37 = vsel %vm104_vm0, %v9576_v57, -inf }
 0x347   :  { %2632 = vmax.xlane.f32.xlu0 %v2631_v37 }
 0x348   :  { %v9586_v46 = vpop.f32.mrb[34].mxu0 }
 0x349   :  { %v9588_v7 = vpop.f32.mrb[35].mxu0  ;;  %7605 = vmatmul.mubr.msk.f32.gmra.mrb[140].mxu0 %vm104_vm0, %v9216_v54  ;;  %v2640_v26 = vsel %vm104_vm0, %v9586_v46, -inf }
 0x34a   :  { %2641 = vmax.xlane.f32.xlu1 %v2640_v26  ;;  %7607 = vmatprep.mubr.msk.f32.mxu0 %vm104_vm0, %v13641_v17  ;;  %v2637_v25 = vsel %vm104_vm0, %v9588_v7, -inf }
 0x34b   :  { %2638 = vmax.xlane.f32.xlu0 %v2637_v25 }
 0x34c   :  { %v9598_v13 = vpop.f32.mrb[36].mxu0 }
 0x34d   :  { %v9600_v5 = vpop.f32.mrb[37].mxu0  ;;  %7608 = vmatmul.mubr.msk.f32.gmra.mrb[142].mxu0 %vm104_vm0, %v13642_v38  ;;  %v2646_v28 = vsel %vm104_vm0, %v9598_v13, -inf }
 0x34e   :  { %2647 = vmax.xlane.f32.xlu1 %v2646_v28  ;;  %7610 = vmatprep.mubr.msk.f32.mxu0 %vm104_vm0, %v13643_v45  ;;  %v2643_v48 = vsel %vm104_vm0, %v9600_v5, -inf }
 0x34f   :  { %2644 = vmax.xlane.f32.xlu0 %v2643_v48 }
 0x350   :  { %v9610_v35 = vpop.f32.mrb[38].mxu0 }
 0x351   :  { %v9612_v23 = vpop.f32.mrb[39].mxu0  ;;  %7611 = vmatmul.mubr.msk.f32.gmra.mrb[144].mxu0 %vm104_vm0, %v13644_v62  ;;  %v2652_v12 = vsel %vm104_vm0, %v9610_v35, -inf }
 0x352   :  { %2653 = vmax.xlane.f32.xlu1 %v2652_v12  ;;  %7613 = vmatprep.mubr.msk.f32.mxu0 %vm104_vm0, %v13645_v36  ;;  %v2649_v20 = vsel %vm104_vm0, %v9612_v23, -inf }
 0x353   :  { %2650 = vmax.xlane.f32.xlu0 %v2649_v20 }
 0x354   :  { %v9622_v51 = vpop.f32.mrb[40].mxu0 }
 0x355   :  { %v9624_v34 = vpop.f32.mrb[41].mxu0  ;;  %7614 = vmatmul.mubr.msk.f32.gmra.mrb[146].mxu0 %vm104_vm0, %v13646_v61  ;;  %v2658_v58 = vsel %vm104_vm0, %v9622_v51, -inf }
 0x356   :  { %2659 = vmax.xlane.f32.xlu1 %v2658_v58  ;;  %7616 = vmatprep.mubr.msk.f32.mxu0 %vm104_vm0, %v13647_v53  ;;  %v2655_v22 = vsel %vm104_vm0, %v9624_v34, -inf }
 0x357   :  { %2656 = vmax.xlane.f32.xlu0 %v2655_v22 }
 0x358   :  { %v9634_v50 = vpop.f32.mrb[42].mxu0 }
 0x359   :  { %v9636_v21 = vpop.f32.mrb[43].mxu0  ;;  %7617 = vmatmul.mubr.msk.f32.gmra.mrb[148].mxu0 %vm104_vm0, %v13630_v19  ;;  %v2664_v55 = vsel %vm104_vm0, %v9634_v50, -inf }
 0x35a   :  { %2665 = vmax.xlane.f32.xlu1 %v2664_v55  ;;  %7619 = vmatprep.mubr.msk.f32.mxu0 %vm104_vm0, %v13648_v43  ;;  %v2661_v40 = vsel %vm104_vm0, %v9636_v21, -inf }
 0x35b   :  { %2662 = vmax.xlane.f32.xlu0 %v2661_v40 }
 0x35c   :  { %v9646_v49 = vpop.f32.mrb[44].mxu0 }
 0x35d   :  { %v9648_v8 = vpop.f32.mrb[45].mxu0  ;;  %7620 = vmatmul.mubr.msk.f32.gmra.mrb[150].mxu0 %vm104_vm0, %v13632_v9  ;;  %v2670_v32 = vsel %vm104_vm0, %v9646_v49, -inf }
 0x35e   :  { %2671 = vmax.xlane.f32.xlu1 %v2670_v32  ;;  %7622 = vmatprep.mubr.msk.f32.mxu0 %vm104_vm0, %v13649_v1  ;;  %v2667_v4 = vsel %vm104_vm0, %v9648_v8, -inf }
 0x35f   :  { %2668 = vmax.xlane.f32.xlu0 %v2667_v4 }
 0x360   :  { %v9658_v16 = vpop.f32.mrb[46].mxu0 }
 0x361   :  { %v9660_v52 = vpop.f32.mrb[47].mxu0  ;;  %7623 = vmatmul.mubr.msk.f32.gmra.mrb[152].mxu0 %vm104_vm0, %v13634_v6  ;;  %v2676_v24 = vsel %vm104_vm0, %v9658_v16, -inf }
 0x362   :  { %2677 = vmax.xlane.f32.xlu1 %v2676_v24  ;;  %7625 = vmatprep.mubr.msk.f32.mxu0 %vm104_vm0, %v13650_v0  ;;  %v2673_v3 = vsel %vm104_vm0, %v9660_v52, -inf }
 0x363   :  { %2674 = vmax.xlane.f32.xlu0 %v2673_v3 }
 0x364   :  { %v9670_v47 = vpop.f32.mrb[48].mxu0 }
 0x365   :  { %v9672_v63 = vpop.f32.mrb[49].mxu0  ;;  %7626 = vmatmul.mubr.msk.f32.gmra.mrb[154].mxu0 %vm104_vm0, %v13636_v60  ;;  %v2682_v54 = vsel %vm104_vm0, %v9670_v47, -inf }
 0x366   :  { %2683 = vmax.xlane.f32.xlu1 %v2682_v54  ;;  %7628 = vmatprep.mubr.msk.f32.mxu0 %vm104_vm0, %v13637_v14  ;;  %v2679_v30 = vsel %vm104_vm0, %v9672_v63, -inf }
 0x367   :  { %2680 = vmax.xlane.f32.xlu0 %v2679_v30 }
 0x368   :  { %v9682_v19 = vpop.f32.mrb[50].mxu0 }
 0x369   :  { %v9684_v9 = vpop.f32.mrb[51].mxu0  ;;  %7629 = vmatmul.mubr.msk.f32.gmra.mrb[156].mxu0 %vm104_vm0, %v13638_v11  ;;  %v2688_v44 = vsel %vm104_vm0, %v9682_v19, -inf }
 0x36a   :  { %2689 = vmax.xlane.f32.xlu1 %v2688_v44  ;;  %7631 = vmatprep.mubr.msk.f32.mxu0 %vm104_vm0, %v13639_v2  ;;  %v2685_v6 = vsel %vm104_vm0, %v9684_v9, -inf }
 0x36b   :  { %2686 = vmax.xlane.f32.xlu0 %v2685_v6 }
 0x36c   :  { %v9694_v15 = vpop.f32.mrb[52].mxu0 }
 0x36d   :  { %v9696_v33 = vpop.f32.mrb[53].mxu0  ;;  %7632 = vmatmul.mubr.msk.f32.gmra.mrb[158].mxu0 %vm104_vm0, %v13640_v39  ;;  %v2694_v31 = vsel %vm104_vm0, %v9694_v15, -inf }
 0x36e   :  { %2695 = vmax.xlane.f32.xlu1 %v2694_v31  ;;  %v2691_v60 = vsel %vm104_vm0, %v9696_v33, -inf }
 0x36f   :  { %2692 = vmax.xlane.f32.xlu0 %v2691_v60 }
 0x370   :  { %v9704_v56 = vpop.f32.mrb[54].mxu0 }
 0x371   :  { %v9706_v14 = vpop.f32.mrb[55].mxu0  ;;  %v2700_v10 = vsel %vm104_vm0, %v9704_v56, -inf }
 0x372   :  { %2701 = vmax.xlane.f32.xlu1 %v2700_v10  ;;  %v2697_v29 = vsel %vm104_vm0, %v9706_v14, -inf }
 0x373   :  { %2698 = vmax.xlane.f32.xlu0 %v2697_v29 }
 0x374   :  { %v9712_v11 = vpop.f32.mrb[56].mxu0 }
 0x375   :  { %v9714_v41 = vpop.f32.mrb[57].mxu0  ;;  %v2706_v2 = vsel %vm104_vm0, %v9712_v11, -inf }
 0x376   :  { %2707 = vmax.xlane.f32.xlu1 %v2706_v2  ;;  %v2703_v27 = vsel %vm104_vm0, %v9714_v41, -inf }
 0x377   :  { %2704 = vmax.xlane.f32.xlu0 %v2703_v27 }
 0x378   :  { %v9720_v39 = vpop.f32.mrb[58].mxu0 }
 0x379   :  { %v9722_v18 = vpop.f32.mrb[59].mxu0  ;;  %v2712_v59 = vsel %vm104_vm0, %v9720_v39, -inf }
 0x37a   :  { %2713 = vmax.xlane.f32.xlu1 %v2712_v59  ;;  %v2709_v37 = vsel %vm104_vm0, %v9722_v18, -inf }
 0x37b   :  { %2710 = vmax.xlane.f32.xlu0 %v2709_v37 }
 0x37c   :  { %v9728_v26 = vpop.f32.mrb[60].mxu0 }
 0x37d   :  { %v9730_v17 = vpop.f32.mrb[61].mxu0  ;;  %v2718_v25 = vsel %vm104_vm0, %v9728_v26, -inf }
 0x37e   :  { %2719 = vmax.xlane.f32.xlu1 %v2718_v25  ;;  %v2715_v38 = vsel %vm104_vm0, %v9730_v17, -inf }
 0x37f   :  { %2716 = vmax.xlane.f32.xlu0 %v2715_v38 }
 0x380   :  { %v9736_v28 = vpop.f32.mrb[62].mxu0 }
 0x381   :  { %v9738_v45 = vpop.f32.mrb[63].mxu0  ;;  %v2724_v48 = vsel %vm104_vm0, %v9736_v28, -inf }
 0x382   :  { %2725 = vmax.xlane.f32.xlu1 %v2724_v48  ;;  %v2721_v62 = vsel %vm104_vm0, %v9738_v45, -inf }
 0x383   :  { %2722 = vmax.xlane.f32.xlu0 %v2721_v62 }
 0x384   :  { %v9744_v12 = vpop.f32.mrb[64].mxu0 }
 0x385   :  { %v9746_v36 = vpop.f32.mrb[65].mxu0  ;;  %v2730_v20 = vsel %vm104_vm0, %v9744_v12, -inf }
 0x386   :  { %2731 = vmax.xlane.f32.xlu1 %v2730_v20  ;;  %v2727_v61 = vsel %vm104_vm0, %v9746_v36, -inf }
 0x387   :  { %2728 = vmax.xlane.f32.xlu0 %v2727_v61 }
 0x388   :  { %v9752_v58 = vpop.f32.mrb[66].mxu0 }
 0x389   :  { %v9754_v53 = vpop.f32.mrb[67].mxu0  ;;  %v2736_v22 = vsel %vm104_vm0, %v9752_v58, -inf }
 0x38a   :  { %2737 = vmax.xlane.f32.xlu1 %v2736_v22  ;;  %v2733_v55 = vsel %vm104_vm0, %v9754_v53, -inf }
 0x38b   :  { %2734 = vmax.xlane.f32.xlu0 %v2733_v55 }
 0x38c   :  { %v9760_v43 = vpop.f32.mrb[68].mxu0 }
 0x38d   :  { %v9762_v40 = vpop.f32.mrb[69].mxu0  ;;  %v2742_v32 = vsel %vm104_vm0, %v9760_v43, -inf }
 0x38e   :  { %2743 = vmax.xlane.f32.xlu1 %v2742_v32  ;;  %v2739_v1 = vsel %vm104_vm0, %v9762_v40, -inf }
 0x38f   :  { %2740 = vmax.xlane.f32.xlu0 %v2739_v1 }
 0x390   :  { %v9768_v4 = vpop.f32.mrb[70].mxu0 }
 0x391   :  { %v9770_v24 = vpop.f32.mrb[71].mxu0  ;;  %v2748_v0 = vsel %vm104_vm0, %v9768_v4, -inf }
 0x392   :  { %13651 = vst [vmem:[#allocation8_spill] sm:$0xff] %v9770_v24  ;;  %2749 = vmax.xlane.f32.xlu1 %v2748_v0  ;;  %v2745_v3 = vsel %vm104_vm0, %v9770_v24, -inf }
 0x393   :  { %2746 = vmax.xlane.f32.xlu0 %v2745_v3 }
 0x394   :  { %v9776_v54 = vpop.f32.mrb[72].mxu0 }
 0x395   :  { %v9778_v30 = vpop.f32.mrb[73].mxu0  ;;  %v2754_v44 = vsel %vm104_vm0, %v9776_v54, -inf }
 0x396   :  { %13652 = vst [vmem:[#allocation10_spill] sm:$0xff] %v9778_v30  ;;  %2755 = vmax.xlane.f32.xlu1 %v2754_v44  ;;  %v2751_v60 = vsel %vm104_vm0, %v9778_v30, -inf }
 0x398   :  { %v9782_v6 = vpop.f32.mrb[74].mxu0 }
 0x399   :  { %v9784_v31 = vpop.f32.mrb[75].mxu0  ;;  %v2760_v2 = vsel %vm104_vm0, %v9782_v6, -inf }
 0x39a   :  { %13653 = vst [vmem:[#allocation12_spill] sm:$0xff] %v9784_v31  ;;  %2752 = vmax.xlane.f32.xlu1 %v2751_v60  ;;  %v2757_v37 = vsel %vm104_vm0, %v9784_v31, -inf }
 0x39c   :  { %v9788_v10 = vpop.f32.mrb[76].mxu0 }
 0x39d   :  { %v9790_v29 = vpop.f32.mrb[77].mxu0  ;;  %v2766_v48 = vsel %vm104_vm0, %v9788_v10, -inf }
 0x39e   :  { %13654 = vst [vmem:[#allocation14_spill] sm:$0xff] %v9790_v29  ;;  %2761 = vmax.xlane.f32.xlu1 %v2760_v2  ;;  %v2763_v61 = vsel %vm104_vm0, %v9790_v29, -inf }
 0x3a0   :  { %v9794_v27 = vpop.f32.mrb[78].mxu0 }
 0x3a1   :  { %v9796_v59 = vpop.f32.mrb[79].mxu0  ;;  %v2772_v32 = vsel %vm104_vm0, %v9794_v27, -inf }
 0x3a2   :  { %13655 = vst [vmem:[#allocation17_spill] sm:$0xff] %v9796_v59  ;;  %2758 = vmax.xlane.f32.xlu1 %v2757_v37  ;;  %v2769_v3 = vsel %vm104_vm0, %v9796_v59, -inf }
 0x3a4   :  { %v9800_v25 = vpop.f32.mrb[80].mxu0 }
 0x3a5   :  { %13656 = vst [vmem:[#allocation16_spill] sm:$0xff] %v9800_v25  ;;  %v9802_v38 = vpop.f32.mrb[81].mxu0  ;;  %v2778_v2 = vsel %vm104_vm0, %v9800_v25, -inf }
 0x3a6   :  { %13657 = vst [vmem:[#allocation19_spill] sm:$0xff] %v9802_v38  ;;  %2767 = vmax.xlane.f32.xlu1 %v2766_v48 }
 0x3a8   :  { %v9806_v62 = vpop.f32.mrb[82].mxu0 }
 0x3a9   :  { %13658 = vst [vmem:[#allocation18_spill] sm:$0xff] %v9806_v62  ;;  %v9808_v20 = vpop.f32.mrb[83].mxu0 }
 0x3aa   :  { %13659 = vst [vmem:[#allocation3_spill] sm:$0xff] %v9808_v20  ;;  %2764 = vmax.xlane.f32.xlu1 %v2763_v61  ;;  %v2775_v61 = vsel %vm104_vm0, %v9802_v38, -inf }
 0x3ac   :  { %v9812_v22 = vpop.f32.mrb[84].mxu0 }
 0x3ad   :  { %v9814_v55 = vpop.f32.mrb[85].mxu0 }
 0x3ae   :  { %2773 = vmax.xlane.f32.xlu1 %v2772_v32 }
 0x3b0   :  { %v9818_v1 = vpop.f32.mrb[86].mxu0 }
 0x3b1   :  { %v9820_v0 = vpop.f32.mrb[87].mxu0 }
 0x3b2   :  { %2770 = vmax.xlane.f32.xlu1 %v2769_v3  ;;  %v2784_v3 = vsel %vm104_vm0, %v9806_v62, -inf }
 0x3b4   :  { %v9824_v44 = vpop.f32.mrb[88].mxu0 }
 0x3b5   :  { %v9826_v60 = vpop.f32.mrb[89].mxu0 }
 0x3b6   :  { %2779 = vmax.xlane.f32.xlu1 %v2778_v2  ;;  %v2781_v2 = vsel %vm104_vm0, %v9808_v20, -inf }
 0x3b8   :  { %v9830_v37 = vpop.f32.mrb[90].mxu0 }
 0x3b9   :  { %v9832_v48 = vpop.f32.mrb[91].mxu0 }
 0x3ba   :  { %2776 = vmax.xlane.f32.xlu1 %v2775_v61  ;;  %v2790_v61 = vsel %vm104_vm0, %v9812_v22, -inf }
 0x3bc   :  { %v9836_v32 = vpop.f32.mrb[92].mxu0 }
 0x3bd   :  { %v9838_v59 = vpop.f32.mrb[93].mxu0 }
 0x3be   :  { %2785 = vmax.xlane.f32.xlu1 %v2784_v3  ;;  %v2787_v3 = vsel %vm104_vm0, %v9814_v55, -inf }
 0x3c0   :  { %v9842_v29 = vpop.f32.mrb[94].mxu0 }
 0x3c1   :  { %v9844_v31 = vpop.f32.mrb[95].mxu0 }
 0x3c2   :  { %2782 = vmax.xlane.f32.xlu1 %v2781_v2  ;;  %v2796_v2 = vsel %vm104_vm0, %v9818_v1, -inf }
 0x3c4   :  { %v9848_v30 = vpop.f32.mrb[96].mxu0 }
 0x3c5   :  { %13660 = vst [vmem:[#allocation2_spill] sm:$0xff] %v9848_v30  ;;  %v9850_v38 = vpop.f32.mrb[97].mxu0 }
 0x3c6   :  { %13661 = vst [vmem:[#allocation5_spill] sm:$0xff] %v9850_v38  ;;  %2791 = vmax.xlane.f32.xlu1 %v2790_v61  ;;  %v2793_v61 = vsel %vm104_vm0, %v9820_v0, -inf }
 0x3c8   :  { %v9854_v24 = vpop.f32.mrb[98].mxu0 }
 0x3c9   :  { %13662 = vst [vmem:[#allocation4_spill] sm:$0xff] %v9854_v24  ;;  %v9856_v62 = vpop.f32.mrb[99].mxu0 }
 0x3ca   :  { %13663 = vst [vmem:[#allocation7_spill] sm:$0xff] %v9856_v62  ;;  %2788 = vmax.xlane.f32.xlu1 %v2787_v3 }
 0x3cc   :  { %v9860_v25 = vpop.f32.mrb[100].mxu0 }
 0x3cd   :  { %13664 = vst [vmem:[#allocation6_spill] sm:$0xff] %v9860_v25  ;;  %v9862_v20 = vpop.f32.mrb[101].mxu0  ;;  %v13671_v25 = vld [vmem:[#allocation20_spill] sm:$0xff] }
 0x3ce   :  { %13665 = vst [vmem:[#allocation9_spill] sm:$0xff] %v9862_v20  ;;  %2797 = vmax.xlane.f32.xlu1 %v2796_v2 }
 0x3d0   :  { %v9866_v38 = vpop.f32.mrb[102].mxu0 }
 0x3d1   :  { %13666 = vst [vmem:[#allocation11_spill] sm:$0xff] %v9866_v38  ;;  %v9868_v30 = vpop.f32.mrb[103].mxu0 }
 0x3d2   :  { %13667 = vst [vmem:[#allocation13_spill] sm:$0xff] %v9868_v30  ;;  %2794 = vmax.xlane.f32.xlu1 %v2793_v61  ;;  %v2802_v30 = vsel %vm104_vm0, %v9824_v44, -inf }
 0x3d3   :  { %v9872_v62 = vpop.xlane.xlu1 %2635 }
 0x3d4   :  { %13668 = vst [vmem:[#allocation15_spill] sm:$0xff] %v9872_v62  ;;  %vm2826_vm8 = vcmp.eq.f32.partialorder %v9574_v42, %v9872_v62  ;;  %v9876_v3 = vpop.f32.mrb[104].mxu0  ;;  %v9878_v20 = vpop.xlane.xlu0 %2632 }
 0x3d5   :  { %13669 = vst [vmem:[#allocation21_spill] sm:$0xff] %v9876_v3  ;;  %13670 = vst [vmem:[#allocation22_spill] sm:$0xff] %v9878_v20  ;;  %v2890_v24 = vsel %vm2826_vm8, %v13671_v25, 32  ;;  %vm2825_vm9 = vcmp.eq.f32.partialorder %v9576_v57, %v9878_v20  ;;  %v9883_v2 = vpop.f32.mrb[105].mxu0 }
 0x3d6   :  { %13672 = vst [vmem:[#allocation20_spill] sm:$0xff] %v9883_v2  ;;  %v2889_v61 = vsel %vm2825_vm9, %v13671_v25, 32  ;;  %2803 = vmax.xlane.f32.xlu1 %v2802_v30  ;;  %v9889_v38 = vsel %vm104_vm0, %v2890_v24, 2147483647  ;;  %v2799_v30 = vsel %vm104_vm0, %v9826_v60, -inf }
 0x3d7   :  { %13673 = vst [vmem:[#allocation23_spill] sm:$0xff] %v9889_v38  ;;  %v9891_v42 = vpop.xlane.xlu1 %2641  ;;  %v2970_v3 = vshra.s32 %v9889_v38, 16  ;;  %v9895_v62 = vsel %vm104_vm0, %v2889_v61, 2147483647 }
 0x3d8   :  { %13674 = vst [vmem:[#allocation24_spill] sm:$0xff] %v9891_v42  ;;  %13675 = vst [vmem:[#allocation25_spill] sm:$0xff] %v9895_v62  ;;  %vm2828_vm10 = vcmp.eq.f32.partialorder %v9586_v46, %v9891_v42  ;;  %v9899_v57 = vpop.f32.mrb[106].mxu0  ;;  %v9901_v2 = vpop.xlane.xlu0 %2638  ;;  %v2955_v61 = vshra.s32 %v9895_v62, 16 }
 0x3d9   :  { %13676 = vst [vmem:[#allocation26_spill] sm:$0xff] %v9899_v57  ;;  %13677 = vst [vmem:[#allocation27_spill] sm:$0xff] %v9901_v2  ;;  %v2892_v24 = vsel %vm2828_vm10, %v13671_v25, 32  ;;  %vm2827_vm11 = vcmp.eq.f32.partialorder %v9588_v7, %v9901_v2  ;;  %v9908_v20 = vpop.f32.mrb[107].mxu0  ;;  %v9910_v38 = vcvt.s32.f32 %v2970_v3 }
 0x3da   :  { %13678 = vst [vmem:[#allocation28_spill] sm:$0xff] %v9908_v20  ;;  %2800 = vmax.xlane.f32.xlu1 %v2799_v30  ;;  %v9914_v46 = vsel %vm104_vm0, %v2892_v24, 2147483647  ;;  %v2891_v57 = vsel %vm2827_vm11, %v13671_v25, 32  ;;  %v2808_v30 = vsel %vm104_vm0, %v9830_v37, -inf  ;;  %v9930_v24 = vcvt.s32.f32 %v2955_v61 }
 0x3db   :  { %13679 = vst [vmem:[#allocation29_spill] sm:$0xff] %v9910_v38  ;;  %13680 = vst [vmem:[#allocation30_spill] sm:$0xff] %v9914_v46  ;;  %v9917_v42 = vpop.xlane.xlu1 %2647  ;;  %2973 = vmin.xlane.f32.xlu0 %v9910_v38  ;;  %v3000_v2 = vshra.s32 %v9914_v46, 16  ;;  %v9934_v62 = vsel %vm104_vm0, %v2891_v57, 2147483647  ;;  %v2805_v61 = vsel %vm104_vm0, %v9832_v48, -inf }
 0x3dc   :  { %13681 = vst [vmem:[#allocation31_spill] sm:$0xff] %v9917_v42  ;;  %vm2830_vm12 = vcmp.eq.f32.partialorder %v9598_v13, %v9917_v42  ;;  %v9922_v7 = vpop.f32.mrb[108].mxu0  ;;  %v9924_v20 = vpop.xlane.xlu0 %2644  ;;  %13685 = vst [vmem:[#allocation35_spill] sm:$0xff] %v9930_v24  ;;  %v2985_v57 = vshra.s32 %v9934_v62, 16 }
 0x3dd   :  { %13682 = vst [vmem:[#allocation32_spill] sm:$0xff] %v9922_v7  ;;  %13683 = vst [vmem:[#allocation33_spill] sm:$0xff] %v9924_v20  ;;  %v9926_v3 = vpop.f32.mrb[109].mxu0  ;;  %v2894_v38 = vsel %vm2830_vm12, %v13671_v25, 32  ;;  %vm2829_vm13 = vcmp.eq.f32.partialorder %v9600_v5, %v9924_v20 }
 0x3de   :  { %13684 = vst [vmem:[#allocation34_spill] sm:$0xff] %v9926_v3  ;;  %2809 = vmax.xlane.f32.xlu1 %v2808_v30  ;;  %13686 = vst [vmem:[#allocation36_spill] sm:$0xff] %v9934_v62  ;;  %v9948_v30 = vcvt.s32.f32 %v3000_v2  ;;  %v9952_v42 = vsel %vm104_vm0, %v2894_v38, 2147483647  ;;  %v9968_v38 = vcvt.s32.f32 %v2985_v57  ;;  %v2811_v57 = vsel %vm104_vm0, %v9838_v59, -inf }
 0x3df   :  { %v9937_v13 = vpop.xlane.xlu1 %2653  ;;  %2958 = vmin.xlane.f32.xlu0 %v9930_v24  ;;  %13690 = vst [vmem:[#allocation40_spill] sm:$0xff] %v9952_v42  ;;  %v2893_v24 = vsel %vm2829_vm13, %v13671_v25, 32 }
 0x3e0   :  { %13687 = vst [vmem:[#allocation37_spill] sm:$0xff] %v9937_v13  ;;  %v9942_v3 = vpop.f32.mrb[110].mxu0  ;;  %vm2832_vm14 = vcmp.eq.f32.partialorder %v9610_v35, %v9937_v13  ;;  %13695 = vst [vmem:[#allocation45_spill] sm:$0xff] %v9968_v38  ;;  %v9972_v20 = vsel %vm104_vm0, %v2893_v24, 2147483647 }
 0x3e1   :  { %13688 = vst [vmem:[#allocation38_spill] sm:$0xff] %v9942_v3  ;;  %v9944_v7 = vpop.f32.mrb[111].mxu0  ;;  %v3030_v3 = vshra.s32 %v9952_v42, 16  ;;  %13696 = vst [vmem:[#allocation46_spill] sm:$0xff] %v9972_v20  ;;  %v2896_v62 = vsel %vm2832_vm14, %v13671_v25, 32  ;;  %v3015_v24 = vshra.s32 %v9972_v20, 16 }
 0x3e2   :  { %13689 = vst [vmem:[#allocation39_spill] sm:$0xff] %v9944_v7  ;;  %2806 = vmax.xlane.f32.xlu1 %v2805_v61  ;;  %v9962_v7 = vpop.xlane.xlu0 %2650  ;;  %v2814_v61 = vsel %vm104_vm0, %v9836_v32, -inf  ;;  %v9990_v13 = vsel %vm104_vm0, %v2896_v62, 2147483647 }
 0x3e3   :  { %v9955_v46 = vpop.xlane.xlu1 %2659  ;;  %3003 = vmin.xlane.f32.xlu0 %v9948_v30  ;;  %13693 = vst [vmem:[#allocation43_spill] sm:$0xff] %v9962_v7  ;;  %vm2831_vm15 = vcmp.eq.f32.partialorder %v9612_v23, %v9962_v7  ;;  %13701 = vst [vmem:[#allocation51_spill] sm:$0xff] %v9990_v13  ;;  %v10006_v62 = vcvt.s32.f32 %v3015_v24 }
 0x3e4   :  { %13691 = vst [vmem:[#allocation41_spill] sm:$0xff] %v9955_v46  ;;  %v9960_v5 = vpop.f32.mrb[112].mxu0  ;;  %vm2834_vm1 = vcmp.eq.f32.partialorder %v9622_v51, %v9955_v46 }
 0x3e5   :  { %13692 = vst [vmem:[#allocation42_spill] sm:$0xff] %v9960_v5  ;;  %v9964_v2 = vpop.f32.mrb[113].mxu0  ;;  %13706 = vst [vmem:[#allocation56_spill] sm:$0xff] %v10006_v62  ;;  %v2898_v20 = vsel %vm2834_vm1, %v13671_v25, 32 }
 0x3e6   :  { %13694 = vst [vmem:[#allocation44_spill] sm:$0xff] %v9964_v2  ;;  %2815 = vmax.xlane.f32.xlu1 %v2814_v61  ;;  %v9986_v61 = vcvt.s32.f32 %v3030_v3  ;;  %v9993_v42 = vpop.xlane.xlu0 %2656  ;;  %v10030_v46 = vsel %vm104_vm0, %v2898_v20, 2147483647 }
 0x3e7   :  { %v9975_v35 = vpop.xlane.xlu1 %2665  ;;  %2988 = vmin.xlane.f32.xlu0 %v9968_v38  ;;  %v2895_v38 = vsel %vm2831_vm15, %v13671_v25, 32  ;;  %13702 = vst [vmem:[#allocation52_spill] sm:$0xff] %v9993_v42  ;;  %vm2833_vm2 = vcmp.eq.f32.partialorder %v9624_v34, %v9993_v42  ;;  %13712 = vst [vmem:[#allocation62_spill] sm:$0xff] %v10030_v46 }
 0x3e8   :  { %13697 = vst [vmem:[#allocation47_spill] sm:$0xff] %v9975_v35  ;;  %v9980_v2 = vpop.f32.mrb[114].mxu0  ;;  %13700 = vst [vmem:[#allocation50_spill] sm:$0xff] %v9986_v61  ;;  %v10010_v7 = vsel %vm104_vm0, %v2895_v38, 2147483647  ;;  %vm2836_vm3 = vcmp.eq.f32.partialorder %v9634_v50, %v9975_v35 }
 0x3e9   :  { %13698 = vst [vmem:[#allocation48_spill] sm:$0xff] %v9980_v2  ;;  %v9982_v5 = vpop.f32.mrb[115].mxu0  ;;  %v3060_v2 = vshra.s32 %v9990_v13, 16  ;;  %13707 = vst [vmem:[#allocation57_spill] sm:$0xff] %v10010_v7  ;;  %v2900_v42 = vsel %vm2836_vm3, %v13671_v25, 32 }
 0x3ea   :  { %13699 = vst [vmem:[#allocation49_spill] sm:$0xff] %v9982_v5  ;;  %2812 = vmax.xlane.f32.xlu1 %v2811_v57  ;;  %v2820_v57 = vsel %vm104_vm0, %v9842_v29, -inf }
 0x3eb   :  { %v9995_v23 = vpop.xlane.xlu1 %2671  ;;  %3033 = vmin.xlane.f32.xlu0 %v9986_v61  ;;  %v10026_v38 = vcvt.s32.f32 %v3060_v2 }
 0x3ec   :  { %13703 = vst [vmem:[#allocation53_spill] sm:$0xff] %v9995_v23  ;;  %v10000_v5 = vpop.f32.mrb[116].mxu0  ;;  %vm2838_vm5 = vcmp.eq.f32.partialorder %v9646_v49, %v9995_v23 }
 0x3ed   :  { %13704 = vst [vmem:[#allocation54_spill] sm:$0xff] %v10000_v5  ;;  %v10002_v3 = vpop.f32.mrb[117].mxu0  ;;  %v3045_v5 = vshra.s32 %v10010_v7, 16 }
 0x3ee   :  { %13705 = vst [vmem:[#allocation55_spill] sm:$0xff] %v10002_v3  ;;  %2821 = vmax.xlane.f32.xlu1 %v2820_v57  ;;  %v10020_v3 = vpop.xlane.xlu0 %2662  ;;  %v2817_v57 = vsel %vm104_vm0, %v9844_v31, -inf }
 0x3ef   :  { %v10013_v61 = vpop.xlane.xlu1 %2677  ;;  %3018 = vmin.xlane.f32.xlu0 %v10006_v62  ;;  %13710 = vst [vmem:[#allocation60_spill] sm:$0xff] %v10020_v3  ;;  %v2897_v62 = vsel %vm2833_vm2, %v13671_v25, 32  ;;  %v10042_v2 = vcvt.s32.f32 %v3045_v5  ;;  %vm2835_vm4 = vcmp.eq.f32.partialorder %v9636_v21, %v10020_v3 }
 0x3f0   :  { %13708 = vst [vmem:[#allocation58_spill] sm:$0xff] %v10013_v61  ;;  %v10018_v51 = vpop.f32.mrb[118].mxu0  ;;  %v10046_v20 = vsel %vm104_vm0, %v2897_v62, 2147483647  ;;  %v2899_v35 = vsel %vm2835_vm4, %v13671_v25, 32  ;;  %vm2840_vm7 = vcmp.eq.f32.partialorder %v9658_v16, %v10013_v61 }
 0x3f1   :  { %13709 = vst [vmem:[#allocation59_spill] sm:$0xff] %v10018_v51  ;;  %v10022_v24 = vpop.f32.mrb[119].mxu0  ;;  %13716 = vst [vmem:[#allocation66_spill] sm:$0xff] %v10042_v2  ;;  %v3075_v62 = vshra.s32 %v10046_v20, 16  ;;  %v10082_v3 = vsel %vm104_vm0, %v2899_v35, 2147483647 }
 0x3f2   :  { %13711 = vst [vmem:[#allocation61_spill] sm:$0xff] %v10022_v24  ;;  %2818 = vmax.xlane.f32.xlu1 %v2817_v57  ;;  %v3090_v57 = vshra.s32 %v10030_v46, 16  ;;  %13717 = vst [vmem:[#allocation67_spill] sm:$0xff] %v10046_v20  ;;  %v10049_v7 = vpop.xlane.xlu0 %2668  ;;  %v2902_v20 = vsel %vm2838_vm5, %v13671_v25, 32  ;;  %v2904_v16 = vsel %vm2840_vm7, %v13671_v25, 32 }
 0x3f3   :  { %v10033_v34 = vpop.xlane.xlu1 %2683  ;;  %3063 = vmin.xlane.f32.xlu0 %v10026_v38  ;;  %13718 = vst [vmem:[#allocation68_spill] sm:$0xff] %v10049_v7  ;;  %13728 = vst [vmem:[#allocation78_spill] sm:$0xff] %v10082_v3  ;;  %vm2837_vm6 = vcmp.eq.f32.partialorder %v9648_v8, %v10049_v7  ;;  %v10098_v35 = vsel %vm104_vm0, %v2902_v20, 2147483647 }
 0x3f4   :  { %13713 = vst [vmem:[#allocation63_spill] sm:$0xff] %v10033_v34  ;;  %v10038_v24 = vpop.f32.mrb[120].mxu0  ;;  %v2901_v23 = vsel %vm2837_vm6, %v13671_v25, 32  ;;  %vm2842_vm11 = vcmp.eq.f32.partialorder %v9670_v47, %v10033_v34 }
 0x3f5   :  { %13714 = vst [vmem:[#allocation64_spill] sm:$0xff] %v10038_v24  ;;  %v10040_v51 = vpop.f32.mrb[121].mxu0  ;;  %v10064_v24 = vsel %vm104_vm0, %v2900_v42, 2147483647 }
 0x3f6   :  { %13715 = vst [vmem:[#allocation65_spill] sm:$0xff] %v10040_v51  ;;  %v10060_v51 = vcvt.s32.f32 %v3090_v57  ;;  %13723 = vst [vmem:[#allocation73_spill] sm:$0xff] %v10064_v24  ;;  %v3120_v42 = vshra.s32 %v10064_v24, 16 }
 0x3f7   :  { %v10051_v13 = vpop.xlane.xlu1 %2689  ;;  %3048 = vmin.xlane.f32.xlu0 %v10042_v2 }
 0x3f8   :  { %13719 = vst [vmem:[#allocation69_spill] sm:$0xff] %v10051_v13  ;;  %v10056_v50 = vpop.f32.mrb[122].mxu0  ;;  %13722 = vst [vmem:[#allocation72_spill] sm:$0xff] %v10060_v51  ;;  %vm2844_vm15 = vcmp.eq.f32.partialorder %v9682_v19, %v10051_v13 }
 0x3f9   :  { %13720 = vst [vmem:[#allocation70_spill] sm:$0xff] %v10056_v50  ;;  %v10058_v5 = vpop.f32.mrb[123].mxu0  ;;  %v10074_v50 = vpop.xlane.xlu0 %2674 }
 0x3fa   :  { %13721 = vst [vmem:[#allocation71_spill] sm:$0xff] %v10058_v5  ;;  %13726 = vst [vmem:[#allocation76_spill] sm:$0xff] %v10074_v50  ;;  %v10078_v5 = vcvt.s32.f32 %v3075_v62  ;;  %v10094_v62 = vcvt.s32.f32 %v3120_v42  ;;  %vm2839_vm9 = vcmp.eq.f32.partialorder %v9660_v52, %v10074_v50  ;;  %v10149_v52 = vsel %vm104_vm0, %v2904_v16, 2147483647 }
 0x3fb   :  { %v10067_v46 = vpop.xlane.xlu1 %2695  ;;  %3093 = vmin.xlane.f32.xlu0 %v10060_v51  ;;  %v3180_v50 = vshra.s32 %v10149_v52, 16 }
 0x3fc   :  { %13724 = vst [vmem:[#allocation74_spill] sm:$0xff] %v10067_v46  ;;  %v10072_v21 = vpop.f32.mrb[124].mxu0  ;;  %vm2846_vm4 = vcmp.eq.f32.partialorder %v9694_v15, %v10067_v46 }
 0x3fd   :  { %13725 = vst [vmem:[#allocation75_spill] sm:$0xff] %v10072_v21  ;;  %v10076_v57 = vpop.f32.mrb[125].mxu0  ;;  %v10101_v24 = vpop.xlane.xlu0 %2680  ;;  %v10196_v34 = vcvt.s32.f32 %v3180_v50 }
 0x3fe   :  { %13727 = vst [vmem:[#allocation77_spill] sm:$0xff] %v10076_v57  ;;  %v3105_v57 = vshra.s32 %v10082_v3, 16  ;;  %13732 = vst [vmem:[#allocation82_spill] sm:$0xff] %v10101_v24  ;;  %v10122_v3 = vsel %vm104_vm0, %v2901_v23, 2147483647  ;;  %vm2841_vm13 = vcmp.eq.f32.partialorder %v9672_v63, %v10101_v24 }
 0x3ff   :  { %v10085_v2 = vpop.xlane.xlu1 %2701  ;;  %3078 = vmin.xlane.f32.xlu0 %v10078_v5 }
 0x400   :  { %13729 = vst [vmem:[#allocation79_spill] sm:$0xff] %v10085_v2  ;;  %v10090_v49 = vpop.f32.mrb[126].mxu0 }
 0x401   :  { %13730 = vst [vmem:[#allocation80_spill] sm:$0xff] %v10090_v49  ;;  %v10092_v21 = vpop.f32.mrb[127].mxu0  ;;  %v3150_v49 = vshra.s32 %v10098_v35, 16 }
 0x402   :  { %13731 = vst [vmem:[#allocation81_spill] sm:$0xff] %v10092_v21  ;;  %v10115_v21 = vcvt.s32.f32 %v3105_v57 }
 0x403   :  { %v10103_v51 = vpop.xlane.xlu1 %2707  ;;  %3123 = vmin.xlane.f32.xlu0 %v10094_v62 }
 0x404   :  { %13733 = vst [vmem:[#allocation83_spill] sm:$0xff] %v10103_v51  ;;  %vm2850_vm8 = vcmp.eq.f32.partialorder %v9712_v11, %v10103_v51  ;;  %v10110_v8 = vpop.f32.mrb[128].mxu0  ;;  %13736 = vst [vmem:[#allocation86_spill] sm:$0xff] %v10115_v21  ;;  %v10142_v51 = vcvt.s32.f32 %v3150_v49 }
 0x405   :  { %13734 = vst [vmem:[#allocation84_spill] sm:$0xff] %v10110_v8  ;;  %v2914_v42 = vsel %vm2850_vm8, %v13671_v25, 32  ;;  %v10113_v20 = vpop.f32.mrb[129].mxu0  ;;  %vm2848_vm8 = vcmp.eq.f32.partialorder %v9704_v56, %v10085_v2 }
 0x406   :  { %13735 = vst [vmem:[#allocation85_spill] sm:$0xff] %v10113_v20  ;;  %v10119_v7 = vsel %vm104_vm0, %v2914_v42, 2147483647  ;;  %v10135_v42 = vpop.xlane.xlu0 %2686 }
 0x407   :  { %13737 = vst [vmem:[#allocation87_spill] sm:$0xff] %v10119_v7  ;;  %v10125_v61 = vpop.xlane.xlu1 %2713  ;;  %3108 = vmin.xlane.f32.xlu0 %v10115_v21  ;;  %v3330_v11 = vshra.s32 %v10119_v7, 16  ;;  %13740 = vst [vmem:[#allocation90_spill] sm:$0xff] %v10135_v42  ;;  %v3135_v7 = vshra.s32 %v10122_v3, 16  ;;  %vm2843_vm2 = vcmp.eq.f32.partialorder %v9684_v9, %v10135_v42 }
 0x408   :  { %13738 = vst [vmem:[#allocation88_spill] sm:$0xff] %v10125_v61  ;;  %vm2852_vm10 = vcmp.eq.f32.partialorder %v9720_v39, %v10125_v61  ;;  %v10133_v57 = vpop.f32.mrb[130].mxu0  ;;  %v2903_v39 = vsel %vm2839_vm9, %v13671_v25, 32 }
 0x409   :  { %13739 = vst [vmem:[#allocation89_spill] sm:$0xff] %v10133_v57  ;;  %v2916_v23 = vsel %vm2852_vm10, %v13671_v25, 32  ;;  %v10138_v20 = vpop.f32.mrb[131].mxu0  ;;  %v10140_v8 = vcvt.s32.f32 %v3330_v11  ;;  %v10168_v61 = vcvt.s32.f32 %v3135_v7  ;;  %v10175_v47 = vsel %vm104_vm0, %v2903_v39, 2147483647 }
 0x40a   :  { %13741 = vst [vmem:[#allocation91_spill] sm:$0xff] %v10138_v20  ;;  %v10146_v21 = vsel %vm104_vm0, %v2916_v23, 2147483647 }
 0x40b   :  { %13742 = vst [vmem:[#allocation92_spill] sm:$0xff] %v10140_v8  ;;  %13743 = vst [vmem:[#allocation93_spill] sm:$0xff] %v10146_v21  ;;  %v10152_v57 = vpop.xlane.xlu1 %2719  ;;  %3333 = vmin.xlane.f32.xlu1 %v10140_v8  ;;  %3153 = vmin.xlane.f32.xlu0 %v10142_v51  ;;  %v3360_v11 = vshra.s32 %v10146_v21, 16 }
 0x40c   :  { %13744 = vst [vmem:[#allocation94_spill] sm:$0xff] %v10152_v57  ;;  %vm2854_vm12 = vcmp.eq.f32.partialorder %v9728_v26, %v10152_v57  ;;  %v10161_v49 = vpop.f32.mrb[132].mxu0  ;;  %v2906_v26 = vsel %vm2842_vm11, %v13671_v25, 32  ;;  %v10178_v57 = vpop.xlane.xlu0 %2692 }
 0x40d   :  { %13745 = vst [vmem:[#allocation95_spill] sm:$0xff] %v10161_v49  ;;  %v2918_v16 = vsel %vm2854_vm12, %v13671_v25, 32  ;;  %v10164_v23 = vpop.f32.mrb[133].mxu0  ;;  %v10166_v20 = vcvt.s32.f32 %v3360_v11  ;;  %13749 = vst [vmem:[#allocation99_spill] sm:$0xff] %v10178_v57  ;;  %v10203_v63 = vsel %vm104_vm0, %v2906_v26, 2147483647  ;;  %vm2845_vm6 = vcmp.eq.f32.partialorder %v9696_v33, %v10178_v57 }
 0x40e   :  { %13746 = vst [vmem:[#allocation96_spill] sm:$0xff] %v10164_v23  ;;  %v10172_v21 = vsel %vm104_vm0, %v2918_v16, 2147483647 }
 0x40f   :  { %13747 = vst [vmem:[#allocation97_spill] sm:$0xff] %v10166_v20  ;;  %13748 = vst [vmem:[#allocation98_spill] sm:$0xff] %v10172_v21  ;;  %v10180_v49 = vpop.xlane.xlu1 %2725  ;;  %3363 = vmin.xlane.f32.xlu1 %v10166_v20  ;;  %3138 = vmin.xlane.f32.xlu0 %v10168_v61  ;;  %v3390_v7 = vshra.s32 %v10172_v21, 16  ;;  %v3165_v20 = vshra.s32 %v10175_v47, 16 }
 0x410   :  { %13750 = vst [vmem:[#allocation100_spill] sm:$0xff] %v10180_v49  ;;  %vm2856_vm14 = vcmp.eq.f32.partialorder %v9736_v28, %v10180_v49  ;;  %v10189_v39 = vpop.f32.mrb[134].mxu0  ;;  %v2905_v28 = vsel %vm2841_vm13, %v13671_v25, 32  ;;  %v10217_v26 = vpop.xlane.xlu0 %2698 }
 0x411   :  { %13751 = vst [vmem:[#allocation101_spill] sm:$0xff] %v10189_v39  ;;  %v2920_v11 = vsel %vm2856_vm14, %v13671_v25, 32  ;;  %v10192_v16 = vpop.f32.mrb[135].mxu0  ;;  %v10194_v23 = vcvt.s32.f32 %v3390_v7  ;;  %13757 = vst [vmem:[#allocation107_spill] sm:$0xff] %v10217_v26  ;;  %v10224_v24 = vcvt.s32.f32 %v3165_v20  ;;  %v10231_v19 = vsel %vm104_vm0, %v2905_v28, 2147483647 }
 0x412   :  { %13752 = vst [vmem:[#allocation102_spill] sm:$0xff] %v10192_v16  ;;  %v10200_v21 = vsel %vm104_vm0, %v2920_v11, 2147483647  ;;  %v3195_v13 = vshra.s32 %v10231_v19, 16  ;;  %vm2847_vm10 = vcmp.eq.f32.partialorder %v9706_v14, %v10217_v26 }
 0x413   :  { %13753 = vst [vmem:[#allocation103_spill] sm:$0xff] %v10194_v23  ;;  %13754 = vst [vmem:[#allocation104_spill] sm:$0xff] %v10200_v21  ;;  %v10206_v49 = vpop.xlane.xlu1 %2731  ;;  %3393 = vmin.xlane.f32.xlu1 %v10194_v23  ;;  %3183 = vmin.xlane.f32.xlu0 %v10196_v34  ;;  %v3420_v7 = vshra.s32 %v10200_v21, 16  ;;  %v3210_v21 = vshra.s32 %v10203_v63, 16 }
 0x414   :  { %13755 = vst [vmem:[#allocation105_spill] sm:$0xff] %v10206_v49  ;;  %vm2858_vm1 = vcmp.eq.f32.partialorder %v9744_v12, %v10206_v49  ;;  %v10215_v50 = vpop.f32.mrb[136].mxu0  ;;  %v2908_v12 = vsel %vm2844_vm15, %v13671_v25, 32  ;;  %v10278_v42 = vcvt.s32.f32 %v3195_v13 }
 0x415   :  { %13756 = vst [vmem:[#allocation106_spill] sm:$0xff] %v10215_v50  ;;  %v2922_v11 = vsel %vm2858_vm1, %v13671_v25, 32  ;;  %v10220_v16 = vpop.f32.mrb[137].mxu0  ;;  %v10222_v39 = vcvt.s32.f32 %v3420_v7  ;;  %v10250_v49 = vcvt.s32.f32 %v3210_v21  ;;  %v10257_v9 = vsel %vm104_vm0, %v2908_v12, 2147483647 }
 0x416   :  { %13758 = vst [vmem:[#allocation108_spill] sm:$0xff] %v10220_v16  ;;  %v10228_v23 = vsel %vm104_vm0, %v2922_v11, 2147483647 }
 0x417   :  { %13759 = vst [vmem:[#allocation109_spill] sm:$0xff] %v10222_v39  ;;  %13760 = vst [vmem:[#allocation110_spill] sm:$0xff] %v10228_v23  ;;  %v10234_v50 = vpop.xlane.xlu1 %2737  ;;  %3423 = vmin.xlane.f32.xlu1 %v10222_v39  ;;  %3168 = vmin.xlane.f32.xlu0 %v10224_v24  ;;  %v3450_v7 = vshra.s32 %v10228_v23, 16 }
 0x418   :  { %13761 = vst [vmem:[#allocation111_spill] sm:$0xff] %v10234_v50  ;;  %vm2860_vm3 = vcmp.eq.f32.partialorder %v9752_v58, %v10234_v50  ;;  %v10243_v20 = vpop.f32.mrb[138].mxu0  ;;  %v2907_v58 = vsel %vm2843_vm2, %v13671_v25, 32  ;;  %v10260_v50 = vpop.xlane.xlu0 %2704 }
 0x419   :  { %13762 = vst [vmem:[#allocation112_spill] sm:$0xff] %v10243_v20  ;;  %v2924_v28 = vsel %vm2860_vm3, %v13671_v25, 32  ;;  %v10246_v11 = vpop.f32.mrb[139].mxu0  ;;  %v10248_v16 = vcvt.s32.f32 %v3450_v7  ;;  %13766 = vst [vmem:[#allocation116_spill] sm:$0xff] %v10260_v50  ;;  %v10285_v15 = vsel %vm104_vm0, %v2907_v58, 2147483647  ;;  %vm2849_vm11 = vcmp.eq.f32.partialorder %v9714_v41, %v10260_v50 }
 0x41a   :  { %13763 = vst [vmem:[#allocation113_spill] sm:$0xff] %v10246_v11  ;;  %v10254_v23 = vsel %vm104_vm0, %v2924_v28, 2147483647 }
 0x41b   :  { %13764 = vst [vmem:[#allocation114_spill] sm:$0xff] %v10248_v16  ;;  %13765 = vst [vmem:[#allocation115_spill] sm:$0xff] %v10254_v23  ;;  %v10262_v20 = vpop.xlane.xlu1 %2743  ;;  %3453 = vmin.xlane.f32.xlu1 %v10248_v16  ;;  %3213 = vmin.xlane.f32.xlu0 %v10250_v49  ;;  %v3480_v21 = vshra.s32 %v10254_v23, 16  ;;  %v3240_v16 = vshra.s32 %v10257_v9, 16 }
 0x41c   :  { %13767 = vst [vmem:[#allocation117_spill] sm:$0xff] %v10262_v20  ;;  %vm2862_vm5 = vcmp.eq.f32.partialorder %v9760_v43, %v10262_v20  ;;  %v10271_v12 = vpop.f32.mrb[140].mxu0  ;;  %v2910_v43 = vsel %vm2846_vm4, %v13671_v25, 32  ;;  %v10299_v58 = vpop.xlane.xlu0 %2710 }
 0x41d   :  { %13768 = vst [vmem:[#allocation118_spill] sm:$0xff] %v10271_v12  ;;  %v2926_v7 = vsel %vm2862_vm5, %v13671_v25, 32  ;;  %v10274_v28 = vpop.f32.mrb[141].mxu0  ;;  %v10276_v11 = vcvt.s32.f32 %v3480_v21  ;;  %13774 = vst [vmem:[#allocation124_spill] sm:$0xff] %v10299_v58  ;;  %v10306_v46 = vcvt.s32.f32 %v3240_v16  ;;  %v10313_v33 = vsel %vm104_vm0, %v2910_v43, 2147483647 }
 0x41e   :  { %13769 = vst [vmem:[#allocation119_spill] sm:$0xff] %v10274_v28  ;;  %v10282_v23 = vsel %vm104_vm0, %v2926_v7, 2147483647  ;;  %v3270_v57 = vshra.s32 %v10313_v33, 16  ;;  %vm2851_vm13 = vcmp.eq.f32.partialorder %v9722_v18, %v10299_v58 }
 0x41f   :  { %13770 = vst [vmem:[#allocation120_spill] sm:$0xff] %v10276_v11  ;;  %13771 = vst [vmem:[#allocation121_spill] sm:$0xff] %v10282_v23  ;;  %v10288_v20 = vpop.xlane.xlu1 %2749  ;;  %3483 = vmin.xlane.f32.xlu1 %v10276_v11  ;;  %3198 = vmin.xlane.f32.xlu0 %v10278_v42  ;;  %v3510_v21 = vshra.s32 %v10282_v23, 16  ;;  %v3225_v23 = vshra.s32 %v10285_v15, 16 }
 0x420   :  { %13772 = vst [vmem:[#allocation122_spill] sm:$0xff] %v10288_v20  ;;  %vm2864_vm7 = vcmp.eq.f32.partialorder %v9768_v4, %v10288_v20  ;;  %v10297_v13 = vpop.f32.mrb[142].mxu0  ;;  %v2909_v4 = vsel %vm2845_vm6, %v13671_v25, 32 }
 0x421   :  { %13773 = vst [vmem:[#allocation123_spill] sm:$0xff] %v10297_v13  ;;  %v2928_v7 = vsel %vm2864_vm7, %v13671_v25, 32  ;;  %v10302_v28 = vpop.f32.mrb[143].mxu0  ;;  %v10304_v12 = vcvt.s32.f32 %v3510_v21  ;;  %v10332_v20 = vcvt.s32.f32 %v3225_v23  ;;  %v10339_v56 = vsel %vm104_vm0, %v2909_v4, 2147483647 }
 0x422   :  { %13775 = vst [vmem:[#allocation125_spill] sm:$0xff] %v10302_v28  ;;  %v10310_v11 = vsel %vm104_vm0, %v2928_v7, 2147483647  ;;  %v3255_v2 = vshra.s32 %v10339_v56, 16 }
 0x423   :  { %13776 = vst [vmem:[#allocation126_spill] sm:$0xff] %v10304_v12  ;;  %13777 = vst [vmem:[#allocation127_spill] sm:$0xff] %v10310_v11  ;;  %v10316_v13 = vpop.xlane.xlu1 %2755  ;;  %3513 = vmin.xlane.f32.xlu1 %v10304_v12  ;;  %3243 = vmin.xlane.f32.xlu0 %v10306_v46  ;;  %v3540_v21 = vshra.s32 %v10310_v11, 16 }
 0x424   :  { %13778 = vst [vmem:[#allocation128_spill] sm:$0xff] %v10316_v13  ;;  %vm2866_vm9 = vcmp.eq.f32.partialorder %v9776_v54, %v10316_v13  ;;  %v10325_v16 = vpop.f32.mrb[144].mxu0  ;;  %v2912_v54 = vsel %vm2848_vm8, %v13671_v25, 32  ;;  %v10342_v13 = vpop.xlane.xlu0 %2716 }
 0x425   :  { %13779 = vst [vmem:[#allocation129_spill] sm:$0xff] %v10325_v16  ;;  %v2930_v43 = vsel %vm2866_vm9, %v13671_v25, 32  ;;  %v10328_v7 = vpop.f32.mrb[145].mxu0  ;;  %v10330_v28 = vcvt.s32.f32 %v3540_v21  ;;  %13783 = vst [vmem:[#allocation133_spill] sm:$0xff] %v10342_v13  ;;  %v10361_v12 = vsel %vm104_vm0, %v2912_v54, 2147483647  ;;  %vm2853_vm14 = vcmp.eq.f32.partialorder %v9730_v17, %v10342_v13 }
 0x426   :  { %13780 = vst [vmem:[#allocation130_spill] sm:$0xff] %v10328_v7  ;;  %v10336_v11 = vsel %vm104_vm0, %v2930_v43, 2147483647  ;;  %v10357_v7 = vcvt.s32.f32 %v3270_v57 }
 0x427   :  { %13781 = vst [vmem:[#allocation131_spill] sm:$0xff] %v10330_v28  ;;  %13782 = vst [vmem:[#allocation132_spill] sm:$0xff] %v10336_v11  ;;  %v10344_v16 = vpop.xlane.xlu1 %2752  ;;  %3543 = vmin.xlane.f32.xlu1 %v10330_v28  ;;  %3228 = vmin.xlane.f32.xlu0 %v10332_v20  ;;  %v3570_v23 = vshra.s32 %v10336_v11, 16  ;;  %v2911_v28 = vsel %vm2847_vm10, %v13671_v25, 32 }
 0x428   :  { %13784 = vst [vmem:[#allocation134_spill] sm:$0xff] %v10344_v16  ;;  %v10351_v21 = vpop.f32.mrb[146].mxu0  ;;  %v10374_v57 = vpop.xlane.xlu0 %2722  ;;  %v10386_v41 = vsel %vm104_vm0, %v2911_v28, 2147483647  ;;  %v4106_v28 = vld [vmem:[%s13358_s7 + $0x8] sm:$0xff] }
 0x429   :  { %13785 = vst [vmem:[#allocation135_spill] sm:$0xff] %v10351_v21  ;;  %v10353_v43 = vpop.f32.mrb[147].mxu0  ;;  %v10355_v4 = vcvt.s32.f32 %v3570_v23  ;;  %13790 = vst [vmem:[#allocation140_spill] sm:$0xff] %v10374_v57  ;;  %v3300_v21 = vshra.s32 %v10361_v12, 16  ;;  %vm2855_vm1 = vcmp.eq.f32.partialorder %v9738_v45, %v10374_v57 }
 0x42a   :  { %13786 = vst [vmem:[#allocation136_spill] sm:$0xff] %v10353_v43  ;;  %v10379_v43 = vcvt.s32.f32 %v3255_v2 }
 0x42b   :  { %13787 = vst [vmem:[#allocation137_spill] sm:$0xff] %v10355_v4  ;;  %v10364_v39 = vpop.xlane.xlu1 %2761  ;;  %3573 = vmin.xlane.f32.xlu1 %v10355_v4  ;;  %3273 = vmin.xlane.f32.xlu0 %v10357_v7  ;;  %v10407_v4 = vcvt.s32.f32 %v3300_v21 }
 0x42c   :  { %13788 = vst [vmem:[#allocation138_spill] sm:$0xff] %v10364_v39  ;;  %vm2868_vm12 = vcmp.eq.f32.partialorder %v9782_v6, %v10364_v39  ;;  %v10372_v14 = vpop.f32.mrb[148].mxu0  ;;  %v2913_v6 = vsel %vm2849_vm11, %v13671_v25, 32  ;;  %v10414_v58 = vpop.xlane.xlu0 %2728 }
 0x42d   :  { %13789 = vst [vmem:[#allocation139_spill] sm:$0xff] %v10372_v14  ;;  %v2932_v54 = vsel %vm2868_vm12, %v13671_v25, 32  ;;  %v10377_v23 = vpop.f32.mrb[149].mxu0  ;;  %v10411_v18 = vsel %vm104_vm0, %v2913_v6, 2147483647  ;;  %13797 = vst [vmem:[#allocation147_spill] sm:$0xff] %v10414_v58  ;;  %vm2857_vm2 = vcmp.eq.f32.partialorder %v9746_v36, %v10414_v58 }
 0x42e   :  { %13791 = vst [vmem:[#allocation141_spill] sm:$0xff] %v10377_v23  ;;  %v10383_v26 = vsel %vm104_vm0, %v2932_v54, 2147483647  ;;  %v4105_v54 = vld [vmem:[%s13358_s7] sm:$0xff]  ;;  %v2921_v36 = vsel %vm2857_vm2, %v13671_v25, 32 }
 0x42f   :  { %13792 = vst [vmem:[#allocation142_spill] sm:$0xff] %v10383_v26  ;;  %v10389_v39 = vpop.xlane.xlu1 %2758  ;;  %3258 = vmin.xlane.f32.xlu0 %v10379_v43  ;;  %v3600_v14 = vshra.s32 %v10383_v26, 16  ;;  %v3285_v26 = vshra.s32 %v10386_v41, 16  ;;  %v7662_v11 = vpack.c.bf16 %v4106_v28, %v4105_v54  ;;  %v3315_v28 = vshra.s32 %v10411_v18, 16 }
 0x430   :  { %13793 = vst [vmem:[#allocation143_spill] sm:$0xff] %v10389_v39  ;;  %v10395_v2 = vpop.f32.mrb[150].mxu0 }
 0x431   :  { %13794 = vst [vmem:[#allocation144_spill] sm:$0xff] %v10395_v2  ;;  %v10403_v23 = vpop.f32.mrb[151].mxu0  ;;  %v10405_v50 = vcvt.s32.f32 %v3600_v14  ;;  %v2915_v2 = vsel %vm2851_vm13, %v13671_v25, 32  ;;  %7663 = vmatprep.subr.bf16.mxu1 %v7662_v11  ;;  %v10429_v54 = vcvt.s32.f32 %v3285_v26 }
 0x432   :  { %13795 = vst [vmem:[#allocation145_spill] sm:$0xff] %v10403_v23  ;;  %7665 = vmatpush3.bf16.msra.mxu1 %v7662_v11  ;;  %v10436_v17 = vsel %vm104_vm0, %v2915_v2, 2147483647  ;;  %v10447_v11 = vpop.xlane.xlu0 %2734  ;;  %v10453_v2 = vcvt.s32.f32 %v3315_v28 }
 0x433   :  { %13796 = vst [vmem:[#allocation146_spill] sm:$0xff] %v10405_v50  ;;  %v10416_v8 = vpop.xlane.xlu1 %2767  ;;  %3603 = vmin.xlane.f32.xlu1 %v10405_v50  ;;  %3303 = vmin.xlane.f32.xlu0 %v10407_v4  ;;  %13801 = vst [vmem:[#allocation151_spill] sm:$0xff] %v10429_v54  ;;  %v3345_v13 = vshra.s32 %v10436_v17, 16  ;;  %vm2859_vm4 = vcmp.eq.f32.partialorder %v9754_v53, %v10447_v11  ;;  %v13821_v53 = vld [vmem:[#allocation16_spill] sm:$0xff] }
 0x434   :  { %13798 = vst [vmem:[#allocation148_spill] sm:$0xff] %v10416_v8  ;;  %vm2870_vm15 = vcmp.eq.f32.partialorder %v9788_v10, %v10416_v8  ;;  %v10424_v21 = vpop.f32.mrb[152].mxu0  ;;  %v2917_v10 = vsel %vm2853_vm14, %v13671_v25, 32  ;;  %13805 = vst [vmem:[#allocation155_spill] sm:$0xff] %v10447_v11 }
 0x435   :  { %13799 = vst [vmem:[#allocation149_spill] sm:$0xff] %v10424_v21  ;;  %v2934_v14 = vsel %vm2870_vm15, %v13671_v25, 32  ;;  %v10427_v6 = vpop.f32.mrb[153].mxu0  ;;  %v10457_v50 = vsel %vm104_vm0, %v2917_v10, 2147483647  ;;  %v10473_v10 = vcvt.s32.f32 %v3345_v13 }
 0x436   :  { %13800 = vst [vmem:[#allocation150_spill] sm:$0xff] %v10427_v6  ;;  %v10433_v23 = vsel %vm104_vm0, %v2934_v14, 2147483647  ;;  %13808 = vst [vmem:[#allocation158_spill] sm:$0xff] %v10457_v50  ;;  %v10483_v58 = vpop.xlane.xlu0 %2740 }
 0x437   :  { %13802 = vst [vmem:[#allocation152_spill] sm:$0xff] %v10433_v23  ;;  %v10439_v8 = vpop.xlane.xlu1 %2764  ;;  %3288 = vmin.xlane.f32.xlu0 %v10429_v54  ;;  %v3630_v21 = vshra.s32 %v10433_v23, 16  ;;  %v2919_v23 = vsel %vm2855_vm1, %v13671_v25, 32  ;;  %13812 = vst [vmem:[#allocation162_spill] sm:$0xff] %v10473_v10  ;;  %vm2861_vm5 = vcmp.eq.f32.partialorder %v9762_v40, %v10483_v58 }
 0x438   :  { %13803 = vst [vmem:[#allocation153_spill] sm:$0xff] %v10439_v8  ;;  %v10445_v26 = vpop.f32.mrb[154].mxu0  ;;  %v10480_v57 = vsel %vm104_vm0, %v2919_v23, 2147483647  ;;  %13814 = vst [vmem:[#allocation164_spill] sm:$0xff] %v10483_v58  ;;  %v2925_v11 = vsel %vm2861_vm5, %v13671_v25, 32 }
 0x439   :  { %13804 = vst [vmem:[#allocation154_spill] sm:$0xff] %v10445_v26  ;;  %v10449_v14 = vpop.f32.mrb[155].mxu0  ;;  %v10451_v6 = vcvt.s32.f32 %v3630_v21 }
 0x43a   :  { %13806 = vst [vmem:[#allocation156_spill] sm:$0xff] %v10449_v14  ;;  %v3375_v14 = vshra.s32 %v10457_v50, 16 }
 0x43b   :  { %13807 = vst [vmem:[#allocation157_spill] sm:$0xff] %v10451_v6  ;;  %v10460_v54 = vpop.xlane.xlu1 %2773  ;;  %3633 = vmin.xlane.f32.xlu1 %v10451_v6  ;;  %3318 = vmin.xlane.f32.xlu0 %v10453_v2  ;;  %v10501_v6 = vsel %vm104_vm0, %v2921_v36, 2147483647 }
 0x43c   :  { %13809 = vst [vmem:[#allocation159_spill] sm:$0xff] %v10460_v54  ;;  %vm2872_vm3 = vcmp.eq.f32.partialorder %v9794_v27, %v10460_v54  ;;  %v10468_v45 = vpop.f32.mrb[156].mxu0  ;;  %v10497_v23 = vcvt.s32.f32 %v3375_v14  ;;  %v3405_v54 = vshra.s32 %v10480_v57, 16  ;;  %13819 = vst [vmem:[#allocation169_spill] sm:$0xff] %v10501_v6  ;;  %v10512_v14 = vpop.xlane.xlu0 %2746 }
 0x43d   :  { %13810 = vst [vmem:[#allocation160_spill] sm:$0xff] %v10468_v45  ;;  %v2936_v21 = vsel %vm2872_vm3, %v13671_v25, 32  ;;  %v10471_v28 = vpop.f32.mrb[157].mxu0  ;;  %13822 = vst [vmem:[#allocation16_spill] sm:$0xff] %v10512_v14 }
 0x43e   :  { %13811 = vst [vmem:[#allocation161_spill] sm:$0xff] %v10471_v28  ;;  %v10477_v26 = vsel %vm104_vm0, %v2936_v21, 2147483647  ;;  %v10515_v36 = vcvt.s32.f32 %v3405_v54 }
 0x43f   :  { %13813 = vst [vmem:[#allocation163_spill] sm:$0xff] %v10477_v26  ;;  %v10485_v27 = vpop.xlane.xlu1 %2770  ;;  %3348 = vmin.xlane.f32.xlu0 %v10473_v10  ;;  %v3660_v28 = vshra.s32 %v10477_v26, 16  ;;  %v2923_v10 = vsel %vm2859_vm4, %v13671_v25, 32 }
 0x440   :  { %13815 = vst [vmem:[#allocation165_spill] sm:$0xff] %v10485_v27  ;;  %v10491_v13 = vpop.f32.mrb[158].mxu0 }
 0x441   :  { %13816 = vst [vmem:[#allocation166_spill] sm:$0xff] %v10491_v13  ;;  %v10493_v21 = vpop.f32.mrb[159].mxu0  ;;  %v10495_v45 = vcvt.s32.f32 %v3660_v28 }
 0x442   :  { %13817 = vst [vmem:[#allocation167_spill] sm:$0xff] %v10493_v21  ;;  %v3435_v21 = vshra.s32 %v10501_v6, 16 }
 0x443   :  { %13818 = vst [vmem:[#allocation168_spill] sm:$0xff] %v10495_v45  ;;  %v10504_v50 = vpop.xlane.xlu1 %2779  ;;  %3663 = vmin.xlane.f32.xlu1 %v10495_v45  ;;  %3378 = vmin.xlane.f32.xlu0 %v10497_v23  ;;  %v10522_v45 = vsel %vm104_vm0, %v2923_v10, 2147483647  ;;  %v10537_v10 = vsel %vm104_vm0, %v2925_v11, 2147483647 }
 0x444   :  { %13820 = vst [vmem:[#allocation170_spill] sm:$0xff] %v10504_v50  ;;  %vm2874_vm6 = vcmp.eq.f32.partialorder %v13821_v53, %v10504_v50  ;;  %13824 = vst [vmem:[#allocation172_spill] sm:$0xff] %v10522_v45  ;;  %v13826_v50 = vld [vmem:[#allocation8_spill] sm:$0xff]  ;;  %v10533_v58 = vcvt.s32.f32 %v3435_v21  ;;  %v3495_v11 = vshra.s32 %v10537_v10, 16 }
 0x445   :  { %v2938_v28 = vsel %vm2874_vm6, %v13671_v25, 32  ;;  %vm2863_vm7 = vcmp.eq.f32.partialorder %v13826_v50, %v10512_v14  ;;  %13829 = vst [vmem:[#allocation175_spill] sm:$0xff] %v10537_v10  ;;  %v13832_v50 = vld [vmem:[#allocation18_spill] sm:$0xff] }
 0x446   :  { %v10519_v13 = vsel %vm104_vm0, %v2938_v28, 2147483647  ;;  %13828 = vst [vmem:[#allocation174_spill] sm:$0xff] %v10533_v58  ;;  %v3465_v28 = vshra.s32 %v10522_v45, 16  ;;  %v2927_v26 = vsel %vm2863_vm7, %v13671_v25, 32 }
 0x447   :  { %13823 = vst [vmem:[#allocation171_spill] sm:$0xff] %v10519_v13  ;;  %v10525_v40 = vpop.xlane.xlu1 %2776  ;;  %3408 = vmin.xlane.f32.xlu0 %v10515_v36  ;;  %v3690_v53 = vshra.s32 %v10519_v13, 16  ;;  %v13831_v13 = vld [vmem:[#allocation10_spill] sm:$0xff]  ;;  %v10556_v45 = vsel %vm104_vm0, %v2927_v26, 2147483647 }
 0x448   :  { %13825 = vst [vmem:[#allocation173_spill] sm:$0xff] %v10525_v40  ;;  %vm2865_vm8 = vcmp.eq.f32.partialorder %v13831_v13, %v10344_v16 }
 0x449   :  { %v10531_v54 = vcvt.s32.f32 %v3690_v53  ;;  %v10549_v53 = vcvt.s32.f32 %v3465_v28 }
 0x44b   :  { %13827 = vst [vmem:[#allocation8_spill] sm:$0xff] %v10531_v54  ;;  %v10540_v6 = vpop.xlane.xlu1 %2785  ;;  %3693 = vmin.xlane.f32.xlu1 %v10531_v54  ;;  %3438 = vmin.xlane.f32.xlu0 %v10533_v58  ;;  %v2929_v54 = vsel %vm2865_vm8, %v13671_v25, 32 }
 0x44c   :  { %13830 = vst [vmem:[#allocation176_spill] sm:$0xff] %v10540_v6  ;;  %vm2876_vm9 = vcmp.eq.f32.partialorder %v13832_v50, %v10540_v6  ;;  %v13835_v50 = vld [vmem:[#allocation12_spill] sm:$0xff]  ;;  %v10567_v6 = vcvt.s32.f32 %v3495_v11  ;;  %v10571_v26 = vsel %vm104_vm0, %v2929_v54, 2147483647 }
 0x44d   :  { %v2940_v21 = vsel %vm2876_vm9, %v13671_v25, 32  ;;  %vm2867_vm10 = vcmp.eq.f32.partialorder %v13835_v50, %v10389_v39  ;;  %13838 = vst [vmem:[#allocation178_spill] sm:$0xff] %v10571_v26  ;;  %v3555_v54 = vshra.s32 %v10571_v26, 16 }
 0x44e   :  { %v10553_v14 = vsel %vm104_vm0, %v2940_v21, 2147483647  ;;  %13837 = vst [vmem:[#allocation177_spill] sm:$0xff] %v10567_v6  ;;  %v3525_v21 = vshra.s32 %v10556_v45, 16  ;;  %v2931_v16 = vsel %vm2867_vm10, %v13671_v25, 32 }
 0x44f   :  { %13833 = vst [vmem:[#allocation10_spill] sm:$0xff] %v10553_v14  ;;  %v10559_v58 = vpop.xlane.xlu1 %2782  ;;  %3468 = vmin.xlane.f32.xlu0 %v10549_v53  ;;  %v3720_v13 = vshra.s32 %v10553_v14, 16  ;;  %v13840_v14 = vld [vmem:[#allocation14_spill] sm:$0xff]  ;;  %v10590_v39 = vsel %vm104_vm0, %v2931_v16, 2147483647 }
 0x450   :  { %13834 = vst [vmem:[#allocation18_spill] sm:$0xff] %v10559_v58  ;;  %vm2869_vm11 = vcmp.eq.f32.partialorder %v13840_v14, %v10439_v8  ;;  %v13843_v14 = vld [vmem:[#allocation17_spill] sm:$0xff] }
 0x451   :  { %v10565_v28 = vcvt.s32.f32 %v3720_v13  ;;  %v10583_v13 = vcvt.s32.f32 %v3525_v21  ;;  %vm2871_vm13 = vcmp.eq.f32.partialorder %v13843_v14, %v10485_v27 }
 0x452   :  { %v2935_v8 = vsel %vm2871_vm13, %v13671_v25, 32 }
 0x453   :  { %13836 = vst [vmem:[#allocation12_spill] sm:$0xff] %v10565_v28  ;;  %v10574_v10 = vpop.xlane.xlu1 %2791  ;;  %3723 = vmin.xlane.f32.xlu1 %v10565_v28  ;;  %3498 = vmin.xlane.f32.xlu0 %v10567_v6  ;;  %v2933_v28 = vsel %vm2869_vm11, %v13671_v25, 32  ;;  %v10624_v27 = vsel %vm104_vm0, %v2935_v8, 2147483647 }
 0x454   :  { %13839 = vst [vmem:[#allocation179_spill] sm:$0xff] %v10574_v10  ;;  %vm2878_vm12 = vcmp.eq.f32.partialorder %v9812_v22, %v10574_v10  ;;  %v10601_v10 = vcvt.s32.f32 %v3555_v54  ;;  %v10605_v16 = vsel %vm104_vm0, %v2933_v28, 2147483647 }
 0x455   :  { %v2942_v11 = vsel %vm2878_vm12, %v13671_v25, 32  ;;  %13846 = vst [vmem:[#allocation182_spill] sm:$0xff] %v10605_v16  ;;  %v3615_v28 = vshra.s32 %v10605_v16, 16 }
 0x456   :  { %v10587_v50 = vsel %vm104_vm0, %v2942_v11, 2147483647  ;;  %13845 = vst [vmem:[#allocation181_spill] sm:$0xff] %v10601_v10  ;;  %v3585_v11 = vshra.s32 %v10590_v39, 16 }
 0x457   :  { %13841 = vst [vmem:[#allocation14_spill] sm:$0xff] %v10587_v50  ;;  %v10593_v6 = vpop.xlane.xlu1 %2788  ;;  %3528 = vmin.xlane.f32.xlu0 %v10583_v13  ;;  %v3750_v22 = vshra.s32 %v10587_v50, 16  ;;  %v13848_v50 = vld [vmem:[#allocation19_spill] sm:$0xff] }
 0x458   :  { %13842 = vst [vmem:[#allocation180_spill] sm:$0xff] %v10593_v6  ;;  %vm2873_vm14 = vcmp.eq.f32.partialorder %v13848_v50, %v10525_v40  ;;  %v13851_v50 = vld [vmem:[#allocation3_spill] sm:$0xff]  ;;  %vm2877_vm2 = vcmp.eq.f32.partialorder %v9814_v55, %v10593_v6 }
 0x459   :  { %v10599_v21 = vcvt.s32.f32 %v3750_v22  ;;  %v10617_v22 = vcvt.s32.f32 %v3585_v11  ;;  %vm2875_vm1 = vcmp.eq.f32.partialorder %v13851_v50, %v10559_v58 }
 0x45a   :  { %v2939_v40 = vsel %vm2875_vm1, %v13671_v25, 32 }
 0x45b   :  { %13844 = vst [vmem:[#allocation17_spill] sm:$0xff] %v10599_v21  ;;  %v10608_v26 = vpop.xlane.xlu1 %2797  ;;  %3753 = vmin.xlane.f32.xlu1 %v10599_v21  ;;  %3558 = vmin.xlane.f32.xlu0 %v10601_v10  ;;  %v2937_v21 = vsel %vm2873_vm14, %v13671_v25, 32 }
 0x45c   :  { %13847 = vst [vmem:[#allocation183_spill] sm:$0xff] %v10608_v26  ;;  %vm2880_vm15 = vcmp.eq.f32.partialorder %v9818_v1, %v10608_v26  ;;  %v10635_v26 = vcvt.s32.f32 %v3615_v28  ;;  %v10639_v8 = vsel %vm104_vm0, %v2937_v21, 2147483647 }
 0x45d   :  { %v2944_v54 = vsel %vm2880_vm15, %v13671_v25, 32  ;;  %13853 = vst [vmem:[#allocation185_spill] sm:$0xff] %v10639_v8  ;;  %v3675_v21 = vshra.s32 %v10639_v8, 16 }
 0x45e   :  { %v10621_v14 = vsel %vm104_vm0, %v2944_v54, 2147483647  ;;  %v3645_v54 = vshra.s32 %v10624_v27, 16 }
 0x45f   :  { %13849 = vst [vmem:[#allocation19_spill] sm:$0xff] %v10621_v14  ;;  %v10627_v10 = vpop.xlane.xlu1 %2794  ;;  %3588 = vmin.xlane.f32.xlu0 %v10617_v22  ;;  %v3780_v1 = vshra.s32 %v10621_v14, 16  ;;  %v10658_v14 = vsel %vm104_vm0, %v2939_v40, 2147483647 }
 0x460   :  { %13850 = vst [vmem:[#allocation184_spill] sm:$0xff] %v10627_v10  ;;  %13856 = vst [vmem:[#allocation188_spill] sm:$0xff] %v10658_v14  ;;  %vm2879_vm4 = vcmp.eq.f32.partialorder %v9820_v0, %v10627_v10  ;;  %v3705_v40 = vshra.s32 %v10658_v14, 16 }
 0x461   :  { %v10633_v11 = vcvt.s32.f32 %v3780_v1  ;;  %v10651_v1 = vcvt.s32.f32 %v3645_v54  ;;  %v2943_v6 = vsel %vm2879_vm4, %v13671_v25, 32 }
 0x463   :  { %13852 = vst [vmem:[#allocation3_spill] sm:$0xff] %v10633_v11  ;;  %v10642_v16 = vpop.xlane.xlu1 %2803  ;;  %3783 = vmin.xlane.f32.xlu1 %v10633_v11  ;;  %3618 = vmin.xlane.f32.xlu0 %v10635_v26  ;;  %v2941_v11 = vsel %vm2877_vm2, %v13671_v25, 32 }
 0x464   :  { %13854 = vst [vmem:[#allocation186_spill] sm:$0xff] %v10642_v16  ;;  %vm2882_vm3 = vcmp.eq.f32.partialorder %v9824_v44, %v10642_v16  ;;  %v10675_v16 = vsel %vm104_vm0, %v2941_v11, 2147483647  ;;  %v10689_v11 = vcvt.s32.f32 %v3705_v40  ;;  %v4107_v40 = vld [vmem:[%s13358_s7 + $0x10] sm:$0xff] }
 0x465   :  { %v2946_v28 = vsel %vm2882_vm3, %v13671_v25, 32  ;;  %13861 = vst [vmem:[#allocation193_spill] sm:$0xff] %v10675_v16 }
 0x466   :  { %v10655_v50 = vsel %vm104_vm0, %v2946_v28, 2147483647  ;;  %v10671_v28 = vcvt.s32.f32 %v3675_v21  ;;  %13864 = vst [vmem:[#allocation196_spill] sm:$0xff] %v10689_v11 }
 0x467   :  { %13855 = vst [vmem:[#allocation187_spill] sm:$0xff] %v10655_v50  ;;  %v10661_v58 = vpop.xlane.xlu1 %2800  ;;  %3648 = vmin.xlane.f32.xlu0 %v10651_v1  ;;  %v3810_v55 = vshra.s32 %v10655_v50, 16 }
 0x468   :  { %13857 = vst [vmem:[#allocation189_spill] sm:$0xff] %v10661_v58  ;;  %v10667_v44 = vpop.xlane.xlu0 %2973  ;;  %13860 = vst [vmem:[#allocation192_spill] sm:$0xff] %v10671_v28  ;;  %vm2881_vm5 = vcmp.eq.f32.partialorder %v9826_v60, %v10661_v58 }
 0x469   :  { %13858 = vst [vmem:[#allocation190_spill] sm:$0xff] %v10667_v44  ;;  %v10669_v54 = vcvt.s32.f32 %v3810_v55  ;;  %v3735_v55 = vshra.s32 %v10675_v16, 16  ;;  %v2945_v50 = vsel %vm2881_vm5, %v13671_v25, 32 }
 0x46b   :  { %13859 = vst [vmem:[#allocation191_spill] sm:$0xff] %v10669_v54  ;;  %v10678_v8 = vpop.xlane.xlu1 %2809  ;;  %3813 = vmin.xlane.f32.xlu1 %v10669_v54  ;;  %3678 = vmin.xlane.f32.xlu0 %v10671_v28  ;;  %v10696_v54 = vsel %vm104_vm0, %v2943_v6, 2147483647  ;;  %v10715_v28 = vcvt.s32.f32 %v3735_v55 }
 0x46c   :  { %13862 = vst [vmem:[#allocation194_spill] sm:$0xff] %v10678_v8  ;;  %vm2884_vm6 = vcmp.eq.f32.partialorder %v9830_v37, %v10678_v8  ;;  %v10686_v0 = vpop.xlane.xlu0 %2958  ;;  %13866 = vst [vmem:[#allocation198_spill] sm:$0xff] %v10696_v54 }
 0x46d   :  { %13863 = vst [vmem:[#allocation195_spill] sm:$0xff] %v10686_v0  ;;  %v2948_v21 = vsel %vm2884_vm6, %v13671_v25, 32  ;;  %13870 = vst [vmem:[#allocation202_spill] sm:$0xff] %v10715_v28 }
 0x46e   :  { %v10693_v10 = vsel %vm104_vm0, %v2948_v21, 2147483647  ;;  %v4108_v21 = vld [vmem:[%s13358_s7 + $0x18] sm:$0xff] }
 0x46f   :  { %13865 = vst [vmem:[#allocation197_spill] sm:$0xff] %v10693_v10  ;;  %v10699_v60 = vpop.xlane.xlu1 %2806  ;;  %3708 = vmin.xlane.f32.xlu0 %v10689_v11  ;;  %v3840_v37 = vshra.s32 %v10693_v10, 16  ;;  %v7666_v8 = vpack.c.bf16 %v4108_v21, %v4107_v40  ;;  %v3765_v11 = vshra.s32 %v10696_v54, 16  ;;  %v10719_v10 = vsel %vm104_vm0, %v2945_v50, 2147483647 }
 0x470   :  { %13867 = vst [vmem:[#allocation199_spill] sm:$0xff] %v10699_v60  ;;  %vm2883_vm7 = vcmp.eq.f32.partialorder %v9832_v48, %v10699_v60  ;;  %v10711_v6 = vpop.xlane.xlu0 %3003  ;;  %13871 = vst [vmem:[#allocation203_spill] sm:$0xff] %v10719_v10  ;;  %v3795_v50 = vshra.s32 %v10719_v10, 16 }
 0x471   :  { %13868 = vst [vmem:[#allocation200_spill] sm:$0xff] %v10711_v6  ;;  %v10713_v58 = vcvt.s32.f32 %v3840_v37  ;;  %7667 = vmatprep.subr.bf16.mxu1 %v7666_v8  ;;  %v2947_v16 = vsel %vm2883_vm7, %v13671_v25, 32  ;;  %v10731_v37 = vcvt.s32.f32 %v3765_v11  ;;  %vm3005_vm14 = vcmp.eq.f32.partialorder %v9948_v30, %v10711_v6  ;;  %v13899_v6 = vld [vmem:[#allocation51_spill] sm:$0xff] }
 0x472   :  { %7669 = vmatpush3.bf16.msra.mxu1 %v7666_v8  ;;  %v10738_v21 = vsel %vm104_vm0, %v2947_v16, 2147483647 }
 0x473   :  { %13869 = vst [vmem:[#allocation201_spill] sm:$0xff] %v10713_v58  ;;  %v10722_v14 = vpop.xlane.xlu1 %2815  ;;  %3843 = vmin.xlane.f32.xlu1 %v10713_v58  ;;  %3738 = vmin.xlane.f32.xlu0 %v10715_v28  ;;  %13873 = vst [vmem:[#allocation205_spill] sm:$0xff] %v10731_v37  ;;  %v3825_v16 = vshra.s32 %v10738_v21, 16 }
 0x474   :  { %13872 = vst [vmem:[#allocation204_spill] sm:$0xff] %v10722_v14  ;;  %vm2886_vm8 = vcmp.eq.f32.partialorder %v9836_v32, %v10722_v14  ;;  %v10728_v48 = vpop.xlane.xlu0 %2988  ;;  %13875 = vst [vmem:[#allocation207_spill] sm:$0xff] %v10738_v21  ;;  %v13891_v21 = vld [vmem:[#allocation30_spill] sm:$0xff] }
 0x475   :  { %v2950_v55 = vsel %vm2886_vm8, %v13671_v25, 32 }
 0x476   :  { %v10735_v40 = vsel %vm104_vm0, %v2950_v55, 2147483647  ;;  %v10751_v55 = vcvt.s32.f32 %v3795_v50  ;;  %v10766_v50 = vcvt.s32.f32 %v3825_v16 }
 0x477   :  { %13874 = vst [vmem:[#allocation206_spill] sm:$0xff] %v10735_v40  ;;  %v10740_v60 = vpop.xlane.xlu1 %2812  ;;  %3768 = vmin.xlane.f32.xlu0 %v10731_v37  ;;  %v3870_v32 = vshra.s32 %v10735_v40, 16 }
 0x478   :  { %13876 = vst [vmem:[#allocation208_spill] sm:$0xff] %v10740_v60  ;;  %vm2885_vm9 = vcmp.eq.f32.partialorder %v9838_v59, %v10740_v60  ;;  %v10746_v8 = vpop.xlane.xlu0 %3033  ;;  %13878 = vst [vmem:[#allocation210_spill] sm:$0xff] %v10751_v55 }
 0x479   :  { %v2949_v11 = vsel %vm2885_vm9, %v13671_v25, 32  ;;  %v10749_v14 = vcvt.s32.f32 %v3870_v32  ;;  %13881 = vst [vmem:[#allocation213_spill] sm:$0xff] %v10766_v50 }
 0x47a   :  { %v10755_v58 = vsel %vm104_vm0, %v2949_v11, 2147483647 }
 0x47b   :  { %13877 = vst [vmem:[#allocation209_spill] sm:$0xff] %v10749_v14  ;;  %13879 = vst [vmem:[#allocation211_spill] sm:$0xff] %v10755_v58  ;;  %v10757_v28 = vpop.xlane.xlu1 %2821  ;;  %3873 = vmin.xlane.f32.xlu1 %v10749_v14  ;;  %3798 = vmin.xlane.f32.xlu0 %v10751_v55  ;;  %v3855_v60 = vshra.s32 %v10755_v58, 16 }
 0x47c   :  { %13880 = vst [vmem:[#allocation212_spill] sm:$0xff] %v10757_v28  ;;  %vm2888_vm10 = vcmp.eq.f32.partialorder %v9842_v29, %v10757_v28  ;;  %v10763_v59 = vpop.xlane.xlu0 %3018  ;;  %v13885_v28 = vld [vmem:[#allocation23_spill] sm:$0xff] }
 0x47d   :  { %v2952_v32 = vsel %vm2888_vm10, %v13671_v25, 32  ;;  %v2969_v55 = vand.u32 65535, %v13885_v28  ;;  %v10784_v58 = vcvt.s32.f32 %v3855_v60  ;;  %v2999_v60 = vand.u32 65535, %v13891_v21 }
 0x47e   :  { %v10770_v11 = vsel %vm104_vm0, %v2952_v32, 2147483647 }
 0x47f   :  { %13882 = vst [vmem:[#allocation214_spill] sm:$0xff] %v10770_v11  ;;  %v10772_v37 = vpop.xlane.xlu1 %2818  ;;  %3828 = vmin.xlane.f32.xlu0 %v10766_v50  ;;  %v3900_v14 = vshra.s32 %v10770_v11, 16  ;;  %13887 = vst [vmem:[#allocation217_spill] sm:$0xff] %v10784_v58  ;;  %v2971_v28 = vcvt.s32.f32 %v2969_v55  ;;  %v13890_v11 = vld [vmem:[#allocation25_spill] sm:$0xff]  ;;  %v3001_v55 = vcvt.s32.f32 %v2999_v60 }
 0x480   :  { %13883 = vst [vmem:[#allocation215_spill] sm:$0xff] %v10772_v37  ;;  %vm2887_vm11 = vcmp.eq.f32.partialorder %v9844_v31, %v10772_v37  ;;  %v10778_v29 = vpop.xlane.xlu0 %3063  ;;  %v13889_v31 = vld [vmem:[#allocation29_spill] sm:$0xff] }
 0x481   :  { %13884 = vst [vmem:[#allocation216_spill] sm:$0xff] %v10778_v29  ;;  %v2951_v16 = vsel %vm2887_vm11, %v13671_v25, 32  ;;  %v10782_v40 = vcvt.s32.f32 %v3900_v14  ;;  %vm2975_vm12 = vcmp.eq.f32.partialorder %v13889_v31, %v10667_v44  ;;  %v2954_v14 = vand.u32 65535, %v13890_v11  ;;  %v13895_v44 = vld [vmem:[#allocation40_spill] sm:$0xff] }
 0x482   :  { %v10787_v32 = vsel %vm104_vm0, %v2951_v16, 2147483647  ;;  %v2976_v16 = vsel %vm2975_vm12, %v2971_v28, inf  ;;  %v3029_v21 = vand.u32 65535, %v13895_v44  ;;  %v3006_v54 = vsel %vm3005_vm14, %v3001_v55, inf  ;;  %v13896_v28 = vld [vmem:[#allocation45_spill] sm:$0xff] }
 0x483   :  { %13886 = vst [vmem:[#allocation23_spill] sm:$0xff] %v10782_v40  ;;  %13888 = vst [vmem:[#allocation218_spill] sm:$0xff] %v10787_v32  ;;  %3903 = vmin.xlane.f32.xlu1 %v10782_v40  ;;  %3858 = vmin.xlane.f32.xlu0 %v10784_v58  ;;  %v3885_v50 = vshra.s32 %v10787_v32, 16  ;;  %v13893_v58 = vld [vmem:[#allocation35_spill] sm:$0xff]  ;;  %v2956_v40 = vcvt.s32.f32 %v2954_v14  ;;  %v13894_v32 = vld [vmem:[#allocation36_spill] sm:$0xff]  ;;  %vm2990_vm15 = vcmp.eq.f32.partialorder %v13896_v28, %v10728_v48 }
 0x484   :  { %v10794_v37 = vpop.xlane.xlu0 %3048  ;;  %vm2960_vm13 = vcmp.eq.f32.partialorder %v13893_v58, %v10686_v0  ;;  %v2984_v11 = vand.u32 65535, %v13894_v32  ;;  %v13897_v58 = vld [vmem:[#allocation50_spill] sm:$0xff]  ;;  %v3059_v32 = vand.u32 65535, %v13899_v6  ;;  %vm3065_vm3 = vcmp.eq.f32.partialorder %v10026_v38, %v10778_v29 }
 0x485   :  { %v10798_v10 = vcvt.s32.f32 %v3885_v50  ;;  %v2961_v50 = vsel %vm2960_vm13, %v2956_v40, inf  ;;  %vm3035_vm1 = vcmp.eq.f32.partialorder %v13897_v58, %v10746_v8  ;;  %v13898_v14 = vld [vmem:[#allocation46_spill] sm:$0xff] }
 0x486   :  { %v2986_v30 = vcvt.s32.f32 %v2984_v11  ;;  %v3014_v60 = vand.u32 65535, %v13898_v14  ;;  %v13901_v11 = vld [vmem:[#allocation57_spill] sm:$0xff]  ;;  %v13902_v28 = vld [vmem:[#allocation62_spill] sm:$0xff] }
 0x487   :  { %13892 = vst [vmem:[#allocation29_spill] sm:$0xff] %v10798_v10  ;;  %3888 = vmin.xlane.f32.xlu0 %v10798_v10  ;;  %2977 = vmin.xlane.f32.xlu1 %v2976_v16  ;;  %v3031_v10 = vcvt.s32.f32 %v3029_v21  ;;  %v3044_v21 = vand.u32 65535, %v13901_v11  ;;  %v3089_v58 = vand.u32 65535, %v13902_v28 }
 0x488   :  { %v10805_v31 = vpop.xlane.xlu0 %3093  ;;  %v2991_v0 = vsel %vm2990_vm15, %v2986_v30, inf  ;;  %v3016_v55 = vcvt.s32.f32 %v3014_v60  ;;  %v13905_v60 = vld [vmem:[#allocation67_spill] sm:$0xff] }
 0x489   :  { %v3036_v44 = vsel %vm3035_vm1, %v3031_v10, inf  ;;  %v13903_v10 = vld [vmem:[#allocation66_spill] sm:$0xff]  ;;  %v3046_v38 = vcvt.s32.f32 %v3044_v21 }
 0x48a   :  { %vm3050_vm4 = vcmp.eq.f32.partialorder %v13903_v10, %v10794_v37  ;;  %v13907_v21 = vld [vmem:[#allocation78_spill] sm:$0xff] }
 0x48b   :  { %2962 = vmin.xlane.f32.xlu0 %v2961_v50  ;;  %3007 = vmin.xlane.f32.xlu1 %v3006_v54  ;;  %v13900_v54 = vld [vmem:[#allocation56_spill] sm:$0xff]  ;;  %v3061_v50 = vcvt.s32.f32 %v3059_v32  ;;  %v3074_v32 = vand.u32 65535, %v13905_v60  ;;  %v3051_v29 = vsel %vm3050_vm4, %v3046_v38, inf  ;;  %v3179_v60 = vand.u32 65535, %v10149_v52 }
 0x48c   :  { %v10813_v16 = vpop.xlane.xlu0 %3078  ;;  %vm3020_vm2 = vcmp.eq.f32.partialorder %v13900_v54, %v10763_v59  ;;  %v13906_v54 = vld [vmem:[#allocation73_spill] sm:$0xff] }
 0x48d   :  { %v3021_v14 = vsel %vm3020_vm2, %v3016_v55, inf  ;;  %v3066_v6 = vsel %vm3065_vm3, %v3061_v50, inf  ;;  %v3119_v11 = vand.u32 65535, %v13906_v54  ;;  %vm3080_vm6 = vcmp.eq.f32.partialorder %v10078_v5, %v10813_v16 }
 0x48e   :  { %v3076_v50 = vcvt.s32.f32 %v3074_v32 }
 0x48f   :  { %2992 = vmin.xlane.f32.xlu0 %v2991_v0  ;;  %3037 = vmin.xlane.f32.xlu1 %v3036_v44  ;;  %v13904_v0 = vld [vmem:[#allocation72_spill] sm:$0xff]  ;;  %v3091_v44 = vcvt.s32.f32 %v3089_v58  ;;  %v3104_v58 = vand.u32 65535, %v13907_v21  ;;  %v3209_v21 = vand.u32 65535, %v10203_v63  ;;  %v3239_v63 = vand.u32 65535, %v10257_v9 }
 0x490   :  { %v10821_v40 = vpop.xlane.xlu0 %3123  ;;  %vm3095_vm5 = vcmp.eq.f32.partialorder %v13904_v0, %v10805_v31  ;;  %v3081_v10 = vsel %vm3080_vm6, %v3076_v50, inf }
 0x491   :  { %v3096_v28 = vsel %vm3095_vm5, %v3091_v44, inf  ;;  %vm3125_vm7 = vcmp.eq.f32.partialorder %v10094_v62, %v10821_v40  ;;  %v3106_v62 = vcvt.s32.f32 %v3104_v58  ;;  %v3134_v44 = vand.u32 65535, %v10122_v3 }
 0x493   :  { %3022 = vmin.xlane.f32.xlu0 %v3021_v14  ;;  %3067 = vmin.xlane.f32.xlu1 %v3066_v6  ;;  %v3121_v14 = vcvt.s32.f32 %v3119_v11  ;;  %v3149_v6 = vand.u32 65535, %v10098_v35  ;;  %v3136_v11 = vcvt.s32.f32 %v3134_v44 }
 0x494   :  { %v10829_v30 = vpop.xlane.xlu0 %3108 }
 0x495   :  { %v3126_v0 = vsel %vm3125_vm7, %v3121_v14, inf  ;;  %v3151_v38 = vcvt.s32.f32 %v3149_v6  ;;  %v3194_v6 = vand.u32 65535, %v10231_v19  ;;  %v3241_v19 = vcvt.s32.f32 %v3239_v63 }
 0x497   :  { %3052 = vmin.xlane.f32.xlu0 %v3051_v29  ;;  %3097 = vmin.xlane.f32.xlu1 %v3096_v28  ;;  %v13908_v29 = vld [vmem:[#allocation86_spill] sm:$0xff]  ;;  %v3181_v28 = vcvt.s32.f32 %v3179_v60  ;;  %v3269_v60 = vand.u32 65535, %v10313_v33 }
 0x498   :  { %v10837_v55 = vpop.xlane.xlu0 %3153  ;;  %vm3110_vm8 = vcmp.eq.f32.partialorder %v13908_v29, %v10829_v30  ;;  %v10871_v29 = vpop.xlane.xlu1 %3333 }
 0x499   :  { %vm3155_vm9 = vcmp.eq.f32.partialorder %v10142_v51, %v10837_v55  ;;  %v3111_v32 = vsel %vm3110_vm8, %v3106_v62, inf  ;;  %v3164_v51 = vand.u32 65535, %v10175_v47  ;;  %v3211_v47 = vcvt.s32.f32 %v3209_v21 }
 0x49a   :  { %v3156_v35 = vsel %vm3155_vm9, %v3151_v38, inf  ;;  %v3224_v38 = vand.u32 65535, %v10285_v15  ;;  %v3271_v15 = vcvt.s32.f32 %v3269_v60 }
 0x49b   :  { %3082 = vmin.xlane.f32.xlu0 %v3081_v10  ;;  %3127 = vmin.xlane.f32.xlu1 %v3126_v0  ;;  %v3166_v14 = vcvt.s32.f32 %v3164_v51  ;;  %v3196_v0 = vcvt.s32.f32 %v3194_v6 }
 0x49c   :  { %v10845_v5 = vpop.xlane.xlu0 %3138  ;;  %v3226_v9 = vcvt.s32.f32 %v3224_v38  ;;  %v13914_v38 = vld [vmem:[#allocation97_spill] sm:$0xff] }
 0x49d   :  { %vm3140_vm10 = vcmp.eq.f32.partialorder %v10168_v61, %v10845_v5 }
 0x49e   :  { %v3141_v50 = vsel %vm3140_vm10, %v3136_v11, inf  ;;  %v3254_v11 = vand.u32 65535, %v10339_v56 }
 0x49f   :  { %3112 = vmin.xlane.f32.xlu0 %v3111_v32  ;;  %3157 = vmin.xlane.f32.xlu1 %v3156_v35 }
 0x4a0   :  { %v10851_v54 = vpop.xlane.xlu0 %3183  ;;  %v3256_v51 = vcvt.s32.f32 %v3254_v11 }
 0x4a1   :  { %vm3185_vm11 = vcmp.eq.f32.partialorder %v10196_v34, %v10851_v54 }
 0x4a2   :  { %v3186_v3 = vsel %vm3185_vm11, %v3181_v28, inf }
 0x4a3   :  { %3142 = vmin.xlane.f32.xlu0 %v3141_v50  ;;  %3187 = vmin.xlane.f32.xlu1 %v3186_v3 }
 0x4a4   :  { %v10856_v52 = vpop.xlane.xlu0 %3168 }
 0x4a5   :  { %vm3170_vm12 = vcmp.eq.f32.partialorder %v10224_v24, %v10856_v52 }
 0x4a6   :  { %v3171_v61 = vsel %vm3170_vm12, %v3166_v14, inf  ;;  %v13909_v14 = vld [vmem:[#allocation87_spill] sm:$0xff] }
 0x4a7   :  { %3172 = vmin.xlane.f32.xlu0 %v3171_v61  ;;  %v3329_v21 = vand.u32 65535, %v13909_v14 }
 0x4a8   :  { %v10861_v58 = vpop.xlane.xlu0 %3213 }
 0x4a9   :  { %vm3215_vm13 = vcmp.eq.f32.partialorder %v10250_v49, %v10861_v58  ;;  %v3331_v6 = vcvt.s32.f32 %v3329_v21  ;;  %v13919_v21 = vld [vmem:[#allocation104_spill] sm:$0xff] }
 0x4aa   :  { %v3216_v34 = vsel %vm3215_vm13, %v3211_v47, inf }
 0x4ab   :  { %3217 = vmin.xlane.f32.xlu1 %v3216_v34 }
 0x4ac   :  { %v10866_v10 = vpop.xlane.xlu0 %3198 }
 0x4ad   :  { %vm3200_vm14 = vcmp.eq.f32.partialorder %v10278_v42, %v10866_v10  ;;  %v10883_v42 = vpop.xlane.xlu1 %3363 }
 0x4ae   :  { %v3201_v24 = vsel %vm3200_vm14, %v3196_v0, inf  ;;  %v13912_v0 = vld [vmem:[#allocation93_spill] sm:$0xff]  ;;  %vm3365_vm7 = vcmp.eq.f32.partialorder %v13914_v38, %v10883_v42  ;;  %v3404_v38 = vand.u32 65535, %v10480_v57 }
 0x4af   :  { %3202 = vmin.xlane.f32.xlu0 %v3201_v24  ;;  %v3359_v63 = vand.u32 65535, %v13912_v0  ;;  %v3314_v24 = vand.u32 65535, %v10411_v18  ;;  %v3344_v18 = vand.u32 65535, %v10436_v17  ;;  %v13921_v17 = vld [vmem:[#allocation162_spill] sm:$0xff]  ;;  %v13922_v0 = vld [vmem:[#allocation109_spill] sm:$0xff] }
 0x4b0   :  { %v10873_v62 = vpop.xlane.xlu0 %3243 }
 0x4b1   :  { %vm3245_vm15 = vcmp.eq.f32.partialorder %v10306_v46, %v10873_v62  ;;  %v10890_v28 = vpop.xlane.xlu1 %3393  ;;  %v3361_v60 = vcvt.s32.f32 %v3359_v63  ;;  %v3346_v14 = vcvt.s32.f32 %v3344_v18 }
 0x4b2   :  { %v3246_v49 = vsel %vm3245_vm15, %v3241_v19, inf  ;;  %vm6049_vm15 = vcmp.eq.s32.totalorder %v13671_v25, 32 }
 0x4b3   :  { %3247 = vmin.xlane.f32.xlu1 %v3246_v49 }
 0x4b4   :  { %v10878_v44 = vpop.xlane.xlu0 %3228 }
 0x4b5   :  { %vm3230_vm1 = vcmp.eq.f32.partialorder %v10332_v20, %v10878_v44  ;;  %v3299_v20 = vand.u32 65535, %v10361_v12  ;;  %v10903_v61 = vpop.xlane.xlu1 %3423  ;;  %v13910_v12 = vld [vmem:[#allocation92_spill] sm:$0xff] }
 0x4b6   :  { %v3231_v32 = vsel %vm3230_vm1, %v3226_v9, inf  ;;  %vm3335_vm5 = vcmp.eq.f32.partialorder %v13910_v12, %v10871_v29  ;;  %vm3425_vm11 = vcmp.eq.f32.partialorder %v13922_v0, %v10903_v61  ;;  %v13932_v0 = vld [vmem:[#allocation172_spill] sm:$0xff] }
 0x4b7   :  { %3232 = vmin.xlane.f32.xlu0 %v3231_v32  ;;  %v3301_v56 = vcvt.s32.f32 %v3299_v20  ;;  %v3336_v19 = vsel %vm3335_vm5, %v3331_v6, inf  ;;  %v3316_v32 = vcvt.s32.f32 %v3314_v24  ;;  %v13917_v20 = vld [vmem:[#allocation103_spill] sm:$0xff] }
 0x4b8   :  { %v10885_v35 = vpop.xlane.xlu0 %3273  ;;  %vm3395_vm9 = vcmp.eq.f32.partialorder %v13917_v20, %v10890_v28  ;;  %v13927_v20 = vld [vmem:[#allocation115_spill] sm:$0xff] }
 0x4b9   :  { %vm3275_vm2 = vcmp.eq.f32.partialorder %v10357_v7, %v10885_v35  ;;  %v3284_v7 = vand.u32 65535, %v10386_v41  ;;  %v13913_v41 = vld [vmem:[#allocation151_spill] sm:$0xff]  ;;  %v10915_v49 = vpop.xlane.xlu1 %3453 }
 0x4ba   :  { %v3276_v46 = vsel %vm3275_vm2, %v3271_v15, inf  ;;  %v13916_v15 = vld [vmem:[#allocation98_spill] sm:$0xff] }
 0x4bb   :  { %3277 = vmin.xlane.f32.xlu1 %v3276_v46  ;;  %v3286_v34 = vcvt.s32.f32 %v3284_v7  ;;  %v3389_v11 = vand.u32 65535, %v13916_v15  ;;  %v3366_v46 = vsel %vm3365_vm7, %v3361_v60, inf  ;;  %v3419_v7 = vand.u32 65535, %v13919_v21  ;;  %v13925_v15 = vld [vmem:[#allocation114_spill] sm:$0xff] }
 0x4bc   :  { %v10892_v33 = vpop.xlane.xlu0 %3258  ;;  %vm3455_vm13 = vcmp.eq.f32.partialorder %v13925_v15, %v10915_v49  ;;  %v13936_v15 = vld [vmem:[#allocation5_spill] sm:$0xff] }
 0x4bd   :  { %vm3260_vm3 = vcmp.eq.f32.partialorder %v10379_v43, %v10892_v33  ;;  %v10931_v6 = vpop.xlane.xlu1 %3483  ;;  %v3421_v24 = vcvt.s32.f32 %v3419_v7  ;;  %v13929_v7 = vld [vmem:[#allocation120_spill] sm:$0xff] }
 0x4be   :  { %v3261_v50 = vsel %vm3260_vm3, %v3256_v51, inf  ;;  %vm3485_vm1 = vcmp.eq.f32.partialorder %v13929_v7, %v10931_v6 }
 0x4bf   :  { %3262 = vmin.xlane.f32.xlu0 %v3261_v50  ;;  %v3426_v60 = vsel %vm3425_vm11, %v3421_v24, inf  ;;  %v3464_v24 = vand.u32 65535, %v13932_v0 }
 0x4c0   :  { %v10897_v3 = vpop.xlane.xlu0 %3303 }
 0x4c1   :  { %vm3305_vm4 = vcmp.eq.f32.partialorder %v10407_v4, %v10897_v3  ;;  %v3466_v7 = vcvt.s32.f32 %v3464_v24  ;;  %v13950_v24 = vld [vmem:[#allocation11_spill] sm:$0xff] }
 0x4c2   :  { %v3306_v47 = vsel %vm3305_vm4, %v3301_v56, inf  ;;  %v3391_v56 = vcvt.s32.f32 %v3389_v11  ;;  %v10943_v11 = vpop.xlane.xlu1 %3513 }
 0x4c3   :  { %3307 = vmin.xlane.f32.xlu1 %v3306_v47  ;;  %v13920_v47 = vld [vmem:[#allocation158_spill] sm:$0xff] }
 0x4c4   :  { %v10907_v43 = vpop.xlane.xlu0 %3288  ;;  %v3374_v12 = vand.u32 65535, %v13920_v47 }
 0x4c5   :  { %13911 = vst [vmem:[#allocation25_spill] sm:$0xff] %v10907_v43  ;;  %vm3290_vm6 = vcmp.eq.f32.partialorder %v13913_v41, %v10907_v43 }
 0x4c6   :  { %v3291_v4 = vsel %vm3290_vm6, %v3286_v34, inf  ;;  %v3376_v41 = vcvt.s32.f32 %v3374_v12 }
 0x4c7   :  { %3337 = vmin.xlane.f32.xlu1 %v3336_v19  ;;  %3292 = vmin.xlane.f32.xlu0 %v3291_v4  ;;  %v13924_v19 = vld [vmem:[#allocation110_spill] sm:$0xff] }
 0x4c8   :  { %v10917_v9 = vpop.xlane.xlu0 %3318  ;;  %v3449_v4 = vand.u32 65535, %v13924_v19  ;;  %v13935_v19 = vld [vmem:[#allocation15_spill] sm:$0xff] }
 0x4c9   :  { %13915 = vst [vmem:[#allocation30_spill] sm:$0xff] %v10917_v9  ;;  %vm3320_vm8 = vcmp.eq.f32.partialorder %v10453_v2, %v10917_v9  ;;  %v3396_v2 = vsel %vm3395_vm9, %v3391_v56, inf  ;;  %v3479_v56 = vand.u32 65535, %v13927_v20  ;;  %v13938_v20 = vld [vmem:[#allocation4_spill] sm:$0xff]  ;;  %v14132_v9 = vld [vmem:[#allocation190_spill] sm:$0xff] }
 0x4ca   :  { %v3321_v51 = vsel %vm3320_vm8, %v3316_v32, inf }
 0x4cb   :  { %3367 = vmin.xlane.f32.xlu1 %v3366_v46  ;;  %3322 = vmin.xlane.f32.xlu0 %v3321_v51  ;;  %v3451_v46 = vcvt.s32.f32 %v3449_v4  ;;  %v3406_v51 = vcvt.s32.f32 %v3404_v38  ;;  %v3481_v12 = vcvt.s32.f32 %v3479_v56  ;;  %v10966_v38 = vpop.xlane.xlu1 %3543  ;;  %v13939_v56 = vld [vmem:[#allocation24_spill] sm:$0xff] }
 0x4cc   :  { %v10925_v50 = vpop.xlane.xlu0 %3348 }
 0x4cd   :  { %13918 = vst [vmem:[#allocation35_spill] sm:$0xff] %v10925_v50  ;;  %vm3350_vm10 = vcmp.eq.f32.partialorder %v13921_v17, %v10925_v50  ;;  %v13980_v50 = vld [vmem:[#allocation39_spill] sm:$0xff] }
 0x4ce   :  { %v3351_v34 = vsel %vm3350_vm10, %v3346_v14, inf  ;;  %v13928_v14 = vld [vmem:[#allocation169_spill] sm:$0xff] }
 0x4cf   :  { %3397 = vmin.xlane.f32.xlu1 %v3396_v2  ;;  %3352 = vmin.xlane.f32.xlu0 %v3351_v34  ;;  %v3434_v57 = vand.u32 65535, %v13928_v14  ;;  %v13931_v2 = vld [vmem:[#allocation121_spill] sm:$0xff]  ;;  %v10978_v14 = vsel %vm6049_vm15, %v13939_v56, %v13938_v20 }
 0x4d0   :  { %v10935_v63 = vpop.xlane.xlu0 %3378  ;;  %v3509_v34 = vand.u32 65535, %v13931_v2  ;;  %v13943_v2 = vld [vmem:[#allocation175_spill] sm:$0xff]  ;;  %v13949_v20 = vld [vmem:[#allocation33_spill] sm:$0xff] }
 0x4d1   :  { %13923 = vst [vmem:[#allocation36_spill] sm:$0xff] %v10935_v63  ;;  %vm3380_vm12 = vcmp.eq.f32.partialorder %v10497_v23, %v10935_v63  ;;  %v3456_v23 = vsel %vm3455_vm13, %v3451_v46, inf  ;;  %v3436_v17 = vcvt.s32.f32 %v3434_v57  ;;  %v13937_v46 = vld [vmem:[#allocation22_spill] sm:$0xff]  ;;  %v3494_v0 = vand.u32 65535, %v13943_v2  ;;  %v13951_v56 = vld [vmem:[#allocation37_spill] sm:$0xff]  ;;  %v13953_v2 = vld [vmem:[#allocation43_spill] sm:$0xff] }
 0x4d2   :  { %v3381_v32 = vsel %vm3380_vm12, %v3376_v41, inf  ;;  %v13933_v41 = vld [vmem:[#allocation174_spill] sm:$0xff]  ;;  %v13965_v63 = vld [vmem:[#allocation47_spill] sm:$0xff] }
 0x4d3   :  { %3427 = vmin.xlane.f32.xlu1 %v3426_v60  ;;  %3382 = vmin.xlane.f32.xlu0 %v3381_v32  ;;  %v3486_v60 = vsel %vm3485_vm1, %v3481_v12, inf  ;;  %v13940_v57 = vld [vmem:[#allocation126_spill] sm:$0xff]  ;;  %v13942_v12 = vld [vmem:[#allocation127_spill] sm:$0xff] }
 0x4d4   :  { %v10945_v18 = vpop.xlane.xlu0 %3408  ;;  %vm3515_vm3 = vcmp.eq.f32.partialorder %v13940_v57, %v10943_v11  ;;  %v11010_v57 = vsel %vm6049_vm15, %v13951_v56, %v13950_v24  ;;  %v13961_v56 = vld [vmem:[#allocation131_spill] sm:$0xff] }
 0x4d5   :  { %13926 = vst [vmem:[#allocation40_spill] sm:$0xff] %v10945_v18  ;;  %vm3410_vm14 = vcmp.eq.f32.partialorder %v10515_v36, %v10945_v18  ;;  %v13934_v36 = vld [vmem:[#allocation2_spill] sm:$0xff]  ;;  %vm3545_vm5 = vcmp.eq.f32.partialorder %v13961_v56, %v10966_v38  ;;  %v13970_v56 = vld [vmem:[#allocation32_spill] sm:$0xff] }
 0x4d6   :  { %v3411_v21 = vsel %vm3410_vm14, %v3406_v51, inf  ;;  %v10964_v4 = vsel %vm6049_vm15, %v13935_v19, %v13934_v36  ;;  %v10972_v51 = vsel %vm6049_vm15, %v13937_v46, %v13936_v15  ;;  %v13945_v36 = vld [vmem:[#allocation27_spill] sm:$0xff]  ;;  %v13946_v15 = vld [vmem:[#allocation6_spill] sm:$0xff]  ;;  %v13948_v46 = vld [vmem:[#allocation9_spill] sm:$0xff] }
 0x4d7   :  { %3457 = vmin.xlane.f32.xlu1 %v3456_v23  ;;  %3412 = vmin.xlane.f32.xlu0 %v3411_v21  ;;  %v3511_v21 = vcvt.s32.f32 %v3509_v34  ;;  %v11002_v34 = vsel %vm6049_vm15, %v13949_v20, %v13948_v46  ;;  %v13956_v46 = vld [vmem:[#allocation41_spill] sm:$0xff]  ;;  %v13964_v18 = vld [vmem:[#allocation26_spill] sm:$0xff] }
 0x4d8   :  { %v10954_v47 = vpop.xlane.xlu0 %3438 }
 0x4d9   :  { %13930 = vst [vmem:[#allocation45_spill] sm:$0xff] %v10954_v47  ;;  %vm3440_vm2 = vcmp.eq.f32.partialorder %v13933_v41, %v10954_v47  ;;  %v13944_v41 = vld [vmem:[#allocation7_spill] sm:$0xff]  ;;  %v13963_v47 = vld [vmem:[#allocation132_spill] sm:$0xff] }
 0x4da   :  { %v3441_v32 = vsel %vm3440_vm2, %v3436_v17, inf  ;;  %v3539_v17 = vand.u32 65535, %v13942_v12  ;;  %v10990_v19 = vsel %vm6049_vm15, %v13945_v36, %v13944_v41  ;;  %v13952_v12 = vld [vmem:[#allocation13_spill] sm:$0xff]  ;;  %v3516_v36 = vsel %vm3515_vm3, %v3511_v21, inf }
 0x4db   :  { %3487 = vmin.xlane.f32.xlu1 %v3486_v60  ;;  %3442 = vmin.xlane.f32.xlu0 %v3441_v32  ;;  %v13947_v60 = vld [vmem:[#allocation31_spill] sm:$0xff]  ;;  %v11016_v41 = vsel %vm6049_vm15, %v13953_v2, %v13952_v12  ;;  %v11032_v12 = vpop.xlane.xlu1 %3573  ;;  %v3496_v2 = vcvt.s32.f32 %v3494_v0  ;;  %v13975_v0 = vld [vmem:[#allocation68_spill] sm:$0xff] }
 0x4dc   :  { %v10982_v23 = vpop.xlane.xlu0 %3468  ;;  %v10996_v32 = vsel %vm6049_vm15, %v13947_v60, %v13946_v15  ;;  %13954 = vst [vmem:[#allocation46_spill] sm:$0xff] %v11016_v41  ;;  %v13955_v60 = vld [vmem:[#allocation21_spill] sm:$0xff] }
 0x4dd   :  { %13941 = vst [vmem:[#allocation50_spill] sm:$0xff] %v10982_v23  ;;  %vm3470_vm4 = vcmp.eq.f32.partialorder %v10549_v53, %v10982_v23  ;;  %v11022_v20 = vsel %vm6049_vm15, %v13956_v46, %v13955_v60  ;;  %v13958_v53 = vld [vmem:[#allocation20_spill] sm:$0xff]  ;;  %v3569_v60 = vand.u32 65535, %v13963_v47  ;;  %v3524_v46 = vand.u32 65535, %v10556_v45  ;;  %v13973_v45 = vld [vmem:[#allocation177_spill] sm:$0xff]  ;;  %v13974_v47 = vld [vmem:[#allocation34_spill] sm:$0xff] }
 0x4de   :  { %v3471_v15 = vsel %vm3470_vm4, %v3466_v7, inf  ;;  %13957 = vst [vmem:[#allocation51_spill] sm:$0xff] %v11022_v20  ;;  %v13959_v23 = vld [vmem:[#allocation52_spill] sm:$0xff]  ;;  %v3541_v7 = vcvt.s32.f32 %v3539_v17  ;;  %v14148_v20 = vld [vmem:[#allocation150_spill] sm:$0xff]  ;;  %v14149_v41 = vld [vmem:[#allocation189_spill] sm:$0xff] }
 0x4df   :  { %v11028_v24 = vsel %vm6049_vm15, %v13959_v23, %v13958_v53  ;;  %3517 = vmin.xlane.f32.xlu1 %v3516_v36  ;;  %3472 = vmin.xlane.f32.xlu0 %v3471_v15  ;;  %v11042_v23 = vsel %vm6049_vm15, %v13965_v63, %v13964_v18  ;;  %v13967_v36 = vld [vmem:[#allocation28_spill] sm:$0xff]  ;;  %v11062_v63 = vsel %vm6049_vm15, %v13975_v0, %v13974_v47  ;;  %v13977_v18 = vld [vmem:[#allocation38_spill] sm:$0xff]  ;;  %v13986_v0 = vld [vmem:[#allocation137_spill] sm:$0xff] }
 0x4e0   :  { %13960 = vst [vmem:[#allocation56_spill] sm:$0xff] %v11028_v24  ;;  %v11034_v21 = vpop.xlane.xlu0 %3498  ;;  %13966 = vst [vmem:[#allocation62_spill] sm:$0xff] %v11042_v23  ;;  %v13968_v15 = vld [vmem:[#allocation60_spill] sm:$0xff]  ;;  %v13971_v24 = vld [vmem:[#allocation53_spill] sm:$0xff]  ;;  %vm3575_vm7 = vcmp.eq.f32.partialorder %v13986_v0, %v11032_v12 }
 0x4e1   :  { %13962 = vst [vmem:[#allocation57_spill] sm:$0xff] %v11034_v21  ;;  %v11048_v53 = vsel %vm6049_vm15, %v13968_v15, %v13967_v36  ;;  %v11054_v17 = vsel %vm6049_vm15, %v13971_v24, %v13970_v56  ;;  %vm3500_vm6 = vcmp.eq.f32.partialorder %v13973_v45, %v11034_v21  ;;  %13976 = vst [vmem:[#allocation67_spill] sm:$0xff] %v11062_v63  ;;  %v13978_v23 = vld [vmem:[#allocation58_spill] sm:$0xff]  ;;  %v3546_v15 = vsel %vm3545_vm5, %v3541_v7, inf  ;;  %v13981_v24 = vld [vmem:[#allocation76_spill] sm:$0xff] }
 0x4e2   :  { %13969 = vst [vmem:[#allocation66_spill] sm:$0xff] %v11048_v53  ;;  %13972 = vst [vmem:[#allocation72_spill] sm:$0xff] %v11054_v17  ;;  %v11068_v36 = vsel %vm6049_vm15, %v13978_v23, %v13977_v18  ;;  %v3501_v53 = vsel %vm3500_vm6, %v3496_v2, inf  ;;  %v11074_v56 = vsel %vm6049_vm15, %v13981_v24, %v13980_v50  ;;  %v13983_v45 = vld [vmem:[#allocation42_spill] sm:$0xff]  ;;  %v13984_v17 = vld [vmem:[#allocation63_spill] sm:$0xff]  ;;  %v11084_v23 = vpop.xlane.xlu1 %3603  ;;  %v3571_v2 = vcvt.s32.f32 %v3569_v60 }
 0x4e3   :  { %13979 = vst [vmem:[#allocation73_spill] sm:$0xff] %v11068_v36  ;;  %13982 = vst [vmem:[#allocation78_spill] sm:$0xff] %v11074_v56  ;;  %v11080_v47 = vsel %vm6049_vm15, %v13984_v17, %v13983_v45  ;;  %3547 = vmin.xlane.f32.xlu1 %v3546_v15  ;;  %3502 = vmin.xlane.f32.xlu0 %v3501_v53  ;;  %v3526_v18 = vcvt.s32.f32 %v3524_v46  ;;  %v13988_v36 = vld [vmem:[#allocation142_spill] sm:$0xff]  ;;  %v13990_v63 = vld [vmem:[#allocation44_spill] sm:$0xff] }
 0x4e4   :  { %13985 = vst [vmem:[#allocation86_spill] sm:$0xff] %v11080_v47  ;;  %v11086_v7 = vpop.xlane.xlu0 %3528  ;;  %v3599_v50 = vand.u32 65535, %v13988_v36  ;;  %v13989_v24 = vld [vmem:[#allocation178_spill] sm:$0xff]  ;;  %v13993_v53 = vld [vmem:[#allocation48_spill] sm:$0xff]  ;;  %v13994_v15 = vld [vmem:[#allocation69_spill] sm:$0xff] }
 0x4e5   :  { %13987 = vst [vmem:[#allocation87_spill] sm:$0xff] %v11086_v7  ;;  %v3554_v56 = vand.u32 65535, %v13989_v24  ;;  %v13991_v21 = vld [vmem:[#allocation82_spill] sm:$0xff]  ;;  %v11100_v45 = vsel %vm6049_vm15, %v13994_v15, %v13993_v53  ;;  %v13996_v0 = vld [vmem:[#allocation49_spill] sm:$0xff]  ;;  %vm3530_vm8 = vcmp.eq.f32.partialorder %v10583_v13, %v11086_v7  ;;  %v14003_v24 = vld [vmem:[#allocation99_spill] sm:$0xff]  ;;  %v3576_v15 = vsel %vm3575_vm7, %v3571_v2, inf }
 0x4e6   :  { %v11094_v17 = vsel %vm6049_vm15, %v13991_v21, %v13990_v63  ;;  %13995 = vst [vmem:[#allocation93_spill] sm:$0xff] %v11100_v45  ;;  %v13997_v47 = vld [vmem:[#allocation90_spill] sm:$0xff]  ;;  %v14002_v63 = vld [vmem:[#allocation55_spill] sm:$0xff]  ;;  %v3531_v45 = vsel %vm3530_vm8, %v3526_v18, inf  ;;  %v14008_v13 = vld [vmem:[#allocation61_spill] sm:$0xff]  ;;  %v3601_v18 = vcvt.s32.f32 %v3599_v50 }
 0x4e7   :  { %13992 = vst [vmem:[#allocation92_spill] sm:$0xff] %v11094_v17  ;;  %v11106_v60 = vsel %vm6049_vm15, %v13997_v47, %v13996_v0  ;;  %v13999_v46 = vld [vmem:[#allocation54_spill] sm:$0xff]  ;;  %v11120_v53 = vsel %vm6049_vm15, %v14003_v24, %v14002_v63  ;;  %v14005_v17 = vld [vmem:[#allocation59_spill] sm:$0xff]  ;;  %3577 = vmin.xlane.f32.xlu1 %v3576_v15  ;;  %3532 = vmin.xlane.f32.xlu0 %v3531_v45  ;;  %v11136_v63 = vpop.xlane.xlu1 %3633  ;;  %v3556_v24 = vcvt.s32.f32 %v3554_v56  ;;  %v14018_v45 = vld [vmem:[#allocation65_spill] sm:$0xff] }
 0x4e8   :  { %13998 = vst [vmem:[#allocation151_spill] sm:$0xff] %v11106_v60  ;;  %v14000_v36 = vld [vmem:[#allocation74_spill] sm:$0xff]  ;;  %14004 = vst [vmem:[#allocation98_spill] sm:$0xff] %v11120_v53  ;;  %v14006_v47 = vld [vmem:[#allocation79_spill] sm:$0xff]  ;;  %v11138_v2 = vpop.xlane.xlu0 %3558 }
 0x4e9   :  { %v11114_v21 = vsel %vm6049_vm15, %v14000_v36, %v13999_v46  ;;  %v11126_v0 = vsel %vm6049_vm15, %v14006_v47, %v14005_v17  ;;  %v14009_v60 = vld [vmem:[#allocation107_spill] sm:$0xff]  ;;  %v14011_v36 = vld [vmem:[#allocation146_spill] sm:$0xff]  ;;  %14012 = vst [vmem:[#allocation158_spill] sm:$0xff] %v11136_v63  ;;  %14013 = vst [vmem:[#allocation162_spill] sm:$0xff] %v11138_v2  ;;  %v3584_v47 = vand.u32 65535, %v10590_v39 }
 0x4ea   :  { %14001 = vst [vmem:[#allocation97_spill] sm:$0xff] %v11114_v21  ;;  %14007 = vst [vmem:[#allocation103_spill] sm:$0xff] %v11126_v0  ;;  %v11132_v46 = vsel %vm6049_vm15, %v14009_v60, %v14008_v13  ;;  %vm3605_vm9 = vcmp.eq.f32.partialorder %v14011_v36, %v11084_v23  ;;  %v14014_v53 = vld [vmem:[#allocation152_spill] sm:$0xff]  ;;  %v14016_v21 = vld [vmem:[#allocation83_spill] sm:$0xff] }
 0x4eb   :  { %14010 = vst [vmem:[#allocation104_spill] sm:$0xff] %v11132_v46  ;;  %v3629_v17 = vand.u32 65535, %v14014_v53  ;;  %v14015_v0 = vld [vmem:[#allocation64_spill] sm:$0xff]  ;;  %v14021_v36 = vld [vmem:[#allocation70_spill] sm:$0xff]  ;;  %v14024_v39 = vld [vmem:[#allocation181_spill] sm:$0xff] }
 0x4ec   :  { %v11146_v60 = vsel %vm6049_vm15, %v14016_v21, %v14015_v0  ;;  %v14019_v15 = vld [vmem:[#allocation116_spill] sm:$0xff]  ;;  %vm3560_vm10 = vcmp.eq.f32.partialorder %v14024_v39, %v11138_v2  ;;  %v14025_v50 = vld [vmem:[#allocation71_spill] sm:$0xff]  ;;  %v14031_v7 = vld [vmem:[#allocation77_spill] sm:$0xff] }
 0x4ed   :  { %14017 = vst [vmem:[#allocation109_spill] sm:$0xff] %v11146_v60  ;;  %v11152_v13 = vsel %vm6049_vm15, %v14019_v15, %v14018_v45  ;;  %v14022_v46 = vld [vmem:[#allocation88_spill] sm:$0xff]  ;;  %v14028_v0 = vld [vmem:[#allocation75_spill] sm:$0xff]  ;;  %v14029_v60 = vld [vmem:[#allocation94_spill] sm:$0xff]  ;;  %v3606_v15 = vsel %vm3605_vm9, %v3601_v18, inf  ;;  %v11190_v18 = vpop.xlane.xlu0 %3588 }
 0x4ee   :  { %14020 = vst [vmem:[#allocation110_spill] sm:$0xff] %v11152_v13  ;;  %v11158_v56 = vsel %vm6049_vm15, %v14022_v46, %v14021_v36  ;;  %v14026_v53 = vld [vmem:[#allocation124_spill] sm:$0xff]  ;;  %v11172_v45 = vsel %vm6049_vm15, %v14029_v60, %v14028_v0  ;;  %v3561_v13 = vsel %vm3560_vm10, %v3556_v24, inf  ;;  %v14032_v46 = vld [vmem:[#allocation133_spill] sm:$0xff]  ;;  %3607 = vmin.xlane.f32.xlu1 %v3606_v15  ;;  %v11188_v60 = vpop.xlane.xlu1 %3663  ;;  %14039 = vst [vmem:[#allocation174_spill] sm:$0xff] %v11190_v18  ;;  %v3631_v24 = vcvt.s32.f32 %v3629_v17 }
 0x4ef   :  { %14023 = vst [vmem:[#allocation114_spill] sm:$0xff] %v11158_v56  ;;  %v11166_v21 = vsel %vm6049_vm15, %v14026_v53, %v14025_v50  ;;  %14030 = vst [vmem:[#allocation169_spill] sm:$0xff] %v11172_v45  ;;  %v11178_v36 = vsel %vm6049_vm15, %v14032_v46, %v14031_v7  ;;  %v14034_v39 = vld [vmem:[#allocation80_spill] sm:$0xff]  ;;  %3562 = vmin.xlane.f32.xlu0 %v3561_v13  ;;  %v14037_v53 = vld [vmem:[#allocation157_spill] sm:$0xff]  ;;  %v3586_v0 = vcvt.s32.f32 %v3584_v47 }
 0x4f0   :  { %14027 = vst [vmem:[#allocation115_spill] sm:$0xff] %v11166_v21  ;;  %14033 = vst [vmem:[#allocation120_spill] sm:$0xff] %v11178_v36  ;;  %v14035_v56 = vld [vmem:[#allocation100_spill] sm:$0xff]  ;;  %vm3635_vm11 = vcmp.eq.f32.partialorder %v14037_v53, %v11136_v63  ;;  %v14040_v45 = vld [vmem:[#allocation163_spill] sm:$0xff]  ;;  %vm3590_vm12 = vcmp.eq.f32.partialorder %v10617_v22, %v11190_v18 }
 0x4f1   :  { %v11184_v50 = vsel %vm6049_vm15, %v14035_v56, %v14034_v39  ;;  %14038 = vst [vmem:[#allocation172_spill] sm:$0xff] %v11188_v60  ;;  %v3659_v7 = vand.u32 65535, %v14040_v45  ;;  %v14041_v46 = vld [vmem:[#allocation182_spill] sm:$0xff]  ;;  %v14042_v21 = vld [vmem:[#allocation81_spill] sm:$0xff]  ;;  %v14043_v2 = vld [vmem:[#allocation140_spill] sm:$0xff] }
 0x4f2   :  { %14036 = vst [vmem:[#allocation121_spill] sm:$0xff] %v11184_v50  ;;  %v3614_v36 = vand.u32 65535, %v14041_v46  ;;  %v11198_v56 = vsel %vm6049_vm15, %v14043_v2, %v14042_v21  ;;  %v14045_v13 = vld [vmem:[#allocation84_spill] sm:$0xff]  ;;  %v14046_v15 = vld [vmem:[#allocation105_spill] sm:$0xff]  ;;  %v14049_v50 = vld [vmem:[#allocation147_spill] sm:$0xff] }
 0x4f3   :  { %14044 = vst [vmem:[#allocation2_spill] sm:$0xff] %v11198_v56  ;;  %v11204_v39 = vsel %vm6049_vm15, %v14046_v15, %v14045_v13  ;;  %v14048_v53 = vld [vmem:[#allocation85_spill] sm:$0xff]  ;;  %v14052_v45 = vld [vmem:[#allocation111_spill] sm:$0xff]  ;;  %v3636_v15 = vsel %vm3635_vm11, %v3631_v24, inf  ;;  %v14060_v22 = vld [vmem:[#allocation96_spill] sm:$0xff]  ;;  %v11242_v24 = vpop.xlane.xlu0 %3618 }
 0x4f4   :  { %14047 = vst [vmem:[#allocation15_spill] sm:$0xff] %v11204_v39  ;;  %v11210_v17 = vsel %vm6049_vm15, %v14049_v50, %v14048_v53  ;;  %v14051_v47 = vld [vmem:[#allocation89_spill] sm:$0xff]  ;;  %v14054_v21 = vld [vmem:[#allocation91_spill] sm:$0xff]  ;;  %v3591_v39 = vsel %vm3590_vm12, %v3586_v0, inf  ;;  %3637 = vmin.xlane.f32.xlu1 %v3636_v15  ;;  %14065 = vst [vmem:[#allocation175_spill] sm:$0xff] %v11242_v24  ;;  %v3661_v0 = vcvt.s32.f32 %v3659_v7  ;;  %vm3620_vm14 = vcmp.eq.f32.partialorder %v10635_v26, %v11242_v24 }
 0x4f5   :  { %14050 = vst [vmem:[#allocation5_spill] sm:$0xff] %v11210_v17  ;;  %v11218_v2 = vsel %vm6049_vm15, %v14052_v45, %v14051_v47  ;;  %v14055_v46 = vld [vmem:[#allocation155_spill] sm:$0xff]  ;;  %v14058_v50 = vld [vmem:[#allocation117_spill] sm:$0xff]  ;;  %v14061_v17 = vld [vmem:[#allocation164_spill] sm:$0xff]  ;;  %3592 = vmin.xlane.f32.xlu0 %v3591_v39 }
 0x4f6   :  { %14053 = vst [vmem:[#allocation22_spill] sm:$0xff] %v11218_v2  ;;  %v11224_v13 = vsel %vm6049_vm15, %v14055_v46, %v14054_v21  ;;  %v14057_v56 = vld [vmem:[#allocation95_spill] sm:$0xff]  ;;  %v11236_v47 = vsel %vm6049_vm15, %v14061_v17, %v14060_v22  ;;  %v14063_v45 = vld [vmem:[#allocation168_spill] sm:$0xff]  ;;  %v11240_v21 = vpop.xlane.xlu1 %3693  ;;  %v3616_v46 = vcvt.s32.f32 %v3614_v36  ;;  %v14068_v2 = vld [vmem:[#allocation122_spill] sm:$0xff] }
 0x4f7   :  { %14056 = vst [vmem:[#allocation4_spill] sm:$0xff] %v11224_v13  ;;  %v11230_v53 = vsel %vm6049_vm15, %v14058_v50, %v14057_v56  ;;  %14062 = vst [vmem:[#allocation126_spill] sm:$0xff] %v11236_v47  ;;  %vm3665_vm13 = vcmp.eq.f32.partialorder %v14063_v45, %v11188_v60  ;;  %v14066_v13 = vld [vmem:[#allocation171_spill] sm:$0xff]  ;;  %v3644_v50 = vand.u32 65535, %v10624_v27  ;;  %v14070_v39 = vld [vmem:[#allocation102_spill] sm:$0xff] }
 0x4f8   :  { %14059 = vst [vmem:[#allocation24_spill] sm:$0xff] %v11230_v53  ;;  %14064 = vst [vmem:[#allocation127_spill] sm:$0xff] %v11240_v21  ;;  %v3689_v56 = vand.u32 65535, %v14066_v13  ;;  %v14067_v53 = vld [vmem:[#allocation101_spill] sm:$0xff]  ;;  %v14071_v15 = vld [vmem:[#allocation16_spill] sm:$0xff] }
 0x4f9   :  { %v11250_v17 = vsel %vm6049_vm15, %v14068_v2, %v14067_v53  ;;  %v11256_v22 = vsel %vm6049_vm15, %v14071_v15, %v14070_v39  ;;  %v14073_v45 = vld [vmem:[#allocation106_spill] sm:$0xff]  ;;  %v14074_v47 = vld [vmem:[#allocation128_spill] sm:$0xff]  ;;  %v3666_v15 = vsel %vm3665_vm13, %v3661_v0, inf  ;;  %v14130_v60 = vld [vmem:[#allocation183_spill] sm:$0xff] }
 0x4fa   :  { %14069 = vst [vmem:[#allocation7_spill] sm:$0xff] %v11250_v17  ;;  %14072 = vst [vmem:[#allocation27_spill] sm:$0xff] %v11256_v22  ;;  %v11262_v36 = vsel %vm6049_vm15, %v14074_v47, %v14073_v45  ;;  %v14076_v27 = vld [vmem:[#allocation108_spill] sm:$0xff]  ;;  %v14077_v7 = vld [vmem:[#allocation134_spill] sm:$0xff]  ;;  %v3621_v22 = vsel %vm3620_vm14, %v3616_v46, inf  ;;  %3667 = vmin.xlane.f32.xlu1 %v3666_v15 }
 0x4fb   :  { %14075 = vst [vmem:[#allocation6_spill] sm:$0xff] %v11262_v36  ;;  %v11270_v2 = vsel %vm6049_vm15, %v14077_v7, %v14076_v27  ;;  %v14079_v13 = vld [vmem:[#allocation112_spill] sm:$0xff]  ;;  %v14080_v53 = vld [vmem:[#allocation138_spill] sm:$0xff]  ;;  %v14082_v17 = vld [vmem:[#allocation113_spill] sm:$0xff]  ;;  %3622 = vmin.xlane.f32.xlu0 %v3621_v22 }
 0x4fc   :  { %14078 = vst [vmem:[#allocation31_spill] sm:$0xff] %v11270_v2  ;;  %v11276_v39 = vsel %vm6049_vm15, %v14080_v53, %v14079_v13  ;;  %v14083_v47 = vld [vmem:[#allocation143_spill] sm:$0xff]  ;;  %v14085_v26 = vld [vmem:[#allocation118_spill] sm:$0xff]  ;;  %v14086_v36 = vld [vmem:[#allocation148_spill] sm:$0xff] }
 0x4fd   :  { %14081 = vst [vmem:[#allocation9_spill] sm:$0xff] %v11276_v39  ;;  %v11282_v45 = vsel %vm6049_vm15, %v14083_v47, %v14082_v17  ;;  %v11288_v27 = vsel %vm6049_vm15, %v14086_v36, %v14085_v26  ;;  %v14088_v7 = vld [vmem:[#allocation8_spill] sm:$0xff]  ;;  %v14089_v13 = vld [vmem:[#allocation185_spill] sm:$0xff]  ;;  %v14090_v46 = vld [vmem:[#allocation119_spill] sm:$0xff]  ;;  %v11299_v17 = vpop.xlane.xlu1 %3723  ;;  %v11301_v47 = vpop.xlane.xlu0 %3648  ;;  %v3646_v36 = vcvt.s32.f32 %v3644_v50 }
 0x4fe   :  { %14084 = vst [vmem:[#allocation33_spill] sm:$0xff] %v11282_v45  ;;  %14087 = vst [vmem:[#allocation11_spill] sm:$0xff] %v11288_v27  ;;  %vm3695_vm1 = vcmp.eq.f32.partialorder %v14088_v7, %v11240_v21  ;;  %v3674_v0 = vand.u32 65535, %v14089_v13  ;;  %v14091_v53 = vld [vmem:[#allocation153_spill] sm:$0xff]  ;;  %v3691_v45 = vcvt.s32.f32 %v3689_v56  ;;  %v14095_v26 = vld [vmem:[#allocation10_spill] sm:$0xff]  ;;  %vm3650_vm2 = vcmp.eq.f32.partialorder %v10651_v1, %v11301_v47 }
 0x4ff   :  { %v11297_v39 = vsel %vm6049_vm15, %v14091_v53, %v14090_v46  ;;  %14093 = vst [vmem:[#allocation13_spill] sm:$0xff] %v11299_v17  ;;  %14094 = vst [vmem:[#allocation43_spill] sm:$0xff] %v11301_v47  ;;  %v3719_v15 = vand.u32 65535, %v14095_v26  ;;  %v14096_v22 = vld [vmem:[#allocation123_spill] sm:$0xff]  ;;  %v14099_v13 = vld [vmem:[#allocation125_spill] sm:$0xff] }
 0x500   :  { %14092 = vst [vmem:[#allocation37_spill] sm:$0xff] %v11297_v39  ;;  %v14097_v27 = vld [vmem:[#allocation159_spill] sm:$0xff]  ;;  %v14100_v2 = vld [vmem:[#allocation165_spill] sm:$0xff]  ;;  %v14102_v53 = vld [vmem:[#allocation188_spill] sm:$0xff]  ;;  %v3696_v24 = vsel %vm3695_vm1, %v3691_v45, inf  ;;  %v3676_v45 = vcvt.s32.f32 %v3674_v0  ;;  %vm6114_vm1 = vcmp.eq.s32.totalorder %v13671_v25, 33 }
 0x501   :  { %v11308_v7 = vsel %vm6049_vm15, %v14097_v27, %v14096_v22  ;;  %v11314_v46 = vsel %vm6049_vm15, %v14100_v2, %v14099_v13  ;;  %v3704_v56 = vand.u32 65535, %v14102_v53  ;;  %v14103_v50 = vld [vmem:[#allocation129_spill] sm:$0xff]  ;;  %v14104_v39 = vld [vmem:[#allocation170_spill] sm:$0xff]  ;;  %v3651_v27 = vsel %vm3650_vm2, %v3646_v36, inf  ;;  %v14110_v13 = vld [vmem:[#allocation135_spill] sm:$0xff]  ;;  %3697 = vmin.xlane.f32.xlu1 %v3696_v24  ;;  %v11354_v24 = vpop.xlane.xlu0 %3678 }
 0x502   :  { %14098 = vst [vmem:[#allocation21_spill] sm:$0xff] %v11308_v7  ;;  %14101 = vst [vmem:[#allocation41_spill] sm:$0xff] %v11314_v46  ;;  %v11323_v26 = vsel %vm6049_vm15, %v14104_v39, %v14103_v50  ;;  %v14106_v22 = vld [vmem:[#allocation14_spill] sm:$0xff]  ;;  %v14108_v21 = vld [vmem:[#allocation173_spill] sm:$0xff]  ;;  %3652 = vmin.xlane.f32.xlu0 %v3651_v27  ;;  %v3721_v27 = vcvt.s32.f32 %v3719_v15 }
 0x503   :  { %14105 = vst [vmem:[#allocation20_spill] sm:$0xff] %v11323_v26  ;;  %v3749_v7 = vand.u32 65535, %v14106_v22  ;;  %v14107_v18 = vld [vmem:[#allocation130_spill] sm:$0xff]  ;;  %v14111_v1 = vld [vmem:[#allocation176_spill] sm:$0xff]  ;;  %14121 = vst [vmem:[#allocation28_spill] sm:$0xff] %v11354_v24 }
 0x504   :  { %v11330_v2 = vsel %vm6049_vm15, %v14108_v21, %v14107_v18  ;;  %v11336_v53 = vsel %vm6049_vm15, %v14111_v1, %v14110_v13  ;;  %v14113_v39 = vld [vmem:[#allocation12_spill] sm:$0xff]  ;;  %v14115_v50 = vld [vmem:[#allocation18_spill] sm:$0xff]  ;;  %v14117_v18 = vld [vmem:[#allocation139_spill] sm:$0xff]  ;;  %v11352_v13 = vpop.xlane.xlu1 %3753 }
 0x505   :  { %14109 = vst [vmem:[#allocation52_spill] sm:$0xff] %v11330_v2  ;;  %14112 = vst [vmem:[#allocation131_spill] sm:$0xff] %v11336_v53  ;;  %vm3725_vm3 = vcmp.eq.f32.partialorder %v14113_v39, %v11299_v17  ;;  %v14114_v36 = vld [vmem:[#allocation136_spill] sm:$0xff]  ;;  %v14118_v21 = vld [vmem:[#allocation179_spill] sm:$0xff]  ;;  %v3751_v46 = vcvt.s32.f32 %v3749_v7 }
 0x506   :  { %v11344_v22 = vsel %vm6049_vm15, %v14115_v50, %v14114_v36  ;;  %v11350_v2 = vsel %vm6049_vm15, %v14118_v21, %v14117_v18  ;;  %14120 = vst [vmem:[#allocation47_spill] sm:$0xff] %v11352_v13  ;;  %v14122_v1 = vld [vmem:[#allocation193_spill] sm:$0xff]  ;;  %v14124_v53 = vld [vmem:[#allocation180_spill] sm:$0xff]  ;;  %v3706_v50 = vcvt.s32.f32 %v3704_v56  ;;  %v3726_v21 = vsel %vm3725_vm3, %v3721_v27, inf  ;;  %v14128_v47 = vld [vmem:[#allocation198_spill] sm:$0xff] }
 0x507   :  { %14116 = vst [vmem:[#allocation132_spill] sm:$0xff] %v11344_v22  ;;  %14119 = vst [vmem:[#allocation26_spill] sm:$0xff] %v11350_v2  ;;  %v3734_v39 = vand.u32 65535, %v14122_v1  ;;  %v14123_v0 = vld [vmem:[#allocation141_spill] sm:$0xff]  ;;  %v14126_v36 = vld [vmem:[#allocation192_spill] sm:$0xff]  ;;  %v3764_v17 = vand.u32 65535, %v14128_v47  ;;  %3727 = vmin.xlane.f32.xlu1 %v3726_v21  ;;  %v11380_v47 = vpop.xlane.xlu0 %3708 }
 0x508   :  { %v11361_v26 = vsel %vm6049_vm15, %v14124_v53, %v14123_v0  ;;  %vm3680_vm4 = vcmp.eq.f32.partialorder %v14126_v36, %v11354_v24  ;;  %v14127_v22 = vld [vmem:[#allocation19_spill] sm:$0xff]  ;;  %v14129_v15 = vld [vmem:[#allocation144_spill] sm:$0xff]  ;;  %v2980_v53 = vcvt.f32.s32 %v14132_v9  ;;  %v14133_v0 = vld [vmem:[#allocation17_spill] sm:$0xff]  ;;  %v11378_v7 = vpop.xlane.xlu1 %3783  ;;  %14137 = vst [vmem:[#allocation177_spill] sm:$0xff] %v11380_v47 }
 0x509   :  { %14125 = vst [vmem:[#allocation60_spill] sm:$0xff] %v11361_v26  ;;  %v3779_v18 = vand.u32 65535, %v14127_v22  ;;  %v3681_v2 = vsel %vm3680_vm4, %v3676_v45, inf  ;;  %v11371_v1 = vsel %vm6049_vm15, %v14130_v60, %v14129_v15  ;;  %vm3755_vm5 = vcmp.eq.f32.partialorder %v14133_v0, %v11352_v13  ;;  %v14134_v56 = vld [vmem:[#allocation187_spill] sm:$0xff]  ;;  %14136 = vst [vmem:[#allocation53_spill] sm:$0xff] %v11378_v7  ;;  %v14138_v26 = vld [vmem:[#allocation197_spill] sm:$0xff] }
 0x50a   :  { %14131 = vst [vmem:[#allocation32_spill] sm:$0xff] %v11371_v1  ;;  %3682 = vmin.xlane.f32.xlu0 %v3681_v2  ;;  %v3809_v22 = vand.u32 65535, %v14134_v56  ;;  %v14135_v27 = vld [vmem:[#allocation195_spill] sm:$0xff]  ;;  %v3736_v36 = vcvt.s32.f32 %v3734_v39  ;;  %v3839_v24 = vand.u32 65535, %v14138_v26  ;;  %v14140_v1 = vld [vmem:[#allocation145_spill] sm:$0xff]  ;;  %v14141_v9 = vld [vmem:[#allocation184_spill] sm:$0xff]  ;;  %v3766_v43 = vcvt.s32.f32 %v3764_v17 }
 0x50b   :  { %v2965_v45 = vcvt.f32.s32 %v14135_v27  ;;  %v14139_v60 = vld [vmem:[#allocation203_spill] sm:$0xff]  ;;  %v11388_v2 = vsel %vm6049_vm15, %v14141_v9, %v14140_v1  ;;  %v14143_v21 = vld [vmem:[#allocation149_spill] sm:$0xff]  ;;  %v14144_v0 = vld [vmem:[#allocation186_spill] sm:$0xff]  ;;  %v3781_v39 = vcvt.s32.f32 %v3779_v18  ;;  %v3756_v63 = vsel %vm3755_vm5, %v3751_v46, inf  ;;  %v11413_v46 = vpop.xlane.xlu0 %3738 }
 0x50c   :  { %v3794_v15 = vand.u32 65535, %v14139_v60  ;;  %14142 = vst [vmem:[#allocation34_spill] sm:$0xff] %v11388_v2  ;;  %v11394_v56 = vsel %vm6049_vm15, %v14144_v0, %v14143_v21  ;;  %v14146_v27 = vld [vmem:[#allocation196_spill] sm:$0xff]  ;;  %v11403_v1 = vsel %vm6049_vm15, %v14149_v41, %v14148_v20  ;;  %v11405_v9 = vshll.u32 %v2980_v53, 16  ;;  %3757 = vmin.xlane.f32.xlu1 %v3756_v63  ;;  %v14151_v21 = vld [vmem:[#allocation3_spill] sm:$0xff]  ;;  %14153 = vst [vmem:[#allocation39_spill] sm:$0xff] %v11413_v46 }
 0x50d   :  { %14145 = vst [vmem:[#allocation68_spill] sm:$0xff] %v11394_v56  ;;  %vm3710_vm6 = vcmp.eq.f32.partialorder %v14146_v27, %v11380_v47  ;;  %v14147_v13 = vld [vmem:[#allocation200_spill] sm:$0xff]  ;;  %14150 = vst [vmem:[#allocation38_spill] sm:$0xff] %v11403_v1  ;;  %vm3785_vm7 = vcmp.eq.f32.partialorder %v14151_v21, %v11378_v7  ;;  %v3811_v0 = vcvt.s32.f32 %v3809_v22  ;;  %v11409_v18 = vshll.u32 %v2965_v45, 16  ;;  %v14154_v27 = vld [vmem:[#allocation207_spill] sm:$0xff] }
 0x50e   :  { %v3010_v26 = vcvt.f32.s32 %v14147_v13  ;;  %v3711_v60 = vsel %vm3710_vm6, %v3706_v50, inf  ;;  %v11411_v13 = vpop.xlane.xlu1 %3813  ;;  %v3841_v17 = vcvt.s32.f32 %v3839_v24  ;;  %v3796_v50 = vcvt.s32.f32 %v3794_v15  ;;  %v14155_v63 = vld [vmem:[#allocation202_spill] sm:$0xff]  ;;  %v14157_v1 = vld [vmem:[#allocation211_spill] sm:$0xff]  ;;  %v14158_v15 = vld [vmem:[#allocation216_spill] sm:$0xff] }
 0x50f   :  { %3712 = vmin.xlane.f32.xlu0 %v3711_v60  ;;  %14152 = vst [vmem:[#allocation58_spill] sm:$0xff] %v11411_v13  ;;  %v3824_v56 = vand.u32 65535, %v14154_v27  ;;  %v2995_v41 = vcvt.f32.s32 %v10728_v48  ;;  %v3040_v20 = vcvt.f32.s32 %v10746_v8  ;;  %vm3740_vm8 = vcmp.eq.f32.partialorder %v14155_v63, %v11413_v46  ;;  %v14156_v53 = vld [vmem:[#allocation206_spill] sm:$0xff]  ;;  %v14159_v48 = vld [vmem:[#allocation191_spill] sm:$0xff] }
 0x510   :  { %v3869_v60 = vand.u32 65535, %v14156_v53  ;;  %v11421_v22 = vshll.u32 %v3010_v26, 16  ;;  %v3786_v45 = vsel %vm3785_vm7, %v3781_v39, inf  ;;  %v3741_v21 = vsel %vm3740_vm8, %v3736_v36, inf  ;;  %v14160_v8 = vld [vmem:[#allocation214_spill] sm:$0xff]  ;;  %v11433_v36 = vpop.xlane.xlu0 %3768 }
 0x511   :  { %v3854_v2 = vand.u32 65535, %v14157_v1  ;;  %v3025_v24 = vcvt.f32.s32 %v10763_v59  ;;  %v3070_v47 = vcvt.f32.s32 %v14158_v15  ;;  %3787 = vmin.xlane.f32.xlu1 %v3786_v45  ;;  %vm3815_vm9 = vcmp.eq.f32.partialorder %v14159_v48, %v11411_v13  ;;  %v14162_v1 = vld [vmem:[#allocation218_spill] sm:$0xff] }
 0x512   :  { %v3899_v27 = vand.u32 65535, %v14160_v8  ;;  %v3055_v63 = vcvt.f32.s32 %v10794_v37  ;;  %v3100_v26 = vcvt.f32.s32 %v10805_v31  ;;  %v11431_v53 = vpop.xlane.xlu1 %3843  ;;  %v3826_v39 = vcvt.s32.f32 %v3824_v56  ;;  %v14164_v56 = vld [vmem:[#allocation201_spill] sm:$0xff] }
 0x513   :  { %3742 = vmin.xlane.f32.xlu0 %v3741_v21  ;;  %14161 = vst [vmem:[#allocation76_spill] sm:$0xff] %v11431_v53  ;;  %v3884_v59 = vand.u32 65535, %v14162_v1  ;;  %v11436_v46 = vshll.u32 %v2995_v41, 16  ;;  %v11438_v45 = vshll.u32 %v3040_v20, 16  ;;  %v14163_v21 = vld [vmem:[#allocation205_spill] sm:$0xff]  ;;  %v3871_v15 = vcvt.s32.f32 %v3869_v60 }
 0x514   :  { %vm3770_vm10 = vcmp.eq.f32.partialorder %v14163_v21, %v11433_v36  ;;  %v3085_v48 = vcvt.f32.s32 %v10813_v16  ;;  %v3816_v37 = vsel %vm3815_vm9, %v3811_v0, inf  ;;  %v11443_v31 = vcvt.s32.f32 %v3854_v2 }
 0x515   :  { %v3771_v8 = vsel %vm3770_vm10, %v3766_v43, inf  ;;  %v11445_v13 = vshll.u32 %v3025_v24, 16  ;;  %v11447_v7 = vshll.u32 %v3070_v47, 16  ;;  %3817 = vmin.xlane.f32.xlu1 %v3816_v37  ;;  %vm3845_vm11 = vcmp.eq.f32.partialorder %v14164_v56, %v11431_v53  ;;  %v11458_v43 = vpop.xlane.xlu0 %3798 }
 0x516   :  { %v3901_v41 = vcvt.s32.f32 %v3899_v27  ;;  %v11451_v20 = vshll.u32 %v3055_v63, 16  ;;  %v11453_v1 = vshll.u32 %v3100_v26, 16  ;;  %v3130_v16 = vcvt.f32.s32 %v10821_v40  ;;  %v11456_v0 = vpop.xlane.xlu1 %3873  ;;  %14166 = vst [vmem:[#allocation63_spill] sm:$0xff] %v11458_v43  ;;  %v14167_v27 = vld [vmem:[#allocation210_spill] sm:$0xff] }
 0x517   :  { %3772 = vmin.xlane.f32.xlu0 %v3771_v8  ;;  %14165 = vst [vmem:[#allocation42_spill] sm:$0xff] %v11456_v0  ;;  %v11460_v2 = vcvt.s32.f32 %v3884_v59  ;;  %v3115_v47 = vcvt.f32.s32 %v10829_v30  ;;  %v3340_v60 = vcvt.f32.s32 %v10871_v29  ;;  %v3160_v24 = vcvt.f32.s32 %v10837_v55  ;;  %v14168_v30 = vld [vmem:[#allocation209_spill] sm:$0xff] }
 0x518   :  { %vm3800_vm12 = vcmp.eq.f32.partialorder %v14167_v27, %v11458_v43  ;;  %v11467_v63 = vshll.u32 %v3085_v48, 16  ;;  %v3370_v26 = vcvt.f32.s32 %v10883_v42  ;;  %v3846_v40 = vsel %vm3845_vm11, %v3841_v17, inf }
 0x519   :  { %v3801_v21 = vsel %vm3800_vm12, %v3796_v50, inf  ;;  %v3145_v37 = vcvt.f32.s32 %v10845_v5  ;;  %v3400_v59 = vcvt.f32.s32 %v10890_v28  ;;  %v3190_v8 = vcvt.f32.s32 %v10851_v54  ;;  %3847 = vmin.xlane.f32.xlu1 %v3846_v40  ;;  %v11479_v42 = vpop.xlane.xlu0 %3828  ;;  %v14170_v54 = vld [vmem:[#allocation213_spill] sm:$0xff]  ;;  %v4687_v50 = vld [vmem:[%s13359_s1 + $0x8] sm:$0xff] }
 0x51a   :  { %vm3875_vm13 = vcmp.eq.f32.partialorder %v14168_v30, %v11456_v0  ;;  %v11475_v55 = vshll.u32 %v3130_v16, 16  ;;  %v3430_v29 = vcvt.f32.s32 %v10903_v61  ;;  %v3175_v48 = vcvt.f32.s32 %v10856_v52  ;;  %14169 = vst [vmem:[#allocation137_spill] sm:$0xff] %v11479_v42  ;;  %v11507_v30 = vpop.xlane.xlu1 %3903 }
 0x51b   :  { %3802 = vmin.xlane.f32.xlu0 %v3801_v21  ;;  %v11481_v17 = vshll.u32 %v3115_v47, 16  ;;  %v11483_v5 = vshll.u32 %v3340_v60, 16  ;;  %v11485_v28 = vshll.u32 %v3160_v24, 16  ;;  %vm3830_vm14 = vcmp.eq.f32.partialorder %v14170_v54, %v11479_v42  ;;  %14171 = vst [vmem:[#allocation142_spill] sm:$0xff] %v11507_v30 }
 0x51c   :  { %v11492_v56 = vshll.u32 %v3370_v26, 16  ;;  %v3460_v61 = vcvt.f32.s32 %v10915_v49  ;;  %v3876_v52 = vsel %vm3875_vm13, %v3871_v15, inf  ;;  %v3831_v16 = vsel %vm3830_vm14, %v3826_v39, inf }
 0x51d   :  { %v11495_v27 = vshll.u32 %v3145_v37, 16  ;;  %v11497_v47 = vshll.u32 %v3400_v59, 16  ;;  %v11499_v60 = vshll.u32 %v3190_v8, 16  ;;  %v3220_v24 = vcvt.f32.s32 %v10861_v58  ;;  %3877 = vmin.xlane.f32.xlu1 %v3876_v52  ;;  %v11509_v49 = vpop.xlane.xlu0 %3858  ;;  %v14173_v37 = vld [vmem:[#allocation23_spill] sm:$0xff]  ;;  %v14174_v58 = vld [vmem:[#allocation217_spill] sm:$0xff] }
 0x51e   :  { %v11502_v40 = vshll.u32 %v3430_v29, 16  ;;  %v11504_v21 = vshll.u32 %v3175_v48, 16  ;;  %v3490_v26 = vcvt.f32.s32 %v10931_v6  ;;  %14172 = vst [vmem:[#allocation178_spill] sm:$0xff] %v11509_v49  ;;  %v4751_v39 = vmul.f32 %v4687_v50, %v4687_v50  ;;  %v4686_v6 = vld [vmem:[%s13359_s1] sm:$0xff]  ;;  %v4689_v59 = vld [vmem:[%s13359_s1 + $0x18] sm:$0xff] }
 0x51f   :  { %3832 = vmin.xlane.f32.xlu0 %v3831_v16  ;;  %v3205_v15 = vcvt.f32.s32 %v10866_v10  ;;  %vm3905_vm2 = vcmp.eq.f32.partialorder %v14173_v37, %v11507_v30  ;;  %vm3860_vm3 = vcmp.eq.f32.partialorder %v14174_v58, %v11509_v49  ;;  %vm4814_vm4 = vcmask 130048   ;;  %v2978_v58 = vpop.xlane.xlu1 %2977 }
 0x520   :  { %v11523_v8 = vshll.u32 %v3460_v61, 16  ;;  %v3520_v29 = vcvt.f32.s32 %v10943_v11  ;;  %v3906_v10 = vsel %vm3905_vm2, %v3901_v41, inf  ;;  %v3861_v48 = vsel %vm3860_vm3, %v11443_v31, inf }
 0x521   :  { %v11527_v54 = vshll.u32 %v3220_v24, 16  ;;  %v3250_v50 = vcvt.f32.s32 %v10873_v62  ;;  %v3550_v52 = vcvt.f32.s32 %v10966_v38  ;;  %v3235_v16 = vcvt.f32.s32 %v10878_v44  ;;  %3907 = vmin.xlane.f32.xlu1 %v3906_v10  ;;  %v11534_v61 = vpop.xlane.xlu0 %3888  ;;  %v14176_v38 = vld [vmem:[#allocation29_spill] sm:$0xff]  ;;  %v4688_v44 = vld [vmem:[%s13359_s1 + $0x10] sm:$0xff] }
 0x522   :  { %v11532_v37 = vshll.u32 %v3490_v26, 16  ;;  %14175 = vst [vmem:[#allocation44_spill] sm:$0xff] %v11534_v61  ;;  %v4818_v11 = vsel %vm4814_vm4, %v4751_v39, 0.0  ;;  %v4750_v41 = vmul.f32 %v4686_v6, %v4686_v6  ;;  %v4753_v49 = vmul.f32 %v4689_v59, %v4689_v59  ;;  %v4691_v26 = vld [vmem:[%s13359_s1 + $0x28] sm:$0xff] }
 0x523   :  { %3862 = vmin.xlane.f32.xlu0 %v3861_v48  ;;  %v11537_v31 = vshll.u32 %v3205_v15, 16  ;;  %v3580_v24 = vcvt.f32.s32 %v11032_v12  ;;  %v2979_v62 = vcvt.f32.s32 %v2978_v58  ;;  %vm3890_vm5 = vcmp.eq.f32.partialorder %v14176_v38, %v11534_v61 }
 0x524   :  { %v11548_v10 = vshll.u32 %v3520_v29, 16  ;;  %v3280_v39 = vcvt.f32.s32 %v10885_v35  ;;  %v3265_v15 = vcvt.f32.s32 %v10892_v33  ;;  %v3891_v12 = vsel %vm3890_vm5, %v11460_v2, inf  ;;  %v4690_v29 = vld [vmem:[%s13359_s1 + $0x20] sm:$0xff]  ;;  %v4693_v35 = vld [vmem:[%s13359_s1 + $0x38] sm:$0xff]  ;;  %v3008_v33 = vpop.xlane.xlu1 %3007 }
 0x525   :  { %v11553_v6 = vshll.u32 %v3250_v50, 16  ;;  %v11555_v59 = vshll.u32 %v3550_v52, 16  ;;  %v11557_v48 = vshll.u32 %v3235_v16, 16  ;;  %v2982_v58 = vadd.s32 %v11405_v9, %v2979_v62  ;;  %4819 = vadd.xlane.f32.xlu1 %v4818_v11  ;;  %v2963_v2 = vpop.xlane.xlu0 %2962 }
 0x526   :  { %v4815_v50 = vsel %vm4814_vm4, %v4750_v41, 0.0  ;;  %v4824_v52 = vsel %vm4814_vm4, %v4753_v49, 0.0  ;;  %v4752_v16 = vmul.f32 %v4688_v44, %v4688_v44  ;;  %v4755_v38 = vmul.f32 %v4691_v26, %v4691_v26  ;;  %v4692_v49 = vld [vmem:[%s13359_s1 + $0x30] sm:$0xff] }
 0x527   :  { %3892 = vmin.xlane.f32.xlu0 %v3891_v12  ;;  %v11568_v61 = vshll.u32 %v3580_v24, 16  ;;  %v6116_v9 = vcvt.s32.f32 %v2982_v58  ;;  %v3009_v11 = vcvt.f32.s32 %v3008_v33  ;;  %v2964_v62 = vcvt.f32.s32 %v2963_v2 }
 0x528   :  { %v11570_v12 = vshll.u32 %v3280_v39, 16  ;;  %v11572_v30 = vshll.u32 %v3265_v15, 16  ;;  %v4754_v42 = vmul.f32 %v4690_v29, %v4690_v29  ;;  %v4757_v0 = vmul.f32 %v4693_v35, %v4693_v35  ;;  %v3038_v26 = vpop.xlane.xlu1 %3037  ;;  %v4695_v15 = vld [vmem:[%s13359_s1 + $0x48] sm:$0xff] }
 0x529   :  { %v3610_v43 = vcvt.f32.s32 %v11084_v23  ;;  %v3012_v53 = vadd.s32 %v11421_v22, %v3009_v11  ;;  %v2967_v41 = vadd.s32 %v11409_v18, %v2964_v62  ;;  %4825 = vadd.xlane.f32.xlu1 %v4824_v52  ;;  %v11583_v24 = vsel %vm6114_vm1, %v6116_v9, %v10964_v4  ;;  %v2993_v39 = vpop.xlane.xlu0 %2992 }
 0x52a   :  { %v3310_v44 = vcvt.f32.s32 %v10897_v3  ;;  %vm3914_vm6 = vcmp.eq.s32.totalorder %v13671_v25, %v2982_v58  ;;  %v4821_v22 = vsel %vm4814_vm4, %v4752_v16, 0.0  ;;  %v4830_v18 = vsel %vm4814_vm4, %v4755_v38, 0.0 }
 0x52b   :  { %4816 = vadd.xlane.f32.xlu0 %v4815_v50  ;;  %v6118_v29 = vcvt.s32.f32 %v3012_v53  ;;  %v6115_v35 = vcvt.s32.f32 %v2967_v41  ;;  %v3039_v33 = vcvt.f32.s32 %v3038_v26  ;;  %v2994_v2 = vcvt.f32.s32 %v2993_v39  ;;  %v4694_v26 = vld [vmem:[%s13359_s1 + $0x40] sm:$0xff] }
 0x52c   :  { %vm3913_vm7 = vcmp.eq.s32.totalorder %v13671_v25, %v2967_v41  ;;  %v4827_v4 = vsel %vm4814_vm4, %v4754_v42, 0.0  ;;  %v4836_v50 = vsel %vm4814_vm4, %v4757_v0, 0.0  ;;  %v4756_v52 = vmul.f32 %v4692_v49, %v4692_v49  ;;  %v4697_v42 = vld [vmem:[%s13359_s1 + $0x58] sm:$0xff] }
 0x52d   :  { %v3042_v9 = vadd.s32 %v11438_v45, %v3039_v33  ;;  %v2997_v16 = vadd.s32 %v11436_v46, %v2994_v2  ;;  %v13597_v38 = vmov 0.0   ;;  %4831 = vadd.xlane.f32.xlu1 %v4830_v18  ;;  %v4759_v62 = vmul.f32 %v4695_v15, %v4695_v15  ;;  %v3068_v46 = vpop.xlane.xlu1 %3067  ;;  %v3023_v0 = vpop.xlane.xlu0 %3022 }
 0x52e   :  { %v6574_v11 = vsel %vm3913_vm7, 1.0, %v13597_v38  ;;  %v6575_v45 = vsel %vm3914_vm6, 1.0, %v13597_v38  ;;  %vm3916_vm8 = vcmp.eq.s32.totalorder %v13671_v25, %v3012_v53  ;;  %v11612_v41 = vsel %vm6114_vm1, %v6115_v35, %v10972_v51 }
 0x52f   :  { %4822 = vadd.xlane.f32.xlu0 %v4821_v22  ;;  %7434 = vmatprep.mubr.msk.f32.mxu1 %vm104_vm0, %v6574_v11  ;;  %v11617_v49 = vsel %vm6114_vm1, %v6118_v29, %v10978_v14  ;;  %v6120_v39 = vcvt.s32.f32 %v3042_v9  ;;  %v6117_v22 = vcvt.s32.f32 %v2997_v16  ;;  %v3069_v58 = vcvt.f32.s32 %v3068_v46  ;;  %v4696_v29 = vld [vmem:[%s13359_s1 + $0x50] sm:$0xff] }
 0x530   :  { %14177 = vst [vmem:[#allocation82_spill] sm:$0xff] %v11617_v49  ;;  %7435 = vmatmul.mubr.msk.f32.vlgmr.msra.gmra.mrb[96].mxu1 %vm104_vm0, %v6575_v45  ;;  %v3024_v18 = vcvt.f32.s32 %v3023_v0  ;;  %vm3915_vm9 = vcmp.eq.s32.totalorder %v13671_v25, %v2997_v16  ;;  %v4833_v15 = vsel %vm4814_vm4, %v4756_v52, 0.0  ;;  %v4758_v33 = vmul.f32 %v4694_v26, %v4694_v26 }
 0x531   :  { %v4761_v2 = vmul.f32 %v4697_v42, %v4697_v42  ;;  %v3072_v51 = vadd.s32 %v11447_v7, %v3069_v58  ;;  %v6576_v11 = vsel %vm3915_vm9, 1.0, %v13597_v38  ;;  %4837 = vadd.xlane.f32.xlu1 %v4836_v50  ;;  %v4842_v14 = vsel %vm4814_vm4, %v4759_v62, 0.0  ;;  %v3098_v16 = vpop.xlane.xlu1 %3097  ;;  %v3053_v7 = vpop.xlane.xlu0 %3052 }
 0x532   :  { %v3027_v35 = vadd.s32 %v11445_v13, %v3024_v18  ;;  %7437 = vmatprep.mubr.msk.f32.mxu1 %vm104_vm0, %v6576_v11  ;;  %v6577_v52 = vsel %vm3916_vm8, 1.0, %v13597_v38  ;;  %vm3918_vm10 = vcmp.eq.s32.totalorder %v13671_v25, %v3042_v9  ;;  %v4699_v13 = vld [vmem:[%s13359_s1 + $0x68] sm:$0xff]  ;;  %v11645_v50 = vsel %vm6114_vm1, %v6120_v39, %v10996_v32 }
 0x533   :  { %4828 = vadd.xlane.f32.xlu0 %v4827_v4  ;;  %v11640_v4 = vsel %vm6114_vm1, %v6117_v22, %v10990_v19  ;;  %14179 = vst [vmem:[#allocation69_spill] sm:$0xff] %v11645_v50  ;;  %v6122_v62 = vcvt.s32.f32 %v3072_v51  ;;  %v3099_v26 = vcvt.f32.s32 %v3098_v16  ;;  %v3054_v42 = vcvt.f32.s32 %v3053_v7  ;;  %v14200_v50 = vld [vmem:[#allocation162_spill] sm:$0xff] }
 0x534   :  { %14178 = vst [vmem:[#allocation48_spill] sm:$0xff] %v11640_v4  ;;  %v6119_v53 = vcvt.s32.f32 %v3027_v35  ;;  %7438 = vmatmul.mubr.msk.f32.gmra.mrb[98].mxu1 %vm104_vm0, %v6577_v52  ;;  %vm3917_vm11 = vcmp.eq.s32.totalorder %v13671_v25, %v3027_v35  ;;  %v4839_v45 = vsel %vm4814_vm4, %v4758_v33, 0.0  ;;  %v4848_v46 = vsel %vm4814_vm4, %v4761_v2, 0.0 }
 0x535   :  { %v4760_v0 = vmul.f32 %v4696_v29, %v4696_v29  ;;  %v3102_v19 = vadd.s32 %v11453_v1, %v3099_v26  ;;  %v3057_v22 = vadd.s32 %v11451_v20, %v3054_v42  ;;  %v6578_v32 = vsel %vm3917_vm11, 1.0, %v13597_v38  ;;  %4843 = vadd.xlane.f32.xlu1 %v4842_v14  ;;  %v3128_v58 = vpop.xlane.xlu1 %3127  ;;  %v3083_v33 = vpop.xlane.xlu0 %3082  ;;  %v4698_v1 = vld [vmem:[%s13359_s1 + $0x60] sm:$0xff]  ;;  %v4701_v14 = vld [vmem:[%s13359_s1 + $0x78] sm:$0xff]  ;;  %v14184_v26 = vld [vmem:[#allocation51_spill] sm:$0xff] }
 0x536   :  { %v4763_v39 = vmul.f32 %v4699_v13, %v4699_v13  ;;  %7440 = vmatprep.mubr.msk.f32.mxu1 %vm104_vm0, %v6578_v32  ;;  %v6579_v18 = vsel %vm3918_vm10, 1.0, %v13597_v38  ;;  %vm3920_vm12 = vcmp.eq.s32.totalorder %v13671_v25, %v3072_v51  ;;  %v11665_v20 = vsel %vm6114_vm1, %v6119_v53, %v11002_v34 }
 0x537   :  { %4834 = vadd.xlane.f32.xlu0 %v4833_v15  ;;  %14180 = vst [vmem:[#allocation49_spill] sm:$0xff] %v11665_v20  ;;  %v11670_v15 = vsel %vm6114_vm1, %v6122_v62, %v11010_v57  ;;  %v6124_v2 = vcvt.s32.f32 %v3102_v19  ;;  %v6121_v9 = vcvt.s32.f32 %v3057_v22  ;;  %v3129_v35 = vcvt.f32.s32 %v3128_v58  ;;  %v14182_v62 = vld [vmem:[#allocation46_spill] sm:$0xff] }
 0x538   :  { %14181 = vst [vmem:[#allocation90_spill] sm:$0xff] %v11670_v15  ;;  %7441 = vmatmul.mubr.msk.f32.gmra.mrb[100].mxu1 %vm104_vm0, %v6579_v18  ;;  %v3084_v11 = vcvt.f32.s32 %v3083_v33  ;;  %v11678_v29 = vshll.u32 %v3610_v43, 16  ;;  %v11682_v34 = vshll.u32 %v3310_v44, 16  ;;  %vm3919_vm13 = vcmp.eq.s32.totalorder %v13671_v25, %v3057_v22  ;;  %v14186_v22 = vld [vmem:[#allocation25_spill] sm:$0xff]  ;;  %v14188_v18 = vld [vmem:[#allocation30_spill] sm:$0xff] }
 0x539   :  { %v4845_v57 = vsel %vm4814_vm4, %v4760_v0, 0.0  ;;  %v6580_v52 = vsel %vm3919_vm13, 1.0, %v13597_v38  ;;  %4849 = vadd.xlane.f32.xlu1 %v4848_v46  ;;  %v4854_v7 = vsel %vm4814_vm4, %v4763_v39, 0.0  ;;  %v4762_v23 = vmul.f32 %v4698_v1, %v4698_v1  ;;  %v3158_v43 = vpop.xlane.xlu1 %3157  ;;  %v3113_v44 = vpop.xlane.xlu0 %3112  ;;  %v4703_v0 = vld [vmem:[%s13359_s1 + $0x88] sm:$0xff]  ;;  %v14187_v39 = vld [vmem:[#allocation158_spill] sm:$0xff] }
 0x53a   :  { %v11687_v16 = vadd.s32 %v11467_v63, %v3084_v11  ;;  %7443 = vmatprep.mubr.msk.f32.mxu1 %vm104_vm0, %v6580_v52  ;;  %v6581_v3 = vsel %vm3920_vm12, 1.0, %v13597_v38  ;;  %v4765_v13 = vmul.f32 %v4701_v14, %v4701_v14  ;;  %v4700_v63 = vld [vmem:[%s13359_s1 + $0x70] sm:$0xff]  ;;  %v11701_v53 = vsel %vm6114_vm1, %v6121_v9, %v14182_v62 }
 0x53b   :  { %4840 = vadd.xlane.f32.xlu0 %v4839_v45  ;;  %14183 = vst [vmem:[#allocation54_spill] sm:$0xff] %v11701_v53  ;;  %v11706_v42 = vsel %vm6114_vm1, %v6124_v2, %v14184_v26  ;;  %v11709_v45 = vadd.s32 %v11475_v55, %v3129_v35  ;;  %v3159_v51 = vcvt.f32.s32 %v3158_v43  ;;  %v3114_v46 = vcvt.f32.s32 %v3113_v44  ;;  %v14189_v55 = vld [vmem:[#allocation35_spill] sm:$0xff] }
 0x53c   :  { %14185 = vst [vmem:[#allocation74_spill] sm:$0xff] %v11706_v42  ;;  %7444 = vmatmul.mubr.msk.f32.gmra.mrb[102].mxu1 %vm104_vm0, %v6581_v3  ;;  %vm3922_vm14 = vcmp.eq.s32.totalorder %v13671_v25, %v3102_v19  ;;  %v3295_v32 = vcvt.f32.s32 %v14186_v22  ;;  %v3640_v58 = vcvt.f32.s32 %v14187_v39  ;;  %v3325_v33 = vcvt.f32.s32 %v14188_v18 }
 0x53d   :  { %vm3921_vm2 = vcmp.eq.s32.totalorder %v13671_v25, %v11687_v16  ;;  %v3355_v1 = vcvt.f32.s32 %v14189_v55  ;;  %v11723_v2 = vadd.s32 %v11481_v17, %v3114_v46  ;;  %4855 = vadd.xlane.f32.xlu1 %v4854_v7  ;;  %v4764_v9 = vmul.f32 %v4700_v63, %v4700_v63  ;;  %v3188_v35 = vpop.xlane.xlu1 %3187  ;;  %v3143_v14 = vpop.xlane.xlu0 %3142  ;;  %v4702_v7 = vld [vmem:[%s13359_s1 + $0x80] sm:$0xff]  ;;  %v14190_v55 = vld [vmem:[#allocation172_spill] sm:$0xff] }
 0x53e   :  { %v6582_v19 = vsel %vm3921_vm2, 1.0, %v13597_v38  ;;  %v6583_v11 = vsel %vm3922_vm14, 1.0, %v13597_v38  ;;  %v4851_v52 = vsel %vm4814_vm4, %v4762_v23, 0.0  ;;  %v4860_v43 = vsel %vm4814_vm4, %v4765_v13, 0.0  ;;  %v4705_v23 = vld [vmem:[%s13359_s1 + $0x98] sm:$0xff] }
 0x53f   :  { %4846 = vadd.xlane.f32.xlu0 %v4845_v57  ;;  %7446 = vmatprep.mubr.msk.f32.mxu1 %vm104_vm0, %v6582_v19  ;;  %v4767_v3 = vmul.f32 %v4703_v0, %v4703_v0  ;;  %v11731_v44 = vadd.s32 %v11485_v28, %v3159_v51  ;;  %v3189_v17 = vcvt.f32.s32 %v3188_v35  ;;  %v3144_v57 = vcvt.f32.s32 %v3143_v14  ;;  %v14191_v19 = vld [vmem:[#allocation36_spill] sm:$0xff] }
 0x540   :  { %7447 = vmatmul.mubr.msk.f32.gmra.mrb[104].mxu1 %vm104_vm0, %v6583_v11  ;;  %vm3924_vm3 = vcmp.eq.s32.totalorder %v13671_v25, %v11709_v45  ;;  %v11742_v13 = vshll.u32 %v3295_v32, 16  ;;  %v11744_v63 = vshll.u32 %v3640_v58, 16  ;;  %v11746_v28 = vshll.u32 %v3325_v33, 16  ;;  %v14192_v35 = vld [vmem:[#allocation40_spill] sm:$0xff] }
 0x541   :  { %vm3923_vm5 = vcmp.eq.s32.totalorder %v13671_v25, %v11723_v2  ;;  %v11750_v62 = vshll.u32 %v3355_v1, 16  ;;  %v11753_v26 = vadd.s32 %v11495_v27, %v3144_v57  ;;  %4861 = vadd.xlane.f32.xlu1 %v4860_v43  ;;  %v4857_v46 = vsel %vm4814_vm4, %v4764_v9, 0.0  ;;  %v3173_v22 = vpop.xlane.xlu0 %3172  ;;  %v4704_v27 = vld [vmem:[%s13359_s1 + $0x90] sm:$0xff] }
 0x542   :  { %v6584_v51 = vsel %vm3923_vm5, 1.0, %v13597_v38  ;;  %v6585_v0 = vsel %vm3924_vm3, 1.0, %v13597_v38  ;;  %v4866_v32 = vsel %vm4814_vm4, %v4767_v3, 0.0  ;;  %v4766_v39 = vmul.f32 %v4702_v7, %v4702_v7  ;;  %v14194_v3 = vld [vmem:[#allocation45_spill] sm:$0xff] }
 0x543   :  { %4852 = vadd.xlane.f32.xlu0 %v4851_v52  ;;  %7449 = vmatprep.mubr.msk.f32.mxu1 %vm104_vm0, %v6584_v51  ;;  %v4769_v58 = vmul.f32 %v4705_v23, %v4705_v23  ;;  %v11764_v18 = vadd.s32 %v11499_v60, %v3189_v17  ;;  %v3174_v33 = vcvt.f32.s32 %v3173_v22  ;;  %vm3925_vm6 = vcmp.eq.s32.totalorder %v13671_v25, %v11753_v26  ;;  %v4707_v60 = vld [vmem:[%s13359_s1 + $0xa8] sm:$0xff]  ;;  %v14195_v23 = vld [vmem:[#allocation50_spill] sm:$0xff] }
 0x544   :  { %7450 = vmatmul.mubr.msk.f32.gmra.mrb[106].mxu1 %vm104_vm0, %v6585_v0  ;;  %vm3926_vm7 = vcmp.eq.s32.totalorder %v13671_v25, %v11731_v44  ;;  %v3670_v1 = vcvt.f32.s32 %v14190_v55  ;;  %v3385_v9 = vcvt.f32.s32 %v14191_v19  ;;  %v3415_v11 = vcvt.f32.s32 %v14192_v35  ;;  %v14193_v52 = vld [vmem:[#allocation127_spill] sm:$0xff]  ;;  %v3218_v0 = vpop.xlane.xlu1 %3217 }
 0x545   :  { %v6586_v14 = vsel %vm3925_vm6, 1.0, %v13597_v38  ;;  %v3700_v43 = vcvt.f32.s32 %v14193_v52  ;;  %v3445_v17 = vcvt.f32.s32 %v14194_v3  ;;  %v11781_v57 = vadd.s32 %v11504_v21, %v3174_v33  ;;  %4867 = vadd.xlane.f32.xlu1 %v4866_v32  ;;  %v4709_v32 = vld [vmem:[%s13359_s1 + $0xb8] sm:$0xff] }
 0x546   :  { %7452 = vmatprep.mubr.msk.f32.mxu1 %vm104_vm0, %v6586_v14  ;;  %v4768_v7 = vmul.f32 %v4704_v27, %v4704_v27  ;;  %v3475_v51 = vcvt.f32.s32 %v14195_v23  ;;  %v6587_v22 = vsel %vm3926_vm7, 1.0, %v13597_v38  ;;  %v4863_v55 = vsel %vm4814_vm4, %v4766_v39, 0.0  ;;  %v14196_v27 = vld [vmem:[#allocation13_spill] sm:$0xff] }
 0x547   :  { %4858 = vadd.xlane.f32.xlu0 %v4857_v46  ;;  %v4872_v19 = vsel %vm4814_vm4, %v4769_v58, 0.0  ;;  %v3219_v35 = vcvt.f32.s32 %v3218_v0  ;;  %vm3927_vm8 = vcmp.eq.s32.totalorder %v13671_v25, %v11781_v57  ;;  %vm3928_vm9 = vcmp.eq.s32.totalorder %v13671_v25, %v11764_v18  ;;  %v4706_v46 = vld [vmem:[%s13359_s1 + $0xa0] sm:$0xff] }
 0x548   :  { %7453 = vmatmul.mubr.msk.f32.gmra.mrb[108].mxu1 %vm104_vm0, %v6587_v22  ;;  %v4771_v21 = vmul.f32 %v4707_v60, %v4707_v60  ;;  %v11799_v39 = vshll.u32 %v3670_v1, 16  ;;  %v11801_v58 = vshll.u32 %v3385_v9, 16  ;;  %v3730_v33 = vcvt.f32.s32 %v14196_v27  ;;  %v4708_v60 = vld [vmem:[%s13359_s1 + $0xb0] sm:$0xff]  ;;  %v4711_v9 = vld [vmem:[%s13359_s1 + $0xc8] sm:$0xff]  ;;  %v4710_v0 = vld [vmem:[%s13359_s1 + $0xc0] sm:$0xff] }
 0x549   :  { %v6588_v14 = vsel %vm3927_vm8, 1.0, %v13597_v38  ;;  %v11808_v52 = vshll.u32 %v3415_v11, 16  ;;  %v11810_v3 = vshll.u32 %v3700_v43, 16  ;;  %v11812_v23 = vshll.u32 %v3445_v17, 16  ;;  %v3203_v17 = vpop.xlane.xlu0 %3202  ;;  %4873 = vadd.xlane.f32.xlu1 %v4872_v19  ;;  %v4713_v19 = vld [vmem:[%s13359_s1 + $0xd8] sm:$0xff] }
 0x54a   :  { %7455 = vmatprep.mubr.msk.f32.mxu1 %vm104_vm0, %v6588_v14  ;;  %v4869_v1 = vsel %vm4814_vm4, %v4768_v7, 0.0  ;;  %v11823_v11 = vadd.s32 %v11527_v54, %v3219_v35  ;;  %v6589_v43 = vsel %vm3928_vm9, 1.0, %v13597_v38  ;;  %v4770_v22 = vmul.f32 %v4706_v46, %v4706_v46  ;;  %v14197_v54 = vld [vmem:[#allocation57_spill] sm:$0xff]  ;;  %v14198_v46 = vld [vmem:[#allocation87_spill] sm:$0xff] }
 0x54b   :  { %4864 = vadd.xlane.f32.xlu0 %v4863_v55  ;;  %v4773_v7 = vmul.f32 %v4709_v32, %v4709_v32  ;;  %v11829_v55 = vshll.u32 %v3475_v51, 16  ;;  %v3204_v27 = vcvt.f32.s32 %v3203_v17  ;;  %v4878_v14 = vsel %vm4814_vm4, %v4771_v21, 0.0  ;;  %v14199_v51 = vld [vmem:[#allocation47_spill] sm:$0xff]  ;;  %v14201_v21 = vld [vmem:[#allocation174_spill] sm:$0xff] }
 0x54c   :  { %7456 = vmatmul.mubr.msk.f32.gmra.mrb[110].mxu1 %vm104_vm0, %v6589_v43  ;;  %v4772_v42 = vmul.f32 %v4708_v60, %v4708_v60  ;;  %v11833_v53 = vshll.u32 %v3730_v33, 16  ;;  %v4775_v15 = vmul.f32 %v4711_v9, %v4711_v9  ;;  %v4774_v20 = vmul.f32 %v4710_v0, %v4710_v0  ;;  %v3248_v60 = vpop.xlane.xlu1 %3247 }
 0x54d   :  { %v3207_v17 = vadd.s32 %v11537_v31, %v3204_v27  ;;  %vm3930_vm10 = vcmp.eq.s32.totalorder %v13671_v25, %v11823_v11  ;;  %4879 = vadd.xlane.f32.xlu1 %v4878_v14  ;;  %v4875_v9 = vsel %vm4814_vm4, %v4770_v22, 0.0  ;;  %v4884_v0 = vsel %vm4814_vm4, %v4773_v7, 0.0  ;;  %v4712_v22 = vld [vmem:[%s13359_s1 + $0xd0] sm:$0xff] }
 0x54e   :  { %v3249_v35 = vcvt.f32.s32 %v3248_v60  ;;  %v4881_v38 = vsel %vm4814_vm4, %v4772_v42, 0.0  ;;  %v4777_v43 = vmul.f32 %v4713_v19, %v4713_v19  ;;  %v6126_v31 = vcvt.s32.f32 %v11709_v45 }
 0x54f   :  { %4870 = vadd.xlane.f32.xlu0 %v4869_v1  ;;  %vm3929_vm11 = vcmp.eq.s32.totalorder %v13671_v25, %v3207_v17  ;;  %v14202_v1 = vmov 0.0   ;;  %v4890_v33 = vsel %vm4814_vm4, %v4775_v15, 0.0  ;;  %v4887_v32 = vsel %vm4814_vm4, %v4774_v20, 0.0  ;;  %v4715_v20 = vld [vmem:[%s13359_s1 + $0xe8] sm:$0xff] }
 0x550   :  { %v6590_v27 = vsel %vm3929_vm11, 1.0, %v14202_v1  ;;  %v6123_v7 = vcvt.s32.f32 %v11687_v16  ;;  %v6125_v14 = vcvt.s32.f32 %v11723_v2  ;;  %v3252_v60 = vadd.s32 %v11553_v6, %v3249_v35  ;;  %v3233_v2 = vpop.xlane.xlu0 %3232 }
 0x551   :  { %7458 = vmatprep.mubr.msk.f32.mxu1 %vm104_vm0, %v6590_v27  ;;  %v6591_v42 = vsel %vm3930_vm10, 1.0, %v14202_v1  ;;  %v6128_v15 = vcvt.s32.f32 %v11731_v44  ;;  %v6130_v16 = vcvt.s32.f32 %v11764_v18  ;;  %v6127_v45 = vcvt.s32.f32 %v11753_v26  ;;  %4885 = vadd.xlane.f32.xlu1 %v4884_v0  ;;  %v14203_v26 = vld [vmem:[#allocation56_spill] sm:$0xff]  ;;  %v14204_v0 = vld [vmem:[#allocation62_spill] sm:$0xff] }
 0x552   :  { %v6129_v6 = vcvt.s32.f32 %v11781_v57  ;;  %7459 = vmatmul.mubr.msk.f32.gmra.mrb[112].mxu1 %vm104_vm0, %v6591_v42  ;;  %v6132_v35 = vcvt.s32.f32 %v11823_v11  ;;  %v3234_v19 = vcvt.f32.s32 %v3233_v2  ;;  %v4776_v27 = vmul.f32 %v4712_v22, %v4712_v22  ;;  %v3278_v22 = vpop.xlane.xlu1 %3277  ;;  %v14206_v42 = vld [vmem:[#allocation72_spill] sm:$0xff]  ;;  %v14210_v2 = vld [vmem:[#allocation78_spill] sm:$0xff] }
 0x553   :  { %4876 = vadd.xlane.f32.xlu0 %v4875_v9  ;;  %v4896_v9 = vsel %vm4814_vm4, %v4777_v43, 0.0  ;;  %v6131_v4 = vcvt.s32.f32 %v3207_v17  ;;  %v6134_v49 = vcvt.s32.f32 %v3252_v60  ;;  %vm3932_vm12 = vcmp.eq.s32.totalorder %v13671_v25, %v3252_v60  ;;  %v14205_v43 = vld [vmem:[#allocation66_spill] sm:$0xff] }
 0x554   :  { %v4779_v44 = vmul.f32 %v4715_v20, %v4715_v20  ;;  %v3237_v18 = vadd.s32 %v11557_v48, %v3234_v19  ;;  %v11880_v57 = vsel %vm6114_vm1, %v6123_v7, %v14203_v26  ;;  %v11885_v11 = vsel %vm6114_vm1, %v6126_v31, %v14204_v0  ;;  %v14208_v20 = vld [vmem:[#allocation73_spill] sm:$0xff]  ;;  %v14212_v26 = vld [vmem:[#allocation86_spill] sm:$0xff] }
 0x555   :  { %v11890_v17 = vsel %vm6114_vm1, %v6125_v14, %v14205_v43  ;;  %4891 = vadd.xlane.f32.xlu1 %v4890_v33  ;;  %v11895_v48 = vsel %vm6114_vm1, %v6128_v15, %v14206_v42  ;;  %v11905_v31 = vsel %vm6114_vm1, %v6130_v16, %v14208_v20  ;;  %v11910_v14 = vsel %vm6114_vm1, %v6129_v6, %v14210_v2  ;;  %v4714_v15 = vld [vmem:[%s13359_s1 + $0xe0] sm:$0xff]  ;;  %v14214_v0 = vld [vmem:[#allocation53_spill] sm:$0xff]  ;;  %v14219_v20 = vld [vmem:[#allocation175_spill] sm:$0xff] }
 0x556   :  { %14209 = vst [vmem:[#allocation55_spill] sm:$0xff] %v11905_v31  ;;  %14211 = vst [vmem:[#allocation99_spill] sm:$0xff] %v11910_v14  ;;  %v6133_v33 = vcvt.s32.f32 %v3237_v18  ;;  %v3279_v19 = vcvt.f32.s32 %v3278_v22  ;;  %vm3931_vm13 = vcmp.eq.s32.totalorder %v13671_v25, %v3237_v18  ;;  %v11922_v16 = vsel %vm6114_vm1, %v6132_v35, %v14212_v26  ;;  %v14215_v22 = vld [vmem:[#allocation92_spill] sm:$0xff]  ;;  %v14217_v42 = vld [vmem:[#allocation93_spill] sm:$0xff] }
 0x557   :  { %4882 = vadd.xlane.f32.xlu0 %v4881_v38  ;;  %v14207_v38 = vld [vmem:[#allocation67_spill] sm:$0xff]  ;;  %14213 = vst [vmem:[#allocation59_spill] sm:$0xff] %v11922_v16  ;;  %v3790_v6 = vcvt.f32.s32 %v14214_v0  ;;  %v6592_v43 = vsel %vm3931_vm13, 1.0, %v14202_v1  ;;  %v11929_v18 = vsel %vm6114_vm1, %v6131_v4, %v14215_v22  ;;  %v3625_v2 = vcvt.f32.s32 %v14219_v20  ;;  %v3263_v22 = vpop.xlane.xlu0 %3262 }
 0x558   :  { %v11900_v7 = vsel %vm6114_vm1, %v6127_v45, %v14207_v38  ;;  %v4717_v45 = vld [vmem:[%s13359_s1 + $0xf8] sm:$0xff]  ;;  %14216 = vst [vmem:[#allocation79_spill] sm:$0xff] %v11929_v18  ;;  %v11934_v38 = vsel %vm6114_vm1, %v6134_v49, %v14217_v42  ;;  %v3282_v14 = vadd.s32 %v11570_v12, %v3279_v19  ;;  %7461 = vmatprep.mubr.msk.f32.mxu1 %vm104_vm0, %v6592_v43  ;;  %v6593_v35 = vsel %vm3932_vm12, 1.0, %v14202_v1  ;;  %v14220_v26 = vld [vmem:[#allocation151_spill] sm:$0xff] }
 0x559   :  { %14218 = vst [vmem:[#allocation61_spill] sm:$0xff] %v11934_v38  ;;  %v11945_v4 = vsel %vm6114_vm1, %v6133_v33, %v14220_v26  ;;  %v14222_v0 = vcvt.f32.s32 %v14197_v54  ;;  %7462 = vmatmul.mubr.msk.f32.gmra.mrb[114].mxu1 %vm104_vm0, %v6593_v35  ;;  %4897 = vadd.xlane.f32.xlu1 %v4896_v9  ;;  %v4893_v12 = vsel %vm4814_vm4, %v4776_v27, 0.0  ;;  %v4778_v19 = vmul.f32 %v4714_v15, %v4714_v15  ;;  %v4716_v54 = vld [vmem:[%s13359_s1 + $0xf0] sm:$0xff] }
 0x55a   :  { %14221 = vst [vmem:[#allocation107_spill] sm:$0xff] %v11945_v4  ;;  %v4781_v43 = vmul.f32 %v4717_v45, %v4717_v45  ;;  %v14223_v60 = vcvt.f32.s32 %v14198_v46  ;;  %v6136_v42 = vcvt.s32.f32 %v3282_v14  ;;  %v3264_v20 = vcvt.f32.s32 %v3263_v22  ;;  %v14227_v22 = vld [vmem:[#allocation43_spill] sm:$0xff] }
 0x55b   :  { %4888 = vadd.xlane.f32.xlu0 %v4887_v32  ;;  %v11949_v49 = vshll.u32 %v14222_v0, 16  ;;  %v4902_v33 = vsel %vm4814_vm4, %v4779_v44, 0.0  ;;  %v14224_v35 = vcvt.f32.s32 %v14199_v51  ;;  %v14225_v9 = vcvt.f32.s32 %v14200_v50  ;;  %v4719_v44 = vld [vmem:[%s13359_s1 + $0x108] sm:$0xff]  ;;  %v14228_v50 = vld [vmem:[#allocation97_spill] sm:$0xff] }
 0x55c   :  { %v11955_v32 = vshll.u32 %v14223_v60, 16  ;;  %v14226_v46 = vcvt.f32.s32 %v14201_v21  ;;  %v11973_v45 = vshll.u32 %v3790_v6, 16  ;;  %v11978_v0 = vshll.u32 %v3625_v2, 16  ;;  %v3308_v21 = vpop.xlane.xlu1 %3307 }
 0x55d   :  { %v11963_v26 = vshll.u32 %v14224_v35, 16  ;;  %v11967_v27 = vshll.u32 %v14225_v9, 16  ;;  %v3655_v51 = vcvt.f32.s32 %v14227_v22  ;;  %v3267_v60 = vadd.s32 %v11572_v30, %v3264_v20  ;;  %4903 = vadd.xlane.f32.xlu1 %v4902_v33  ;;  %v14230_v20 = vld [vmem:[#allocation58_spill] sm:$0xff]  ;;  %v14231_v22 = vld [vmem:[#allocation28_spill] sm:$0xff] }
 0x55e   :  { %v11971_v15 = vshll.u32 %v14226_v46, 16  ;;  %v11985_v35 = vsel %vm6114_vm1, %v6136_v42, %v14228_v50  ;;  %vm3934_vm14 = vcmp.eq.s32.totalorder %v13671_v25, %v3282_v14  ;;  %v4899_v6 = vsel %vm4814_vm4, %v4778_v19, 0.0  ;;  %v4721_v42 = vld [vmem:[%s13359_s1 + $0x118] sm:$0xff] }
 0x55f   :  { %4894 = vadd.xlane.f32.xlu0 %v4893_v12  ;;  %14229 = vst [vmem:[#allocation146_spill] sm:$0xff] %v11985_v35  ;;  %v4908_v9 = vsel %vm4814_vm4, %v4781_v43, 0.0  ;;  %v4780_v2 = vmul.f32 %v4716_v54, %v4716_v54  ;;  %v6135_v46 = vcvt.s32.f32 %v3267_v60  ;;  %v3309_v4 = vcvt.f32.s32 %v3308_v21  ;;  %v4718_v12 = vld [vmem:[%s13359_s1 + $0x100] sm:$0xff]  ;;  %v14232_v50 = vld [vmem:[#allocation177_spill] sm:$0xff] }
 0x560   :  { %vm3933_vm2 = vcmp.eq.s32.totalorder %v13671_v25, %v3267_v60  ;;  %v4783_v30 = vmul.f32 %v4719_v44, %v4719_v44  ;;  %v3820_v33 = vcvt.f32.s32 %v14230_v20  ;;  %v3685_v19 = vcvt.f32.s32 %v14231_v22  ;;  %v4720_v20 = vld [vmem:[%s13359_s1 + $0x110] sm:$0xff]  ;;  %v14233_v22 = vld [vmem:[#allocation98_spill] sm:$0xff]  ;;  %v3338_v38 = vpop.xlane.xlu1 %3337 }
 0x561   :  { %v3715_v43 = vcvt.f32.s32 %v14232_v50  ;;  %v6594_v54 = vsel %vm3933_vm2, 1.0, %v14202_v1  ;;  %v12001_v21 = vshll.u32 %v3655_v51, 16  ;;  %v3312_v44 = vadd.s32 %v11682_v34, %v3309_v4  ;;  %v14235_v51 = vld [vmem:[#allocation39_spill] sm:$0xff]  ;;  %v3293_v34 = vpop.xlane.xlu0 %3292  ;;  %4909 = vadd.xlane.f32.xlu1 %v4908_v9 }
 0x562   :  { %7464 = vmatprep.mubr.msk.f32.mxu1 %vm104_vm0, %v6594_v54  ;;  %v6595_v60 = vsel %vm3934_vm14, 1.0, %v14202_v1  ;;  %v12014_v50 = vsel %vm6114_vm1, %v6135_v46, %v14233_v22  ;;  %v3745_v35 = vcvt.f32.s32 %v14235_v51  ;;  %v4905_v14 = vsel %vm4814_vm4, %v4780_v2, 0.0  ;;  %v4723_v54 = vld [vmem:[%s13359_s1 + $0x128] sm:$0xff] }
 0x563   :  { %4900 = vadd.xlane.f32.xlu0 %v4899_v6  ;;  %14234 = vst [vmem:[#allocation152_spill] sm:$0xff] %v12014_v50  ;;  %7465 = vmatmul.mubr.msk.f32.gmra.mrb[116].mxu1 %vm104_vm0, %v6595_v60  ;;  %v4782_v4 = vmul.f32 %v4718_v12, %v4718_v12  ;;  %v4785_v6 = vmul.f32 %v4721_v42, %v4721_v42  ;;  %v6138_v18 = vcvt.s32.f32 %v3312_v44  ;;  %v3339_v16 = vcvt.f32.s32 %v3338_v38  ;;  %v4722_v38 = vld [vmem:[%s13359_s1 + $0x120] sm:$0xff] }
 0x564   :  { %v3294_v31 = vcvt.f32.s32 %v3293_v34  ;;  %v4914_v46 = vsel %vm4814_vm4, %v4783_v30, 0.0  ;;  %v12023_v22 = vshll.u32 %v3820_v33, 16  ;;  %v12025_v51 = vshll.u32 %v3685_v19, 16  ;;  %v4725_v30 = vld [vmem:[%s13359_s1 + $0x138] sm:$0xff]  ;;  %v14236_v33 = vld [vmem:[#allocation103_spill] sm:$0xff] }
 0x565   :  { %v12027_v60 = vshll.u32 %v3715_v43, 16  ;;  %v4784_v9 = vmul.f32 %v4720_v20, %v4720_v20  ;;  %v3342_v2 = vadd.s32 %v11483_v5, %v3339_v16  ;;  %v4787_v42 = vmul.f32 %v4723_v54, %v4723_v54  ;;  %v3368_v5 = vpop.xlane.xlu1 %3367  ;;  %v3323_v16 = vpop.xlane.xlu0 %3322  ;;  %4915 = vadd.xlane.f32.xlu1 %v4914_v46 }
 0x566   :  { %v3297_v12 = vadd.s32 %v11742_v13, %v3294_v31  ;;  %v12040_v19 = vsel %vm6114_vm1, %v6138_v18, %v14236_v33  ;;  %v12042_v43 = vshll.u32 %v3745_v35, 16  ;;  %vm3936_vm3 = vcmp.eq.s32.totalorder %v13671_v25, %v3312_v44 }
 0x567   :  { %4906 = vadd.xlane.f32.xlu0 %v4905_v14  ;;  %14237 = vst [vmem:[#allocation64_spill] sm:$0xff] %v12040_v19  ;;  %v4911_v13 = vsel %vm4814_vm4, %v4782_v4, 0.0  ;;  %v4920_v31 = vsel %vm4814_vm4, %v4785_v6, 0.0  ;;  %v6140_v20 = vcvt.s32.f32 %v3342_v2  ;;  %v3369_v14 = vcvt.f32.s32 %v3368_v5  ;;  %v4724_v6 = vld [vmem:[%s13359_s1 + $0x130] sm:$0xff] }
 0x568   :  { %v6137_v34 = vcvt.s32.f32 %v3297_v12  ;;  %v3324_v54 = vcvt.f32.s32 %v3323_v16  ;;  %vm3935_vm5 = vcmp.eq.s32.totalorder %v13671_v25, %v3297_v12  ;;  %v4917_v18 = vsel %vm4814_vm4, %v4784_v9, 0.0 }
 0x569   :  { %v4786_v33 = vmul.f32 %v4722_v38, %v4722_v38  ;;  %v4789_v35 = vmul.f32 %v4725_v30, %v4725_v30  ;;  %v3372_v19 = vadd.s32 %v11492_v56, %v3369_v14  ;;  %v6596_v46 = vsel %vm3935_vm5, 1.0, %v14202_v1  ;;  %v3398_v12 = vpop.xlane.xlu1 %3397  ;;  %v3353_v38 = vpop.xlane.xlu0 %3352  ;;  %4921 = vadd.xlane.f32.xlu1 %v4920_v31  ;;  %v4727_v56 = vld [vmem:[%s13359_s1 + $0x148] sm:$0xff]  ;;  %v14239_v30 = vld [vmem:[#allocation109_spill] sm:$0xff] }
 0x56a   :  { %v3327_v50 = vadd.s32 %v11746_v28, %v3324_v54  ;;  %v4926_v4 = vsel %vm4814_vm4, %v4787_v42, 0.0  ;;  %7467 = vmatprep.mubr.msk.f32.mxu1 %vm104_vm0, %v6596_v46  ;;  %v6597_v9 = vsel %vm3936_vm3, 1.0, %v14202_v1  ;;  %vm3938_vm6 = vcmp.eq.s32.totalorder %v13671_v25, %v3342_v2  ;;  %v14238_v28 = vld [vmem:[#allocation104_spill] sm:$0xff] }
 0x56b   :  { %4912 = vadd.xlane.f32.xlu0 %v4911_v13  ;;  %v12067_v42 = vsel %vm6114_vm1, %v6137_v34, %v14238_v28  ;;  %v12072_v5 = vsel %vm6114_vm1, %v6140_v20, %v14239_v30  ;;  %v6142_v44 = vcvt.s32.f32 %v3372_v19  ;;  %v3399_v13 = vcvt.f32.s32 %v3398_v12  ;;  %7468 = vmatmul.mubr.msk.f32.gmra.mrb[118].mxu1 %vm104_vm0, %v6597_v9  ;;  %v4726_v12 = vld [vmem:[%s13359_s1 + $0x140] sm:$0xff] }
 0x56c   :  { %v6139_v16 = vcvt.s32.f32 %v3327_v50  ;;  %v3354_v31 = vcvt.f32.s32 %v3353_v38  ;;  %vm3937_vm7 = vcmp.eq.s32.totalorder %v13671_v25, %v3327_v50  ;;  %v4923_v14 = vsel %vm4814_vm4, %v4786_v33, 0.0  ;;  %v4729_v50 = vld [vmem:[%s13359_s1 + $0x158] sm:$0xff] }
 0x56d   :  { %v4932_v54 = vsel %vm4814_vm4, %v4789_v35, 0.0  ;;  %v4788_v46 = vmul.f32 %v4724_v6, %v4724_v6  ;;  %v3402_v34 = vadd.s32 %v11497_v47, %v3399_v13  ;;  %v6598_v20 = vsel %vm3937_vm7, 1.0, %v14202_v1  ;;  %v3428_v33 = vpop.xlane.xlu1 %3427  ;;  %4927 = vadd.xlane.f32.xlu1 %v4926_v4  ;;  %v14242_v6 = vld [vmem:[#allocation114_spill] sm:$0xff] }
 0x56e   :  { %v3357_v28 = vadd.s32 %v11750_v62, %v3354_v31  ;;  %v4791_v30 = vmul.f32 %v4727_v56, %v4727_v56  ;;  %7470 = vmatprep.mubr.msk.f32.mxu1 %vm104_vm0, %v6598_v20  ;;  %v6599_v47 = vsel %vm3938_vm6, 1.0, %v14202_v1  ;;  %v3383_v62 = vpop.xlane.xlu0 %3382  ;;  %vm3940_vm8 = vcmp.eq.s32.totalorder %v13671_v25, %v3372_v19 }
 0x56f   :  { %4918 = vadd.xlane.f32.xlu0 %v4917_v18  ;;  %v14240_v18 = vld [vmem:[#allocation110_spill] sm:$0xff]  ;;  %v12100_v9 = vsel %vm6114_vm1, %v6142_v44, %v14242_v6  ;;  %v6144_v38 = vcvt.s32.f32 %v3402_v34  ;;  %v3429_v13 = vcvt.f32.s32 %v3428_v33  ;;  %7471 = vmatmul.mubr.msk.f32.gmra.mrb[120].mxu1 %vm104_vm0, %v6599_v47  ;;  %v3384_v2 = vcvt.f32.s32 %v3383_v62  ;;  %v4728_v33 = vld [vmem:[%s13359_s1 + $0x150] sm:$0xff] }
 0x570   :  { %v12095_v35 = vsel %vm6114_vm1, %v6139_v16, %v14240_v18  ;;  %v6141_v56 = vcvt.s32.f32 %v3357_v28  ;;  %vm3939_vm9 = vcmp.eq.s32.totalorder %v13671_v25, %v3357_v28  ;;  %v4929_v4 = vsel %vm4814_vm4, %v4788_v46, 0.0 }
 0x571   :  { %14241 = vst [vmem:[#allocation83_spill] sm:$0xff] %v12095_v35  ;;  %v4790_v31 = vmul.f32 %v4726_v12, %v4726_v12  ;;  %v4793_v20 = vmul.f32 %v4729_v50, %v4729_v50  ;;  %v3432_v16 = vadd.s32 %v11502_v40, %v3429_v13  ;;  %v3387_v18 = vadd.s32 %v11801_v58, %v3384_v2  ;;  %v3458_v28 = vpop.xlane.xlu1 %3457  ;;  %v4731_v40 = vld [vmem:[%s13359_s1 + $0x168] sm:$0xff] }
 0x572   :  { %v6600_v35 = vsel %vm3939_vm9, 1.0, %v14202_v1  ;;  %v4938_v44 = vsel %vm4814_vm4, %v4791_v30, 0.0  ;;  %v6601_v46 = vsel %vm3940_vm8, 1.0, %v14202_v1  ;;  %v3413_v12 = vpop.xlane.xlu0 %3412  ;;  %vm3942_vm10 = vcmp.eq.s32.totalorder %v13671_v25, %v3402_v34  ;;  %4933 = vadd.xlane.f32.xlu1 %v4932_v54  ;;  %v14243_v58 = vld [vmem:[#allocation115_spill] sm:$0xff]  ;;  %v14244_v30 = vld [vmem:[#allocation169_spill] sm:$0xff] }
 0x573   :  { %4924 = vadd.xlane.f32.xlu0 %v4923_v14  ;;  %7473 = vmatprep.mubr.msk.f32.mxu1 %vm104_vm0, %v6600_v35  ;;  %v12123_v14 = vsel %vm6114_vm1, %v6141_v56, %v14243_v58  ;;  %v12128_v50 = vsel %vm6114_vm1, %v6144_v38, %v14244_v30  ;;  %v6146_v19 = vcvt.s32.f32 %v3432_v16  ;;  %v6143_v47 = vcvt.s32.f32 %v3387_v18 }
 0x574   :  { %v3459_v62 = vcvt.f32.s32 %v3458_v28  ;;  %7474 = vmatmul.mubr.msk.f32.gmra.mrb[122].mxu1 %vm104_vm0, %v6601_v46  ;;  %v3414_v54 = vcvt.f32.s32 %v3413_v12  ;;  %vm3941_vm11 = vcmp.eq.s32.totalorder %v13671_v25, %v3387_v18  ;;  %v4935_v35 = vsel %vm4814_vm4, %v4790_v31, 0.0  ;;  %v4730_v28 = vld [vmem:[%s13359_s1 + $0x160] sm:$0xff]  ;;  %v4733_v18 = vld [vmem:[%s13359_s1 + $0x178] sm:$0xff] }
 0x575   :  { %v4944_v6 = vsel %vm4814_vm4, %v4793_v20, 0.0  ;;  %v4792_v13 = vmul.f32 %v4728_v33, %v4728_v33  ;;  %v6602_v38 = vsel %vm3941_vm11, 1.0, %v14202_v1  ;;  %v4795_v58 = vmul.f32 %v4731_v40, %v4731_v40  ;;  %v3488_v31 = vpop.xlane.xlu1 %3487  ;;  %v14246_v33 = vld [vmem:[#allocation121_spill] sm:$0xff] }
 0x576   :  { %v3462_v56 = vadd.s32 %v11523_v8, %v3459_v62  ;;  %v3417_v2 = vadd.s32 %v11808_v52, %v3414_v54  ;;  %7476 = vmatprep.mubr.msk.f32.mxu1 %vm104_vm0, %v6602_v38  ;;  %v6603_v8 = vsel %vm3942_vm10, 1.0, %v14202_v1  ;;  %v3443_v52 = vpop.xlane.xlu0 %3442  ;;  %vm3944_vm12 = vcmp.eq.s32.totalorder %v13671_v25, %v3432_v16  ;;  %4939 = vadd.xlane.f32.xlu1 %v4938_v44 }
 0x577   :  { %4930 = vadd.xlane.f32.xlu0 %v4929_v4  ;;  %v14245_v4 = vld [vmem:[#allocation120_spill] sm:$0xff]  ;;  %v12156_v46 = vsel %vm6114_vm1, %v6146_v19, %v14246_v33  ;;  %v3489_v30 = vcvt.f32.s32 %v3488_v31  ;;  %v3444_v34 = vcvt.f32.s32 %v3443_v52  ;;  %v4941_v44 = vsel %vm4814_vm4, %v4792_v13, 0.0 }
 0x578   :  { %v12151_v20 = vsel %vm6114_vm1, %v6143_v47, %v14245_v4  ;;  %v6148_v12 = vcvt.s32.f32 %v3462_v56  ;;  %v6145_v40 = vcvt.s32.f32 %v3417_v2  ;;  %7477 = vmatmul.mubr.msk.f32.gmra.mrb[124].mxu1 %vm104_vm0, %v6603_v8  ;;  %vm3943_vm13 = vcmp.eq.s32.totalorder %v13671_v25, %v3417_v2  ;;  %v4732_v31 = vld [vmem:[%s13359_s1 + $0x170] sm:$0xff]  ;;  %v4735_v2 = vld [vmem:[%s13359_s1 + $0x188] sm:$0xff] }
 0x579   :  { %v4794_v62 = vmul.f32 %v4730_v28, %v4730_v28  ;;  %v4797_v54 = vmul.f32 %v4733_v18, %v4733_v18  ;;  %v3492_v47 = vadd.s32 %v11532_v37, %v3489_v30  ;;  %v3447_v38 = vadd.s32 %v11812_v23, %v3444_v34  ;;  %v3518_v13 = vpop.xlane.xlu1 %3517  ;;  %v14248_v28 = vld [vmem:[#allocation15_spill] sm:$0xff] }
 0x57a   :  { %v6604_v4 = vsel %vm3943_vm13, 1.0, %v14202_v1  ;;  %v4950_v19 = vsel %vm4814_vm4, %v4795_v58, 0.0  ;;  %v6605_v37 = vsel %vm3944_vm12, 1.0, %v14202_v1  ;;  %v3473_v23 = vpop.xlane.xlu0 %3472  ;;  %vm3946_vm14 = vcmp.eq.s32.totalorder %v13671_v25, %v3462_v56  ;;  %4945 = vadd.xlane.f32.xlu1 %v4944_v6 }
 0x57b   :  { %4936 = vadd.xlane.f32.xlu0 %v4935_v35  ;;  %7479 = vmatprep.mubr.msk.f32.mxu1 %vm104_vm0, %v6604_v4  ;;  %v14247_v35 = vld [vmem:[#allocation2_spill] sm:$0xff]  ;;  %v12184_v18 = vsel %vm6114_vm1, %v6148_v12, %v14248_v28  ;;  %v6150_v8 = vcvt.s32.f32 %v3492_v47  ;;  %v6147_v52 = vcvt.s32.f32 %v3447_v38  ;;  %v3519_v33 = vcvt.f32.s32 %v3518_v13 }
 0x57c   :  { %v12179_v58 = vsel %vm6114_vm1, %v6145_v40, %v14247_v35  ;;  %7480 = vmatmul.mubr.msk.f32.gmra.mrb[126].mxu1 %vm104_vm0, %v6605_v37  ;;  %v3474_v16 = vcvt.f32.s32 %v3473_v23  ;;  %vm3945_vm2 = vcmp.eq.s32.totalorder %v13671_v25, %v3447_v38  ;;  %v4947_v6 = vsel %vm4814_vm4, %v4794_v62, 0.0  ;;  %v4734_v13 = vld [vmem:[%s13359_s1 + $0x180] sm:$0xff] }
 0x57d   :  { %v4796_v30 = vmul.f32 %v4732_v31, %v4732_v31  ;;  %v4799_v34 = vmul.f32 %v4735_v2, %v4735_v2  ;;  %v3522_v40 = vadd.s32 %v11548_v10, %v3519_v33  ;;  %v6606_v35 = vsel %vm3945_vm2, 1.0, %v14202_v1  ;;  %v3548_v38 = vpop.xlane.xlu1 %3547  ;;  %v4737_v10 = vld [vmem:[%s13359_s1 + $0x198] sm:$0xff] }
 0x57e   :  { %v3477_v4 = vadd.s32 %v11829_v55, %v3474_v16  ;;  %v4956_v12 = vsel %vm4814_vm4, %v4797_v54, 0.0  ;;  %7482 = vmatprep.mubr.msk.f32.mxu1 %vm104_vm0, %v6606_v35  ;;  %v6607_v62 = vsel %vm3946_vm14, 1.0, %v14202_v1  ;;  %v3503_v31 = vpop.xlane.xlu0 %3502  ;;  %vm3948_vm3 = vcmp.eq.s32.totalorder %v13671_v25, %v3492_v47  ;;  %4951 = vadd.xlane.f32.xlu1 %v4950_v19  ;;  %v14249_v55 = vld [vmem:[#allocation5_spill] sm:$0xff]  ;;  %v14250_v54 = vld [vmem:[#allocation22_spill] sm:$0xff] }
 0x57f   :  { %4942 = vadd.xlane.f32.xlu0 %v4941_v44  ;;  %v12207_v44 = vsel %vm6114_vm1, %v6147_v52, %v14249_v55  ;;  %v12212_v2 = vsel %vm6114_vm1, %v6150_v8, %v14250_v54  ;;  %v6152_v56 = vcvt.s32.f32 %v3522_v40  ;;  %v3549_v23 = vcvt.f32.s32 %v3548_v38  ;;  %v4736_v38 = vld [vmem:[%s13359_s1 + $0x190] sm:$0xff] }
 0x580   :  { %v6149_v37 = vcvt.s32.f32 %v3477_v4  ;;  %7483 = vmatmul.mubr.msk.f32.gmra.mrb[128].mxu1 %vm104_vm0, %v6607_v62  ;;  %v3504_v19 = vcvt.f32.s32 %v3503_v31  ;;  %vm3947_vm5 = vcmp.eq.s32.totalorder %v13671_v25, %v3477_v4  ;;  %v4953_v28 = vsel %vm4814_vm4, %v4796_v30, 0.0  ;;  %v4739_v4 = vld [vmem:[%s13359_s1 + $0x1a8] sm:$0xff] }
 0x581   :  { %v4962_v33 = vsel %vm4814_vm4, %v4799_v34, 0.0  ;;  %v4798_v16 = vmul.f32 %v4734_v13, %v4734_v13  ;;  %v3552_v52 = vadd.s32 %v11555_v59, %v3549_v23  ;;  %v6608_v8 = vsel %vm3947_vm5, 1.0, %v14202_v1  ;;  %v3578_v30 = vpop.xlane.xlu1 %3577  ;;  %v14252_v13 = vld [vmem:[#allocation24_spill] sm:$0xff] }
 0x582   :  { %v3507_v35 = vadd.s32 %v11949_v49, %v3504_v19  ;;  %v4801_v55 = vmul.f32 %v4737_v10, %v4737_v10  ;;  %7485 = vmatprep.mubr.msk.f32.mxu1 %vm104_vm0, %v6608_v8  ;;  %v6609_v59 = vsel %vm3948_vm3, 1.0, %v14202_v1  ;;  %v3533_v49 = vpop.xlane.xlu0 %3532  ;;  %vm3950_vm6 = vcmp.eq.s32.totalorder %v13671_v25, %v3522_v40  ;;  %4957 = vadd.xlane.f32.xlu1 %v4956_v12 }
 0x583   :  { %4948 = vadd.xlane.f32.xlu0 %v4947_v6  ;;  %v14251_v6 = vld [vmem:[#allocation4_spill] sm:$0xff]  ;;  %v12240_v62 = vsel %vm6114_vm1, %v6152_v56, %v14252_v13  ;;  %v6154_v31 = vcvt.s32.f32 %v3552_v52  ;;  %v3579_v54 = vcvt.f32.s32 %v3578_v30  ;;  %v3534_v47 = vcvt.f32.s32 %v3533_v49  ;;  %v4738_v30 = vld [vmem:[%s13359_s1 + $0x1a0] sm:$0xff] }
 0x584   :  { %v12235_v34 = vsel %vm6114_vm1, %v6149_v37, %v14251_v6  ;;  %v6151_v10 = vcvt.s32.f32 %v3507_v35  ;;  %7486 = vmatmul.mubr.msk.f32.gmra.mrb[130].mxu1 %vm104_vm0, %v6609_v59  ;;  %vm3949_vm7 = vcmp.eq.s32.totalorder %v13671_v25, %v3507_v35  ;;  %v4959_v12 = vsel %vm4814_vm4, %v4798_v16, 0.0 }
 0x585   :  { %v4800_v23 = vmul.f32 %v4736_v38, %v4736_v38  ;;  %v4803_v19 = vmul.f32 %v4739_v4, %v4739_v4  ;;  %v3582_v37 = vadd.s32 %v11568_v61, %v3579_v54  ;;  %v3537_v8 = vadd.s32 %v11955_v32, %v3534_v47  ;;  %v3608_v35 = vpop.xlane.xlu1 %3607  ;;  %v4741_v61 = vld [vmem:[%s13359_s1 + $0x1b8] sm:$0xff]  ;;  %v14253_v32 = vld [vmem:[#allocation126_spill] sm:$0xff] }
 0x586   :  { %v6610_v6 = vsel %vm3949_vm7, 1.0, %v14202_v1  ;;  %v4968_v56 = vsel %vm4814_vm4, %v4801_v55, 0.0  ;;  %v6611_v16 = vsel %vm3950_vm6, 1.0, %v14202_v1  ;;  %v3563_v38 = vpop.xlane.xlu0 %3562  ;;  %vm3952_vm8 = vcmp.eq.s32.totalorder %v13671_v25, %v3552_v52  ;;  %4963 = vadd.xlane.f32.xlu1 %v4962_v33  ;;  %v14254_v55 = vld [vmem:[#allocation7_spill] sm:$0xff] }
 0x587   :  { %4954 = vadd.xlane.f32.xlu0 %v4953_v28  ;;  %7488 = vmatprep.mubr.msk.f32.mxu1 %vm104_vm0, %v6610_v6  ;;  %v12263_v28 = vsel %vm6114_vm1, %v6151_v10, %v14253_v32  ;;  %v12268_v4 = vsel %vm6114_vm1, %v6154_v31, %v14254_v55  ;;  %v6156_v40 = vcvt.s32.f32 %v3582_v37  ;;  %v6153_v59 = vcvt.s32.f32 %v3537_v8 }
 0x588   :  { %v3609_v49 = vcvt.f32.s32 %v3608_v35  ;;  %7489 = vmatmul.mubr.msk.f32.gmra.mrb[132].mxu1 %vm104_vm0, %v6611_v16  ;;  %v3564_v33 = vcvt.f32.s32 %v3563_v38  ;;  %vm3951_vm9 = vcmp.eq.s32.totalorder %v13671_v25, %v3537_v8  ;;  %v4965_v13 = vsel %vm4814_vm4, %v4800_v23, 0.0  ;;  %v4740_v35 = vld [vmem:[%s13359_s1 + $0x1b0] sm:$0xff]  ;;  %v4743_v8 = vld [vmem:[%s13359_s1 + $0x1c8] sm:$0xff] }
 0x589   :  { %v4974_v54 = vsel %vm4814_vm4, %v4803_v19, 0.0  ;;  %v4802_v47 = vmul.f32 %v4738_v30, %v4738_v30  ;;  %v6612_v31 = vsel %vm3951_vm9, 1.0, %v14202_v1  ;;  %v4805_v32 = vmul.f32 %v4741_v61, %v4741_v61  ;;  %v3638_v23 = vpop.xlane.xlu1 %3637  ;;  %v14256_v30 = vld [vmem:[#allocation6_spill] sm:$0xff] }
 0x58a   :  { %v3612_v10 = vadd.s32 %v11678_v29, %v3609_v49  ;;  %v3567_v6 = vadd.s32 %v11967_v27, %v3564_v33  ;;  %7491 = vmatprep.mubr.msk.f32.mxu1 %vm104_vm0, %v6612_v31  ;;  %v6613_v29 = vsel %vm3952_vm8, 1.0, %v14202_v1  ;;  %v3593_v27 = vpop.xlane.xlu0 %3592  ;;  %vm3954_vm10 = vcmp.eq.s32.totalorder %v13671_v25, %v3582_v37  ;;  %4969 = vadd.xlane.f32.xlu1 %v4968_v56 }
 0x58b   :  { %4960 = vadd.xlane.f32.xlu0 %v4959_v12  ;;  %v14255_v12 = vld [vmem:[#allocation27_spill] sm:$0xff]  ;;  %v12296_v16 = vsel %vm6114_vm1, %v6156_v40, %v14256_v30  ;;  %v3639_v55 = vcvt.f32.s32 %v3638_v23  ;;  %v3594_v52 = vcvt.f32.s32 %v3593_v27  ;;  %v4971_v56 = vsel %vm4814_vm4, %v4802_v47, 0.0  ;;  %v4742_v23 = vld [vmem:[%s13359_s1 + $0x1c0] sm:$0xff] }
 0x58c   :  { %v12291_v19 = vsel %vm6114_vm1, %v6153_v59, %v14255_v12  ;;  %v6158_v38 = vcvt.s32.f32 %v3612_v10  ;;  %v6155_v61 = vcvt.s32.f32 %v3567_v6  ;;  %7492 = vmatmul.mubr.msk.f32.gmra.mrb[134].mxu1 %vm104_vm0, %v6613_v29  ;;  %vm3953_vm11 = vcmp.eq.s32.totalorder %v13671_v25, %v3567_v6  ;;  %v4745_v6 = vld [vmem:[%s13359_s1 + $0x1d8] sm:$0xff] }
 0x58d   :  { %v4804_v49 = vmul.f32 %v4740_v35, %v4740_v35  ;;  %v4807_v33 = vmul.f32 %v4743_v8, %v4743_v8  ;;  %v3642_v59 = vadd.s32 %v11744_v63, %v3639_v55  ;;  %v3597_v31 = vadd.s32 %v11971_v15, %v3594_v52  ;;  %v3668_v47 = vpop.xlane.xlu1 %3667  ;;  %v14258_v35 = vld [vmem:[#allocation9_spill] sm:$0xff] }
 0x58e   :  { %v6614_v12 = vsel %vm3953_vm11, 1.0, %v14202_v1  ;;  %v4980_v40 = vsel %vm4814_vm4, %v4805_v32, 0.0  ;;  %v6615_v63 = vsel %vm3954_vm10, 1.0, %v14202_v1  ;;  %v3623_v15 = vpop.xlane.xlu0 %3622  ;;  %vm3956_vm12 = vcmp.eq.s32.totalorder %v13671_v25, %v3612_v10  ;;  %4975 = vadd.xlane.f32.xlu1 %v4974_v54 }
 0x58f   :  { %4966 = vadd.xlane.f32.xlu0 %v4965_v13  ;;  %7494 = vmatprep.mubr.msk.f32.mxu1 %vm104_vm0, %v6614_v12  ;;  %v14257_v13 = vld [vmem:[#allocation31_spill] sm:$0xff]  ;;  %v12324_v8 = vsel %vm6114_vm1, %v6158_v38, %v14258_v35  ;;  %v6160_v29 = vcvt.s32.f32 %v3642_v59  ;;  %v6157_v27 = vcvt.s32.f32 %v3597_v31  ;;  %v3669_v30 = vcvt.f32.s32 %v3668_v47  ;;  %v4744_v47 = vld [vmem:[%s13359_s1 + $0x1d0] sm:$0xff] }
 0x590   :  { %v12319_v32 = vsel %vm6114_vm1, %v6155_v61, %v14257_v13  ;;  %7495 = vmatmul.mubr.msk.f32.gmra.mrb[136].mxu1 %vm104_vm0, %v6615_v63  ;;  %v3624_v37 = vcvt.f32.s32 %v3623_v15  ;;  %vm3955_vm13 = vcmp.eq.s32.totalorder %v13671_v25, %v3597_v31  ;;  %v4977_v54 = vsel %vm4814_vm4, %v4804_v49, 0.0 }
 0x591   :  { %v4806_v55 = vmul.f32 %v4742_v23, %v4742_v23  ;;  %v4809_v52 = vmul.f32 %v4745_v6, %v4745_v6  ;;  %v3672_v61 = vadd.s32 %v11799_v39, %v3669_v30  ;;  %v6616_v13 = vsel %vm3955_vm13, 1.0, %v14202_v1  ;;  %v3698_v31 = vpop.xlane.xlu1 %3697  ;;  %v4747_v39 = vld [vmem:[%s13359_s1 + $0x1e8] sm:$0xff] }
 0x592   :  { %v3627_v12 = vadd.s32 %v11978_v0, %v3624_v37  ;;  %v4986_v38 = vsel %vm4814_vm4, %v4807_v33, 0.0  ;;  %7497 = vmatprep.mubr.msk.f32.mxu1 %vm104_vm0, %v6616_v13  ;;  %v6617_v49 = vsel %vm3956_vm12, 1.0, %v14202_v1  ;;  %v3653_v23 = vpop.xlane.xlu0 %3652  ;;  %vm3958_vm14 = vcmp.eq.s32.totalorder %v13671_v25, %v3642_v59  ;;  %4981 = vadd.xlane.f32.xlu1 %v4980_v40  ;;  %v14259_v0 = vld [vmem:[#allocation33_spill] sm:$0xff]  ;;  %v14260_v33 = vld [vmem:[#allocation11_spill] sm:$0xff] }
 0x593   :  { %4972 = vadd.xlane.f32.xlu0 %v4971_v56  ;;  %v12347_v56 = vsel %vm6114_vm1, %v6157_v27, %v14259_v0  ;;  %v12352_v6 = vsel %vm6114_vm1, %v6160_v29, %v14260_v33  ;;  %v6162_v10 = vcvt.s32.f32 %v3672_v61  ;;  %v3699_v15 = vcvt.f32.s32 %v3698_v31  ;;  %v4746_v31 = vld [vmem:[%s13359_s1 + $0x1e0] sm:$0xff] }
 0x594   :  { %v6159_v63 = vcvt.s32.f32 %v3627_v12  ;;  %7498 = vmatmul.mubr.msk.f32.gmra.mrb[138].mxu1 %vm104_vm0, %v6617_v49  ;;  %v3654_v40 = vcvt.f32.s32 %v3653_v23  ;;  %vm3957_vm2 = vcmp.eq.s32.totalorder %v13671_v25, %v3627_v12  ;;  %v4983_v35 = vsel %vm4814_vm4, %v4806_v55, 0.0  ;;  %v4749_v12 = vld [vmem:[%s13359_s1 + $0x1f8] sm:$0xff] }
 0x595   :  { %v4992_v30 = vsel %vm4814_vm4, %v4809_v52, 0.0  ;;  %v4808_v37 = vmul.f32 %v4744_v47, %v4744_v47  ;;  %v3702_v27 = vadd.s32 %v11810_v3, %v3699_v15  ;;  %v6618_v29 = vsel %vm3957_vm2, 1.0, %v14202_v1  ;;  %v3728_v55 = vpop.xlane.xlu1 %3727  ;;  %v14262_v47 = vld [vmem:[#allocation21_spill] sm:$0xff] }
 0x596   :  { %v3657_v13 = vadd.s32 %v12001_v21, %v3654_v40  ;;  %v4811_v0 = vmul.f32 %v4747_v39, %v4747_v39  ;;  %7500 = vmatprep.mubr.msk.f32.mxu1 %vm104_vm0, %v6618_v29  ;;  %v6619_v3 = vsel %vm3958_vm14, 1.0, %v14202_v1  ;;  %vm3960_vm3 = vcmp.eq.s32.totalorder %v13671_v25, %v3672_v61  ;;  %4987 = vadd.xlane.f32.xlu1 %v4986_v38 }
 0x597   :  { %4978 = vadd.xlane.f32.xlu0 %v4977_v54  ;;  %v3683_v21 = vpop.xlane.xlu0 %3682  ;;  %v14261_v54 = vld [vmem:[#allocation37_spill] sm:$0xff]  ;;  %v12380_v49 = vsel %vm6114_vm1, %v6162_v10, %v14262_v47  ;;  %v6164_v23 = vcvt.s32.f32 %v3702_v27  ;;  %v3729_v33 = vcvt.f32.s32 %v3728_v55  ;;  %v4989_v38 = vsel %vm4814_vm4, %v4808_v37, 0.0  ;;  %v4748_v55 = vld [vmem:[%s13359_s1 + $0x1f0] sm:$0xff] }
 0x598   :  { %v12375_v52 = vsel %vm6114_vm1, %v6159_v63, %v14261_v54  ;;  %v6161_v39 = vcvt.s32.f32 %v3657_v13  ;;  %7501 = vmatmul.mubr.msk.f32.gmra.mrb[140].mxu1 %vm104_vm0, %v6619_v3  ;;  %v3684_v59 = vcvt.f32.s32 %v3683_v21  ;;  %vm3959_vm5 = vcmp.eq.s32.totalorder %v13671_v25, %v3657_v13 }
 0x599   :  { %v4810_v15 = vmul.f32 %v4746_v31, %v4746_v31  ;;  %v4813_v40 = vmul.f32 %v4749_v12, %v4749_v12  ;;  %v3732_v63 = vadd.s32 %v11833_v53, %v3729_v33  ;;  %v6620_v54 = vsel %vm3959_vm5, 1.0, %v14202_v1  ;;  %v3758_v13 = vpop.xlane.xlu1 %3757  ;;  %v14263_v53 = vld [vmem:[#allocation41_spill] sm:$0xff] }
 0x59a   :  { %v3687_v29 = vadd.s32 %v12025_v51, %v3684_v59  ;;  %v4998_v10 = vsel %vm4814_vm4, %v4811_v0, 0.0  ;;  %7503 = vmatprep.mubr.msk.f32.mxu1 %vm104_vm0, %v6620_v54  ;;  %v6621_v37 = vsel %vm3960_vm3, 1.0, %v14202_v1  ;;  %vm3962_vm6 = vcmp.eq.s32.totalorder %v13671_v25, %v3702_v27  ;;  %4993 = vadd.xlane.f32.xlu1 %v4992_v30 }
 0x59b   :  { %4984 = vadd.xlane.f32.xlu0 %v4983_v35  ;;  %v12400_v51 = vsel %vm6114_vm1, %v6161_v39, %v14263_v53  ;;  %v14264_v35 = vld [vmem:[#allocation20_spill] sm:$0xff]  ;;  %v6166_v12 = vcvt.s32.f32 %v3732_v63  ;;  %v3759_v21 = vcvt.f32.s32 %v3758_v13  ;;  %v3775_v47 = vcvt.f32.s32 %v11433_v36 }
 0x59c   :  { %v3713_v31 = vpop.xlane.xlu0 %3712  ;;  %v12405_v0 = vsel %vm6114_vm1, %v6164_v23, %v14264_v35  ;;  %v6163_v3 = vcvt.s32.f32 %v3687_v29  ;;  %7504 = vmatmul.mubr.msk.f32.gmra.mrb[142].mxu1 %vm104_vm0, %v6621_v37  ;;  %vm3961_vm7 = vcmp.eq.s32.totalorder %v13671_v25, %v3687_v29  ;;  %v4995_v30 = vsel %vm4814_vm4, %v4810_v15, 0.0  ;;  %v14266_v15 = vld [vmem:[#allocation52_spill] sm:$0xff] }
 0x59d   :  { %14265 = vst [vmem:[#allocation65_spill] sm:$0xff] %v12405_v0  ;;  %v3714_v61 = vcvt.f32.s32 %v3713_v31  ;;  %v4812_v33 = vmul.f32 %v4748_v55, %v4748_v55  ;;  %v3762_v39 = vadd.s32 %v11963_v26, %v3759_v21  ;;  %v6622_v23 = vsel %vm3961_vm7, 1.0, %v14202_v1  ;;  %v14270_v31 = vld [vmem:[#allocation76_spill] sm:$0xff] }
 0x59e   :  { %v5004_v54 = vsel %vm4814_vm4, %v4813_v40, 0.0  ;;  %7506 = vmatprep.mubr.msk.f32.mxu1 %vm104_vm0, %v6622_v23  ;;  %v3788_v13 = vpop.xlane.xlu1 %3787  ;;  %v6623_v36 = vsel %vm3962_vm6, 1.0, %v14202_v1  ;;  %vm3964_vm8 = vcmp.eq.s32.totalorder %v13671_v25, %v3732_v63  ;;  %4999 = vadd.xlane.f32.xlu1 %v4998_v10  ;;  %v12423_v26 = vsel %vm6114_vm1, %v6163_v3, %v14266_v15  ;;  %v14271_v10 = vld [vmem:[#allocation63_spill] sm:$0xff] }
 0x59f   :  { %v3717_v59 = vadd.s32 %v12027_v60, %v3714_v61  ;;  %4990 = vadd.xlane.f32.xlu0 %v4989_v38  ;;  %14267 = vst [vmem:[#allocation116_spill] sm:$0xff] %v12423_v26  ;;  %v14268_v60 = vld [vmem:[#allocation131_spill] sm:$0xff]  ;;  %v6168_v40 = vcvt.s32.f32 %v3762_v39  ;;  %v3789_v37 = vcvt.f32.s32 %v3788_v13  ;;  %v3850_v53 = vcvt.f32.s32 %v14270_v31  ;;  %v14277_v31 = vld [vmem:[#allocation137_spill] sm:$0xff] }
 0x5a0   :  { %v3743_v29 = vpop.xlane.xlu0 %3742  ;;  %v12428_v38 = vsel %vm6114_vm1, %v6166_v12, %v14268_v60  ;;  %7507 = vmatmul.mubr.msk.f32.gmra.mrb[144].mxu1 %vm104_vm0, %v6623_v36  ;;  %v3776_v35 = vshll.u32 %v3775_v47, 16  ;;  %v3805_v21 = vcvt.f32.s32 %v14271_v10  ;;  %v5001_v23 = vsel %vm4814_vm4, %v4812_v33, 0.0 }
 0x5a1   :  { %14269 = vst [vmem:[#allocation70_spill] sm:$0xff] %v12428_v38  ;;  %v6165_v55 = vcvt.s32.f32 %v3717_v59  ;;  %v3744_v27 = vcvt.f32.s32 %v3743_v29  ;;  %vm3963_vm9 = vcmp.eq.s32.totalorder %v13671_v25, %v3717_v59  ;;  %v3792_v3 = vadd.s32 %v11973_v45, %v3789_v37  ;;  %v14272_v59 = vld [vmem:[#allocation132_spill] sm:$0xff]  ;;  %v14276_v37 = vld [vmem:[#allocation42_spill] sm:$0xff] }
 0x5a2   :  { %v6624_v12 = vsel %vm3963_vm9, 1.0, %v14202_v1  ;;  %v3818_v13 = vpop.xlane.xlu1 %3817  ;;  %v6625_v47 = vsel %vm3964_vm8, 1.0, %v14202_v1  ;;  %vm3966_vm10 = vcmp.eq.s32.totalorder %v13671_v25, %v3762_v39  ;;  %5005 = vadd.xlane.f32.xlu1 %v5004_v54  ;;  %v3851_v60 = vshll.u32 %v3850_v53, 16 }
 0x5a3   :  { %v3747_v61 = vadd.s32 %v12042_v43, %v3744_v27  ;;  %4996 = vadd.xlane.f32.xlu0 %v4995_v30  ;;  %7509 = vmatprep.mubr.msk.f32.mxu1 %vm104_vm0, %v6624_v12  ;;  %v12446_v45 = vsel %vm6114_vm1, %v6165_v55, %v14272_v59  ;;  %v14274_v43 = vld [vmem:[#allocation26_spill] sm:$0xff]  ;;  %v6170_v33 = vcvt.s32.f32 %v3792_v3  ;;  %v3819_v15 = vcvt.f32.s32 %v3818_v13 }
 0x5a4   :  { %v3773_v36 = vpop.xlane.xlu0 %3772  ;;  %14273 = vst [vmem:[#allocation88_spill] sm:$0xff] %v12446_v45  ;;  %v12451_v30 = vsel %vm6114_vm1, %v6168_v40, %v14274_v43  ;;  %7510 = vmatmul.mubr.msk.f32.gmra.mrb[146].mxu1 %vm104_vm0, %v6625_v47  ;;  %v3880_v27 = vcvt.f32.s32 %v14276_v37  ;;  %v3806_v54 = vshll.u32 %v3805_v21, 16  ;;  %v3835_v55 = vcvt.f32.s32 %v14277_v31  ;;  %v14278_v21 = vld [vmem:[#allocation60_spill] sm:$0xff]  ;;  %v14283_v37 = vld [vmem:[#allocation178_spill] sm:$0xff] }
 0x5a5   :  { %14275 = vst [vmem:[#allocation181_spill] sm:$0xff] %v12451_v30  ;;  %v6167_v29 = vcvt.s32.f32 %v3747_v61  ;;  %v3774_v63 = vcvt.f32.s32 %v3773_v36  ;;  %vm3965_vm11 = vcmp.eq.s32.totalorder %v13671_v25, %v3747_v61  ;;  %v3822_v10 = vadd.s32 %v12023_v22, %v3819_v15  ;;  %v14280_v22 = vld [vmem:[#allocation32_spill] sm:$0xff]  ;;  %v14282_v15 = vld [vmem:[#allocation142_spill] sm:$0xff] }
 0x5a6   :  { %v6626_v40 = vsel %vm3965_vm11, 1.0, %v14202_v1  ;;  %v3848_v13 = vpop.xlane.xlu1 %3847  ;;  %v6627_v53 = vsel %vm3966_vm10, 1.0, %v14202_v1  ;;  %vm3968_vm12 = vcmp.eq.s32.totalorder %v13671_v25, %v3792_v3  ;;  %v3881_v43 = vshll.u32 %v3880_v27, 16  ;;  %v14284_v27 = vld [vmem:[#allocation34_spill] sm:$0xff] }
 0x5a7   :  { %v3777_v12 = vadd.s32 %v3776_v35, %v3774_v63  ;;  %5002 = vadd.xlane.f32.xlu0 %v5001_v23  ;;  %7512 = vmatprep.mubr.msk.f32.mxu1 %vm104_vm0, %v6626_v40  ;;  %v12467_v61 = vsel %vm6114_vm1, %v6167_v29, %v14278_v21  ;;  %v12472_v35 = vsel %vm6114_vm1, %v6170_v33, %v14280_v22  ;;  %v6172_v23 = vcvt.s32.f32 %v3822_v10  ;;  %v14288_v22 = vld [vmem:[#allocation154_spill] sm:$0xff] }
 0x5a8   :  { %v3803_v47 = vpop.xlane.xlu0 %3802  ;;  %14279 = vst [vmem:[#allocation71_spill] sm:$0xff] %v12467_v61  ;;  %14281 = vst [vmem:[#allocation124_spill] sm:$0xff] %v12472_v35  ;;  %v3849_v59 = vcvt.f32.s32 %v3848_v13  ;;  %7513 = vmatmul.mubr.msk.f32.gmra.mrb[148].mxu1 %vm104_vm0, %v6627_v53  ;;  %v3910_v63 = vcvt.f32.s32 %v14282_v15  ;;  %v3865_v31 = vcvt.f32.s32 %v14283_v37  ;;  %v3836_v29 = vshll.u32 %v3835_v55, 16  ;;  %v14286_v55 = vld [vmem:[#allocation68_spill] sm:$0xff] }
 0x5a9   :  { %v6169_v36 = vcvt.s32.f32 %v3777_v12  ;;  %v3804_v39 = vcvt.f32.s32 %v3803_v47  ;;  %vm3967_vm13 = vcmp.eq.s32.totalorder %v13671_v25, %v3777_v12  ;;  %v6629_v13 = vsel %vm3968_vm12, 1.0, %v14202_v1 }
 0x5aa   :  { %v3852_v40 = vadd.s32 %v3851_v60, %v3849_v59  ;;  %v6628_v61 = vsel %vm3967_vm13, 1.0, %v14202_v1  ;;  %v3878_v33 = vpop.xlane.xlu1 %3877  ;;  %vm3970_vm14 = vcmp.eq.s32.totalorder %v13671_v25, %v3822_v10  ;;  %v12492_v60 = vsel %vm6114_vm1, %v6172_v23, %v14286_v55  ;;  %v14289_v59 = vld [vmem:[#allocation194_spill] sm:$0xff]  ;;  %v14294_v10 = vld [vmem:[#allocation156_spill] sm:$0xff] }
 0x5ab   :  { %v3807_v21 = vadd.s32 %v3806_v54, %v3804_v39  ;;  %7515 = vmatprep.mubr.msk.f32.mxu1 %vm104_vm0, %v6628_v61  ;;  %v12487_v47 = vsel %vm6114_vm1, %v6169_v36, %v14284_v27  ;;  %14287 = vst [vmem:[#allocation94_spill] sm:$0xff] %v12492_v60  ;;  %v3879_v61 = vcvt.f32.s32 %v3878_v33  ;;  %v6109_v39 = vsel %vm6049_vm15, %v14289_v59, %v14288_v22  ;;  %v14290_v36 = vld [vmem:[#allocation44_spill] sm:$0xff]  ;;  %v14295_v22 = vld [vmem:[#allocation199_spill] sm:$0xff] }
 0x5ac   :  { %v3833_v53 = vpop.xlane.xlu0 %3832  ;;  %14285 = vst [vmem:[#allocation75_spill] sm:$0xff] %v12487_v47  ;;  %v6174_v54 = vcvt.s32.f32 %v3852_v40  ;;  %7516 = vmatmul.mubr.msk.f32.gmra.mrb[150].mxu1 %vm104_vm0, %v6629_v13  ;;  %v3911_v15 = vshll.u32 %v3910_v63, 16  ;;  %v3866_v37 = vshll.u32 %v3865_v31, 16  ;;  %v3895_v27 = vcvt.f32.s32 %v14290_v36  ;;  %v14291_v63 = vld [vmem:[#allocation38_spill] sm:$0xff]  ;;  %v14296_v36 = vld [vmem:[#allocation160_spill] sm:$0xff] }
 0x5ad   :  { %v6171_v12 = vcvt.s32.f32 %v3807_v21  ;;  %v3834_v3 = vcvt.f32.s32 %v3833_v53  ;;  %vm3969_vm2 = vcmp.eq.s32.totalorder %v13671_v25, %v3807_v21  ;;  %v3882_v47 = vadd.s32 %v3881_v43, %v3879_v61 }
 0x5ae   :  { %v6630_v55 = vsel %vm3969_vm2, 1.0, %v14202_v1  ;;  %v3908_v33 = vpop.xlane.xlu1 %3907  ;;  %v6631_v13 = vsel %vm3970_vm14, 1.0, %v14202_v1  ;;  %vm3972_vm3 = vcmp.eq.s32.totalorder %v13671_v25, %v3852_v40  ;;  %v12514_v43 = vsel %vm6114_vm1, %v6174_v54, %v6109_v39  ;;  %v14300_v40 = vld [vmem:[#allocation161_spill] sm:$0xff] }
 0x5af   :  { %v3837_v23 = vadd.s32 %v3836_v29, %v3834_v3  ;;  %7518 = vmatprep.mubr.msk.f32.mxu1 %vm104_vm0, %v6630_v55  ;;  %v12510_v31 = vsel %vm6114_vm1, %v6171_v12, %v14291_v63  ;;  %14293 = vst [vmem:[#allocation133_spill] sm:$0xff] %v12514_v43  ;;  %v6176_v29 = vcvt.s32.f32 %v3882_v47  ;;  %v3909_v61 = vcvt.f32.s32 %v3908_v33  ;;  %v14297_v55 = vld [vmem:[#allocation204_spill] sm:$0xff] }
 0x5b0   :  { %v3863_v53 = vpop.xlane.xlu0 %3862  ;;  %14292 = vst [vmem:[#allocation77_spill] sm:$0xff] %v12510_v31  ;;  %7519 = vmatmul.mubr.msk.f32.gmra.mrb[152].mxu1 %vm104_vm0, %v6631_v13  ;;  %v6108_v59 = vsel %vm6049_vm15, %v14295_v22, %v14294_v10  ;;  %v6111_v12 = vsel %vm6049_vm15, %v14297_v55, %v14296_v36  ;;  %v3896_v54 = vshll.u32 %v3895_v27, 16  ;;  %v6633_v13 = vsel %vm3972_vm3, 1.0, %v14202_v1  ;;  %v14303_v22 = vld [vmem:[#allocation212_spill] sm:$0xff] }
 0x5b1   :  { %v6173_v21 = vcvt.s32.f32 %v3837_v23  ;;  %v3864_v3 = vcvt.f32.s32 %v3863_v53  ;;  %vm3971_vm5 = vcmp.eq.s32.totalorder %v13671_v25, %v3837_v23  ;;  %v3912_v39 = vadd.s32 %v3911_v15, %v3909_v61  ;;  %v14301_v61 = vld [vmem:[#allocation208_spill] sm:$0xff] }
 0x5b2   :  { %v6632_v33 = vsel %vm3971_vm5, 1.0, %v14202_v1  ;;  %vm3974_vm6 = vcmp.eq.s32.totalorder %v13671_v25, %v3882_v47  ;;  %v12538_v27 = vsel %vm6114_vm1, %v6176_v29, %v6111_v12  ;;  %v6110_v47 = vsel %vm6049_vm15, %v14301_v61, %v14300_v40 }
 0x5b3   :  { %v3867_v63 = vadd.s32 %v3866_v37, %v3864_v3  ;;  %7521 = vmatprep.mubr.msk.f32.mxu1 %vm104_vm0, %v6632_v33  ;;  %v12534_v10 = vsel %vm6114_vm1, %v6173_v21, %v6108_v59  ;;  %14299 = vst [vmem:[#allocation100_spill] sm:$0xff] %v12538_v27  ;;  %v6178_v15 = vcvt.s32.f32 %v3912_v39  ;;  %v14302_v3 = vld [vmem:[#allocation166_spill] sm:$0xff]  ;;  %v6635_v12 = vsel %vm3974_vm6, 1.0, %v14202_v1  ;;  %v14307_v33 = vld [vmem:[#allocation215_spill] sm:$0xff] }
 0x5b4   :  { %v3893_v53 = vpop.xlane.xlu0 %3892  ;;  %14298 = vst [vmem:[#allocation80_spill] sm:$0xff] %v12534_v10  ;;  %7522 = vmatmul.mubr.msk.f32.gmra.mrb[154].mxu1 %vm104_vm0, %v6633_v13  ;;  %v6113_v21 = vsel %vm6049_vm15, %v14303_v22, %v14302_v3  ;;  %vm3976_vm9 = vcmp.eq.s32.totalorder %v13671_v25, %v3912_v39 }
 0x5b5   :  { %v6175_v37 = vcvt.s32.f32 %v3867_v63  ;;  %v3894_v23 = vcvt.f32.s32 %v3893_v53  ;;  %vm3973_vm7 = vcmp.eq.s32.totalorder %v13671_v25, %v3867_v63  ;;  %v12558_v55 = vsel %vm6114_vm1, %v6178_v15, %v6113_v21 }
 0x5b6   :  { %v6634_v29 = vsel %vm3973_vm7, 1.0, %v14202_v1  ;;  %14305 = vst [vmem:[#allocation163_spill] sm:$0xff] %v12558_v55 }
 0x5b7   :  { %v3897_v59 = vadd.s32 %v3896_v54, %v3894_v23  ;;  %7524 = vmatprep.mubr.msk.f32.mxu1 %vm104_vm0, %v6634_v29  ;;  %v12554_v36 = vsel %vm6114_vm1, %v6175_v37, %v6110_v47  ;;  %v14306_v54 = vld [vmem:[#allocation167_spill] sm:$0xff]  ;;  %v6637_v37 = vsel %vm3976_vm9, 1.0, %v14202_v1  ;;  %v4820_v23 = vpop.xlane.xlu1 %4819 }
 0x5b8   :  { %14304 = vst [vmem:[#allocation157_spill] sm:$0xff] %v12554_v36  ;;  %7525 = vmatmul.mubr.msk.f32.gmra.mrb[156].mxu1 %vm104_vm0, %v6635_v12  ;;  %v6112_v13 = vsel %vm6049_vm15, %v14307_v33, %v14306_v54  ;;  %v4817_v40 = vpop.xlane.xlu0 %4816 }
 0x5b9   :  { %v6177_v63 = vcvt.s32.f32 %v3897_v59  ;;  %vm3975_vm8 = vcmp.eq.s32.totalorder %v13671_v25, %v3897_v59 }
 0x5ba   :  { %v6636_v53 = vsel %vm3975_vm8, 1.0, %v14202_v1  ;;  %v5008_v1 = vmax.f32 %v4820_v23, 1e-24 }
 0x5bb   :  { %7527 = vmatprep.mubr.msk.f32.mxu1 %vm104_vm0, %v6636_v53  ;;  %v12572_v15 = vsel %vm6114_vm1, %v6177_v63, %v6112_v13  ;;  %v4826_v39 = vpop.xlane.xlu1 %4825  ;;  %v5007_v13 = vmax.f32 %v4817_v40, 1e-24 }
 0x5bc   :  { %14308 = vst [vmem:[#allocation182_spill] sm:$0xff] %v12572_v15  ;;  %7528 = vmatmul.mubr.msk.f32.gmra.mrb[158].mxu1 %vm104_vm0, %v6637_v37  ;;  %v4823_v61 = vpop.xlane.xlu0 %4822  ;;  %7940 = vrsqrt.f32 %v5008_v1  ;;  %v5010_v15 = vmax.f32 %v4826_v39, 1e-24  ;;  %vm6243_vm0 = vcmp.eq.s32.totalorder %v13671_v25, 34 }
 0x5bd   :  { %7942 = vrsqrt.f32 %v5007_v13  ;;  %v5009_v55 = vmax.f32 %v4823_v61, 1e-24 }
 0x5be   :  { %7944 = vrsqrt.f32 %v5010_v15 }
 0x5bf   :  { %v4832_v47 = vpop.xlane.xlu1 %4831  ;;  %7946 = vrsqrt.f32 %v5009_v55  ;;  %v8069_v55 = vld [vmem:[%s13359_s1 + $0x8] sm:$0xff] }
 0x5c0   :  { %v4829_v3 = vpop.xlane.xlu0 %4828  ;;  %v5012_v10 = vmax.f32 %v4832_v47, 1e-24 }
 0x5c1   :  { %v5011_v43 = vmax.f32 %v4829_v3, 1e-24 }
 0x5c2   :  { %7948 = vrsqrt.f32 %v5012_v10 }
 0x5c3   :  { %v4838_v22 = vpop.xlane.xlu1 %4837  ;;  %7950 = vrsqrt.f32 %v5011_v43  ;;  %v8070_v43 = vld [vmem:[%s13359_s1] sm:$0xff] }
 0x5c4   :  { %v4835_v21 = vpop.xlane.xlu0 %4834  ;;  %v5014_v40 = vmax.f32 %v4838_v22, 1e-24 }
 0x5c5   :  { %v5013_v60 = vmax.f32 %v4835_v21, 1e-24 }
 0x5c6   :  { %v7941_v39 = vpop.eup %7940  ;;  %7952 = vrsqrt.f32 %v5014_v40 }
 0x5c7   :  { %v4844_v29 = vpop.xlane.xlu1 %4843  ;;  %v7943_v13 = vpop.eup %7942  ;;  %7954 = vrsqrt.f32 %v5013_v60  ;;  %v5136_v15 = vmul.f32 %v8069_v55, %v7941_v39 }
 0x5c8   :  { %v4841_v59 = vpop.xlane.xlu0 %4840  ;;  %v5016_v35 = vmax.f32 %v4844_v29, 1e-24  ;;  %v7945_v10 = vpop.eup %7944  ;;  %v5135_v22 = vmul.f32 %v8070_v43, %v7943_v13  ;;  %v8072_v13 = vld [vmem:[%s13359_s1 + $0x10] sm:$0xff] }
 0x5c9   :  { %v5015_v47 = vmax.f32 %v4841_v59, 1e-24  ;;  %v7947_v30 = vpop.eup %7946  ;;  %v8071_v59 = vld [vmem:[%s13359_s1 + $0x18] sm:$0xff] }
 0x5ca   :  { %7956 = vrsqrt.f32 %v5016_v35  ;;  %v5138_v39 = vmul.f32 %v8071_v59, %v7945_v10  ;;  %v5137_v43 = vmul.f32 %v8072_v13, %v7947_v30  ;;  %v8073_v30 = vld [vmem:[%s13359_s1 + $0x28] sm:$0xff] }
 0x5cb   :  { %v4850_v12 = vpop.xlane.xlu1 %4849  ;;  %7958 = vrsqrt.f32 %v5015_v47 }
 0x5cc   :  { %v12576_v54 = vpop.xlane.xlu0 %4846  ;;  %v5018_v60 = vmax.f32 %v4850_v12, 1e-24  ;;  %v7949_v38 = vpop.eup %7948 }
 0x5cd   :  { %v5017_v55 = vmax.f32 %v12576_v54, 1e-24  ;;  %v7951_v0 = vpop.eup %7950 }
 0x5ce   :  { %7960 = vrsqrt.f32 %v5018_v60 }
 0x5cf   :  { %v12578_v33 = vpop.xlane.xlu1 %4855  ;;  %7962 = vrsqrt.f32 %v5017_v55 }
 0x5d0   :  { %v12580_v63 = vpop.xlane.xlu0 %4852  ;;  %v5020_v10 = vmax.f32 %v12578_v33, 1e-24  ;;  %v7953_v59 = vpop.eup %7952 }
 0x5d1   :  { %v7955_v60 = vpop.eup %7954 }
 0x5d2   :  { %7964 = vrsqrt.f32 %v5020_v10  ;;  %v8076_v10 = vld [vmem:[%s13359_s1 + $0x30] sm:$0xff] }
 0x5d3   :  { %v12582_v53 = vpop.xlane.xlu1 %4861 }
 0x5d4   :  { %v12584_v37 = vpop.xlane.xlu0 %4858 }
 0x5d7   :  { %v12586_v36 = vpop.xlane.xlu1 %4867 }
 0x5d8   :  { %v12588_v27 = vpop.xlane.xlu0 %4864 }
 0x5db   :  { %v12590_v31 = vpop.xlane.xlu1 %4873 }
 0x5dc   :  { %v12592_v23 = vpop.xlane.xlu0 %4870 }
 0x5df   :  { %v12594_v1 = vpop.xlane.xlu1 %4879 }
 0x5e0   :  { %v12596_v61 = vpop.xlane.xlu0 %4876 }
 0x5e3   :  { %v12601_v3 = vpop.xlane.xlu1 %4885 }
 0x5e4   :  { %v12606_v21 = vpop.xlane.xlu0 %4882 }
 0x5e7   :  { %v12616_v12 = vpop.xlane.xlu1 %4891 }
 0x5e8   :  { %v12620_v54 = vpop.xlane.xlu0 %4888 }
 0x603   :  { %v7436_v40 = vpop.f32.mrb[96].mxu1 }
 0x604   :  { %v5200_v29 = vmul.f32 %v7436_v40, %v5136_v15  ;;  %v4367_v45 = vpop.f32.mrb[97].mxu1  ;;  %v5140_v40 = vmul.f32 %v8073_v30, %v7949_v38 }
 0x605   :  { %v5199_v26 = vmul.f32 %v5135_v22, %v4367_v45 }
 0x606   :  { %v5266_v35 = vsel %vm4814_vm4, %v5200_v29, 0.0  ;;  %v5019_v29 = vmax.f32 %v12580_v63, 1e-24  ;;  %v8075_v63 = vld [vmem:[%s13359_s1 + $0x38] sm:$0xff] }
 0x607   :  { %5267 = vadd.xlane.f32.xlu1 %v5266_v35  ;;  %v7439_v15 = vpop.f32.mrb[98].mxu1  ;;  %v5263_v47 = vsel %vm4814_vm4, %v5199_v26, 0.0  ;;  %v8074_v26 = vld [vmem:[%s13359_s1 + $0x20] sm:$0xff] }
 0x608   :  { %v5202_v45 = vmul.f32 %v7439_v15, %v5138_v39  ;;  %v4377_v22 = vpop.f32.mrb[99].mxu1  ;;  %5264 = vadd.xlane.f32.xlu0 %v5263_v47  ;;  %v5139_v33 = vmul.f32 %v8074_v26, %v7951_v0  ;;  %v5022_v15 = vmax.f32 %v12582_v53, 1e-24  ;;  %7966 = vrsqrt.f32 %v5019_v29 }
 0x609   :  { %v5201_v13 = vmul.f32 %v5137_v43, %v4377_v22  ;;  %v5142_v43 = vmul.f32 %v8075_v63, %v7953_v59  ;;  %v5021_v0 = vmax.f32 %v12584_v37, 1e-24  ;;  %v12636_v22 = vpop.xlane.xlu1 %4897  ;;  %v5141_v53 = vmul.f32 %v8076_v10, %v7955_v60 }
 0x60a   :  { %v5272_v39 = vsel %vm4814_vm4, %v5202_v45, 0.0  ;;  %v7957_v45 = vpop.eup %7956  ;;  %7968 = vrsqrt.f32 %v5022_v15 }
 0x60b   :  { %5273 = vadd.xlane.f32.xlu1 %v5272_v39  ;;  %v7442_v35 = vpop.f32.mrb[100].mxu1  ;;  %v5269_v55 = vsel %vm4814_vm4, %v5201_v13, 0.0  ;;  %v7959_v13 = vpop.eup %7958  ;;  %7970 = vrsqrt.f32 %v5021_v0 }
 0x60c   :  { %v5204_v38 = vmul.f32 %v7442_v35, %v5140_v40  ;;  %v4387_v47 = vpop.f32.mrb[101].mxu1  ;;  %5270 = vadd.xlane.f32.xlu0 %v5269_v55  ;;  %v12641_v40 = vpop.xlane.xlu0 %4894 }
 0x60d   :  { %v5203_v30 = vmul.f32 %v5139_v33, %v4387_v47  ;;  %v8077_v33 = vld [vmem:[%s13359_s1 + $0x48] sm:$0xff]  ;;  %v7961_v60 = vpop.eup %7960 }
 0x60e   :  { %v5278_v29 = vsel %vm4814_vm4, %v5204_v38, 0.0  ;;  %v5144_v35 = vmul.f32 %v8077_v33, %v7957_v45  ;;  %v8078_v38 = vld [vmem:[%s13359_s1 + $0x40] sm:$0xff]  ;;  %v7963_v63 = vpop.eup %7962  ;;  %v5023_v45 = vmax.f32 %v12588_v27, 1e-24 }
 0x60f   :  { %5279 = vadd.xlane.f32.xlu1 %v5278_v29  ;;  %v7445_v26 = vpop.f32.mrb[102].mxu1  ;;  %v5275_v59 = vsel %vm4814_vm4, %v5203_v30, 0.0  ;;  %v5143_v47 = vmul.f32 %v8078_v38, %v7959_v13  ;;  %v12653_v30 = vpop.xlane.xlu1 %4903  ;;  %v8079_v13 = vld [vmem:[%s13359_s1 + $0x58] sm:$0xff] }
 0x610   :  { %v5206_v37 = vmul.f32 %v7445_v26, %v5142_v43  ;;  %v4397_v39 = vpop.f32.mrb[103].mxu1  ;;  %5276 = vadd.xlane.f32.xlu0 %v5275_v59  ;;  %v5024_v43 = vmax.f32 %v12586_v36, 1e-24  ;;  %v12657_v29 = vpop.xlane.xlu0 %4900  ;;  %v5146_v59 = vmul.f32 %v8079_v13, %v7961_v60  ;;  %v8081_v60 = vld [vmem:[%s13359_s1 + $0x68] sm:$0xff] }
 0x611   :  { %v5205_v55 = vmul.f32 %v5141_v53, %v4397_v39  ;;  %v8080_v39 = vld [vmem:[%s13359_s1 + $0x50] sm:$0xff] }
 0x612   :  { %v5284_v15 = vsel %vm4814_vm4, %v5206_v37, 0.0  ;;  %v7965_v37 = vpop.eup %7964  ;;  %v5145_v33 = vmul.f32 %v8080_v39, %v7963_v63  ;;  %7972 = vrsqrt.f32 %v5024_v43  ;;  %v8082_v43 = vld [vmem:[%s13359_s1 + $0x60] sm:$0xff] }
 0x613   :  { %5285 = vadd.xlane.f32.xlu1 %v5284_v15  ;;  %v7448_v0 = vpop.f32.mrb[104].mxu1  ;;  %v5281_v10 = vsel %vm4814_vm4, %v5205_v55, 0.0  ;;  %v7967_v55 = vpop.eup %7966  ;;  %7974 = vrsqrt.f32 %v5023_v45 }
 0x614   :  { %v5208_v53 = vmul.f32 %v7448_v0, %v5144_v35  ;;  %v4407_v26 = vpop.f32.mrb[105].mxu1  ;;  %5282 = vadd.xlane.f32.xlu0 %v5281_v10  ;;  %v12670_v10 = vpop.xlane.xlu1 %4909 }
 0x615   :  { %v5207_v36 = vmul.f32 %v5143_v47, %v4407_v26  ;;  %v5148_v47 = vmul.f32 %v8081_v60, %v7965_v37  ;;  %v7969_v63 = vpop.eup %7968  ;;  %v12675_v13 = vpop.xlane.xlu0 %4906 }
 0x616   :  { %v5290_v27 = vsel %vm4814_vm4, %v5208_v53, 0.0  ;;  %v5147_v53 = vmul.f32 %v8082_v43, %v7967_v55  ;;  %v7971_v45 = vpop.eup %7970  ;;  %v8083_v55 = vld [vmem:[%s13359_s1 + $0x78] sm:$0xff] }
 0x617   :  { %5291 = vadd.xlane.f32.xlu1 %v5290_v27  ;;  %v7451_v35 = vpop.f32.mrb[106].mxu1  ;;  %v5287_v38 = vsel %vm4814_vm4, %v5207_v36, 0.0  ;;  %v5026_v36 = vmax.f32 %v12590_v31, 1e-24  ;;  %v5025_v27 = vmax.f32 %v12592_v23, 1e-24 }
 0x618   :  { %v5210_v15 = vmul.f32 %v7451_v35, %v5146_v59  ;;  %v4417_v0 = vpop.f32.mrb[107].mxu1  ;;  %5288 = vadd.xlane.f32.xlu0 %v5287_v38  ;;  %v5150_v38 = vmul.f32 %v8083_v55, %v7969_v63  ;;  %v5027_v55 = vmax.f32 %v12596_v61, 1e-24 }
 0x619   :  { %v5209_v26 = vmul.f32 %v5145_v33, %v4417_v0  ;;  %7976 = vrsqrt.f32 %v5026_v36  ;;  %v12691_v43 = vpop.xlane.xlu0 %4912 }
 0x61a   :  { %v5296_v59 = vsel %vm4814_vm4, %v5210_v15, 0.0  ;;  %v8084_v15 = vld [vmem:[%s13359_s1 + $0x70] sm:$0xff]  ;;  %7978 = vrsqrt.f32 %v5025_v27 }
 0x61b   :  { %5297 = vadd.xlane.f32.xlu1 %v5296_v59  ;;  %v7454_v39 = vpop.f32.mrb[108].mxu1  ;;  %v5293_v37 = vsel %vm4814_vm4, %v5209_v26, 0.0  ;;  %v5149_v31 = vmul.f32 %v8084_v15, %v7971_v45  ;;  %v12688_v26 = vpop.xlane.xlu1 %4915 }
 0x61c   :  { %v5212_v35 = vmul.f32 %v7454_v39, %v5148_v47  ;;  %v4427_v33 = vpop.f32.mrb[109].mxu1  ;;  %5294 = vadd.xlane.f32.xlu0 %v5293_v37  ;;  %v7973_v59 = vpop.eup %7972 }
 0x61d   :  { %v5211_v0 = vmul.f32 %v5147_v53, %v4427_v33  ;;  %v7975_v39 = vpop.eup %7974  ;;  %v8085_v33 = vld [vmem:[%s13359_s1 + $0x88] sm:$0xff] }
 0x61e   :  { %v5302_v60 = vsel %vm4814_vm4, %v5212_v35, 0.0  ;;  %v5028_v35 = vmax.f32 %v12594_v1, 1e-24  ;;  %v5152_v27 = vmul.f32 %v8085_v33, %v7973_v59  ;;  %v8088_v33 = vld [vmem:[%s13359_s1 + $0x90] sm:$0xff] }
 0x61f   :  { %5303 = vadd.xlane.f32.xlu1 %v5302_v60  ;;  %v7457_v23 = vpop.f32.mrb[110].mxu1  ;;  %v5299_v47 = vsel %vm4814_vm4, %v5211_v0, 0.0  ;;  %v12703_v15 = vpop.xlane.xlu1 %4921 }
 0x620   :  { %v5214_v63 = vmul.f32 %v7457_v23, %v5150_v38  ;;  %v4437_v53 = vpop.f32.mrb[111].mxu1  ;;  %5300 = vadd.xlane.f32.xlu0 %v5299_v47  ;;  %v8086_v38 = vld [vmem:[%s13359_s1 + $0x80] sm:$0xff]  ;;  %7980 = vrsqrt.f32 %v5028_v35  ;;  %v5030_v35 = vmax.f32 %v12601_v3, 1e-24  ;;  %v5031_v3 = vmax.f32 %v12620_v54, 1e-24 }
 0x621   :  { %v5213_v37 = vmul.f32 %v5149_v31, %v4437_v53  ;;  %v5151_v0 = vmul.f32 %v8086_v38, %v7975_v39  ;;  %v12705_v31 = vpop.xlane.xlu0 %4918  ;;  %7982 = vrsqrt.f32 %v5027_v55  ;;  %v8087_v39 = vld [vmem:[%s13359_s1 + $0x98] sm:$0xff]  ;;  %v5029_v55 = vmax.f32 %v12606_v21, 1e-24  ;;  %v8090_v54 = vld [vmem:[%s13359_s1 + $0xa0] sm:$0xff] }
 0x622   :  { %v5308_v45 = vsel %vm4814_vm4, %v5214_v63, 0.0  ;;  %7984 = vrsqrt.f32 %v5030_v35 }
 0x623   :  { %5309 = vadd.xlane.f32.xlu1 %v5308_v45  ;;  %v5305_v36 = vsel %vm4814_vm4, %v5213_v37, 0.0  ;;  %v7977_v47 = vpop.eup %7976  ;;  %v12709_v37 = vpop.xlane.xlu1 %4927  ;;  %7986 = vrsqrt.f32 %v5029_v55 }
 0x624   :  { %5306 = vadd.xlane.f32.xlu0 %v5305_v36  ;;  %v7979_v59 = vpop.eup %7978  ;;  %v5154_v45 = vmul.f32 %v8087_v39, %v7977_v47 }
 0x625   :  { %v7460_v1 = vpop.f32.mrb[112].mxu1  ;;  %v12715_v36 = vpop.xlane.xlu0 %4924 }
 0x626   :  { %v5216_v60 = vmul.f32 %v7460_v1, %v5152_v27  ;;  %v4447_v23 = vpop.f32.mrb[113].mxu1  ;;  %v5153_v27 = vmul.f32 %v8088_v33, %v7979_v59  ;;  %v5033_v33 = vmax.f32 %v12641_v40, 1e-24 }
 0x627   :  { %v5215_v63 = vmul.f32 %v5151_v0, %v4447_v23  ;;  %v12723_v47 = vpop.xlane.xlu1 %4933 }
 0x628   :  { %v5314_v61 = vsel %vm4814_vm4, %v5216_v60, 0.0  ;;  %v5032_v60 = vmax.f32 %v12616_v12, 1e-24  ;;  %v8089_v12 = vld [vmem:[%s13359_s1 + $0xa8] sm:$0xff] }
 0x629   :  { %5315 = vadd.xlane.f32.xlu1 %v5314_v61  ;;  %v5311_v53 = vsel %vm4814_vm4, %v5215_v63, 0.0  ;;  %v12726_v39 = vpop.xlane.xlu0 %4930 }
 0x62a   :  { %5312 = vadd.xlane.f32.xlu0 %v5311_v53  ;;  %v7981_v23 = vpop.eup %7980  ;;  %7988 = vrsqrt.f32 %v5032_v60 }
 0x62b   :  { %v7983_v61 = vpop.eup %7982  ;;  %v5156_v59 = vmul.f32 %v8089_v12, %v7981_v23  ;;  %7990 = vrsqrt.f32 %v5031_v3  ;;  %v12737_v55 = vpop.xlane.xlu1 %4939  ;;  %v5037_v12 = vmax.f32 %v12675_v13, 1e-24  ;;  %v8093_v13 = vld [vmem:[%s13359_s1 + $0xc8] sm:$0xff] }
 0x62c   :  { %v7463_v38 = vpop.f32.mrb[114].mxu1  ;;  %v5155_v35 = vmul.f32 %v8090_v54, %v7983_v61 }
 0x62d   :  { %v5218_v0 = vmul.f32 %v7463_v38, %v5154_v45  ;;  %v4457_v1 = vpop.f32.mrb[115].mxu1  ;;  %v5034_v45 = vmax.f32 %v12636_v22, 1e-24  ;;  %v12740_v60 = vpop.xlane.xlu0 %4936  ;;  %v5035_v22 = vmax.f32 %v12657_v29, 1e-24 }
 0x62e   :  { %v5217_v63 = vmul.f32 %v5153_v27, %v4457_v1  ;;  %v5036_v1 = vmax.f32 %v12653_v30, 1e-24  ;;  %v8091_v30 = vld [vmem:[%s13359_s1 + $0xb8] sm:$0xff] }
 0x62f   :  { %v5320_v53 = vsel %vm4814_vm4, %v5218_v0, 0.0  ;;  %7992 = vrsqrt.f32 %v5034_v45  ;;  %v12750_v29 = vpop.xlane.xlu1 %4945  ;;  %v8092_v45 = vld [vmem:[%s13359_s1 + $0xb0] sm:$0xff] }
 0x630   :  { %5321 = vadd.xlane.f32.xlu1 %v5320_v53  ;;  %v5317_v21 = vsel %vm4814_vm4, %v5217_v63, 0.0  ;;  %7994 = vrsqrt.f32 %v5033_v33  ;;  %v7985_v63 = vpop.eup %7984  ;;  %v5038_v53 = vmax.f32 %v12670_v10, 1e-24 }
 0x631   :  { %5318 = vadd.xlane.f32.xlu0 %v5317_v21  ;;  %v7987_v61 = vpop.eup %7986  ;;  %7996 = vrsqrt.f32 %v5036_v1  ;;  %v5158_v21 = vmul.f32 %v8091_v30, %v7985_v63 }
 0x632   :  { %7998 = vrsqrt.f32 %v5035_v22  ;;  %v5157_v54 = vmul.f32 %v8092_v45, %v7987_v61 }
 0x633   :  { %8000 = vrsqrt.f32 %v5038_v53  ;;  %v12766_v53 = vpop.xlane.xlu1 %4951 }
 0x634   :  { %8002 = vrsqrt.f32 %v5037_v12  ;;  %v5042_v12 = vmax.f32 %v12703_v15, 1e-24 }
 0x636   :  { %v7466_v27 = vpop.f32.mrb[116].mxu1 }
 0x637   :  { %v5220_v38 = vmul.f32 %v7466_v27, %v5156_v59  ;;  %v4467_v0 = vpop.f32.mrb[117].mxu1  ;;  %v7989_v59 = vpop.eup %7988  ;;  %v5040_v27 = vmax.f32 %v12688_v26, 1e-24 }
 0x638   :  { %v5219_v23 = vmul.f32 %v5155_v35, %v4467_v0  ;;  %v12755_v35 = vpop.xlane.xlu0 %4942  ;;  %v7991_v33 = vpop.eup %7990  ;;  %v5160_v1 = vmul.f32 %v8093_v13, %v7989_v59 }
 0x639   :  { %v5326_v3 = vsel %vm4814_vm4, %v5220_v38, 0.0  ;;  %v7993_v22 = vpop.eup %7992  ;;  %8004 = vrsqrt.f32 %v5040_v27  ;;  %v8096_v27 = vld [vmem:[%s13359_s1 + $0xd0] sm:$0xff] }
 0x63a   :  { %5327 = vadd.xlane.f32.xlu1 %v5326_v3  ;;  %v5323_v40 = vsel %vm4814_vm4, %v5219_v23, 0.0  ;;  %v5039_v23 = vmax.f32 %v12691_v43, 1e-24  ;;  %v8094_v3 = vld [vmem:[%s13359_s1 + $0xc0] sm:$0xff] }
 0x63b   :  { %5324 = vadd.xlane.f32.xlu0 %v5323_v40  ;;  %v5159_v61 = vmul.f32 %v8094_v3, %v7991_v33  ;;  %v7995_v40 = vpop.eup %7994  ;;  %v5044_v3 = vmax.f32 %v12709_v37, 1e-24 }
 0x63c   :  { %v12770_v43 = vpop.xlane.xlu0 %4948  ;;  %8006 = vrsqrt.f32 %v5039_v23  ;;  %v5161_v15 = vmul.f32 %v8096_v27, %v7995_v40  ;;  %v5043_v40 = vmax.f32 %v12715_v36, 1e-24  ;;  %v5046_v36 = vmax.f32 %v12723_v47, 1e-24 }
 0x63d   :  { %8008 = vrsqrt.f32 %v5042_v12  ;;  %v8098_v12 = vld [vmem:[%s13359_s1 + $0xe0] sm:$0xff] }
 0x63e   :  { %v7469_v10 = vpop.f32.mrb[118].mxu1 }
 0x63f   :  { %v5222_v38 = vmul.f32 %v7469_v10, %v5158_v21  ;;  %v4477_v0 = vpop.f32.mrb[119].mxu1  ;;  %v5041_v10 = vmax.f32 %v12705_v31, 1e-24  ;;  %v8097_v31 = vld [vmem:[%s13359_s1 + $0xe8] sm:$0xff] }
 0x640   :  { %v5221_v63 = vmul.f32 %v5157_v54, %v4477_v0  ;;  %v8095_v54 = vld [vmem:[%s13359_s1 + $0xd8] sm:$0xff] }
 0x641   :  { %v5332_v26 = vsel %vm4814_vm4, %v5222_v38, 0.0  ;;  %v5162_v33 = vmul.f32 %v8095_v54, %v7993_v22  ;;  %v7997_v38 = vpop.eup %7996  ;;  %8010 = vrsqrt.f32 %v5041_v10 }
 0x642   :  { %5333 = vadd.xlane.f32.xlu1 %v5332_v26  ;;  %v7472_v30 = vpop.f32.mrb[120].mxu1  ;;  %v5329_v21 = vsel %vm4814_vm4, %v5221_v63, 0.0  ;;  %v7999_v13 = vpop.eup %7998  ;;  %8012 = vrsqrt.f32 %v5044_v3  ;;  %v8100_v3 = vld [vmem:[%s13359_s1 + $0xf0] sm:$0xff] }
 0x643   :  { %v5224_v59 = vmul.f32 %v7472_v30, %v5160_v1  ;;  %v4487_v45 = vpop.f32.mrb[121].mxu1  ;;  %5330 = vadd.xlane.f32.xlu0 %v5329_v21  ;;  %v12786_v30 = vpop.xlane.xlu1 %4957  ;;  %v5163_v37 = vmul.f32 %v8098_v12, %v7999_v13  ;;  %8014 = vrsqrt.f32 %v5043_v40 }
 0x644   :  { %v5223_v0 = vmul.f32 %v5159_v61, %v4487_v45  ;;  %v5164_v61 = vmul.f32 %v8097_v31, %v7997_v38  ;;  %v8001_v21 = vpop.eup %8000  ;;  %v12791_v45 = vpop.xlane.xlu0 %4954  ;;  %8016 = vrsqrt.f32 %v5046_v36  ;;  %v8102_v36 = vld [vmem:[%s13359_s1 + $0x100] sm:$0xff] }
 0x645   :  { %v5338_v1 = vsel %vm4814_vm4, %v5224_v59, 0.0  ;;  %v8003_v54 = vpop.eup %8002 }
 0x646   :  { %5339 = vadd.xlane.f32.xlu1 %v5338_v1  ;;  %v5335_v23 = vsel %vm4814_vm4, %v5223_v0, 0.0  ;;  %v5045_v1 = vmax.f32 %v12726_v39, 1e-24 }
 0x647   :  { %v7475_v63 = vpop.f32.mrb[122].mxu1  ;;  %5336 = vadd.xlane.f32.xlu0 %v5335_v23  ;;  %v12804_v31 = vpop.xlane.xlu1 %4963 }
 0x648   :  { %v5226_v22 = vmul.f32 %v7475_v63, %v5162_v33  ;;  %v4497_v26 = vpop.f32.mrb[123].mxu1  ;;  %v8005_v63 = vpop.eup %8004  ;;  %8018 = vrsqrt.f32 %v5045_v1  ;;  %v5050_v1 = vmax.f32 %v12750_v29, 1e-24 }
 0x649   :  { %v5225_v59 = vmul.f32 %v5161_v15, %v4497_v26  ;;  %v8099_v15 = vld [vmem:[%s13359_s1 + $0xf8] sm:$0xff]  ;;  %v8007_v26 = vpop.eup %8006  ;;  %v12808_v39 = vpop.xlane.xlu0 %4960 }
 0x64a   :  { %v5344_v33 = vsel %vm4814_vm4, %v5226_v22, 0.0  ;;  %v5166_v13 = vmul.f32 %v8099_v15, %v8001_v21  ;;  %v5165_v22 = vmul.f32 %v8100_v3, %v8003_v54  ;;  %v5048_v21 = vmax.f32 %v12737_v55, 1e-24 }
 0x64b   :  { %5345 = vadd.xlane.f32.xlu1 %v5344_v33  ;;  %v7478_v10 = vpop.f32.mrb[124].mxu1  ;;  %v5341_v38 = vsel %vm4814_vm4, %v5225_v59, 0.0  ;;  %v5047_v33 = vmax.f32 %v12740_v60, 1e-24  ;;  %v5167_v55 = vmul.f32 %v8102_v36, %v8007_v26  ;;  %v8103_v60 = vld [vmem:[%s13359_s1 + $0x118] sm:$0xff]  ;;  %v12824_v26 = vpop.xlane.xlu1 %4969 }
 0x64c   :  { %v5228_v0 = vmul.f32 %v7478_v10, %v5164_v61  ;;  %v4507_v27 = vpop.f32.mrb[125].mxu1  ;;  %5342 = vadd.xlane.f32.xlu0 %v5341_v38  ;;  %v8009_v10 = vpop.eup %8008  ;;  %8020 = vrsqrt.f32 %v5048_v21 }
 0x64d   :  { %v5227_v23 = vmul.f32 %v5163_v37, %v4507_v27  ;;  %v8101_v37 = vld [vmem:[%s13359_s1 + $0x108] sm:$0xff]  ;;  %8022 = vrsqrt.f32 %v5047_v33  ;;  %v5170_v3 = vmul.f32 %v8103_v60, %v8009_v10  ;;  %v12829_v21 = vpop.xlane.xlu0 %4966 }
 0x64e   :  { %v5350_v47 = vsel %vm4814_vm4, %v5228_v0, 0.0  ;;  %v5168_v54 = vmul.f32 %v8101_v37, %v8005_v63  ;;  %v8011_v0 = vpop.eup %8010  ;;  %8024 = vrsqrt.f32 %v5050_v1 }
 0x64f   :  { %5351 = vadd.xlane.f32.xlu1 %v5350_v47  ;;  %v7481_v61 = vpop.f32.mrb[126].mxu1  ;;  %v5347_v40 = vsel %vm4814_vm4, %v5227_v23, 0.0  ;;  %v8013_v47 = vpop.eup %8012 }
 0x650   :  { %v5230_v59 = vmul.f32 %v7481_v61, %v5166_v13  ;;  %v4517_v12 = vpop.f32.mrb[127].mxu1  ;;  %5348 = vadd.xlane.f32.xlu0 %v5347_v40  ;;  %v8104_v40 = vld [vmem:[%s13359_s1 + $0x110] sm:$0xff] }
 0x651   :  { %v5229_v38 = vmul.f32 %v5165_v22, %v4517_v12  ;;  %v5049_v22 = vmax.f32 %v12755_v35, 1e-24  ;;  %v5169_v29 = vmul.f32 %v8104_v40, %v8011_v0  ;;  %v5052_v35 = vmax.f32 %v12766_v53, 1e-24 }
 0x652   :  { %v5356_v27 = vsel %vm4814_vm4, %v5230_v59, 0.0  ;;  %v8015_v59 = vpop.eup %8014 }
 0x653   :  { %5357 = vadd.xlane.f32.xlu1 %v5356_v27  ;;  %v7484_v15 = vpop.f32.mrb[128].mxu1  ;;  %v5353_v13 = vsel %vm4814_vm4, %v5229_v38, 0.0  ;;  %8026 = vrsqrt.f32 %v5049_v22  ;;  %v8105_v38 = vld [vmem:[%s13359_s1 + $0x128] sm:$0xff]  ;;  %v8017_v0 = vpop.eup %8016 }
 0x654   :  { %v5232_v63 = vmul.f32 %v7484_v15, %v5168_v54  ;;  %v4527_v23 = vpop.f32.mrb[129].mxu1  ;;  %5354 = vadd.xlane.f32.xlu0 %v5353_v13  ;;  %v5172_v36 = vmul.f32 %v8105_v38, %v8013_v47  ;;  %v8106_v15 = vld [vmem:[%s13359_s1 + $0x120] sm:$0xff]  ;;  %v8019_v1 = vpop.eup %8018  ;;  %8028 = vrsqrt.f32 %v5052_v35  ;;  %v5056_v38 = vmax.f32 %v12804_v31, 1e-24 }
 0x655   :  { %v5231_v61 = vmul.f32 %v5167_v55, %v4527_v23  ;;  %v5051_v55 = vmax.f32 %v12770_v43, 1e-24  ;;  %v5171_v13 = vmul.f32 %v8106_v15, %v8015_v59  ;;  %v12846_v43 = vpop.xlane.xlu0 %4972 }
 0x656   :  { %v5362_v12 = vsel %vm4814_vm4, %v5232_v63, 0.0  ;;  %v12842_v63 = vpop.xlane.xlu1 %4975  ;;  %v8021_v59 = vpop.eup %8020 }
 0x657   :  { %5363 = vadd.xlane.f32.xlu1 %v5362_v12  ;;  %v7487_v37 = vpop.f32.mrb[130].mxu1  ;;  %v5359_v54 = vsel %vm4814_vm4, %v5231_v61, 0.0  ;;  %8030 = vrsqrt.f32 %v5051_v55  ;;  %v8107_v61 = vld [vmem:[%s13359_s1 + $0x138] sm:$0xff] }
 0x658   :  { %v5234_v33 = vmul.f32 %v7487_v37, %v5170_v3  ;;  %v4537_v10 = vpop.f32.mrb[131].mxu1  ;;  %5360 = vadd.xlane.f32.xlu0 %v5359_v54  ;;  %v5054_v3 = vmax.f32 %v12786_v30, 1e-24  ;;  %v5174_v40 = vmul.f32 %v8107_v61, %v8017_v0  ;;  %v8108_v37 = vld [vmem:[%s13359_s1 + $0x130] sm:$0xff]  ;;  %v8023_v54 = vpop.eup %8022 }
 0x659   :  { %v5233_v27 = vmul.f32 %v5169_v29, %v4537_v10  ;;  %v5053_v29 = vmax.f32 %v12791_v45, 1e-24  ;;  %v5173_v30 = vmul.f32 %v8108_v37, %v8019_v1  ;;  %v8109_v45 = vld [vmem:[%s13359_s1 + $0x148] sm:$0xff] }
 0x65a   :  { %v5368_v53 = vsel %vm4814_vm4, %v5234_v33, 0.0  ;;  %8032 = vrsqrt.f32 %v5054_v3  ;;  %v5176_v0 = vmul.f32 %v8109_v45, %v8021_v59  ;;  %v12862_v15 = vpop.xlane.xlu1 %4981 }
 0x65b   :  { %5369 = vadd.xlane.f32.xlu1 %v5368_v53  ;;  %v7490_v23 = vpop.f32.mrb[132].mxu1  ;;  %v5365_v60 = vsel %vm4814_vm4, %v5233_v27, 0.0  ;;  %8034 = vrsqrt.f32 %v5053_v29  ;;  %v5055_v27 = vmax.f32 %v12808_v39, 1e-24  ;;  %v8110_v53 = vld [vmem:[%s13359_s1 + $0x140] sm:$0xff]  ;;  %v8111_v29 = vld [vmem:[%s13359_s1 + $0x158] sm:$0xff] }
 0x65c   :  { %v5236_v22 = vmul.f32 %v7490_v23, %v5172_v36  ;;  %v4547_v47 = vpop.f32.mrb[133].mxu1  ;;  %5366 = vadd.xlane.f32.xlu0 %v5365_v60  ;;  %v5175_v31 = vmul.f32 %v8110_v53, %v8023_v54  ;;  %v12867_v23 = vpop.xlane.xlu0 %4978  ;;  %8036 = vrsqrt.f32 %v5056_v38  ;;  %v5058_v39 = vmax.f32 %v12824_v26, 1e-24  ;;  %v8112_v54 = vld [vmem:[%s13359_s1 + $0x150] sm:$0xff] }
 0x65d   :  { %v5235_v12 = vmul.f32 %v5171_v13, %v4547_v47  ;;  %v8025_v13 = vpop.eup %8024  ;;  %8038 = vrsqrt.f32 %v5055_v27  ;;  %v8113_v27 = vld [vmem:[%s13359_s1 + $0x168] sm:$0xff] }
 0x65e   :  { %v5374_v35 = vsel %vm4814_vm4, %v5236_v22, 0.0  ;;  %v8027_v60 = vpop.eup %8026  ;;  %v5178_v59 = vmul.f32 %v8111_v29, %v8025_v13  ;;  %8040 = vrsqrt.f32 %v5058_v39 }
 0x65f   :  { %5375 = vadd.xlane.f32.xlu1 %v5374_v35  ;;  %v7493_v33 = vpop.f32.mrb[134].mxu1  ;;  %v5371_v10 = vsel %vm4814_vm4, %v5235_v12, 0.0  ;;  %v5057_v12 = vmax.f32 %v12829_v21, 1e-24  ;;  %v8029_v37 = vpop.eup %8028  ;;  %v5177_v35 = vmul.f32 %v8112_v54, %v8027_v60  ;;  %v8114_v60 = vld [vmem:[%s13359_s1 + $0x160] sm:$0xff] }
 0x660   :  { %v5238_v36 = vmul.f32 %v7493_v33, %v5174_v40  ;;  %v4557_v55 = vpop.f32.mrb[135].mxu1  ;;  %5372 = vadd.xlane.f32.xlu0 %v5371_v10  ;;  %v4988_v10 = vpop.xlane.xlu1 %4987  ;;  %v5180_v13 = vmul.f32 %v8113_v27, %v8029_v37  ;;  %v8117_v27 = vld [vmem:[%s13359_s1 + $0x188] sm:$0xff] }
 0x661   :  { %v5237_v1 = vmul.f32 %v5173_v30, %v4557_v55  ;;  %v8031_v33 = vpop.eup %8030  ;;  %v5060_v55 = vmax.f32 %v12842_v63, 1e-24  ;;  %v4985_v45 = vpop.xlane.xlu0 %4984  ;;  %8042 = vrsqrt.f32 %v5057_v12  ;;  %v5061_v12 = vmax.f32 %v12867_v23, 1e-24 }
 0x662   :  { %v5380_v3 = vsel %vm4814_vm4, %v5238_v36, 0.0 }
 0x663   :  { %5381 = vadd.xlane.f32.xlu1 %v5380_v3  ;;  %v7496_v22 = vpop.f32.mrb[136].mxu1  ;;  %v5377_v47 = vsel %vm4814_vm4, %v5237_v1, 0.0  ;;  %v5059_v1 = vmax.f32 %v12846_v43, 1e-24  ;;  %v5179_v3 = vmul.f32 %v8114_v60, %v8031_v33  ;;  %8044 = vrsqrt.f32 %v5060_v55  ;;  %v8115_v43 = vld [vmem:[%s13359_s1 + $0x178] sm:$0xff]  ;;  %v8118_v60 = vld [vmem:[%s13359_s1 + $0x180] sm:$0xff] }
 0x664   :  { %v5240_v61 = vmul.f32 %v7496_v22, %v5176_v0  ;;  %v4567_v40 = vpop.f32.mrb[137].mxu1  ;;  %5378 = vadd.xlane.f32.xlu0 %v5377_v47  ;;  %v8033_v53 = vpop.eup %8032 }
 0x665   :  { %v5239_v30 = vmul.f32 %v5175_v31, %v4567_v40  ;;  %v8035_v63 = vpop.eup %8034  ;;  %8046 = vrsqrt.f32 %v5059_v1  ;;  %v4994_v37 = vpop.xlane.xlu1 %4993  ;;  %v5063_v1 = vmax.f32 %v4985_v45, 1e-24 }
 0x666   :  { %v5386_v26 = vsel %vm4814_vm4, %v5240_v61, 0.0  ;;  %v5062_v61 = vmax.f32 %v12862_v15, 1e-24  ;;  %v4991_v15 = vpop.xlane.xlu0 %4990 }
 0x667   :  { %5387 = vadd.xlane.f32.xlu1 %v5386_v26  ;;  %v7499_v38 = vpop.f32.mrb[138].mxu1  ;;  %v5383_v36 = vsel %vm4814_vm4, %v5239_v30, 0.0  ;;  %v8037_v30 = vpop.eup %8036 }
 0x668   :  { %v5242_v21 = vmul.f32 %v7499_v38, %v5178_v59  ;;  %v4577_v0 = vpop.f32.mrb[139].mxu1  ;;  %5384 = vadd.xlane.f32.xlu0 %v5383_v36  ;;  %v5182_v59 = vmul.f32 %v8115_v43, %v8033_v53  ;;  %v8039_v26 = vpop.eup %8038  ;;  %8048 = vrsqrt.f32 %v5062_v61  ;;  %v5066_v61 = vmax.f32 %v4994_v37, 1e-24  ;;  %v8119_v43 = vld [vmem:[%s13359_s1 + $0x198] sm:$0xff] }
 0x669   :  { %v5241_v31 = vmul.f32 %v5177_v35, %v4577_v0  ;;  %v8116_v35 = vld [vmem:[%s13359_s1 + $0x170] sm:$0xff]  ;;  %8050 = vrsqrt.f32 %v5061_v12  ;;  %v8041_v53 = vpop.eup %8040  ;;  %v5065_v12 = vmax.f32 %v4991_v15, 1e-24  ;;  %v8121_v15 = vld [vmem:[%s13359_s1 + $0x1a8] sm:$0xff] }
 0x66a   :  { %v5392_v22 = vsel %vm4814_vm4, %v5242_v21, 0.0  ;;  %v5181_v33 = vmul.f32 %v8116_v35, %v8035_v63  ;;  %v5064_v21 = vmax.f32 %v4988_v10, 1e-24  ;;  %v8120_v35 = vld [vmem:[%s13359_s1 + $0x190] sm:$0xff] }
 0x66b   :  { %5393 = vadd.xlane.f32.xlu1 %v5392_v22  ;;  %v7502_v47 = vpop.f32.mrb[140].mxu1  ;;  %v5389_v39 = vsel %vm4814_vm4, %v5241_v31, 0.0  ;;  %v8043_v63 = vpop.eup %8042 }
 0x66c   :  { %v5244_v40 = vmul.f32 %v7502_v47, %v5180_v13  ;;  %v4587_v29 = vpop.f32.mrb[141].mxu1  ;;  %5390 = vadd.xlane.f32.xlu0 %v5389_v39  ;;  %v5184_v13 = vmul.f32 %v8117_v27, %v8037_v30  ;;  %v5000_v22 = vpop.xlane.xlu1 %4999  ;;  %8052 = vrsqrt.f32 %v5064_v21 }
 0x66d   :  { %v5243_v54 = vmul.f32 %v5179_v3, %v4587_v29  ;;  %v5183_v3 = vmul.f32 %v8118_v60, %v8039_v26  ;;  %8054 = vrsqrt.f32 %v5063_v1  ;;  %v8045_v30 = vpop.eup %8044 }
 0x66e   :  { %v5398_v38 = vsel %vm4814_vm4, %v5244_v40, 0.0  ;;  %v4997_v40 = vpop.xlane.xlu0 %4996  ;;  %8056 = vrsqrt.f32 %v5066_v61 }
 0x66f   :  { %5399 = vadd.xlane.f32.xlu1 %v5398_v38  ;;  %v7505_v36 = vpop.f32.mrb[142].mxu1  ;;  %v5395_v55 = vsel %vm4814_vm4, %v5243_v54, 0.0  ;;  %v8047_v26 = vpop.eup %8046  ;;  %8058 = vrsqrt.f32 %v5065_v12  ;;  %v5067_v27 = vmax.f32 %v4997_v40, 1e-24 }
 0x670   :  { %v5246_v0 = vmul.f32 %v7505_v36, %v5182_v59  ;;  %v4597_v23 = vpop.f32.mrb[143].mxu1  ;;  %5396 = vadd.xlane.f32.xlu0 %v5395_v55  ;;  %v5186_v59 = vmul.f32 %v8119_v43, %v8041_v53  ;;  %v5068_v55 = vmax.f32 %v5000_v22, 1e-24 }
 0x671   :  { %v5245_v31 = vmul.f32 %v5181_v33, %v4597_v23  ;;  %v5185_v33 = vmul.f32 %v8120_v35, %v8043_v63  ;;  %v5188_v23 = vmul.f32 %v8121_v15, %v8045_v30  ;;  %v8124_v30 = vld [vmem:[%s13359_s1 + $0x1b0] sm:$0xff] }
 0x672   :  { %v5404_v10 = vsel %vm4814_vm4, %v5246_v0, 0.0  ;;  %v8049_v1 = vpop.eup %8048  ;;  %8060 = vrsqrt.f32 %v5068_v55  ;;  %v8125_v55 = vld [vmem:[%s13359_s1 + $0x1c8] sm:$0xff] }
 0x673   :  { %5405 = vadd.xlane.f32.xlu1 %v5404_v10  ;;  %v7508_v47 = vpop.f32.mrb[144].mxu1  ;;  %v5401_v39 = vsel %vm4814_vm4, %v5245_v31, 0.0  ;;  %v8122_v31 = vld [vmem:[%s13359_s1 + $0x1a0] sm:$0xff]  ;;  %v8051_v63 = vpop.eup %8050  ;;  %8062 = vrsqrt.f32 %v5067_v27 }
 0x674   :  { %v5248_v29 = vmul.f32 %v7508_v47, %v5184_v13  ;;  %v4607_v45 = vpop.f32.mrb[145].mxu1  ;;  %5402 = vadd.xlane.f32.xlu0 %v5401_v39  ;;  %v5006_v13 = vpop.xlane.xlu1 %5005  ;;  %v5187_v60 = vmul.f32 %v8122_v31, %v8047_v26 }
 0x675   :  { %v5247_v54 = vmul.f32 %v5183_v3, %v4607_v45  ;;  %v5003_v3 = vpop.xlane.xlu0 %5002  ;;  %v5070_v39 = vmax.f32 %v5006_v13, 1e-24 }
 0x676   :  { %v5410_v37 = vsel %vm4814_vm4, %v5248_v29, 0.0  ;;  %v8123_v29 = vld [vmem:[%s13359_s1 + $0x1b8] sm:$0xff]  ;;  %v5069_v43 = vmax.f32 %v5003_v3, 1e-24 }
 0x677   :  { %5411 = vadd.xlane.f32.xlu1 %v5410_v37  ;;  %v7511_v38 = vpop.f32.mrb[146].mxu1  ;;  %v5407_v36 = vsel %vm4814_vm4, %v5247_v54, 0.0  ;;  %v5190_v45 = vmul.f32 %v8123_v29, %v8049_v1  ;;  %v5189_v54 = vmul.f32 %v8124_v30, %v8051_v63  ;;  %8064 = vrsqrt.f32 %v5070_v39  ;;  %v8127_v63 = vld [vmem:[%s13359_s1 + $0x1d8] sm:$0xff]  ;;  %v8128_v39 = vld [vmem:[%s13359_s1 + $0x1d0] sm:$0xff]  ;;  %v8129_v30 = vld [vmem:[%s13359_s1 + $0x1e8] sm:$0xff] }
 0x678   :  { %v5250_v21 = vmul.f32 %v7511_v38, %v5186_v59  ;;  %v4617_v0 = vpop.f32.mrb[147].mxu1  ;;  %5408 = vadd.xlane.f32.xlu0 %v5407_v36  ;;  %v8053_v59 = vpop.eup %8052  ;;  %8066 = vrsqrt.f32 %v5069_v43 }
 0x679   :  { %v5249_v53 = vmul.f32 %v5185_v33, %v4617_v0  ;;  %v8055_v35 = vpop.eup %8054 }
 0x67a   :  { %v5416_v10 = vsel %vm4814_vm4, %v5250_v21, 0.0  ;;  %v5192_v21 = vmul.f32 %v8125_v55, %v8053_v59  ;;  %v8057_v0 = vpop.eup %8056 }
 0x67b   :  { %5417 = vadd.xlane.f32.xlu1 %v5416_v10  ;;  %v7514_v22 = vpop.f32.mrb[148].mxu1  ;;  %v5413_v47 = vsel %vm4814_vm4, %v5249_v53, 0.0  ;;  %v8059_v13 = vpop.eup %8058  ;;  %v5194_v10 = vmul.f32 %v8127_v63, %v8057_v0 }
 0x67c   :  { %v5252_v61 = vmul.f32 %v7514_v22, %v5188_v23  ;;  %v4627_v40 = vpop.f32.mrb[149].mxu1  ;;  %5414 = vadd.xlane.f32.xlu0 %v5413_v47  ;;  %v8126_v23 = vld [vmem:[%s13359_s1 + $0x1c0] sm:$0xff]  ;;  %v8061_v22 = vpop.eup %8060 }
 0x67d   :  { %v5251_v12 = vmul.f32 %v5187_v60, %v4627_v40  ;;  %v5191_v27 = vmul.f32 %v8126_v23, %v8055_v35  ;;  %v8063_v40 = vpop.eup %8062  ;;  %v8131_v23 = vld [vmem:[%s13359_s1 + $0x1f8] sm:$0xff] }
 0x67e   :  { %v5422_v33 = vsel %vm4814_vm4, %v5252_v61, 0.0  ;;  %v5193_v61 = vmul.f32 %v8128_v39, %v8059_v13 }
 0x67f   :  { %5423 = vadd.xlane.f32.xlu1 %v5422_v33  ;;  %v7517_v26 = vpop.f32.mrb[150].mxu1  ;;  %v5419_v37 = vsel %vm4814_vm4, %v5251_v12, 0.0 }
 0x680   :  { %v5254_v38 = vmul.f32 %v7517_v26, %v5190_v45  ;;  %v4637_v36 = vpop.f32.mrb[151].mxu1  ;;  %5420 = vadd.xlane.f32.xlu0 %v5419_v37  ;;  %v8130_v26 = vld [vmem:[%s13359_s1 + $0x1e0] sm:$0xff] }
 0x681   :  { %v5253_v15 = vmul.f32 %v5189_v54, %v4637_v36  ;;  %v5196_v54 = vmul.f32 %v8129_v30, %v8061_v22  ;;  %v8065_v35 = vpop.eup %8064  ;;  %v5195_v37 = vmul.f32 %v8130_v26, %v8063_v40 }
 0x682   :  { %v5428_v1 = vsel %vm4814_vm4, %v5254_v38, 0.0  ;;  %v8067_v38 = vpop.eup %8066 }
 0x683   :  { %5429 = vadd.xlane.f32.xlu1 %v5428_v1  ;;  %v7520_v53 = vpop.f32.mrb[152].mxu1  ;;  %v5425_v31 = vsel %vm4814_vm4, %v5253_v15, 0.0  ;;  %v8132_v1 = vld [vmem:[%s13359_s1 + $0x1f0] sm:$0xff] }
 0x684   :  { %v5256_v60 = vmul.f32 %v7520_v53, %v5192_v21  ;;  %v4647_v3 = vpop.f32.mrb[153].mxu1  ;;  %5426 = vadd.xlane.f32.xlu0 %v5425_v31  ;;  %v5197_v53 = vmul.f32 %v8132_v1, %v8067_v38 }
 0x685   :  { %v5255_v47 = vmul.f32 %v5191_v27, %v4647_v3  ;;  %v5198_v27 = vmul.f32 %v8131_v23, %v8065_v35  ;;  %v14311_v35 = vld [vmem:[#allocation69_spill] sm:$0xff] }
 0x686   :  { %v5434_v29 = vsel %vm4814_vm4, %v5256_v60, 0.0 }
 0x687   :  { %5435 = vadd.xlane.f32.xlu1 %v5434_v29  ;;  %v7523_v45 = vpop.f32.mrb[154].mxu1  ;;  %v5431_v43 = vsel %vm4814_vm4, %v5255_v47, 0.0 }
 0x688   :  { %v5258_v59 = vmul.f32 %v7523_v45, %v5194_v10  ;;  %v4657_v12 = vpop.f32.mrb[155].mxu1  ;;  %5432 = vadd.xlane.f32.xlu0 %v5431_v43 }
 0x689   :  { %v5257_v33 = vmul.f32 %v5193_v61, %v4657_v12 }
 0x68a   :  { %v5440_v36 = vsel %vm4814_vm4, %v5258_v59, 0.0  ;;  %v14309_v59 = vld [vmem:[#allocation82_spill] sm:$0xff] }
 0x68b   :  { %5441 = vadd.xlane.f32.xlu1 %v5440_v36  ;;  %v7526_v55 = vpop.f32.mrb[156].mxu1  ;;  %v5437_v21 = vsel %vm4814_vm4, %v5257_v33, 0.0 }
 0x68c   :  { %v5260_v0 = vmul.f32 %v7526_v55, %v5196_v54  ;;  %v4667_v15 = vpop.f32.mrb[157].mxu1  ;;  %5438 = vadd.xlane.f32.xlu0 %v5437_v21  ;;  %v14313_v55 = vld [vmem:[#allocation90_spill] sm:$0xff] }
 0x68d   :  { %v5259_v13 = vmul.f32 %v5195_v37, %v4667_v15  ;;  %v14312_v37 = vld [vmem:[#allocation49_spill] sm:$0xff]  ;;  %v14314_v15 = vld [vmem:[#allocation54_spill] sm:$0xff] }
 0x68e   :  { %v5446_v31 = vsel %vm4814_vm4, %v5260_v0, 0.0 }
 0x68f   :  { %5447 = vadd.xlane.f32.xlu1 %v5446_v31  ;;  %v7529_v60 = vpop.f32.mrb[158].mxu1  ;;  %v5443_v3 = vsel %vm4814_vm4, %v5259_v13, 0.0  ;;  %v14315_v13 = vld [vmem:[#allocation74_spill] sm:$0xff] }
 0x690   :  { %v5262_v63 = vmul.f32 %v7529_v60, %v5198_v27  ;;  %v4677_v10 = vpop.f32.mrb[159].mxu1  ;;  %5444 = vadd.xlane.f32.xlu0 %v5443_v3 }
 0x691   :  { %v5261_v22 = vmul.f32 %v5197_v53, %v4677_v10 }
 0x692   :  { %v5452_v47 = vsel %vm4814_vm4, %v5262_v63, 0.0 }
 0x693   :  { %5453 = vadd.xlane.f32.xlu1 %v5452_v47  ;;  %v5449_v39 = vsel %vm4814_vm4, %v5261_v22, 0.0 }
 0x694   :  { %v5268_v61 = vpop.xlane.xlu1 %5267  ;;  %5450 = vadd.xlane.f32.xlu0 %v5449_v39  ;;  %v14316_v39 = vld [vmem:[#allocation55_spill] sm:$0xff] }
 0x695   :  { %v6245_v40 = vsel %vm6243_vm0, %v5268_v61, %v11583_v24  ;;  %v5265_v29 = vpop.xlane.xlu0 %5264  ;;  %v14310_v24 = vld [vmem:[#allocation48_spill] sm:$0xff] }
 0x696   :  { %6309 = vst [vmem:[%s13360_s8 + $0x8] sm:$0xff] %v6245_v40  ;;  %v6244_v45 = vsel %vm6243_vm0, %v5265_v29, %v11612_v41 }
 0x697   :  { %6308 = vst [vmem:[%s13360_s8] sm:$0xff] %v6244_v45  ;;  %v14318_v45 = vld [vmem:[#allocation59_spill] sm:$0xff] }
 0x698   :  { %v5274_v43 = vpop.xlane.xlu1 %5273 }
 0x699   :  { %v6247_v12 = vsel %vm6243_vm0, %v5274_v43, %v14309_v59  ;;  %v5271_v30 = vpop.xlane.xlu0 %5270 }
 0x69a   :  { %6311 = vst [vmem:[%s13360_s8 + $0x18] sm:$0xff] %v6247_v12  ;;  %v6246_v54 = vsel %vm6243_vm0, %v5271_v30, %v14310_v24  ;;  %v14319_v12 = vld [vmem:[#allocation79_spill] sm:$0xff] }
 0x69b   :  { %6310 = vst [vmem:[%s13360_s8 + $0x10] sm:$0xff] %v6246_v54  ;;  %v14320_v54 = vld [vmem:[#allocation61_spill] sm:$0xff] }
 0x69c   :  { %v5280_v41 = vpop.xlane.xlu1 %5279 }
 0x69d   :  { %v6249_v33 = vsel %vm6243_vm0, %v5280_v41, %v14311_v35  ;;  %v5277_v26 = vpop.xlane.xlu0 %5276 }
 0x69e   :  { %6313 = vst [vmem:[%s13360_s8 + $0x28] sm:$0xff] %v6249_v33  ;;  %v6248_v38 = vsel %vm6243_vm0, %v5277_v26, %v14312_v37  ;;  %v14321_v33 = vld [vmem:[#allocation107_spill] sm:$0xff] }
 0x69f   :  { %6312 = vst [vmem:[%s13360_s8 + $0x20] sm:$0xff] %v6248_v38  ;;  %v14322_v38 = vld [vmem:[#allocation146_spill] sm:$0xff] }
 0x6a0   :  { %v5286_v36 = vpop.xlane.xlu1 %5285 }
 0x6a1   :  { %v6251_v21 = vsel %vm6243_vm0, %v5286_v36, %v14313_v55  ;;  %v5283_v0 = vpop.xlane.xlu0 %5282 }
 0x6a2   :  { %6315 = vst [vmem:[%s13360_s8 + $0x38] sm:$0xff] %v6251_v21  ;;  %v6250_v23 = vsel %vm6243_vm0, %v5283_v0, %v14314_v15  ;;  %v14323_v21 = vld [vmem:[#allocation152_spill] sm:$0xff] }
 0x6a3   :  { %6314 = vst [vmem:[%s13360_s8 + $0x30] sm:$0xff] %v6250_v23  ;;  %v14324_v23 = vld [vmem:[#allocation64_spill] sm:$0xff] }
 0x6a4   :  { %v5292_v27 = vpop.xlane.xlu1 %5291 }
 0x6a5   :  { %v6253_v1 = vsel %vm6243_vm0, %v5292_v27, %v14315_v13  ;;  %v5289_v53 = vpop.xlane.xlu0 %5288 }
 0x6a6   :  { %6317 = vst [vmem:[%s13360_s8 + $0x48] sm:$0xff] %v6253_v1  ;;  %v6252_v31 = vsel %vm6243_vm0, %v5289_v53, %v11880_v57 }
 0x6a7   :  { %6316 = vst [vmem:[%s13360_s8 + $0x40] sm:$0xff] %v6252_v31 }
 0x6a8   :  { %v5298_v60 = vpop.xlane.xlu1 %5297 }
 0x6a9   :  { %v6255_v3 = vsel %vm6243_vm0, %v5298_v60, %v11885_v11  ;;  %v5295_v63 = vpop.xlane.xlu0 %5294 }
 0x6aa   :  { %6319 = vst [vmem:[%s13360_s8 + $0x58] sm:$0xff] %v6255_v3  ;;  %v6254_v10 = vsel %vm6243_vm0, %v5295_v63, %v11890_v17  ;;  %v14325_v3 = vld [vmem:[#allocation83_spill] sm:$0xff] }
 0x6ab   :  { %6318 = vst [vmem:[%s13360_s8 + $0x50] sm:$0xff] %v6254_v10 }
 0x6ac   :  { %v5304_v57 = vpop.xlane.xlu1 %5303 }
 0x6ad   :  { %v6257_v22 = vsel %vm6243_vm0, %v5304_v57, %v11895_v48  ;;  %v5301_v47 = vpop.xlane.xlu0 %5300  ;;  %v14317_v48 = vld [vmem:[#allocation99_spill] sm:$0xff] }
 0x6ae   :  { %6321 = vst [vmem:[%s13360_s8 + $0x68] sm:$0xff] %v6257_v22  ;;  %v6256_v11 = vsel %vm6243_vm0, %v5301_v47, %v11900_v7 }
 0x6af   :  { %6320 = vst [vmem:[%s13360_s8 + $0x60] sm:$0xff] %v6256_v11 }
 0x6b0   :  { %v5310_v17 = vpop.xlane.xlu1 %5309 }
 0x6b1   :  { %v6259_v61 = vsel %vm6243_vm0, %v5310_v17, %v14316_v39  ;;  %v5307_v40 = vpop.xlane.xlu0 %5306 }
 0x6b2   :  { %6323 = vst [vmem:[%s13360_s8 + $0x78] sm:$0xff] %v6259_v61  ;;  %v6258_v29 = vsel %vm6243_vm0, %v5307_v40, %v14317_v48 }
 0x6b3   :  { %6322 = vst [vmem:[%s13360_s8 + $0x70] sm:$0xff] %v6258_v29 }
 0x6b6   :  { %v5316_v7 = vpop.xlane.xlu1 %5315 }
 0x6b7   :  { %v6261_v43 = vsel %vm6243_vm0, %v5316_v7, %v14318_v45  ;;  %v5313_v59 = vpop.xlane.xlu0 %5312 }
 0x6b8   :  { %6325 = vst [vmem:[%s13360_s8 + $0x88] sm:$0xff] %v6261_v43  ;;  %v6260_v30 = vsel %vm6243_vm0, %v5313_v59, %v14319_v12 }
 0x6b9   :  { %6324 = vst [vmem:[%s13360_s8 + $0x80] sm:$0xff] %v6260_v30 }
 0x6bd   :  { %v5322_v24 = vpop.xlane.xlu1 %5321 }
 0x6be   :  { %v6263_v41 = vsel %vm6243_vm0, %v5322_v24, %v14320_v54  ;;  %v5319_v35 = vpop.xlane.xlu0 %5318 }
 0x6bf   :  { %6327 = vst [vmem:[%s13360_s8 + $0x98] sm:$0xff] %v6263_v41  ;;  %v6262_v26 = vsel %vm6243_vm0, %v5319_v35, %v14321_v33 }
 0x6c0   :  { %6326 = vst [vmem:[%s13360_s8 + $0x90] sm:$0xff] %v6262_v26 }
 0x6c7   :  { %v5328_v37 = vpop.xlane.xlu1 %5327 }
 0x6c8   :  { %v6265_v36 = vsel %vm6243_vm0, %v5328_v37, %v14322_v38  ;;  %v5325_v55 = vpop.xlane.xlu0 %5324  ;;  %v14326_v37 = vld [vmem:[#allocation65_spill] sm:$0xff] }
 0x6c9   :  { %6329 = vst [vmem:[%s13360_s8 + $0xa8] sm:$0xff] %v6265_v36  ;;  %v6264_v0 = vsel %vm6243_vm0, %v5325_v55, %v14323_v21  ;;  %v14328_v21 = vld [vmem:[#allocation70_spill] sm:$0xff] }
 0x6ca   :  { %6328 = vst [vmem:[%s13360_s8 + $0xa0] sm:$0xff] %v6264_v0 }
 0x6cf   :  { %v5334_v15 = vpop.xlane.xlu1 %5333 }
 0x6d0   :  { %v6267_v27 = vsel %vm6243_vm0, %v5334_v15, %v14324_v23  ;;  %v5331_v13 = vpop.xlane.xlu0 %5330  ;;  %v14329_v23 = vld [vmem:[#allocation88_spill] sm:$0xff] }
 0x6d1   :  { %6331 = vst [vmem:[%s13360_s8 + $0xb8] sm:$0xff] %v6267_v27  ;;  %v6266_v1 = vsel %vm6243_vm0, %v5331_v13, %v12067_v42 }
 0x6d2   :  { %6330 = vst [vmem:[%s13360_s8 + $0xb0] sm:$0xff] %v6266_v1  ;;  %v14330_v1 = vld [vmem:[#allocation181_spill] sm:$0xff] }
 0x6d3   :  { %v5340_v53 = vpop.xlane.xlu1 %5339 }
 0x6d4   :  { %v6269_v31 = vsel %vm6243_vm0, %v5340_v53, %v12072_v5  ;;  %v5337_v60 = vpop.xlane.xlu0 %5336 }
 0x6d5   :  { %6333 = vst [vmem:[%s13360_s8 + $0xc8] sm:$0xff] %v6269_v31  ;;  %v6268_v63 = vsel %vm6243_vm0, %v5337_v60, %v14325_v3  ;;  %v14331_v60 = vld [vmem:[#allocation71_spill] sm:$0xff] }
 0x6d6   :  { %6332 = vst [vmem:[%s13360_s8 + $0xc0] sm:$0xff] %v6268_v63 }
 0x6d8   :  { %v5346_v42 = vpop.xlane.xlu1 %5345 }
 0x6d9   :  { %v6271_v10 = vsel %vm6243_vm0, %v5346_v42, %v12100_v9  ;;  %v5343_v57 = vpop.xlane.xlu0 %5342  ;;  %v14332_v42 = vld [vmem:[#allocation124_spill] sm:$0xff] }
 0x6da   :  { %6335 = vst [vmem:[%s13360_s8 + $0xd8] sm:$0xff] %v6271_v10  ;;  %v6270_v5 = vsel %vm6243_vm0, %v5343_v57, %v12123_v14 }
 0x6db   :  { %6334 = vst [vmem:[%s13360_s8 + $0xd0] sm:$0xff] %v6270_v5  ;;  %v14333_v5 = vld [vmem:[#allocation75_spill] sm:$0xff] }
 0x6dc   :  { %v5352_v22 = vpop.xlane.xlu1 %5351 }
 0x6dd   :  { %v6273_v47 = vsel %vm6243_vm0, %v5352_v22, %v12128_v50  ;;  %v5349_v11 = vpop.xlane.xlu0 %5348 }
 0x6de   :  { %6337 = vst [vmem:[%s13360_s8 + $0xe8] sm:$0xff] %v6273_v47  ;;  %v6272_v9 = vsel %vm6243_vm0, %v5349_v11, %v12151_v20  ;;  %v14334_v11 = vld [vmem:[#allocation94_spill] sm:$0xff] }
 0x6df   :  { %6336 = vst [vmem:[%s13360_s8 + $0xe0] sm:$0xff] %v6272_v9 }
 0x6e0   :  { %v5358_v14 = vpop.xlane.xlu1 %5357 }
 0x6e1   :  { %v6275_v17 = vsel %vm6243_vm0, %v5358_v14, %v12156_v46  ;;  %v5355_v39 = vpop.xlane.xlu0 %5354 }
 0x6e2   :  { %6339 = vst [vmem:[%s13360_s8 + $0xf8] sm:$0xff] %v6275_v17  ;;  %v6274_v50 = vsel %vm6243_vm0, %v5355_v39, %v12179_v58  ;;  %v14335_v17 = vld [vmem:[#allocation77_spill] sm:$0xff] }
 0x6e3   :  { %6338 = vst [vmem:[%s13360_s8 + $0xf0] sm:$0xff] %v6274_v50 }
 0x6e4   :  { %v5364_v20 = vpop.xlane.xlu1 %5363 }
 0x6e5   :  { %v6277_v61 = vsel %vm6243_vm0, %v5364_v20, %v12184_v18  ;;  %v5361_v40 = vpop.xlane.xlu0 %5360  ;;  %v14336_v20 = vld [vmem:[#allocation133_spill] sm:$0xff] }
 0x6e6   :  { %6341 = vst [vmem:[%s13360_s8 + $0x108] sm:$0xff] %v6277_v61  ;;  %v6276_v46 = vsel %vm6243_vm0, %v5361_v40, %v12207_v44 }
 0x6e7   :  { %6340 = vst [vmem:[%s13360_s8 + $0x100] sm:$0xff] %v6276_v46  ;;  %v14337_v46 = vld [vmem:[#allocation80_spill] sm:$0xff] }
 0x6e8   :  { %v5370_v58 = vpop.xlane.xlu1 %5369 }
 0x6e9   :  { %v6279_v48 = vsel %vm6243_vm0, %v5370_v58, %v12212_v2  ;;  %v5367_v29 = vpop.xlane.xlu0 %5366 }
 0x6ea   :  { %6343 = vst [vmem:[%s13360_s8 + $0x118] sm:$0xff] %v6279_v48  ;;  %v6278_v18 = vsel %vm6243_vm0, %v5367_v29, %v12235_v34  ;;  %v14338_v29 = vld [vmem:[#allocation100_spill] sm:$0xff] }
 0x6eb   :  { %6342 = vst [vmem:[%s13360_s8 + $0x110] sm:$0xff] %v6278_v18 }
 0x6ec   :  { %v5376_v44 = vpop.xlane.xlu1 %5375 }
 0x6ed   :  { %v6281_v7 = vsel %vm6243_vm0, %v5376_v44, %v12240_v62  ;;  %v5373_v45 = vpop.xlane.xlu0 %5372 }
 0x6ee   :  { %6345 = vst [vmem:[%s13360_s8 + $0x128] sm:$0xff] %v6281_v7  ;;  %v6280_v2 = vsel %vm6243_vm0, %v5373_v45, %v12263_v28  ;;  %v14339_v7 = vld [vmem:[#allocation157_spill] sm:$0xff] }
 0x6ef   :  { %6344 = vst [vmem:[%s13360_s8 + $0x120] sm:$0xff] %v6280_v2 }
 0x6f0   :  { %v5382_v34 = vpop.xlane.xlu1 %5381 }
 0x6f1   :  { %v6283_v43 = vsel %vm6243_vm0, %v5382_v34, %v12268_v4  ;;  %v5379_v59 = vpop.xlane.xlu0 %5378  ;;  %v14340_v34 = vld [vmem:[#allocation163_spill] sm:$0xff] }
 0x6f2   :  { %6347 = vst [vmem:[%s13360_s8 + $0x138] sm:$0xff] %v6283_v43  ;;  %v6282_v62 = vsel %vm6243_vm0, %v5379_v59, %v12291_v19 }
 0x6f3   :  { %6346 = vst [vmem:[%s13360_s8 + $0x130] sm:$0xff] %v6282_v62  ;;  %v14341_v62 = vld [vmem:[#allocation182_spill] sm:$0xff] }
 0x6f4   :  { %v5388_v28 = vpop.xlane.xlu1 %5387 }
 0x6f5   :  { %v6285_v12 = vsel %vm6243_vm0, %v5388_v28, %v12296_v16  ;;  %v5385_v30 = vpop.xlane.xlu0 %5384 }
 0x6f6   :  { %6349 = vst [vmem:[%s13360_s8 + $0x148] sm:$0xff] %v6285_v12  ;;  %v6284_v4 = vsel %vm6243_vm0, %v5385_v30, %v12319_v32 }
 0x6f7   :  { %6348 = vst [vmem:[%s13360_s8 + $0x140] sm:$0xff] %v6284_v4 }
 0x6f8   :  { %v5394_v19 = vpop.xlane.xlu1 %5393 }
 0x6f9   :  { %v6287_v24 = vsel %vm6243_vm0, %v5394_v19, %v12324_v8  ;;  %v5391_v54 = vpop.xlane.xlu0 %5390 }
 0x6fa   :  { %6351 = vst [vmem:[%s13360_s8 + $0x158] sm:$0xff] %v6287_v24  ;;  %v6286_v16 = vsel %vm6243_vm0, %v5391_v54, %v12347_v56 }
 0x6fb   :  { %6350 = vst [vmem:[%s13360_s8 + $0x150] sm:$0xff] %v6286_v16 }
 0x6fc   :  { %v5400_v32 = vpop.xlane.xlu1 %5399 }
 0x6fd   :  { %v6289_v41 = vsel %vm6243_vm0, %v5400_v32, %v12352_v6  ;;  %v5397_v35 = vpop.xlane.xlu0 %5396 }
 0x6fe   :  { %6353 = vst [vmem:[%s13360_s8 + $0x168] sm:$0xff] %v6289_v41  ;;  %v6288_v8 = vsel %vm6243_vm0, %v5397_v35, %v12375_v52 }
 0x6ff   :  { %6352 = vst [vmem:[%s13360_s8 + $0x160] sm:$0xff] %v6288_v8 }
 0x700   :  { %v5406_v56 = vpop.xlane.xlu1 %5405 }
 0x701   :  { %v6291_v33 = vsel %vm6243_vm0, %v5406_v56, %v12380_v49  ;;  %v5403_v26 = vpop.xlane.xlu0 %5402  ;;  %v14327_v49 = vld [vmem:[#allocation116_spill] sm:$0xff] }
 0x702   :  { %6355 = vst [vmem:[%s13360_s8 + $0x178] sm:$0xff] %v6291_v33  ;;  %v6290_v6 = vsel %vm6243_vm0, %v5403_v26, %v12400_v51 }
 0x703   :  { %6354 = vst [vmem:[%s13360_s8 + $0x170] sm:$0xff] %v6290_v6 }
 0x704   :  { %v5412_v52 = vpop.xlane.xlu1 %5411 }
 0x705   :  { %v6293_v38 = vsel %vm6243_vm0, %v5412_v52, %v14326_v37  ;;  %v5409_v36 = vpop.xlane.xlu0 %5408 }
 0x706   :  { %6357 = vst [vmem:[%s13360_s8 + $0x188] sm:$0xff] %v6293_v38  ;;  %v6292_v55 = vsel %vm6243_vm0, %v5409_v36, %v14327_v49 }
 0x707   :  { %6356 = vst [vmem:[%s13360_s8 + $0x180] sm:$0xff] %v6292_v55 }
 0x708   :  { %v5418_v51 = vpop.xlane.xlu1 %5417 }
 0x709   :  { %v6295_v0 = vsel %vm6243_vm0, %v5418_v51, %v14328_v21  ;;  %v5415_v15 = vpop.xlane.xlu0 %5414 }
 0x70a   :  { %6359 = vst [vmem:[%s13360_s8 + $0x198] sm:$0xff] %v6295_v0  ;;  %v6294_v27 = vsel %vm6243_vm0, %v5415_v15, %v14329_v23 }
 0x70b   :  { %6358 = vst [vmem:[%s13360_s8 + $0x190] sm:$0xff] %v6294_v27 }
 0x70c   :  { %v5424_v13 = vpop.xlane.xlu1 %5423 }
 0x70d   :  { %v6297_v53 = vsel %vm6243_vm0, %v5424_v13, %v14330_v1  ;;  %v5421_v31 = vpop.xlane.xlu0 %5420 }
 0x70e   :  { %6361 = vst [vmem:[%s13360_s8 + $0x1a8] sm:$0xff] %v6297_v53  ;;  %v6296_v3 = vsel %vm6243_vm0, %v5421_v31, %v14331_v60 }
 0x70f   :  { %6360 = vst [vmem:[%s13360_s8 + $0x1a0] sm:$0xff] %v6296_v3 }
 0x710   :  { %v5430_v63 = vpop.xlane.xlu1 %5429 }
 0x711   :  { %v6299_v10 = vsel %vm6243_vm0, %v5430_v63, %v14332_v42  ;;  %v5427_v57 = vpop.xlane.xlu0 %5426 }
 0x712   :  { %6363 = vst [vmem:[%s13360_s8 + $0x1b8] sm:$0xff] %v6299_v10  ;;  %v6298_v22 = vsel %vm6243_vm0, %v5427_v57, %v14333_v5 }
 0x713   :  { %6362 = vst [vmem:[%s13360_s8 + $0x1b0] sm:$0xff] %v6298_v22 }
 0x714   :  { %v5436_v47 = vpop.xlane.xlu1 %5435 }
 0x715   :  { %v6301_v9 = vsel %vm6243_vm0, %v5436_v47, %v14334_v11  ;;  %v5433_v14 = vpop.xlane.xlu0 %5432 }
 0x716   :  { %6365 = vst [vmem:[%s13360_s8 + $0x1c8] sm:$0xff] %v6301_v9  ;;  %v6300_v39 = vsel %vm6243_vm0, %v5433_v14, %v14335_v17 }
 0x717   :  { %6364 = vst [vmem:[%s13360_s8 + $0x1c0] sm:$0xff] %v6300_v39 }
 0x718   :  { %v5442_v50 = vpop.xlane.xlu1 %5441 }
 0x719   :  { %v6303_v61 = vsel %vm6243_vm0, %v5442_v50, %v14336_v20  ;;  %v5439_v40 = vpop.xlane.xlu0 %5438 }
 0x71a   :  { %6367 = vst [vmem:[%s13360_s8 + $0x1d8] sm:$0xff] %v6303_v61  ;;  %v6302_v58 = vsel %vm6243_vm0, %v5439_v40, %v14337_v46 }
 0x71b   :  { %6366 = vst [vmem:[%s13360_s8 + $0x1d0] sm:$0xff] %v6302_v58 }
 0x71c   :  { %v5448_v48 = vpop.xlane.xlu1 %5447 }
 0x71d   :  { %v6305_v18 = vsel %vm6243_vm0, %v5448_v48, %v14338_v29  ;;  %v5445_v44 = vpop.xlane.xlu0 %5444 }
 0x71e   :  { %6369 = vst [vmem:[%s13360_s8 + $0x1e8] sm:$0xff] %v6305_v18  ;;  %v6304_v45 = vsel %vm6243_vm0, %v5445_v44, %v14339_v7 }
 0x71f   :  { %6368 = vst [vmem:[%s13360_s8 + $0x1e0] sm:$0xff] %v6304_v45 }
 0x720   :  { %v5454_v2 = vpop.xlane.xlu1 %5453 }
 0x721   :  { %v6307_v43 = vsel %vm6243_vm0, %v5454_v2, %v14340_v34  ;;  %v5451_v59 = vpop.xlane.xlu0 %5450 }
 0x722   :  { %6371 = vst [vmem:[%s13360_s8 + $0x1f8] sm:$0xff] %v6307_v43  ;;  %v6306_v28 = vsel %vm6243_vm0, %v5451_v59, %v14341_v62 }
 0x723   :  { %6370 = vst [vmem:[%s13360_s8 + $0x1f0] sm:$0xff] %v6306_v28 }

// kernel: pattern_memory_block_forward.3
= control target key start
LH: loop header
LB: loop body
LE: loop exit
PB: predicated region body
PF: predicated region fallthrough
CT: control target
= control target key end

     0   :  { %vm142_vm0 = vcmask 261120   ;;  %s6266_s0 = inlined_call_operand.vmem [shape: f32[512,32], index: 0, kind: input, shape index: {}]   ;;  %s6267_s1 = inlined_call_operand.vmem [shape: f32[32,32], index: 1, kind: input, shape index: {}]   ;;  %s6268_s2 = inlined_call_operand.vmem [shape: f32[32,128], index: 2, kind: input, shape index: {}]   ;;  %s6269_s3 = inlined_call_operand.vmem [shape: f32[512,128], index: 3, kind: output, shape index: {}]  }
   0x1   :  { %v3956_v0 = vld [vmem:[%s6266_s0] sm:$0xff]  ;;  %v3961_v1 = vld [vmem:[%s6266_s0 + $0x10] sm:$0xff]  ;;  %v3966_v2 = vld [vmem:[%s6266_s0 + $0x8] sm:$0xff] }
   0x2   :  { %v78_v3 = vmul.f32 %v3956_v0, %v3956_v0  ;;  %v80_v4 = vmul.f32 %v3961_v1, %v3961_v1  ;;  %v79_v5 = vmul.f32 %v3966_v2, %v3966_v2  ;;  %v3977_v6 = vld [vmem:[%s6266_s0 + $0x18] sm:$0xff]  ;;  %v3984_v8 = vld [vmem:[%s6266_s0 + $0x20] sm:$0xff]  ;;  %v3989_v9 = vld [vmem:[%s6266_s0 + $0x28] sm:$0xff] }
   0x3   :  { %v81_v7 = vmul.f32 %v3977_v6, %v3977_v6  ;;  %v82_v14 = vmul.f32 %v3984_v8, %v3984_v8  ;;  %v83_v15 = vmul.f32 %v3989_v9, %v3989_v9  ;;  %v4002_v16 = vld [vmem:[%s6266_s0 + $0x30] sm:$0xff]  ;;  %v4007_v17 = vld [vmem:[%s6266_s0 + $0x38] sm:$0xff]  ;;  %v4018_v22 = vld [vmem:[%s6266_s0 + $0x40] sm:$0xff] }
   0x4   :  { %v143_v10 = vsel %vm142_vm0, %v78_v3, 0.0  ;;  %v149_v11 = vsel %vm142_vm0, %v80_v4, 0.0  ;;  %v146_v12 = vsel %vm142_vm0, %v79_v5, 0.0  ;;  %v84_v20 = vmul.f32 %v4002_v16, %v4002_v16  ;;  %v4023_v23 = vld [vmem:[%s6266_s0 + $0x48] sm:$0xff]  ;;  %v4034_v28 = vld [vmem:[%s6266_s0 + $0x50] sm:$0xff]  ;;  %v4039_v29 = vld [vmem:[%s6266_s0 + $0x58] sm:$0xff] }
   0x5   :  { %144 = vadd.xlane.f32.xlu0 %v143_v10  ;;  %150 = vadd.xlane.f32.xlu1 %v149_v11  ;;  %v152_v13 = vsel %vm142_vm0, %v81_v7, 0.0  ;;  %v155_v18 = vsel %vm142_vm0, %v82_v14, 0.0  ;;  %v158_v19 = vsel %vm142_vm0, %v83_v15, 0.0  ;;  %v85_v21 = vmul.f32 %v4007_v17, %v4007_v17  ;;  %v4050_v34 = vld [vmem:[%s6266_s0 + $0x60] sm:$0xff]  ;;  %v4055_v35 = vld [vmem:[%s6266_s0 + $0x68] sm:$0xff]  ;;  %v4066_v40 = vld [vmem:[%s6266_s0 + $0x70] sm:$0xff] }
   0x6   :  { %v161_v24 = vsel %vm142_vm0, %v84_v20, 0.0  ;;  %v86_v26 = vmul.f32 %v4018_v22, %v4018_v22  ;;  %v87_v27 = vmul.f32 %v4023_v23, %v4023_v23  ;;  %v88_v32 = vmul.f32 %v4034_v28, %v4034_v28  ;;  %v4071_v41 = vld [vmem:[%s6266_s0 + $0x78] sm:$0xff]  ;;  %v4082_v46 = vld [vmem:[%s6266_s0 + $0x80] sm:$0xff]  ;;  %v4087_v47 = vld [vmem:[%s6266_s0 + $0x88] sm:$0xff] }
   0x7   :  { %v164_v25 = vsel %vm142_vm0, %v85_v21, 0.0  ;;  %v89_v33 = vmul.f32 %v4039_v29, %v4039_v29  ;;  %v90_v38 = vmul.f32 %v4050_v34, %v4050_v34  ;;  %v91_v39 = vmul.f32 %v4055_v35, %v4055_v35  ;;  %v527_v48 = vld [vmem:[%s6267_s1] sm:$0xff]  ;;  %v528_v49 = vld [vmem:[%s6267_s1 + $0x8] sm:$0xff]  ;;  %v529_v50 = vld [vmem:[%s6267_s1 + $0x10] sm:$0xff] }
   0x8   :  { %v167_v30 = vsel %vm142_vm0, %v86_v26, 0.0  ;;  %v170_v31 = vsel %vm142_vm0, %v87_v27, 0.0  ;;  %v173_v36 = vsel %vm142_vm0, %v88_v32, 0.0  ;;  %v92_v42 = vmul.f32 %v4066_v40, %v4066_v40  ;;  %v530_v51 = vld [vmem:[%s6267_s1 + $0x18] sm:$0xff]  ;;  %vm4104_vm1 = vmpackc.low %vm142_vm0, %vm142_vm0  ;;  %v4116_v58 = vld [vmem:[%s6266_s0 + $0x90] sm:$0xff] }
   0x9   :  { %147 = vadd.xlane.f32.xlu0 %v146_v12  ;;  %153 = vadd.xlane.f32.xlu1 %v152_v13  ;;  %v176_v37 = vsel %vm142_vm0, %v89_v33, 0.0  ;;  %v179_v43 = vsel %vm142_vm0, %v90_v38, 0.0  ;;  %v182_v44 = vsel %vm142_vm0, %v91_v39, 0.0  ;;  %v93_v45 = vmul.f32 %v4071_v41, %v4071_v41  ;;  %v4121_v59 = vld [vmem:[%s6266_s0 + $0x98] sm:$0xff]  ;;  %v4136_v4 = vld [vmem:[%s6266_s0 + $0xa0] sm:$0xff]  ;;  %v4141_v5 = vld [vmem:[%s6266_s0 + $0xa8] sm:$0xff] }
   0xa   :  { %v185_v52 = vsel %vm142_vm0, %v92_v42, 0.0  ;;  %v94_v55 = vmul.f32 %v4082_v46, %v4082_v46  ;;  %v95_v56 = vmul.f32 %v4087_v47, %v4087_v47  ;;  %v3783_v57 = vpack.c.bf16 %v528_v49, %v527_v48  ;;  %v4154_v13 = vld [vmem:[%s6266_s0 + $0xb0] sm:$0xff]  ;;  %v4159_v14 = vld [vmem:[%s6266_s0 + $0xb8] sm:$0xff]  ;;  %v4172_v21 = vld [vmem:[%s6266_s0 + $0xc0] sm:$0xff] }
   0xb   :  { %v188_v54 = vsel %vm142_vm0, %v93_v45, 0.0  ;;  %v3789_v60 = vpack.c.bf16 %v530_v51, %v529_v50  ;;  %v96_v63 = vmul.f32 %v4116_v58, %v4116_v58  ;;  %v97_v3 = vmul.f32 %v4121_v59, %v4121_v59  ;;  %v4193_v32 = vld [vmem:[%s6266_s0 + $0xd8] sm:$0xff]  ;;  %v4204_v39 = vld [vmem:[%s6266_s0 + $0xe0] sm:$0xff]  ;;  %v4209_v42 = vld [vmem:[%s6266_s0 + $0xe8] sm:$0xff] }
   0xc   :  { %3785 = vmatprep.subr.msk.bf16.mxu0 %vm4104_vm1, %v3783_v57  ;;  %v191_v61 = vsel %vm142_vm0, %v94_v55, 0.0  ;;  %v194_v62 = vsel %vm142_vm0, %v95_v56, 0.0  ;;  %v98_v11 = vmul.f32 %v4136_v4, %v4136_v4  ;;  %v99_v12 = vmul.f32 %v4141_v5, %v4141_v5  ;;  %v4220_v49 = vld [vmem:[%s6266_s0 + $0xf0] sm:$0xff]  ;;  %v4225_v50 = vld [vmem:[%s6266_s0 + $0xf8] sm:$0xff]  ;;  %v4236_v55 = vld [vmem:[%s6266_s0 + $0x100] sm:$0xff] }
   0xd   :  { %156 = vadd.xlane.f32.xlu0 %v155_v18  ;;  %159 = vadd.xlane.f32.xlu1 %v158_v19  ;;  %v197_v7 = vsel %vm142_vm0, %v96_v63, 0.0  ;;  %v200_v10 = vsel %vm142_vm0, %v97_v3, 0.0  ;;  %v100_v19 = vmul.f32 %v4154_v13, %v4154_v13  ;;  %v101_v20 = vmul.f32 %v4159_v14, %v4159_v14  ;;  %v4241_v56 = vld [vmem:[%s6266_s0 + $0x108] sm:$0xff]  ;;  %v4252_v63 = vld [vmem:[%s6266_s0 + $0x110] sm:$0xff]  ;;  %v4257_v3 = vld [vmem:[%s6266_s0 + $0x118] sm:$0xff] }
   0xe   :  { %3788 = vmatpush3.bf16.xpose.msk.msra.mxu0 %vm4104_vm1, %v3783_v57  ;;  %v203_v15 = vsel %vm142_vm0, %v98_v11, 0.0  ;;  %v206_v18 = vsel %vm142_vm0, %v99_v12, 0.0  ;;  %v102_v27 = vmul.f32 %v4172_v21, %v4172_v21  ;;  %v105_v38 = vmul.f32 %v4193_v32, %v4193_v32 }
   0xf   :  { %3791 = vmatprep.subr.msk.bf16.mxu0 %vm4104_vm1, %v3789_v60  ;;  %v212_v26 = vsel %vm142_vm0, %v101_v20, 0.0  ;;  %v106_v45 = vmul.f32 %v4204_v39, %v4204_v39  ;;  %v107_v48 = vmul.f32 %v4209_v42, %v4209_v42  ;;  %v108_v53 = vmul.f32 %v4220_v49, %v4220_v49 }
  0x10   :  { %v215_v33 = vsel %vm142_vm0, %v102_v27, 0.0  ;;  %v112_v11 = vmul.f32 %v4252_v63, %v4252_v63  ;;  %v113_v12 = vmul.f32 %v4257_v3, %v4257_v3  ;;  %v4284_v27 = vld [vmem:[%s6266_s0 + $0x130] sm:$0xff] }
  0x11   :  { %162 = vadd.xlane.f32.xlu0 %v161_v24  ;;  %165 = vadd.xlane.f32.xlu1 %v164_v25  ;;  %v4177_v24 = vld [vmem:[%s6266_s0 + $0xc8] sm:$0xff]  ;;  %v209_v25 = vsel %vm142_vm0, %v100_v19, 0.0  ;;  %v227_v51 = vsel %vm142_vm0, %v106_v45, 0.0  ;;  %v233_v57 = vsel %vm142_vm0, %v108_v53, 0.0  ;;  %v4316_v53 = vld [vmem:[%s6266_s0 + $0x150] sm:$0xff] }
  0x12   :  { %v245_v19 = vsel %vm142_vm0, %v112_v11, 0.0  ;;  %v248_v20 = vsel %vm142_vm0, %v113_v12, 0.0 }
  0x15   :  { %168 = vadd.xlane.f32.xlu0 %v167_v30  ;;  %171 = vadd.xlane.f32.xlu1 %v170_v31  ;;  %v103_v30 = vmul.f32 %v4177_v24, %v4177_v24  ;;  %v4188_v31 = vld [vmem:[%s6266_s0 + $0xd0] sm:$0xff] }
  0x16   :  { %3794 = vmatpush3.bf16.xpose.msk.msra.mxu0 %vm4104_vm1, %v3789_v60 }
  0x19   :  { %174 = vadd.xlane.f32.xlu0 %v173_v36  ;;  %177 = vadd.xlane.f32.xlu1 %v176_v37  ;;  %v218_v36 = vsel %vm142_vm0, %v103_v30, 0.0  ;;  %v104_v37 = vmul.f32 %v4188_v31, %v4188_v31  ;;  %v4289_v30 = vld [vmem:[%s6266_s0 + $0x138] sm:$0xff] }
  0x1d   :  { %180 = vadd.xlane.f32.xlu0 %v179_v43  ;;  %183 = vadd.xlane.f32.xlu1 %v182_v44  ;;  %v221_v43 = vsel %vm142_vm0, %v104_v37, 0.0  ;;  %v224_v44 = vsel %vm142_vm0, %v105_v38, 0.0  ;;  %v116_v37 = vmul.f32 %v4284_v27, %v4284_v27  ;;  %v117_v38 = vmul.f32 %v4289_v30, %v4289_v30 }
  0x1f   :  { %v257_v45 = vsel %vm142_vm0, %v116_v37, 0.0 }
  0x21   :  { %186 = vadd.xlane.f32.xlu0 %v185_v52  ;;  %189 = vadd.xlane.f32.xlu1 %v188_v54  ;;  %v230_v52 = vsel %vm142_vm0, %v107_v48, 0.0  ;;  %v109_v54 = vmul.f32 %v4225_v50, %v4225_v50  ;;  %v260_v48 = vsel %vm142_vm0, %v117_v38, 0.0 }
  0x23   :  { %v236_v60 = vsel %vm142_vm0, %v109_v54, 0.0  ;;  %v4321_v54 = vld [vmem:[%s6266_s0 + $0x158] sm:$0xff] }
  0x25   :  { %192 = vadd.xlane.f32.xlu0 %v191_v61  ;;  %195 = vadd.xlane.f32.xlu1 %v194_v62  ;;  %v110_v61 = vmul.f32 %v4236_v55, %v4236_v55  ;;  %v111_v62 = vmul.f32 %v4241_v56, %v4241_v56 }
  0x29   :  { %198 = vadd.xlane.f32.xlu0 %v197_v7  ;;  %201 = vadd.xlane.f32.xlu1 %v200_v10  ;;  %v239_v7 = vsel %vm142_vm0, %v110_v61, 0.0  ;;  %v242_v10 = vsel %vm142_vm0, %v111_v62, 0.0  ;;  %v120_v61 = vmul.f32 %v4316_v53, %v4316_v53  ;;  %v121_v62 = vmul.f32 %v4321_v54, %v4321_v54 }
  0x2b   :  { %v269_v11 = vsel %vm142_vm0, %v120_v61, 0.0  ;;  %v272_v12 = vsel %vm142_vm0, %v121_v62, 0.0  ;;  %v4380_v61 = vld [vmem:[%s6266_s0 + $0x190] sm:$0xff]  ;;  %v4385_v62 = vld [vmem:[%s6266_s0 + $0x198] sm:$0xff] }
  0x2c   :  { %6408 = vst [vmem:[#allocation4_spill] sm:$0xff] %v4380_v61  ;;  %6409 = vst [vmem:[#allocation5_spill] sm:$0xff] %v4385_v62 }
  0x2d   :  { %204 = vadd.xlane.f32.xlu0 %v203_v15  ;;  %207 = vadd.xlane.f32.xlu1 %v206_v18  ;;  %v4268_v15 = vld [vmem:[%s6266_s0 + $0x120] sm:$0xff]  ;;  %v4273_v18 = vld [vmem:[%s6266_s0 + $0x128] sm:$0xff] }
  0x31   :  { %210 = vadd.xlane.f32.xlu0 %v209_v25  ;;  %213 = vadd.xlane.f32.xlu1 %v212_v26  ;;  %v114_v25 = vmul.f32 %v4268_v15, %v4268_v15  ;;  %v115_v26 = vmul.f32 %v4273_v18, %v4273_v18 }
  0x35   :  { %216 = vadd.xlane.f32.xlu0 %v215_v33  ;;  %219 = vadd.xlane.f32.xlu1 %v218_v36  ;;  %v251_v33 = vsel %vm142_vm0, %v114_v25, 0.0  ;;  %v254_v36 = vsel %vm142_vm0, %v115_v26, 0.0  ;;  %v4348_v25 = vld [vmem:[%s6266_s0 + $0x170] sm:$0xff]  ;;  %v4353_v26 = vld [vmem:[%s6266_s0 + $0x178] sm:$0xff] }
  0x36   :  { %v124_v37 = vmul.f32 %v4348_v25, %v4348_v25  ;;  %v125_v38 = vmul.f32 %v4353_v26, %v4353_v26 }
  0x39   :  { %222 = vadd.xlane.f32.xlu0 %v221_v43  ;;  %225 = vadd.xlane.f32.xlu1 %v224_v44  ;;  %v4300_v43 = vld [vmem:[%s6266_s0 + $0x140] sm:$0xff]  ;;  %v4305_v44 = vld [vmem:[%s6266_s0 + $0x148] sm:$0xff] }
  0x3d   :  { %228 = vadd.xlane.f32.xlu0 %v227_v51  ;;  %231 = vadd.xlane.f32.xlu1 %v230_v52  ;;  %v118_v51 = vmul.f32 %v4300_v43, %v4300_v43  ;;  %v119_v52 = vmul.f32 %v4305_v44, %v4305_v44 }
  0x41   :  { %234 = vadd.xlane.f32.xlu0 %v233_v57  ;;  %237 = vadd.xlane.f32.xlu1 %v236_v60  ;;  %v263_v57 = vsel %vm142_vm0, %v118_v51, 0.0  ;;  %v266_v60 = vsel %vm142_vm0, %v119_v52, 0.0  ;;  %v281_v51 = vsel %vm142_vm0, %v124_v37, 0.0  ;;  %v284_v52 = vsel %vm142_vm0, %v125_v38, 0.0 }
  0x45   :  { %240 = vadd.xlane.f32.xlu0 %v239_v7  ;;  %243 = vadd.xlane.f32.xlu1 %v242_v10  ;;  %v4332_v7 = vld [vmem:[%s6266_s0 + $0x160] sm:$0xff]  ;;  %v4337_v10 = vld [vmem:[%s6266_s0 + $0x168] sm:$0xff] }
  0x49   :  { %246 = vadd.xlane.f32.xlu0 %v245_v19  ;;  %249 = vadd.xlane.f32.xlu1 %v248_v20  ;;  %v122_v19 = vmul.f32 %v4332_v7, %v4332_v7  ;;  %v123_v20 = vmul.f32 %v4337_v10, %v4337_v10 }
  0x4d   :  { %252 = vadd.xlane.f32.xlu0 %v251_v33  ;;  %255 = vadd.xlane.f32.xlu1 %v254_v36  ;;  %v275_v33 = vsel %vm142_vm0, %v122_v19, 0.0  ;;  %v278_v36 = vsel %vm142_vm0, %v123_v20, 0.0  ;;  %v128_v19 = vmul.f32 %v4380_v61, %v4380_v61  ;;  %v129_v20 = vmul.f32 %v4385_v62, %v4385_v62 }
  0x4f   :  { %v293_v37 = vsel %vm142_vm0, %v128_v19, 0.0  ;;  %v296_v38 = vsel %vm142_vm0, %v129_v20, 0.0 }
  0x51   :  { %258 = vadd.xlane.f32.xlu0 %v257_v45  ;;  %261 = vadd.xlane.f32.xlu1 %v260_v48  ;;  %v4364_v45 = vld [vmem:[%s6266_s0 + $0x180] sm:$0xff]  ;;  %v4369_v48 = vld [vmem:[%s6266_s0 + $0x188] sm:$0xff] }
  0x52   :  { %6406 = vst [vmem:[#allocation2_spill] sm:$0xff] %v4364_v45  ;;  %6407 = vst [vmem:[#allocation3_spill] sm:$0xff] %v4369_v48 }
  0x55   :  { %264 = vadd.xlane.f32.xlu0 %v263_v57  ;;  %267 = vadd.xlane.f32.xlu1 %v266_v60  ;;  %v126_v57 = vmul.f32 %v4364_v45, %v4364_v45  ;;  %v127_v60 = vmul.f32 %v4369_v48, %v4369_v48 }
  0x59   :  { %270 = vadd.xlane.f32.xlu0 %v269_v11  ;;  %273 = vadd.xlane.f32.xlu1 %v272_v12  ;;  %v287_v11 = vsel %vm142_vm0, %v126_v57, 0.0  ;;  %v290_v12 = vsel %vm142_vm0, %v127_v60, 0.0  ;;  %v4412_v57 = vld [vmem:[%s6266_s0 + $0x1b0] sm:$0xff]  ;;  %v4417_v60 = vld [vmem:[%s6266_s0 + $0x1b8] sm:$0xff] }
  0x5a   :  { %6412 = vst [vmem:[#allocation8_spill] sm:$0xff] %v4412_v57  ;;  %6413 = vst [vmem:[#allocation9_spill] sm:$0xff] %v4417_v60  ;;  %v132_v19 = vmul.f32 %v4412_v57, %v4412_v57  ;;  %v133_v20 = vmul.f32 %v4417_v60, %v4417_v60  ;;  %v4444_v57 = vld [vmem:[%s6266_s0 + $0x1d0] sm:$0xff] }
  0x5b   :  { %6416 = vst [vmem:[#allocation12_spill] sm:$0xff] %v4444_v57 }
  0x5d   :  { %276 = vadd.xlane.f32.xlu0 %v275_v33  ;;  %279 = vadd.xlane.f32.xlu1 %v278_v36  ;;  %v4396_v33 = vld [vmem:[%s6266_s0 + $0x1a0] sm:$0xff]  ;;  %v4401_v36 = vld [vmem:[%s6266_s0 + $0x1a8] sm:$0xff] }
  0x5e   :  { %6410 = vst [vmem:[#allocation6_spill] sm:$0xff] %v4396_v33  ;;  %6411 = vst [vmem:[#allocation7_spill] sm:$0xff] %v4401_v36 }
  0x61   :  { %282 = vadd.xlane.f32.xlu0 %v281_v51  ;;  %285 = vadd.xlane.f32.xlu1 %v284_v52  ;;  %v130_v51 = vmul.f32 %v4396_v33, %v4396_v33  ;;  %v131_v52 = vmul.f32 %v4401_v36, %v4401_v36  ;;  %v4428_v36 = vld [vmem:[%s6266_s0 + $0x1c0] sm:$0xff] }
  0x62   :  { %6414 = vst [vmem:[#allocation10_spill] sm:$0xff] %v4428_v36 }
  0x65   :  { %288 = vadd.xlane.f32.xlu0 %v287_v11  ;;  %291 = vadd.xlane.f32.xlu1 %v290_v12  ;;  %v299_v11 = vsel %vm142_vm0, %v130_v51, 0.0  ;;  %v302_v12 = vsel %vm142_vm0, %v131_v52, 0.0  ;;  %v308_v51 = vsel %vm142_vm0, %v133_v20, 0.0  ;;  %v134_v52 = vmul.f32 %v4428_v36, %v4428_v36  ;;  %v4460_v36 = vld [vmem:[%s6266_s0 + $0x1e0] sm:$0xff] }
  0x66   :  { %v136_v20 = vmul.f32 %v4444_v57, %v4444_v57  ;;  %6418 = vst [vmem:[#allocation14_spill] sm:$0xff] %v4460_v36  ;;  %v4476_v57 = vld [vmem:[%s6266_s0 + $0x1f0] sm:$0xff] }
  0x67   :  { %6420 = vst [vmem:[#allocation16_spill] sm:$0xff] %v4476_v57 }
  0x69   :  { %294 = vadd.xlane.f32.xlu0 %v293_v37  ;;  %297 = vadd.xlane.f32.xlu1 %v296_v38  ;;  %v4433_v37 = vld [vmem:[%s6266_s0 + $0x1c8] sm:$0xff]  ;;  %v305_v38 = vsel %vm142_vm0, %v132_v19, 0.0 }
  0x6a   :  { %6415 = vst [vmem:[#allocation11_spill] sm:$0xff] %v4433_v37  ;;  %v135_v60 = vmul.f32 %v4433_v37, %v4433_v37 }
  0x6c   :  { %v314_v19 = vsel %vm142_vm0, %v135_v60, 0.0  ;;  %v317_v60 = vsel %vm142_vm0, %v136_v20, 0.0  ;;  %v140_v20 = vmul.f32 %v4476_v57, %v4476_v57 }
  0x6d   :  { %300 = vadd.xlane.f32.xlu0 %v299_v11  ;;  %303 = vadd.xlane.f32.xlu1 %v302_v12  ;;  %v4449_v11 = vld [vmem:[%s6266_s0 + $0x1d8] sm:$0xff]  ;;  %v311_v12 = vsel %vm142_vm0, %v134_v52, 0.0  ;;  %v138_v52 = vmul.f32 %v4460_v36, %v4460_v36 }
  0x6e   :  { %6417 = vst [vmem:[#allocation13_spill] sm:$0xff] %v4449_v11  ;;  %v137_v37 = vmul.f32 %v4449_v11, %v4449_v11  ;;  %v329_v36 = vsel %vm142_vm0, %v140_v20, 0.0 }
  0x71   :  { %306 = vadd.xlane.f32.xlu0 %v305_v38  ;;  %309 = vadd.xlane.f32.xlu1 %v308_v51  ;;  %v4465_v38 = vld [vmem:[%s6266_s0 + $0x1e8] sm:$0xff]  ;;  %v320_v51 = vsel %vm142_vm0, %v137_v37, 0.0  ;;  %v323_v37 = vsel %vm142_vm0, %v138_v52, 0.0 }
  0x72   :  { %6419 = vst [vmem:[#allocation15_spill] sm:$0xff] %v4465_v38  ;;  %v139_v11 = vmul.f32 %v4465_v38, %v4465_v38 }
  0x75   :  { %312 = vadd.xlane.f32.xlu0 %v311_v12  ;;  %315 = vadd.xlane.f32.xlu1 %v314_v19  ;;  %v4481_v12 = vld [vmem:[%s6266_s0 + $0x1f8] sm:$0xff]  ;;  %v326_v19 = vsel %vm142_vm0, %v139_v11, 0.0 }
  0x76   :  { %6421 = vst [vmem:[#allocation17_spill] sm:$0xff] %v4481_v12  ;;  %v141_v38 = vmul.f32 %v4481_v12, %v4481_v12 }
  0x78   :  { %v332_v33 = vsel %vm142_vm0, %v141_v38, 0.0 }
  0x79   :  { %318 = vadd.xlane.f32.xlu0 %v317_v60  ;;  %321 = vadd.xlane.f32.xlu1 %v320_v51 }
  0x7d   :  { %324 = vadd.xlane.f32.xlu0 %v323_v37  ;;  %327 = vadd.xlane.f32.xlu1 %v326_v19 }
  0x81   :  { %330 = vadd.xlane.f32.xlu0 %v329_v36  ;;  %333 = vadd.xlane.f32.xlu1 %v332_v33 }
  0x92   :  { %v145_v60 = vpop.xlane.xlu0 %144  ;;  %v151_v51 = vpop.xlane.xlu1 %150 }
  0x93   :  { %v335_v62 = vmax.f32 %v145_v60, 1e-24  ;;  %v337_v52 = vmax.f32 %v151_v51, 1e-24 }
  0x95   :  { %3804 = vrsqrt.f32 %v335_v62 }
  0x96   :  { %3806 = vrsqrt.f32 %v337_v52  ;;  %v148_v11 = vpop.xlane.xlu0 %147  ;;  %v154_v61 = vpop.xlane.xlu1 %153 }
  0x97   :  { %v336_v57 = vmax.f32 %v148_v11, 1e-24  ;;  %v338_v48 = vmax.f32 %v154_v61, 1e-24 }
  0x99   :  { %3808 = vrsqrt.f32 %v336_v57 }
  0x9a   :  { %3810 = vrsqrt.f32 %v338_v48  ;;  %v157_v37 = vpop.xlane.xlu0 %156  ;;  %v160_v19 = vpop.xlane.xlu1 %159 }
  0x9b   :  { %v339_v12 = vmax.f32 %v157_v37, 1e-24  ;;  %v340_v20 = vmax.f32 %v160_v19, 1e-24 }
  0x9d   :  { %3812 = vrsqrt.f32 %v339_v12 }
  0x9e   :  { %3814 = vrsqrt.f32 %v340_v20  ;;  %v163_v36 = vpop.xlane.xlu0 %162  ;;  %v166_v33 = vpop.xlane.xlu1 %165 }
  0x9f   :  { %v3805_v38 = vpop.eup %3804  ;;  %v341_v45 = vmax.f32 %v163_v36, 1e-24  ;;  %v342_v60 = vmax.f32 %v166_v33, 1e-24 }
  0xa0   :  { %v3807_v51 = vpop.eup %3806  ;;  %v463_v62 = vmul.f32 %v3805_v38, %v3956_v0 }
  0xa1   :  { %3816 = vrsqrt.f32 %v341_v45  ;;  %v465_v12 = vmul.f32 %v3807_v51, %v3961_v1 }
  0xa2   :  { %3818 = vrsqrt.f32 %v342_v60  ;;  %3583 = vmatprep.mubr.msk.f32.mxu0 %vm142_vm0, %v463_v62  ;;  %v169_v61 = vpop.xlane.xlu0 %168  ;;  %v172_v48 = vpop.xlane.xlu1 %171 }
  0xa3   :  { %v3809_v57 = vpop.eup %3808  ;;  %v343_v52 = vmax.f32 %v169_v61, 1e-24  ;;  %v344_v11 = vmax.f32 %v172_v48, 1e-24 }
  0xa4   :  { %v3811_v37 = vpop.eup %3810  ;;  %v464_v19 = vmul.f32 %v3809_v57, %v3966_v2 }
  0xa5   :  { %3820 = vrsqrt.f32 %v343_v52  ;;  %v466_v45 = vmul.f32 %v3811_v37, %v3977_v6 }
  0xa6   :  { %3822 = vrsqrt.f32 %v344_v11  ;;  %3584 = vmatmul.mubr.msk.f32.vlgmr.msra.gmra.mrb[0].mxu0 %vm142_vm0, %v464_v19  ;;  %v175_v20 = vpop.xlane.xlu0 %174  ;;  %v178_v0 = vpop.xlane.xlu1 %177 }
  0xa7   :  { %v3813_v36 = vpop.eup %3812  ;;  %3586 = vmatprep.mubr.msk.f32.mxu0 %vm142_vm0, %v465_v12  ;;  %v345_v33 = vmax.f32 %v175_v20, 1e-24  ;;  %v346_v38 = vmax.f32 %v178_v0, 1e-24 }
  0xa8   :  { %v3815_v60 = vpop.eup %3814  ;;  %v467_v62 = vmul.f32 %v3813_v36, %v3984_v8 }
  0xa9   :  { %3824 = vrsqrt.f32 %v345_v33  ;;  %v468_v51 = vmul.f32 %v3815_v60, %v3989_v9 }
  0xaa   :  { %3826 = vrsqrt.f32 %v346_v38  ;;  %3587 = vmatmul.mubr.msk.f32.gmra.mrb[2].mxu0 %vm142_vm0, %v466_v45  ;;  %v181_v1 = vpop.xlane.xlu0 %180  ;;  %v184_v2 = vpop.xlane.xlu1 %183 }
  0xab   :  { %v3817_v61 = vpop.eup %3816  ;;  %3589 = vmatprep.mubr.msk.f32.mxu0 %vm142_vm0, %v467_v62  ;;  %v347_v6 = vmax.f32 %v181_v1, 1e-24  ;;  %v348_v48 = vmax.f32 %v184_v2, 1e-24 }
  0xac   :  { %v3819_v57 = vpop.eup %3818  ;;  %v469_v52 = vmul.f32 %v3817_v61, %v4002_v16 }
  0xad   :  { %3828 = vrsqrt.f32 %v347_v6  ;;  %v470_v12 = vmul.f32 %v3819_v57, %v4007_v17 }
  0xae   :  { %3830 = vrsqrt.f32 %v348_v48  ;;  %3590 = vmatmul.mubr.msk.f32.gmra.mrb[4].mxu0 %vm142_vm0, %v468_v51  ;;  %v187_v8 = vpop.xlane.xlu0 %186  ;;  %v190_v11 = vpop.xlane.xlu1 %189 }
  0xaf   :  { %v3821_v37 = vpop.eup %3820  ;;  %3592 = vmatprep.mubr.msk.f32.mxu0 %vm142_vm0, %v469_v52  ;;  %v349_v9 = vmax.f32 %v187_v8, 1e-24  ;;  %v350_v19 = vmax.f32 %v190_v11, 1e-24 }
  0xb0   :  { %v3823_v20 = vpop.eup %3822  ;;  %v471_v0 = vmul.f32 %v3821_v37, %v4018_v22 }
  0xb1   :  { %3832 = vrsqrt.f32 %v349_v9  ;;  %v472_v36 = vmul.f32 %v3823_v20, %v4023_v23 }
  0xb2   :  { %3834 = vrsqrt.f32 %v350_v19  ;;  %3593 = vmatmul.mubr.msk.f32.gmra.mrb[6].mxu0 %vm142_vm0, %v470_v12  ;;  %v193_v16 = vpop.xlane.xlu0 %192  ;;  %v196_v45 = vpop.xlane.xlu1 %195 }
  0xb3   :  { %v3825_v33 = vpop.eup %3824  ;;  %3595 = vmatprep.mubr.msk.f32.mxu0 %vm142_vm0, %v471_v0  ;;  %v351_v17 = vmax.f32 %v193_v16, 1e-24  ;;  %v352_v38 = vmax.f32 %v196_v45, 1e-24 }
  0xb4   :  { %v3827_v60 = vpop.eup %3826  ;;  %v473_v62 = vmul.f32 %v3825_v33, %v4034_v28 }
  0xb5   :  { %3836 = vrsqrt.f32 %v351_v17  ;;  %v474_v2 = vmul.f32 %v3827_v60, %v4039_v29 }
  0xb6   :  { %3838 = vrsqrt.f32 %v352_v38  ;;  %3596 = vmatmul.mubr.msk.f32.gmra.mrb[8].mxu0 %vm142_vm0, %v472_v36  ;;  %v199_v22 = vpop.xlane.xlu0 %198  ;;  %v202_v1 = vpop.xlane.xlu1 %201 }
  0xb7   :  { %v3829_v51 = vpop.eup %3828  ;;  %3598 = vmatprep.mubr.msk.f32.mxu0 %vm142_vm0, %v473_v62  ;;  %v353_v23 = vmax.f32 %v199_v22, 1e-24  ;;  %v354_v61 = vmax.f32 %v202_v1, 1e-24 }
  0xb8   :  { %v3831_v6 = vpop.eup %3830  ;;  %v475_v48 = vmul.f32 %v3829_v51, %v4050_v34 }
  0xb9   :  { %3840 = vrsqrt.f32 %v353_v23  ;;  %v476_v52 = vmul.f32 %v3831_v6, %v4055_v35 }
  0xba   :  { %3842 = vrsqrt.f32 %v354_v61  ;;  %3599 = vmatmul.mubr.msk.f32.gmra.mrb[10].mxu0 %vm142_vm0, %v474_v2  ;;  %v205_v28 = vpop.xlane.xlu0 %204  ;;  %v208_v57 = vpop.xlane.xlu1 %207 }
  0xbb   :  { %v3833_v8 = vpop.eup %3832  ;;  %3601 = vmatprep.mubr.msk.f32.mxu0 %vm142_vm0, %v475_v48  ;;  %v355_v29 = vmax.f32 %v205_v28, 1e-24  ;;  %v356_v11 = vmax.f32 %v208_v57, 1e-24 }
  0xbc   :  { %v3835_v12 = vpop.eup %3834  ;;  %v477_v37 = vmul.f32 %v3833_v8, %v4066_v40 }
  0xbd   :  { %3844 = vrsqrt.f32 %v355_v29  ;;  %v478_v19 = vmul.f32 %v3835_v12, %v4071_v41 }
  0xbe   :  { %3846 = vrsqrt.f32 %v356_v11  ;;  %3602 = vmatmul.mubr.msk.f32.gmra.mrb[12].mxu0 %vm142_vm0, %v476_v52  ;;  %v211_v34 = vpop.xlane.xlu0 %210  ;;  %v214_v9 = vpop.xlane.xlu1 %213 }
  0xbf   :  { %v3837_v20 = vpop.eup %3836  ;;  %3604 = vmatprep.mubr.msk.f32.mxu0 %vm142_vm0, %v477_v37  ;;  %v357_v35 = vmax.f32 %v211_v34, 1e-24  ;;  %v358_v0 = vmax.f32 %v214_v9, 1e-24 }
  0xc0   :  { %v3839_v16 = vpop.eup %3838  ;;  %v479_v45 = vmul.f32 %v3837_v20, %v4082_v46 }
  0xc1   :  { %3848 = vrsqrt.f32 %v357_v35  ;;  %v480_v33 = vmul.f32 %v3839_v16, %v4087_v47 }
  0xc2   :  { %3850 = vrsqrt.f32 %v358_v0  ;;  %3605 = vmatmul.mubr.msk.f32.gmra.mrb[14].mxu0 %vm142_vm0, %v478_v19  ;;  %v217_v40 = vpop.xlane.xlu0 %216  ;;  %v220_v36 = vpop.xlane.xlu1 %219 }
  0xc3   :  { %v3841_v17 = vpop.eup %3840  ;;  %3607 = vmatprep.mubr.msk.f32.mxu0 %vm142_vm0, %v479_v45  ;;  %v359_v41 = vmax.f32 %v217_v40, 1e-24  ;;  %v360_v38 = vmax.f32 %v220_v36, 1e-24 }
  0xc4   :  { %v3843_v60 = vpop.eup %3842  ;;  %v481_v62 = vmul.f32 %v3841_v17, %v4116_v58 }
  0xc5   :  { %3852 = vrsqrt.f32 %v359_v41  ;;  %v482_v1 = vmul.f32 %v3843_v60, %v4121_v59 }
  0xc6   :  { %3854 = vrsqrt.f32 %v360_v38  ;;  %3608 = vmatmul.mubr.msk.f32.gmra.mrb[16].mxu0 %vm142_vm0, %v480_v33  ;;  %v223_v46 = vpop.xlane.xlu0 %222  ;;  %v226_v22 = vpop.xlane.xlu1 %225 }
  0xc7   :  { %v3845_v2 = vpop.eup %3844  ;;  %3610 = vmatprep.mubr.msk.f32.mxu0 %vm142_vm0, %v481_v62  ;;  %v361_v47 = vmax.f32 %v223_v46, 1e-24  ;;  %v362_v51 = vmax.f32 %v226_v22, 1e-24 }
  0xc8   :  { %v3847_v23 = vpop.eup %3846  ;;  %v483_v61 = vmul.f32 %v3845_v2, %v4136_v4 }
  0xc9   :  { %3856 = vrsqrt.f32 %v361_v47  ;;  %v484_v48 = vmul.f32 %v3847_v23, %v4141_v5 }
  0xca   :  { %3858 = vrsqrt.f32 %v362_v51  ;;  %3611 = vmatmul.mubr.msk.f32.gmra.mrb[18].mxu0 %vm142_vm0, %v482_v1  ;;  %v229_v58 = vpop.xlane.xlu0 %228  ;;  %v232_v6 = vpop.xlane.xlu1 %231 }
  0xcb   :  { %v3849_v28 = vpop.eup %3848  ;;  %3613 = vmatprep.mubr.msk.f32.mxu0 %vm142_vm0, %v483_v61  ;;  %v363_v59 = vmax.f32 %v229_v58, 1e-24  ;;  %v364_v57 = vmax.f32 %v232_v6, 1e-24 }
  0xcc   :  { %v3851_v52 = vpop.eup %3850  ;;  %v485_v8 = vmul.f32 %v3849_v28, %v4154_v13 }
  0xcd   :  { %3860 = vrsqrt.f32 %v363_v59  ;;  %v486_v11 = vmul.f32 %v3851_v52, %v4159_v14 }
  0xce   :  { %3862 = vrsqrt.f32 %v364_v57  ;;  %3614 = vmatmul.mubr.msk.f32.gmra.mrb[20].mxu0 %vm142_vm0, %v484_v48  ;;  %v235_v4 = vpop.xlane.xlu0 %234  ;;  %v238_v29 = vpop.xlane.xlu1 %237 }
  0xcf   :  { %v3853_v12 = vpop.eup %3852  ;;  %3616 = vmatprep.mubr.msk.f32.mxu0 %vm142_vm0, %v485_v8  ;;  %v365_v5 = vmax.f32 %v235_v4, 1e-24  ;;  %v366_v37 = vmax.f32 %v238_v29, 1e-24 }
  0xd0   :  { %v3855_v34 = vpop.eup %3854  ;;  %v487_v9 = vmul.f32 %v3853_v12, %v4172_v21 }
  0xd1   :  { %3864 = vrsqrt.f32 %v365_v5  ;;  %v488_v20 = vmul.f32 %v3855_v34, %v4177_v24 }
  0xd2   :  { %3866 = vrsqrt.f32 %v366_v37  ;;  %3617 = vmatmul.mubr.msk.f32.gmra.mrb[22].mxu0 %vm142_vm0, %v486_v11  ;;  %v241_v13 = vpop.xlane.xlu0 %240  ;;  %v244_v19 = vpop.xlane.xlu1 %243 }
  0xd3   :  { %v3857_v35 = vpop.eup %3856  ;;  %3619 = vmatprep.mubr.msk.f32.mxu0 %vm142_vm0, %v487_v9  ;;  %v367_v14 = vmax.f32 %v241_v13, 1e-24  ;;  %v368_v0 = vmax.f32 %v244_v19, 1e-24 }
  0xd4   :  { %v3859_v16 = vpop.eup %3858  ;;  %v489_v45 = vmul.f32 %v3857_v35, %v4188_v31 }
  0xd5   :  { %3868 = vrsqrt.f32 %v367_v14  ;;  %v490_v36 = vmul.f32 %v3859_v16, %v4193_v32 }
  0xd6   :  { %3870 = vrsqrt.f32 %v368_v0  ;;  %3620 = vmatmul.mubr.msk.f32.gmra.mrb[24].mxu0 %vm142_vm0, %v488_v20  ;;  %v247_v21 = vpop.xlane.xlu0 %246  ;;  %v250_v40 = vpop.xlane.xlu1 %249 }
  0xd7   :  { %v3861_v33 = vpop.eup %3860  ;;  %3622 = vmatprep.mubr.msk.f32.mxu0 %vm142_vm0, %v489_v45  ;;  %v369_v24 = vmax.f32 %v247_v21, 1e-24  ;;  %v370_v17 = vmax.f32 %v250_v40, 1e-24 }
  0xd8   :  { %v3863_v41 = vpop.eup %3862  ;;  %v491_v38 = vmul.f32 %v3861_v33, %v4204_v39 }
  0xd9   :  { %3872 = vrsqrt.f32 %v369_v24  ;;  %v492_v62 = vmul.f32 %v3863_v41, %v4209_v42 }
  0xda   :  { %3874 = vrsqrt.f32 %v370_v17  ;;  %3623 = vmatmul.mubr.msk.f32.gmra.mrb[26].mxu0 %vm142_vm0, %v490_v36  ;;  %v253_v31 = vpop.xlane.xlu0 %252  ;;  %v256_v60 = vpop.xlane.xlu1 %255 }
  0xdb   :  { %v3865_v46 = vpop.eup %3864  ;;  %3625 = vmatprep.mubr.msk.f32.mxu0 %vm142_vm0, %v491_v38  ;;  %v371_v32 = vmax.f32 %v253_v31, 1e-24  ;;  %v372_v22 = vmax.f32 %v256_v60, 1e-24 }
  0xdc   :  { %v3867_v1 = vpop.eup %3866  ;;  %v493_v2 = vmul.f32 %v3865_v46, %v4220_v49 }
  0xdd   :  { %3876 = vrsqrt.f32 %v371_v32  ;;  %v494_v51 = vmul.f32 %v3867_v1, %v4225_v50 }
  0xde   :  { %3878 = vrsqrt.f32 %v372_v22  ;;  %3626 = vmatmul.mubr.msk.f32.gmra.mrb[28].mxu0 %vm142_vm0, %v492_v62  ;;  %v259_v39 = vpop.xlane.xlu0 %258  ;;  %v262_v47 = vpop.xlane.xlu1 %261 }
  0xdf   :  { %v3869_v23 = vpop.eup %3868  ;;  %3628 = vmatprep.mubr.msk.f32.mxu0 %vm142_vm0, %v493_v2  ;;  %v373_v42 = vmax.f32 %v259_v39, 1e-24  ;;  %v374_v61 = vmax.f32 %v262_v47, 1e-24 }
  0xe0   :  { %v3871_v58 = vpop.eup %3870  ;;  %v495_v6 = vmul.f32 %v3869_v23, %v4236_v55 }
  0xe1   :  { %3880 = vrsqrt.f32 %v373_v42  ;;  %v496_v28 = vmul.f32 %v3871_v58, %v4241_v56 }
  0xe2   :  { %3882 = vrsqrt.f32 %v374_v61  ;;  %3629 = vmatmul.mubr.msk.f32.gmra.mrb[30].mxu0 %vm142_vm0, %v494_v51  ;;  %v265_v49 = vpop.xlane.xlu0 %264  ;;  %v268_v48 = vpop.xlane.xlu1 %267 }
  0xe3   :  { %v3873_v59 = vpop.eup %3872  ;;  %3631 = vmatprep.mubr.msk.f32.mxu0 %vm142_vm0, %v495_v6  ;;  %v375_v50 = vmax.f32 %v265_v49, 1e-24  ;;  %v376_v57 = vmax.f32 %v268_v48, 1e-24  ;;  %v6422_v48 = vld [vmem:[#allocation2_spill] sm:$0xff] }
  0xe4   :  { %v3875_v52 = vpop.eup %3874  ;;  %v497_v8 = vmul.f32 %v3873_v59, %v4252_v63 }
  0xe5   :  { %3884 = vrsqrt.f32 %v375_v50  ;;  %v498_v55 = vmul.f32 %v3875_v52, %v4257_v3 }
  0xe6   :  { %3886 = vrsqrt.f32 %v376_v57  ;;  %3632 = vmatmul.mubr.msk.f32.gmra.mrb[32].mxu0 %vm142_vm0, %v496_v28  ;;  %v271_v4 = vpop.xlane.xlu0 %270  ;;  %v274_v29 = vpop.xlane.xlu1 %273 }
  0xe7   :  { %v3877_v11 = vpop.eup %3876  ;;  %3634 = vmatprep.mubr.msk.f32.mxu0 %vm142_vm0, %v497_v8  ;;  %v377_v56 = vmax.f32 %v271_v4, 1e-24  ;;  %v378_v12 = vmax.f32 %v274_v29, 1e-24  ;;  %v6424_v4 = vld [vmem:[#allocation4_spill] sm:$0xff] }
  0xe8   :  { %v3879_v5 = vpop.eup %3878  ;;  %v499_v37 = vmul.f32 %v3877_v11, %v4268_v15  ;;  %v6425_v11 = vld [vmem:[#allocation5_spill] sm:$0xff] }
  0xe9   :  { %3888 = vrsqrt.f32 %v377_v56  ;;  %v500_v63 = vmul.f32 %v3879_v5, %v4273_v18 }
  0xea   :  { %3635 = vmatmul.mubr.msk.f32.gmra.mrb[34].mxu0 %vm142_vm0, %v498_v55  ;;  %3890 = vrsqrt.f32 %v378_v12  ;;  %v277_v34 = vpop.xlane.xlu0 %276  ;;  %v280_v9 = vpop.xlane.xlu1 %279 }
  0xeb   :  { %v3881_v13 = vpop.eup %3880  ;;  %3637 = vmatprep.mubr.msk.f32.mxu0 %vm142_vm0, %v499_v37  ;;  %v379_v3 = vmax.f32 %v277_v34, 1e-24  ;;  %v380_v19 = vmax.f32 %v280_v9, 1e-24 }
  0xec   :  { %v3883_v20 = vpop.eup %3882  ;;  %v501_v35 = vmul.f32 %v3881_v13, %v4284_v27  ;;  %v6426_v13 = vld [vmem:[#allocation6_spill] sm:$0xff] }
  0xed   :  { %3892 = vrsqrt.f32 %v379_v3  ;;  %v502_v15 = vmul.f32 %v3883_v20, %v4289_v30 }
  0xee   :  { %3638 = vmatmul.mubr.msk.f32.gmra.mrb[36].mxu0 %vm142_vm0, %v500_v63  ;;  %3894 = vrsqrt.f32 %v380_v19  ;;  %v283_v14 = vpop.xlane.xlu0 %282  ;;  %v286_v0 = vpop.xlane.xlu1 %285  ;;  %v6427_v19 = vld [vmem:[#allocation7_spill] sm:$0xff] }
  0xef   :  { %v3885_v16 = vpop.eup %3884  ;;  %3640 = vmatprep.mubr.msk.f32.mxu0 %vm142_vm0, %v501_v35  ;;  %v381_v18 = vmax.f32 %v283_v14, 1e-24  ;;  %v382_v45 = vmax.f32 %v286_v0, 1e-24 }
  0xf0   :  { %v3887_v21 = vpop.eup %3886  ;;  %v503_v40 = vmul.f32 %v3885_v16, %v4300_v43 }
  0xf1   :  { %3896 = vrsqrt.f32 %v381_v18  ;;  %v504_v27 = vmul.f32 %v3887_v21, %v4305_v44 }
  0xf2   :  { %3641 = vmatmul.mubr.msk.f32.gmra.mrb[38].mxu0 %vm142_vm0, %v502_v15  ;;  %3898 = vrsqrt.f32 %v382_v45  ;;  %v289_v36 = vpop.xlane.xlu0 %288  ;;  %v292_v33 = vpop.xlane.xlu1 %291  ;;  %v6428_v45 = vld [vmem:[#allocation8_spill] sm:$0xff] }
  0xf3   :  { %v3889_v30 = vpop.eup %3888  ;;  %3643 = vmatprep.mubr.msk.f32.mxu0 %vm142_vm0, %v503_v40  ;;  %v383_v24 = vmax.f32 %v289_v36, 1e-24  ;;  %v384_v17 = vmax.f32 %v292_v33, 1e-24  ;;  %v6429_v40 = vld [vmem:[#allocation9_spill] sm:$0xff] }
  0xf4   :  { %v3891_v41 = vpop.eup %3890  ;;  %v505_v38 = vmul.f32 %v3889_v30, %v4316_v53 }
  0xf5   :  { %3900 = vrsqrt.f32 %v383_v24  ;;  %v506_v43 = vmul.f32 %v3891_v41, %v4321_v54 }
  0xf6   :  { %3644 = vmatmul.mubr.msk.f32.gmra.mrb[40].mxu0 %vm142_vm0, %v504_v27  ;;  %3902 = vrsqrt.f32 %v384_v17  ;;  %v295_v31 = vpop.xlane.xlu0 %294  ;;  %v298_v60 = vpop.xlane.xlu1 %297 }
  0xf7   :  { %v3893_v44 = vpop.eup %3892  ;;  %3646 = vmatprep.mubr.msk.f32.mxu0 %vm142_vm0, %v505_v38  ;;  %v385_v62 = vmax.f32 %v295_v31, 1e-24  ;;  %v386_v46 = vmax.f32 %v298_v60, 1e-24  ;;  %v6430_v38 = vld [vmem:[#allocation10_spill] sm:$0xff]  ;;  %v6431_v31 = vld [vmem:[#allocation11_spill] sm:$0xff] }
  0xf8   :  { %v3895_v32 = vpop.eup %3894  ;;  %v507_v22 = vmul.f32 %v3893_v44, %v4332_v7 }
  0xf9   :  { %3904 = vrsqrt.f32 %v385_v62  ;;  %v508_v53 = vmul.f32 %v3895_v32, %v4337_v10 }
  0xfa   :  { %3647 = vmatmul.mubr.msk.f32.gmra.mrb[42].mxu0 %vm142_vm0, %v506_v43  ;;  %3906 = vrsqrt.f32 %v386_v46  ;;  %v301_v1 = vpop.xlane.xlu0 %300  ;;  %v304_v2 = vpop.xlane.xlu1 %303  ;;  %v6432_v46 = vld [vmem:[#allocation12_spill] sm:$0xff] }
  0xfb   :  { %v3897_v54 = vpop.eup %3896  ;;  %3649 = vmatprep.mubr.msk.f32.mxu0 %vm142_vm0, %v507_v22  ;;  %v387_v39 = vmax.f32 %v301_v1, 1e-24  ;;  %v388_v47 = vmax.f32 %v304_v2, 1e-24  ;;  %v6433_v22 = vld [vmem:[#allocation13_spill] sm:$0xff] }
  0xfc   :  { %v3899_v51 = vpop.eup %3898  ;;  %v509_v23 = vmul.f32 %v3897_v54, %v4348_v25  ;;  %v6423_v25 = vld [vmem:[#allocation3_spill] sm:$0xff]  ;;  %v6434_v54 = vld [vmem:[#allocation14_spill] sm:$0xff] }
  0xfd   :  { %3908 = vrsqrt.f32 %v387_v39  ;;  %v510_v7 = vmul.f32 %v3899_v51, %v4353_v26 }
  0xfe   :  { %3650 = vmatmul.mubr.msk.f32.gmra.mrb[44].mxu0 %vm142_vm0, %v508_v53  ;;  %3910 = vrsqrt.f32 %v388_v47  ;;  %v307_v42 = vpop.xlane.xlu0 %306  ;;  %v310_v61 = vpop.xlane.xlu1 %309  ;;  %v6435_v47 = vld [vmem:[#allocation15_spill] sm:$0xff] }
  0xff   :  { %v3901_v10 = vpop.eup %3900  ;;  %3652 = vmatprep.mubr.msk.f32.mxu0 %vm142_vm0, %v509_v23  ;;  %v389_v58 = vmax.f32 %v307_v42, 1e-24  ;;  %v390_v6 = vmax.f32 %v310_v61, 1e-24  ;;  %v6436_v42 = vld [vmem:[#allocation16_spill] sm:$0xff] }
 0x100   :  { %v3903_v49 = vpop.eup %3902  ;;  %v511_v28 = vmul.f32 %v3901_v10, %v6422_v48  ;;  %v6437_v10 = vld [vmem:[#allocation17_spill] sm:$0xff] }
 0x101   :  { %3912 = vrsqrt.f32 %v389_v58  ;;  %v512_v59 = vmul.f32 %v3903_v49, %v6423_v25 }
 0x102   :  { %3653 = vmatmul.mubr.msk.f32.gmra.mrb[46].mxu0 %vm142_vm0, %v510_v7  ;;  %3914 = vrsqrt.f32 %v390_v6  ;;  %v313_v50 = vpop.xlane.xlu0 %312  ;;  %v316_v57 = vpop.xlane.xlu1 %315 }
 0x103   :  { %v3905_v26 = vpop.eup %3904  ;;  %3655 = vmatprep.mubr.msk.f32.mxu0 %vm142_vm0, %v511_v28  ;;  %v391_v52 = vmax.f32 %v313_v50, 1e-24  ;;  %v392_v8 = vmax.f32 %v316_v57, 1e-24 }
 0x104   :  { %v3907_v55 = vpop.eup %3906  ;;  %v513_v29 = vmul.f32 %v3905_v26, %v6424_v4 }
 0x105   :  { %3916 = vrsqrt.f32 %v391_v52  ;;  %v514_v56 = vmul.f32 %v3907_v55, %v6425_v11 }
 0x106   :  { %3656 = vmatmul.mubr.msk.f32.gmra.mrb[48].mxu0 %vm142_vm0, %v512_v59  ;;  %3918 = vrsqrt.f32 %v392_v8  ;;  %v319_v12 = vpop.xlane.xlu0 %318  ;;  %v322_v5 = vpop.xlane.xlu1 %321 }
 0x107   :  { %v3909_v37 = vpop.eup %3908  ;;  %3658 = vmatprep.mubr.msk.f32.mxu0 %vm142_vm0, %v513_v29  ;;  %v393_v63 = vmax.f32 %v319_v12, 1e-24  ;;  %v394_v34 = vmax.f32 %v322_v5, 1e-24 }
 0x108   :  { %v3911_v9 = vpop.eup %3910  ;;  %v515_v3 = vmul.f32 %v3909_v37, %v6426_v13 }
 0x109   :  { %3920 = vrsqrt.f32 %v393_v63  ;;  %v516_v20 = vmul.f32 %v3911_v9, %v6427_v19 }
 0x10a   :  { %3659 = vmatmul.mubr.msk.f32.gmra.mrb[50].mxu0 %vm142_vm0, %v514_v56  ;;  %3922 = vrsqrt.f32 %v394_v34  ;;  %v325_v35 = vpop.xlane.xlu0 %324  ;;  %v328_v15 = vpop.xlane.xlu1 %327 }
 0x10b   :  { %v3913_v14 = vpop.eup %3912  ;;  %3661 = vmatprep.mubr.msk.f32.mxu0 %vm142_vm0, %v515_v3  ;;  %v395_v0 = vmax.f32 %v325_v35, 1e-24  ;;  %v396_v16 = vmax.f32 %v328_v15, 1e-24 }
 0x10c   :  { %v3915_v18 = vpop.eup %3914  ;;  %v517_v21 = vmul.f32 %v3913_v14, %v6428_v45 }
 0x10d   :  { %3924 = vrsqrt.f32 %v395_v0  ;;  %v518_v27 = vmul.f32 %v3915_v18, %v6429_v40 }
 0x10e   :  { %3662 = vmatmul.mubr.msk.f32.gmra.mrb[52].mxu0 %vm142_vm0, %v516_v20  ;;  %3926 = vrsqrt.f32 %v396_v16  ;;  %v331_v36 = vpop.xlane.xlu0 %330  ;;  %v334_v33 = vpop.xlane.xlu1 %333 }
 0x10f   :  { %v3917_v30 = vpop.eup %3916  ;;  %3664 = vmatprep.mubr.msk.f32.mxu0 %vm142_vm0, %v517_v21  ;;  %v397_v24 = vmax.f32 %v331_v36, 1e-24  ;;  %v398_v17 = vmax.f32 %v334_v33, 1e-24 }
 0x110   :  { %v3919_v41 = vpop.eup %3918  ;;  %v519_v43 = vmul.f32 %v3917_v30, %v6430_v38 }
 0x111   :  { %3928 = vrsqrt.f32 %v397_v24  ;;  %v520_v60 = vmul.f32 %v3919_v41, %v6431_v31 }
 0x112   :  { %3665 = vmatmul.mubr.msk.f32.gmra.mrb[54].mxu0 %vm142_vm0, %v518_v27  ;;  %3930 = vrsqrt.f32 %v398_v17 }
 0x113   :  { %v3921_v44 = vpop.eup %3920  ;;  %3667 = vmatprep.mubr.msk.f32.mxu0 %vm142_vm0, %v519_v43 }
 0x114   :  { %v3923_v62 = vpop.eup %3922  ;;  %v521_v32 = vmul.f32 %v3921_v44, %v6432_v46 }
 0x115   :  { %v522_v53 = vmul.f32 %v3923_v62, %v6433_v22 }
 0x116   :  { %3668 = vmatmul.mubr.msk.f32.gmra.mrb[56].mxu0 %vm142_vm0, %v520_v60 }
 0x117   :  { %v3925_v1 = vpop.eup %3924  ;;  %3670 = vmatprep.mubr.msk.f32.mxu0 %vm142_vm0, %v521_v32 }
 0x118   :  { %v3927_v2 = vpop.eup %3926  ;;  %v523_v39 = vmul.f32 %v3925_v1, %v6434_v54 }
 0x119   :  { %v524_v51 = vmul.f32 %v3927_v2, %v6435_v47 }
 0x11a   :  { %3671 = vmatmul.mubr.msk.f32.gmra.mrb[58].mxu0 %vm142_vm0, %v522_v53 }
 0x11b   :  { %v3929_v23 = vpop.eup %3928  ;;  %3673 = vmatprep.mubr.msk.f32.mxu0 %vm142_vm0, %v523_v39 }
 0x11c   :  { %v3931_v7 = vpop.eup %3930  ;;  %v525_v61 = vmul.f32 %v3929_v23, %v6436_v42 }
 0x11d   :  { %v526_v58 = vmul.f32 %v3931_v7, %v6437_v10 }
 0x11e   :  { %3674 = vmatmul.mubr.msk.f32.gmra.mrb[60].mxu0 %vm142_vm0, %v524_v51 }
 0x11f   :  { %3676 = vmatprep.mubr.msk.f32.mxu0 %vm142_vm0, %v525_v61 }
 0x122   :  { %3677 = vmatmul.mubr.msk.f32.gmra.mrb[62].mxu0 %vm142_vm0, %v526_v58 }
 0x179   :  { %v4619_v6 = vpop.f32.mrb[0].mxu0 }
 0x17a   :  { %v4621_v49 = vpop.f32.mrb[1].mxu0  ;;  %v1123_v48 = vsel %vm142_vm0, %v4619_v6, -inf }
 0x17b   :  { %1124 = vmax.xlane.f32.xlu1 %v1123_v48  ;;  %v1120_v28 = vsel %vm142_vm0, %v4621_v49, -inf }
 0x17c   :  { %1121 = vmax.xlane.f32.xlu0 %v1120_v28 }
 0x17d   :  { %v4627_v25 = vpop.f32.mrb[2].mxu0 }
 0x17e   :  { %v4629_v59 = vpop.f32.mrb[3].mxu0  ;;  %v1129_v50 = vsel %vm142_vm0, %v4627_v25, -inf }
 0x17f   :  { %1130 = vmax.xlane.f32.xlu1 %v1129_v50  ;;  %v1126_v57 = vsel %vm142_vm0, %v4629_v59, -inf }
 0x180   :  { %1127 = vmax.xlane.f32.xlu0 %v1126_v57 }
 0x181   :  { %v4635_v26 = vpop.f32.mrb[4].mxu0 }
 0x182   :  { %v4637_v52 = vpop.f32.mrb[5].mxu0  ;;  %v1135_v8 = vsel %vm142_vm0, %v4635_v26, -inf }
 0x183   :  { %1136 = vmax.xlane.f32.xlu1 %v1135_v8  ;;  %v1132_v55 = vsel %vm142_vm0, %v4637_v52, -inf }
 0x184   :  { %1133 = vmax.xlane.f32.xlu0 %v1132_v55 }
 0x185   :  { %v4643_v4 = vpop.f32.mrb[6].mxu0 }
 0x186   :  { %v4645_v29 = vpop.f32.mrb[7].mxu0  ;;  %v1141_v11 = vsel %vm142_vm0, %v4643_v4, -inf }
 0x187   :  { %1142 = vmax.xlane.f32.xlu1 %v1141_v11  ;;  %v1138_v56 = vsel %vm142_vm0, %v4645_v29, -inf }
 0x188   :  { %1139 = vmax.xlane.f32.xlu0 %v1138_v56 }
 0x189   :  { %v4651_v12 = vpop.f32.mrb[8].mxu0 }
 0x18a   :  { %v4653_v5 = vpop.f32.mrb[9].mxu0  ;;  %v1147_v37 = vsel %vm142_vm0, %v4651_v12, -inf }
 0x18b   :  { %1148 = vmax.xlane.f32.xlu1 %v1147_v37  ;;  %v1144_v63 = vsel %vm142_vm0, %v4653_v5, -inf }
 0x18c   :  { %1145 = vmax.xlane.f32.xlu0 %v1144_v63 }
 0x18d   :  { %v4659_v34 = vpop.f32.mrb[10].mxu0 }
 0x18e   :  { %v4661_v9 = vpop.f32.mrb[11].mxu0  ;;  %v1153_v13 = vsel %vm142_vm0, %v4659_v34, -inf }
 0x18f   :  { %1154 = vmax.xlane.f32.xlu1 %v1153_v13  ;;  %v1150_v3 = vsel %vm142_vm0, %v4661_v9, -inf }
 0x190   :  { %1151 = vmax.xlane.f32.xlu0 %v1150_v3 }
 0x191   :  { %v4667_v19 = vpop.f32.mrb[12].mxu0 }
 0x192   :  { %v4669_v20 = vpop.f32.mrb[13].mxu0  ;;  %v1159_v35 = vsel %vm142_vm0, %v4667_v19, -inf }
 0x193   :  { %1160 = vmax.xlane.f32.xlu1 %v1159_v35  ;;  %v1156_v15 = vsel %vm142_vm0, %v4669_v20, -inf }
 0x194   :  { %1157 = vmax.xlane.f32.xlu0 %v1156_v15 }
 0x195   :  { %v4675_v14 = vpop.f32.mrb[14].mxu0 }
 0x196   :  { %v4677_v0 = vpop.f32.mrb[15].mxu0  ;;  %v1165_v16 = vsel %vm142_vm0, %v4675_v14, -inf }
 0x197   :  { %1166 = vmax.xlane.f32.xlu1 %v1165_v16  ;;  %v1162_v18 = vsel %vm142_vm0, %v4677_v0, -inf }
 0x198   :  { %1163 = vmax.xlane.f32.xlu0 %v1162_v18 }
 0x199   :  { %v4683_v45 = vpop.f32.mrb[16].mxu0 }
 0x19a   :  { %v4685_v21 = vpop.f32.mrb[17].mxu0  ;;  %v1171_v40 = vsel %vm142_vm0, %v4683_v45, -inf }
 0x19b   :  { %1172 = vmax.xlane.f32.xlu1 %v1171_v40  ;;  %v1168_v27 = vsel %vm142_vm0, %v4685_v21, -inf }
 0x19c   :  { %1169 = vmax.xlane.f32.xlu0 %v1168_v27 }
 0x19d   :  { %v4691_v36 = vpop.f32.mrb[18].mxu0 }
 0x19e   :  { %v4693_v33 = vpop.f32.mrb[19].mxu0  ;;  %v1177_v30 = vsel %vm142_vm0, %v4691_v36, -inf }
 0x19f   :  { %1178 = vmax.xlane.f32.xlu1 %v1177_v30  ;;  %v1174_v24 = vsel %vm142_vm0, %v4693_v33, -inf }
 0x1a0   :  { %1175 = vmax.xlane.f32.xlu0 %v1174_v24 }
 0x1a1   :  { %v4699_v17 = vpop.f32.mrb[20].mxu0 }
 0x1a2   :  { %v4701_v41 = vpop.f32.mrb[21].mxu0  ;;  %v1183_v38 = vsel %vm142_vm0, %v4699_v17, -inf }
 0x1a3   :  { %1184 = vmax.xlane.f32.xlu1 %v1183_v38  ;;  %v1180_v43 = vsel %vm142_vm0, %v4701_v41, -inf }
 0x1a4   :  { %1181 = vmax.xlane.f32.xlu0 %v1180_v43 }
 0x1a5   :  { %v4707_v31 = vpop.f32.mrb[22].mxu0 }
 0x1a6   :  { %v4709_v60 = vpop.f32.mrb[23].mxu0  ;;  %v1189_v44 = vsel %vm142_vm0, %v4707_v31, -inf }
 0x1a7   :  { %1190 = vmax.xlane.f32.xlu1 %v1189_v44  ;;  %v1186_v62 = vsel %vm142_vm0, %v4709_v60, -inf }
 0x1a8   :  { %1187 = vmax.xlane.f32.xlu0 %v1186_v62 }
 0x1a9   :  { %v4715_v46 = vpop.f32.mrb[24].mxu0 }
 0x1aa   :  { %v4717_v32 = vpop.f32.mrb[25].mxu0  ;;  %v1195_v22 = vsel %vm142_vm0, %v4715_v46, -inf }
 0x1ab   :  { %1196 = vmax.xlane.f32.xlu1 %v1195_v22  ;;  %v1192_v53 = vsel %vm142_vm0, %v4717_v32, -inf }
 0x1ac   :  { %1193 = vmax.xlane.f32.xlu0 %v1192_v53 }
 0x1ad   :  { %v4723_v1 = vpop.f32.mrb[26].mxu0 }
 0x1ae   :  { %v4725_v2 = vpop.f32.mrb[27].mxu0  ;;  %v1201_v54 = vsel %vm142_vm0, %v4723_v1, -inf }
 0x1af   :  { %1202 = vmax.xlane.f32.xlu1 %v1201_v54  ;;  %v1198_v39 = vsel %vm142_vm0, %v4725_v2, -inf }
 0x1b0   :  { %1199 = vmax.xlane.f32.xlu0 %v1198_v39 }
 0x1b1   :  { %v4731_v47 = vpop.f32.mrb[28].mxu0 }
 0x1b2   :  { %v4733_v51 = vpop.f32.mrb[29].mxu0  ;;  %v1207_v23 = vsel %vm142_vm0, %v4731_v47, -inf }
 0x1b3   :  { %1208 = vmax.xlane.f32.xlu1 %v1207_v23  ;;  %v1204_v7 = vsel %vm142_vm0, %v4733_v51, -inf }
 0x1b4   :  { %1205 = vmax.xlane.f32.xlu0 %v1204_v7 }
 0x1b5   :  { %v4739_v42 = vpop.f32.mrb[30].mxu0 }
 0x1b6   :  { %v4741_v61 = vpop.f32.mrb[31].mxu0  ;;  %v1213_v10 = vsel %vm142_vm0, %v4739_v42, -inf }
 0x1b7   :  { %1214 = vmax.xlane.f32.xlu1 %v1213_v10  ;;  %v1210_v58 = vsel %vm142_vm0, %v4741_v61, -inf }
 0x1b8   :  { %1211 = vmax.xlane.f32.xlu0 %v1210_v58 }
 0x1b9   :  { %v4747_v48 = vpop.f32.mrb[32].mxu0 }
 0x1ba   :  { %v4749_v28 = vpop.f32.mrb[33].mxu0  ;;  %v1219_v50 = vsel %vm142_vm0, %v4747_v48, -inf }
 0x1bb   :  { %1220 = vmax.xlane.f32.xlu1 %v1219_v50  ;;  %v1216_v57 = vsel %vm142_vm0, %v4749_v28, -inf }
 0x1bc   :  { %1217 = vmax.xlane.f32.xlu0 %v1216_v57 }
 0x1bd   :  { %v4755_v8 = vpop.f32.mrb[34].mxu0 }
 0x1be   :  { %v4757_v55 = vpop.f32.mrb[35].mxu0  ;;  %v1225_v11 = vsel %vm142_vm0, %v4755_v8, -inf }
 0x1bf   :  { %1226 = vmax.xlane.f32.xlu1 %v1225_v11  ;;  %v1222_v56 = vsel %vm142_vm0, %v4757_v55, -inf }
 0x1c0   :  { %1223 = vmax.xlane.f32.xlu0 %v1222_v56 }
 0x1c1   :  { %v4763_v37 = vpop.f32.mrb[36].mxu0 }
 0x1c2   :  { %v4765_v63 = vpop.f32.mrb[37].mxu0  ;;  %v1231_v13 = vsel %vm142_vm0, %v4763_v37, -inf }
 0x1c3   :  { %1232 = vmax.xlane.f32.xlu1 %v1231_v13  ;;  %v1228_v3 = vsel %vm142_vm0, %v4765_v63, -inf }
 0x1c4   :  { %1229 = vmax.xlane.f32.xlu0 %v1228_v3 }
 0x1c5   :  { %v4771_v35 = vpop.f32.mrb[38].mxu0 }
 0x1c6   :  { %v4773_v15 = vpop.f32.mrb[39].mxu0  ;;  %v1237_v16 = vsel %vm142_vm0, %v4771_v35, -inf }
 0x1c7   :  { %1238 = vmax.xlane.f32.xlu1 %v1237_v16  ;;  %v1234_v18 = vsel %vm142_vm0, %v4773_v15, -inf }
 0x1c8   :  { %1235 = vmax.xlane.f32.xlu0 %v1234_v18 }
 0x1c9   :  { %v4779_v40 = vpop.f32.mrb[40].mxu0 }
 0x1ca   :  { %v4781_v27 = vpop.f32.mrb[41].mxu0  ;;  %v1243_v30 = vsel %vm142_vm0, %v4779_v40, -inf }
 0x1cb   :  { %6438 = vst [vmem:[#allocation2_spill] sm:$0xff] %v4781_v27  ;;  %1244 = vmax.xlane.f32.xlu1 %v1243_v30  ;;  %v1240_v38 = vsel %vm142_vm0, %v4781_v27, -inf }
 0x1cd   :  { %v4785_v24 = vpop.f32.mrb[42].mxu0 }
 0x1ce   :  { %v4789_v43 = vpop.f32.mrb[43].mxu0  ;;  %v1249_v44 = vsel %vm142_vm0, %v4785_v24, -inf }
 0x1cf   :  { %6439 = vst [vmem:[#allocation3_spill] sm:$0xff] %v4789_v43  ;;  %1241 = vmax.xlane.f32.xlu1 %v1240_v38  ;;  %v1246_v54 = vsel %vm142_vm0, %v4789_v43, -inf }
 0x1d1   :  { %v4793_v62 = vpop.f32.mrb[44].mxu0 }
 0x1d2   :  { %v4795_v22 = vpop.f32.mrb[45].mxu0  ;;  %v1255_v23 = vsel %vm142_vm0, %v4793_v62, -inf }
 0x1d3   :  { %6440 = vst [vmem:[#allocation4_spill] sm:$0xff] %v4795_v22  ;;  %1250 = vmax.xlane.f32.xlu1 %v1249_v44  ;;  %v1252_v50 = vsel %vm142_vm0, %v4795_v22, -inf }
 0x1d5   :  { %v4797_v53 = vpop.f32.mrb[46].mxu0 }
 0x1d6   :  { %v4801_v39 = vpop.f32.mrb[47].mxu0  ;;  %v1261_v11 = vsel %vm142_vm0, %v4797_v53, -inf }
 0x1d7   :  { %6441 = vst [vmem:[#allocation5_spill] sm:$0xff] %v4801_v39  ;;  %1247 = vmax.xlane.f32.xlu1 %v1246_v54  ;;  %v1258_v16 = vsel %vm142_vm0, %v4801_v39, -inf }
 0x1d9   :  { %v4805_v7 = vpop.f32.mrb[48].mxu0 }
 0x1da   :  { %v4807_v10 = vpop.f32.mrb[49].mxu0  ;;  %v1267_v30 = vsel %vm142_vm0, %v4805_v7, -inf }
 0x1db   :  { %6442 = vst [vmem:[#allocation6_spill] sm:$0xff] %v4807_v10  ;;  %1256 = vmax.xlane.f32.xlu1 %v1255_v23  ;;  %v1264_v23 = vsel %vm142_vm0, %v4807_v10, -inf }
 0x1dd   :  { %v4809_v58 = vpop.f32.mrb[50].mxu0 }
 0x1de   :  { %6443 = vst [vmem:[#allocation7_spill] sm:$0xff] %v4809_v58  ;;  %v4813_v57 = vpop.f32.mrb[51].mxu0 }
 0x1df   :  { %6444 = vst [vmem:[#allocation8_spill] sm:$0xff] %v4813_v57  ;;  %1253 = vmax.xlane.f32.xlu1 %v1252_v50 }
 0x1e1   :  { %v4817_v56 = vpop.f32.mrb[52].mxu0 }
 0x1e2   :  { %6445 = vst [vmem:[#allocation9_spill] sm:$0xff] %v4817_v56  ;;  %v4819_v13 = vpop.f32.mrb[53].mxu0  ;;  %v1279_v10 = vsel %vm142_vm0, %v4817_v56, -inf }
 0x1e3   :  { %6446 = vst [vmem:[#allocation10_spill] sm:$0xff] %v4819_v13  ;;  %1262 = vmax.xlane.f32.xlu1 %v1261_v11  ;;  %v1273_v11 = vsel %vm142_vm0, %v4809_v58, -inf }
 0x1e5   :  { %v4821_v3 = vpop.f32.mrb[54].mxu0 }
 0x1e6   :  { %v4825_v18 = vpop.f32.mrb[55].mxu0  ;;  %v1285_v58 = vsel %vm142_vm0, %v4821_v3, -inf }
 0x1e7   :  { %6447 = vst [vmem:[#allocation11_spill] sm:$0xff] %v4825_v18  ;;  %1259 = vmax.xlane.f32.xlu1 %v1258_v16  ;;  %v1282_v27 = vsel %vm142_vm0, %v4825_v18, -inf }
 0x1e9   :  { %v4829_v38 = vpop.f32.mrb[56].mxu0 }
 0x1ea   :  { %v4831_v44 = vpop.f32.mrb[57].mxu0  ;;  %v1291_v56 = vsel %vm142_vm0, %v4829_v38, -inf }
 0x1eb   :  { %1268 = vmax.xlane.f32.xlu1 %v1267_v30  ;;  %v1270_v30 = vsel %vm142_vm0, %v4813_v57, -inf }
 0x1ed   :  { %v4833_v54 = vpop.f32.mrb[58].mxu0 }
 0x1ee   :  { %v4837_v50 = vpop.f32.mrb[59].mxu0 }
 0x1ef   :  { %1265 = vmax.xlane.f32.xlu1 %v1264_v23  ;;  %v1276_v23 = vsel %vm142_vm0, %v4819_v13, -inf }
 0x1f1   :  { %v4841_v16 = vpop.f32.mrb[60].mxu0 }
 0x1f2   :  { %v4843_v39 = vpop.f32.mrb[61].mxu0 }
 0x1f3   :  { %1274 = vmax.xlane.f32.xlu1 %v1273_v11  ;;  %v1312_v11 = vlaneseq }
 0x1f5   :  { %v4845_v22 = vpop.f32.mrb[62].mxu0  ;;  %v4859_v57 = vand.u32 127, %v1312_v11 }
 0x1f6   :  { %v4849_v43 = vpop.f32.mrb[63].mxu0 }
 0x1f7   :  { %1271 = vmax.xlane.f32.xlu1 %v1270_v30  ;;  %6448 = vst [vmem:[#allocation12_spill] sm:$0xff] %v4859_v57 }
 0x1fb   :  { %1280 = vmax.xlane.f32.xlu1 %v1279_v10 }
 0x1ff   :  { %1277 = vmax.xlane.f32.xlu1 %v1276_v23 }
 0x203   :  { %1286 = vmax.xlane.f32.xlu1 %v1285_v58 }
 0x207   :  { %1283 = vmax.xlane.f32.xlu1 %v1282_v27 }
 0x208   :  { %v1125_v30 = vpop.xlane.xlu1 %1124 }
 0x209   :  { %vm1315_vm2 = vcmp.eq.f32.partialorder %v4619_v6, %v1125_v30  ;;  %v1122_v10 = vpop.xlane.xlu0 %1121  ;;  %v1288_v30 = vsel %vm142_vm0, %v4831_v44, -inf }
 0x20a   :  { %v1379_v23 = vsel %vm1315_vm2, %v4859_v57, 32  ;;  %vm1314_vm3 = vcmp.eq.f32.partialorder %v4621_v49, %v1122_v10 }
 0x20b   :  { %v4867_v13 = vsel %vm142_vm0, %v1379_v23, 2147483647  ;;  %v1378_v58 = vsel %vm1314_vm3, %v4859_v57, 32  ;;  %1292 = vmax.xlane.f32.xlu1 %v1291_v56 }
 0x20c   :  { %6449 = vst [vmem:[#allocation13_spill] sm:$0xff] %v4867_v13  ;;  %v4871_v11 = vsel %vm142_vm0, %v1378_v58, 2147483647  ;;  %v1131_v27 = vpop.xlane.xlu1 %1130  ;;  %v1459_v18 = vshra.s32 %v4867_v13, 16 }
 0x20d   :  { %6450 = vst [vmem:[#allocation14_spill] sm:$0xff] %v4871_v11  ;;  %vm1317_vm4 = vcmp.eq.f32.partialorder %v4627_v25, %v1131_v27  ;;  %v1128_v6 = vpop.xlane.xlu0 %1127  ;;  %v1444_v56 = vshra.s32 %v4871_v11, 16  ;;  %v1297_v25 = vsel %vm142_vm0, %v4833_v54, -inf  ;;  %v1294_v11 = vsel %vm142_vm0, %v4837_v50, -inf }
 0x20e   :  { %v1381_v49 = vsel %vm1317_vm4, %v4859_v57, 32  ;;  %vm1316_vm5 = vcmp.eq.f32.partialorder %v4629_v59, %v1128_v6  ;;  %v4879_v10 = vcvt.s32.f32 %v1459_v18 }
 0x20f   :  { %v4883_v23 = vsel %vm142_vm0, %v1381_v49, 2147483647  ;;  %1289 = vmax.xlane.f32.xlu1 %v1288_v30  ;;  %v1380_v58 = vsel %vm1316_vm5, %v4859_v57, 32  ;;  %v4890_v59 = vcvt.s32.f32 %v1444_v56 }
 0x210   :  { %v1137_v13 = vpop.xlane.xlu1 %1136  ;;  %1462 = vmin.xlane.f32.xlu0 %v4879_v10  ;;  %v1489_v18 = vshra.s32 %v4883_v23, 16  ;;  %v4894_v6 = vsel %vm142_vm0, %v1380_v58, 2147483647 }
 0x211   :  { %vm1319_vm6 = vcmp.eq.f32.partialorder %v4635_v26, %v1137_v13  ;;  %v1134_v27 = vpop.xlane.xlu0 %1133  ;;  %6451 = vst [vmem:[#allocation15_spill] sm:$0xff] %v4890_v59  ;;  %6452 = vst [vmem:[#allocation16_spill] sm:$0xff] %v4894_v6  ;;  %v1474_v13 = vshra.s32 %v4894_v6, 16 }
 0x212   :  { %v1383_v30 = vsel %vm1319_vm6, %v4859_v57, 32  ;;  %vm1318_vm7 = vcmp.eq.f32.partialorder %v4637_v52, %v1134_v27  ;;  %v4901_v26 = vcvt.s32.f32 %v1489_v18 }
 0x213   :  { %1298 = vmax.xlane.f32.xlu1 %v1297_v25  ;;  %v4905_v56 = vsel %vm142_vm0, %v1383_v30, 2147483647  ;;  %v1382_v58 = vsel %vm1318_vm7, %v4859_v57, 32  ;;  %v4912_v27 = vcvt.s32.f32 %v1474_v13 }
 0x214   :  { %v1143_v49 = vpop.xlane.xlu1 %1142  ;;  %1447 = vmin.xlane.f32.xlu0 %v4890_v59  ;;  %6453 = vst [vmem:[#allocation17_spill] sm:$0xff] %v4901_v26  ;;  %6454 = vst [vmem:[#allocation18_spill] sm:$0xff] %v4905_v56  ;;  %v1303_v59 = vsel %vm142_vm0, %v4841_v16, -inf  ;;  %v1519_v18 = vshra.s32 %v4905_v56, 16  ;;  %v4916_v6 = vsel %vm142_vm0, %v1382_v58, 2147483647 }
 0x215   :  { %vm1321_vm8 = vcmp.eq.f32.partialorder %v4643_v4, %v1143_v49  ;;  %v1140_v52 = vpop.xlane.xlu0 %1139  ;;  %6455 = vst [vmem:[#allocation19_spill] sm:$0xff] %v4912_v27  ;;  %6456 = vst [vmem:[#allocation20_spill] sm:$0xff] %v4916_v6  ;;  %v1504_v49 = vshra.s32 %v4916_v6, 16 }
 0x216   :  { %vm1320_vm9 = vcmp.eq.f32.partialorder %v4645_v29, %v1140_v52  ;;  %v4923_v4 = vcvt.s32.f32 %v1519_v18  ;;  %v1309_v29 = vsel %vm142_vm0, %v4845_v22, -inf }
 0x217   :  { %1295 = vmax.xlane.f32.xlu1 %v1294_v11  ;;  %v1385_v11 = vsel %vm1321_vm8, %v4859_v57, 32  ;;  %v4934_v52 = vcvt.s32.f32 %v1504_v49 }
 0x218   :  { %v1149_v25 = vpop.xlane.xlu1 %1148  ;;  %1492 = vmin.xlane.f32.xlu0 %v4901_v26  ;;  %v1300_v26 = vsel %vm142_vm0, %v4843_v39, -inf  ;;  %6457 = vst [vmem:[#allocation21_spill] sm:$0xff] %v4923_v4  ;;  %v4927_v13 = vsel %vm142_vm0, %v1385_v11, 2147483647 }
 0x219   :  { %v1146_v58 = vpop.xlane.xlu0 %1145  ;;  %vm1323_vm10 = vcmp.eq.f32.partialorder %v4651_v12, %v1149_v25  ;;  %6458 = vst [vmem:[#allocation22_spill] sm:$0xff] %v4934_v52  ;;  %v1549_v18 = vshra.s32 %v4927_v13, 16 }
 0x21a   :  { %vm1322_vm11 = vcmp.eq.f32.partialorder %v4653_v5, %v1146_v58 }
 0x21b   :  { %1304 = vmax.xlane.f32.xlu1 %v1303_v59  ;;  %v1384_v59 = vsel %vm1320_vm9, %v4859_v57, 32  ;;  %v4945_v12 = vcvt.s32.f32 %v1549_v18 }
 0x21c   :  { %v1155_v30 = vpop.xlane.xlu1 %1154  ;;  %1477 = vmin.xlane.f32.xlu0 %v4912_v27  ;;  %v4938_v6 = vsel %vm142_vm0, %v1384_v59, 2147483647  ;;  %v1306_v27 = vsel %vm142_vm0, %v4849_v43, -inf  ;;  %v1386_v59 = vsel %vm1322_vm11, %v4859_v57, 32 }
 0x21d   :  { %6459 = vst [vmem:[#allocation23_spill] sm:$0xff] %v4938_v6  ;;  %6460 = vst [vmem:[#allocation24_spill] sm:$0xff] %v4945_v12  ;;  %v1534_v25 = vshra.s32 %v4938_v6, 16  ;;  %vm1325_vm12 = vcmp.eq.f32.partialorder %v4659_v34, %v1155_v30  ;;  %v4960_v18 = vsel %vm142_vm0, %v1386_v59, 2147483647 }
 0x21e   :  { %6462 = vst [vmem:[#allocation26_spill] sm:$0xff] %v4960_v18  ;;  %v1389_v6 = vsel %vm1325_vm12, %v4859_v57, 32  ;;  %v1564_v34 = vshra.s32 %v4960_v18, 16 }
 0x21f   :  { %1301 = vmax.xlane.f32.xlu1 %v1300_v26  ;;  %v1387_v26 = vsel %vm1323_vm10, %v4859_v57, 32  ;;  %v4956_v5 = vcvt.s32.f32 %v1534_v25  ;;  %v4971_v30 = vsel %vm142_vm0, %v1389_v6, 2147483647 }
 0x220   :  { %v1161_v56 = vpop.xlane.xlu1 %1160  ;;  %1522 = vmin.xlane.f32.xlu0 %v4923_v4  ;;  %v1152_v4 = vpop.xlane.xlu0 %1151  ;;  %v4949_v49 = vsel %vm142_vm0, %v1387_v26, 2147483647  ;;  %6464 = vst [vmem:[#allocation28_spill] sm:$0xff] %v4971_v30 }
 0x221   :  { %6461 = vst [vmem:[#allocation25_spill] sm:$0xff] %v4949_v49  ;;  %v1579_v58 = vshra.s32 %v4949_v49, 16  ;;  %vm1324_vm13 = vcmp.eq.f32.partialorder %v4661_v9, %v1152_v4  ;;  %vm1327_vm14 = vcmp.eq.f32.partialorder %v4667_v19, %v1161_v56  ;;  %v1609_v9 = vshra.s32 %v4971_v30, 16 }
 0x222   :  { %v1388_v25 = vsel %vm1324_vm13, %v4859_v57, 32 }
 0x223   :  { %1310 = vmax.xlane.f32.xlu1 %v1309_v29  ;;  %v4982_v4 = vsel %vm142_vm0, %v1388_v25, 2147483647  ;;  %v4989_v18 = vcvt.s32.f32 %v1609_v9 }
 0x224   :  { %v1167_v11 = vpop.xlane.xlu1 %1166  ;;  %1507 = vmin.xlane.f32.xlu0 %v4934_v52  ;;  %v1158_v26 = vpop.xlane.xlu0 %1157  ;;  %6466 = vst [vmem:[#allocation30_spill] sm:$0xff] %v4982_v4  ;;  %v1594_v19 = vshra.s32 %v4982_v4, 16 }
 0x225   :  { %vm1326_vm15 = vcmp.eq.f32.partialorder %v4669_v20, %v1158_v26  ;;  %vm1329_vm1 = vcmp.eq.f32.partialorder %v4675_v14, %v1167_v11 }
 0x226   :  { %v5000_v20 = vcvt.s32.f32 %v1594_v19  ;;  %v1393_v4 = vsel %vm1329_vm1, %v4859_v57, 32 }
 0x227   :  { %1307 = vmax.xlane.f32.xlu1 %v1306_v27  ;;  %v4967_v27 = vcvt.s32.f32 %v1579_v58  ;;  %v1391_v58 = vsel %vm1327_vm14, %v4859_v57, 32 }
 0x228   :  { %v4952_v29 = vpop.xlane.xlu1 %1172  ;;  %1552 = vmin.xlane.f32.xlu0 %v4945_v12  ;;  %v1164_v49 = vpop.xlane.xlu0 %1163  ;;  %v4978_v12 = vcvt.s32.f32 %v1564_v34  ;;  %v4993_v56 = vsel %vm142_vm0, %v1391_v58, 2147483647  ;;  %v1390_v34 = vsel %vm1326_vm15, %v4859_v57, 32  ;;  %6467 = vst [vmem:[#allocation31_spill] sm:$0xff] %v5000_v20 }
 0x229   :  { %6463 = vst [vmem:[#allocation27_spill] sm:$0xff] %v4967_v27  ;;  %v1639_v26 = vshra.s32 %v4993_v56, 16  ;;  %v5004_v9 = vsel %vm142_vm0, %v1390_v34, 2147483647  ;;  %vm1328_vm3 = vcmp.eq.f32.partialorder %v4677_v0, %v1164_v49  ;;  %vm1331_vm5 = vcmp.eq.f32.partialorder %v4683_v45, %v4952_v29 }
 0x22a   :  { %6465 = vst [vmem:[#allocation29_spill] sm:$0xff] %v4978_v12 }
 0x22b   :  { %v5017_v34 = vcvt.s32.f32 %v1639_v26 }
 0x22c   :  { %v4963_v52 = vpop.xlane.xlu1 %1178  ;;  %1537 = vmin.xlane.f32.xlu0 %v4956_v5  ;;  %v1170_v30 = vpop.xlane.xlu0 %1169 }
 0x22d   :  { %vm1330_vm7 = vcmp.eq.f32.partialorder %v4685_v21, %v1170_v30  ;;  %vm1333_vm9 = vcmp.eq.f32.partialorder %v4691_v36, %v4963_v52 }
 0x22e   :  { %v1397_v36 = vsel %vm1333_vm9, %v4859_v57, 32 }
 0x230   :  { %v4974_v59 = vpop.xlane.xlu1 %1184  ;;  %1582 = vmin.xlane.f32.xlu0 %v4967_v27 }
 0x231   :  { %vm1335_vm13 = vcmp.eq.f32.partialorder %v4699_v17, %v4974_v59 }
 0x234   :  { %v4985_v6 = vpop.xlane.xlu1 %1190  ;;  %1567 = vmin.xlane.f32.xlu0 %v4978_v12 }
 0x238   :  { %v1197_v25 = vpop.xlane.xlu1 %1196  ;;  %1612 = vmin.xlane.f32.xlu0 %v4989_v18 }
 0x239   :  { %vm1339_vm2 = vcmp.eq.f32.partialorder %v4715_v46, %v1197_v25  ;;  %v1176_v46 = vpop.xlane.xlu0 %1175  ;;  %v5021_v25 = vsel %vm142_vm0, %v1393_v4, 2147483647 }
 0x23a   :  { %v1403_v12 = vsel %vm1339_vm2, %v4859_v57, 32  ;;  %v1669_v26 = vshra.s32 %v5021_v25, 16  ;;  %vm1332_vm11 = vcmp.eq.f32.partialorder %v4693_v33, %v1176_v46  ;;  %vm1337_vm2 = vcmp.eq.f32.partialorder %v4707_v31, %v4985_v6 }
 0x23b   :  { %v5007_v58 = vsel %vm142_vm0, %v1403_v12, 2147483647  ;;  %v1624_v12 = vshra.s32 %v5004_v9, 16 }
 0x23c   :  { %6468 = vst [vmem:[#allocation32_spill] sm:$0xff] %v5007_v58  ;;  %v1203_v27 = vpop.xlane.xlu1 %1202  ;;  %1597 = vmin.xlane.f32.xlu0 %v5000_v20  ;;  %v1819_v14 = vshra.s32 %v5007_v58, 16  ;;  %v1392_v58 = vsel %vm1328_vm3, %v4859_v57, 32 }
 0x23d   :  { %vm1341_vm4 = vcmp.eq.f32.partialorder %v4723_v1, %v1203_v27  ;;  %v5036_v4 = vcvt.s32.f32 %v1624_v12  ;;  %v5056_v12 = vcvt.s32.f32 %v1669_v26 }
 0x23e   :  { %v1405_v11 = vsel %vm1341_vm4, %v4859_v57, 32  ;;  %v5015_v19 = vcvt.s32.f32 %v1819_v14  ;;  %v5040_v14 = vsel %vm142_vm0, %v1392_v58, 2147483647 }
 0x23f   :  { %v5024_v20 = vsel %vm142_vm0, %v1405_v11, 2147483647 }
 0x240   :  { %6469 = vst [vmem:[#allocation33_spill] sm:$0xff] %v5015_v19  ;;  %6470 = vst [vmem:[#allocation34_spill] sm:$0xff] %v5024_v20  ;;  %v1209_v0 = vpop.xlane.xlu1 %1208  ;;  %1822 = vmin.xlane.f32.xlu1 %v5015_v19  ;;  %1642 = vmin.xlane.f32.xlu0 %v5017_v34  ;;  %v1849_v1 = vshra.s32 %v5024_v20, 16  ;;  %v1395_v20 = vsel %vm1331_vm5, %v4859_v57, 32  ;;  %v5046_v19 = vpop.xlane.xlu0 %1181 }
 0x241   :  { %vm1343_vm6 = vcmp.eq.f32.partialorder %v4731_v47, %v1209_v0  ;;  %v1654_v0 = vshra.s32 %v5040_v14, 16  ;;  %vm1334_vm15 = vcmp.eq.f32.partialorder %v4701_v41, %v5046_v19 }
 0x242   :  { %v1407_v49 = vsel %vm1343_vm6, %v4859_v57, 32  ;;  %v5034_v27 = vcvt.s32.f32 %v1849_v1  ;;  %v5060_v1 = vsel %vm142_vm0, %v1395_v20, 2147483647 }
 0x243   :  { %v5043_v11 = vsel %vm142_vm0, %v1407_v49, 2147483647  ;;  %v5077_v26 = vcvt.s32.f32 %v1654_v0 }
 0x244   :  { %6471 = vst [vmem:[#allocation35_spill] sm:$0xff] %v5034_v27  ;;  %6472 = vst [vmem:[#allocation36_spill] sm:$0xff] %v5043_v11  ;;  %v1215_v45 = vpop.xlane.xlu1 %1214  ;;  %1852 = vmin.xlane.f32.xlu1 %v5034_v27  ;;  %1627 = vmin.xlane.f32.xlu0 %v5036_v4  ;;  %v1879_v47 = vshra.s32 %v5043_v11, 16  ;;  %v1394_v11 = vsel %vm1330_vm7, %v4859_v57, 32 }
 0x245   :  { %vm1345_vm8 = vcmp.eq.f32.partialorder %v4739_v42, %v1215_v45  ;;  %v5072_v42 = vpop.xlane.xlu0 %1187  ;;  %v1699_v45 = vshra.s32 %v5060_v1, 16 }
 0x246   :  { %v1409_v29 = vsel %vm1345_vm8, %v4859_v57, 32  ;;  %v5054_v58 = vcvt.s32.f32 %v1879_v47  ;;  %v5081_v47 = vsel %vm142_vm0, %v1394_v11, 2147483647  ;;  %vm1336_vm4 = vcmp.eq.f32.partialorder %v4709_v60, %v5072_v42 }
 0x247   :  { %v5063_v49 = vsel %vm142_vm0, %v1409_v29, 2147483647  ;;  %v5095_v0 = vcvt.s32.f32 %v1699_v45 }
 0x248   :  { %6473 = vst [vmem:[#allocation37_spill] sm:$0xff] %v5054_v58  ;;  %6474 = vst [vmem:[#allocation38_spill] sm:$0xff] %v5063_v49  ;;  %v1221_v27 = vpop.xlane.xlu1 %1220  ;;  %1882 = vmin.xlane.f32.xlu1 %v5054_v58  ;;  %1672 = vmin.xlane.f32.xlu0 %v5056_v12  ;;  %v1909_v21 = vshra.s32 %v5063_v49, 16 }
 0x249   :  { %vm1347_vm10 = vcmp.eq.f32.partialorder %v4747_v48, %v1221_v27  ;;  %v5105_v49 = vpop.xlane.xlu0 %1193 }
 0x24a   :  { %v1411_v30 = vsel %vm1347_vm10, %v4859_v57, 32  ;;  %v5075_v20 = vcvt.s32.f32 %v1909_v21  ;;  %v1684_v21 = vshra.s32 %v5081_v47, 16  ;;  %vm1338_vm5 = vcmp.eq.f32.partialorder %v4717_v32, %v5105_v49 }
 0x24b   :  { %v5084_v29 = vsel %vm142_vm0, %v1411_v30, 2147483647  ;;  %v5099_v30 = vsel %vm142_vm0, %v1397_v36, 2147483647 }
 0x24c   :  { %6475 = vst [vmem:[#allocation39_spill] sm:$0xff] %v5075_v20  ;;  %6476 = vst [vmem:[#allocation40_spill] sm:$0xff] %v5084_v29  ;;  %v1227_v52 = vpop.xlane.xlu1 %1226  ;;  %1912 = vmin.xlane.f32.xlu1 %v5075_v20  ;;  %1657 = vmin.xlane.f32.xlu0 %v5077_v26  ;;  %v1939_v48 = vshra.s32 %v5084_v29, 16  ;;  %v1396_v29 = vsel %vm1332_vm11, %v4859_v57, 32  ;;  %v5116_v36 = vcvt.s32.f32 %v1684_v21 }
 0x24d   :  { %vm1349_vm12 = vcmp.eq.f32.partialorder %v4755_v8, %v1227_v52  ;;  %v1729_v52 = vshra.s32 %v5099_v30, 16 }
 0x24e   :  { %v1413_v27 = vsel %vm1349_vm12, %v4859_v57, 32  ;;  %v5093_v11 = vcvt.s32.f32 %v1939_v48  ;;  %v5120_v48 = vsel %vm142_vm0, %v1396_v29, 2147483647 }
 0x24f   :  { %v5102_v20 = vsel %vm142_vm0, %v1413_v27, 2147483647  ;;  %v5135_v21 = vcvt.s32.f32 %v1729_v52 }
 0x250   :  { %6477 = vst [vmem:[#allocation41_spill] sm:$0xff] %v5093_v11  ;;  %6478 = vst [vmem:[#allocation42_spill] sm:$0xff] %v5102_v20  ;;  %v1233_v33 = vpop.xlane.xlu1 %1232  ;;  %1942 = vmin.xlane.f32.xlu1 %v5093_v11  ;;  %1702 = vmin.xlane.f32.xlu0 %v5095_v0  ;;  %v1969_v8 = vshra.s32 %v5102_v20, 16  ;;  %v1399_v20 = vsel %vm1335_vm13, %v4859_v57, 32 }
 0x251   :  { %vm1351_vm14 = vcmp.eq.f32.partialorder %v4763_v37, %v1233_v33  ;;  %v1200_v37 = vpop.xlane.xlu0 %1199  ;;  %v1714_v33 = vshra.s32 %v5120_v48, 16 }
 0x252   :  { %v1415_v46 = vsel %vm1351_vm14, %v4859_v57, 32  ;;  %v5114_v45 = vcvt.s32.f32 %v1969_v8  ;;  %v5139_v8 = vsel %vm142_vm0, %v1399_v20, 2147483647  ;;  %vm1340_vm7 = vcmp.eq.f32.partialorder %v4725_v2, %v1200_v37 }
 0x253   :  { %v5123_v27 = vsel %vm142_vm0, %v1415_v46, 2147483647  ;;  %v1759_v52 = vshra.s32 %v5139_v8, 16 }
 0x254   :  { %6479 = vst [vmem:[#allocation43_spill] sm:$0xff] %v5114_v45  ;;  %6480 = vst [vmem:[#allocation44_spill] sm:$0xff] %v5123_v27  ;;  %v1239_v11 = vpop.xlane.xlu1 %1238  ;;  %1972 = vmin.xlane.f32.xlu1 %v5114_v45  ;;  %1687 = vmin.xlane.f32.xlu0 %v5116_v36  ;;  %v1999_v17 = vshra.s32 %v5123_v27, 16  ;;  %v1398_v27 = vsel %vm1334_vm15, %v4859_v57, 32 }
 0x255   :  { %vm1353_vm1 = vcmp.eq.f32.partialorder %v4771_v35, %v1239_v11  ;;  %v5154_v11 = vcvt.s32.f32 %v1714_v33 }
 0x256   :  { %v1417_v59 = vsel %vm1353_vm1, %v4859_v57, 32  ;;  %v5133_v29 = vcvt.s32.f32 %v1999_v17  ;;  %v5158_v17 = vsel %vm142_vm0, %v1398_v27, 2147483647  ;;  %v5173_v27 = vcvt.s32.f32 %v1759_v52 }
 0x257   :  { %v5142_v46 = vsel %vm142_vm0, %v1417_v59, 2147483647  ;;  %v1744_v33 = vshra.s32 %v5158_v17, 16 }
 0x258   :  { %6481 = vst [vmem:[#allocation45_spill] sm:$0xff] %v5133_v29  ;;  %6482 = vst [vmem:[#allocation46_spill] sm:$0xff] %v5142_v46  ;;  %v1245_v41 = vpop.xlane.xlu1 %1244  ;;  %2002 = vmin.xlane.f32.xlu1 %v5133_v29  ;;  %1732 = vmin.xlane.f32.xlu0 %v5135_v21  ;;  %v2029_v35 = vshra.s32 %v5142_v46, 16  ;;  %v1401_v46 = vsel %vm1337_vm2, %v4859_v57, 32  ;;  %v1206_v29 = vpop.xlane.xlu0 %1205 }
 0x259   :  { %vm1355_vm3 = vcmp.eq.f32.partialorder %v4779_v40, %v1245_v41  ;;  %v5177_v41 = vsel %vm142_vm0, %v1401_v46, 2147483647  ;;  %v5186_v52 = vcvt.s32.f32 %v1744_v33  ;;  %vm1342_vm8 = vcmp.eq.f32.partialorder %v4733_v51, %v1206_v29 }
 0x25a   :  { %v1419_v19 = vsel %vm1355_vm3, %v4859_v57, 32  ;;  %v5152_v20 = vcvt.s32.f32 %v2029_v35  ;;  %v1400_v35 = vsel %vm1336_vm4, %v4859_v57, 32  ;;  %v1789_v46 = vshra.s32 %v5177_v41, 16 }
 0x25b   :  { %v5161_v59 = vsel %vm142_vm0, %v1419_v19, 2147483647 }
 0x25c   :  { %6483 = vst [vmem:[#allocation47_spill] sm:$0xff] %v5152_v20  ;;  %6484 = vst [vmem:[#allocation48_spill] sm:$0xff] %v5161_v59  ;;  %v5164_v31 = vpop.xlane.xlu1 %1241  ;;  %2032 = vmin.xlane.f32.xlu1 %v5152_v20  ;;  %1717 = vmin.xlane.f32.xlu0 %v5154_v11  ;;  %v2059_v40 = vshra.s32 %v5161_v59, 16  ;;  %v1212_v60 = vpop.xlane.xlu0 %1211  ;;  %v5203_v49 = vcvt.s32.f32 %v1789_v46 }
 0x25d   :  { %vm1344_vm10 = vcmp.eq.f32.partialorder %v4741_v61, %v1212_v60 }
 0x25e   :  { %v5171_v6 = vcvt.s32.f32 %v2059_v40  ;;  %v5190_v40 = vsel %vm142_vm0, %v1400_v35, 2147483647 }
 0x25f   :  { %v1774_v33 = vshra.s32 %v5190_v40, 16 }
 0x260   :  { %6485 = vst [vmem:[#allocation49_spill] sm:$0xff] %v5171_v6  ;;  %v1251_v19 = vpop.xlane.xlu1 %1250  ;;  %2062 = vmin.xlane.f32.xlu1 %v5171_v6  ;;  %1762 = vmin.xlane.f32.xlu0 %v5173_v27  ;;  %v1402_v6 = vsel %vm1338_vm5, %v4859_v57, 32 }
 0x261   :  { %vm1357_vm6 = vcmp.eq.f32.partialorder %v4785_v24, %v1251_v19  ;;  %v5207_v35 = vsel %vm142_vm0, %v1402_v6, 2147483647  ;;  %v1404_v19 = vsel %vm1340_vm7, %v4859_v57, 32  ;;  %v5215_v37 = vcvt.s32.f32 %v1774_v33 }
 0x262   :  { %v1421_v42 = vsel %vm1357_vm6, %v4859_v57, 32  ;;  %v1804_v46 = vshra.s32 %v5207_v35, 16  ;;  %v5219_v6 = vsel %vm142_vm0, %v1404_v19, 2147483647 }
 0x263   :  { %v5193_v59 = vsel %vm142_vm0, %v1421_v42, 2147483647  ;;  %v1218_v42 = vpop.xlane.xlu0 %1217  ;;  %v1834_v33 = vshra.s32 %v5219_v6, 16 }
 0x264   :  { %6486 = vst [vmem:[#allocation50_spill] sm:$0xff] %v5193_v59  ;;  %v5196_v20 = vpop.xlane.xlu1 %1247  ;;  %1747 = vmin.xlane.f32.xlu0 %v5186_v52  ;;  %v2089_v32 = vshra.s32 %v5193_v59, 16  ;;  %v5232_v29 = vcvt.s32.f32 %v1804_v46  ;;  %vm1346_vm11 = vcmp.eq.f32.partialorder %v4749_v28, %v1218_v42 }
 0x265   :  { %v5244_v60 = vcvt.s32.f32 %v1834_v33 }
 0x266   :  { %v5201_v24 = vcvt.s32.f32 %v2089_v32  ;;  %6490 = vst [vmem:[#allocation54_spill] sm:$0xff] %v5232_v29 }
 0x268   :  { %6487 = vst [vmem:[#allocation51_spill] sm:$0xff] %v5201_v24  ;;  %v1257_v45 = vpop.xlane.xlu1 %1256  ;;  %2092 = vmin.xlane.f32.xlu1 %v5201_v24  ;;  %1792 = vmin.xlane.f32.xlu0 %v5203_v49  ;;  %v1406_v24 = vsel %vm1342_vm8, %v4859_v57, 32 }
 0x269   :  { %vm1359_vm9 = vcmp.eq.f32.partialorder %v4793_v62, %v1257_v45  ;;  %v1224_v62 = vpop.xlane.xlu0 %1223  ;;  %v5236_v19 = vsel %vm142_vm0, %v1406_v24, 2147483647 }
 0x26a   :  { %v1423_v2 = vsel %vm1359_vm9, %v4859_v57, 32  ;;  %v1864_v46 = vshra.s32 %v5236_v19, 16  ;;  %vm1348_vm13 = vcmp.eq.f32.partialorder %v4757_v55, %v1224_v62 }
 0x26b   :  { %v5222_v32 = vsel %vm142_vm0, %v1423_v2, 2147483647  ;;  %v1408_v2 = vsel %vm1344_vm10, %v4859_v57, 32 }
 0x26c   :  { %6488 = vst [vmem:[#allocation52_spill] sm:$0xff] %v5222_v32  ;;  %v5225_v59 = vpop.xlane.xlu1 %1253  ;;  %1777 = vmin.xlane.f32.xlu0 %v5215_v37  ;;  %v2119_v51 = vshra.s32 %v5222_v32, 16  ;;  %v5248_v24 = vsel %vm142_vm0, %v1408_v2, 2147483647  ;;  %v1412_v2 = vsel %vm1348_vm13, %v4859_v57, 32 }
 0x26d   :  { %v1230_v32 = vpop.xlane.xlu0 %1229  ;;  %v1894_v42 = vshra.s32 %v5248_v24, 16 }
 0x26e   :  { %v5230_v45 = vcvt.s32.f32 %v2119_v51  ;;  %vm1350_vm14 = vcmp.eq.f32.partialorder %v4765_v63, %v1230_v32 }
 0x270   :  { %6489 = vst [vmem:[#allocation53_spill] sm:$0xff] %v5230_v45  ;;  %v1263_v58 = vpop.xlane.xlu1 %1262  ;;  %2122 = vmin.xlane.f32.xlu1 %v5230_v45  ;;  %1807 = vmin.xlane.f32.xlu0 %v5232_v29  ;;  %v1410_v45 = vsel %vm1346_vm11, %v4859_v57, 32 }
 0x271   :  { %vm1361_vm12 = vcmp.eq.f32.partialorder %v4797_v53, %v1263_v58  ;;  %v5261_v58 = vcvt.s32.f32 %v1864_v46  ;;  %v5265_v33 = vsel %vm142_vm0, %v1410_v45, 2147483647  ;;  %v1236_v55 = vpop.xlane.xlu0 %1235  ;;  %v5273_v46 = vcvt.s32.f32 %v1894_v42 }
 0x272   :  { %v1425_v61 = vsel %vm1361_vm12, %v4859_v57, 32  ;;  %v5277_v45 = vsel %vm142_vm0, %v1412_v2, 2147483647  ;;  %vm1352_vm1 = vcmp.eq.f32.partialorder %v4773_v15, %v1236_v55  ;;  %v6500_v15 = vld [vmem:[#allocation7_spill] sm:$0xff] }
 0x273   :  { %v5251_v51 = vsel %vm142_vm0, %v1425_v61, 2147483647  ;;  %6493 = vst [vmem:[#allocation57_spill] sm:$0xff] %v5261_v58  ;;  %6494 = vst [vmem:[#allocation58_spill] sm:$0xff] %v5277_v45  ;;  %v1954_v42 = vshra.s32 %v5277_v45, 16 }
 0x274   :  { %6491 = vst [vmem:[#allocation55_spill] sm:$0xff] %v5251_v51  ;;  %v5254_v29 = vpop.xlane.xlu1 %1259  ;;  %1837 = vmin.xlane.f32.xlu0 %v5244_v60  ;;  %v2149_v28 = vshra.s32 %v5251_v51, 16 }
 0x276   :  { %v5259_v53 = vcvt.s32.f32 %v2149_v28  ;;  %v1924_v28 = vshra.s32 %v5265_v33, 16 }
 0x278   :  { %6492 = vst [vmem:[#allocation56_spill] sm:$0xff] %v5259_v53  ;;  %v1269_v61 = vpop.xlane.xlu1 %1268  ;;  %2152 = vmin.xlane.f32.xlu1 %v5259_v53  ;;  %1867 = vmin.xlane.f32.xlu0 %v5261_v58  ;;  %v1414_v53 = vsel %vm1350_vm14, %v4859_v57, 32  ;;  %v5288_v32 = vcvt.s32.f32 %v1924_v28  ;;  %v5301_v28 = vcvt.s32.f32 %v1954_v42 }
 0x279   :  { %vm1363_vm15 = vcmp.eq.f32.partialorder %v4805_v7, %v1269_v61  ;;  %v5292_v2 = vsel %vm142_vm0, %v1414_v53, 2147483647  ;;  %v1416_v61 = vsel %vm1352_vm1, %v4859_v57, 32 }
 0x27a   :  { %v1427_v62 = vsel %vm1363_vm15, %v4859_v57, 32  ;;  %6497 = vst [vmem:[#allocation61_spill] sm:$0xff] %v5288_v32  ;;  %6498 = vst [vmem:[#allocation62_spill] sm:$0xff] %v5292_v2  ;;  %v5305_v53 = vsel %vm142_vm0, %v1416_v61, 2147483647 }
 0x27b   :  { %v5280_v51 = vsel %vm142_vm0, %v1427_v62, 2147483647  ;;  %v2014_v61 = vshra.s32 %v5305_v53, 16 }
 0x27c   :  { %6495 = vst [vmem:[#allocation59_spill] sm:$0xff] %v5280_v51  ;;  %v1266_v58 = vpop.xlane.xlu1 %1265  ;;  %1897 = vmin.xlane.f32.xlu0 %v5273_v46  ;;  %v2179_v63 = vshra.s32 %v5280_v51, 16  ;;  %v6499_v51 = vld [vmem:[#allocation2_spill] sm:$0xff] }
 0x27d   :  { %vm1354_vm2 = vcmp.eq.f32.partialorder %v6499_v51, %v5164_v31  ;;  %6501 = vst [vmem:[#allocation2_spill] sm:$0xff] %v5305_v53  ;;  %v6503_v51 = vld [vmem:[#allocation3_spill] sm:$0xff] }
 0x27e   :  { %v5286_v7 = vcvt.s32.f32 %v2179_v63  ;;  %v1984_v63 = vshra.s32 %v5292_v2, 16  ;;  %vm1356_vm4 = vcmp.eq.f32.partialorder %v6503_v51, %v5196_v20  ;;  %v6508_v20 = vld [vmem:[#allocation9_spill] sm:$0xff] }
 0x280   :  { %6496 = vst [vmem:[#allocation60_spill] sm:$0xff] %v5286_v7  ;;  %v1275_v62 = vpop.xlane.xlu1 %1274  ;;  %2182 = vmin.xlane.f32.xlu1 %v5286_v7  ;;  %1927 = vmin.xlane.f32.xlu0 %v5288_v32  ;;  %v1418_v7 = vsel %vm1354_vm2, %v4859_v57, 32 }
 0x281   :  { %vm1365_vm3 = vcmp.eq.f32.partialorder %v6500_v15, %v1275_v62  ;;  %v5317_v62 = vcvt.s32.f32 %v1984_v63  ;;  %v5321_v15 = vsel %vm142_vm0, %v1418_v7, 2147483647 }
 0x282   :  { %v1429_v55 = vsel %vm1365_vm3, %v4859_v57, 32  ;;  %6506 = vst [vmem:[#allocation64_spill] sm:$0xff] %v5321_v15  ;;  %v2044_v51 = vshra.s32 %v5321_v15, 16 }
 0x283   :  { %v5308_v45 = vsel %vm142_vm0, %v1429_v55, 2147483647  ;;  %6505 = vst [vmem:[#allocation63_spill] sm:$0xff] %v5317_v62  ;;  %v1420_v55 = vsel %vm1356_vm4, %v4859_v57, 32 }
 0x284   :  { %6502 = vst [vmem:[#allocation7_spill] sm:$0xff] %v5308_v45  ;;  %v1272_v32 = vpop.xlane.xlu1 %1271  ;;  %1957 = vmin.xlane.f32.xlu0 %v5301_v28  ;;  %v2209_v31 = vshra.s32 %v5308_v45, 16  ;;  %v6507_v45 = vld [vmem:[#allocation4_spill] sm:$0xff]  ;;  %v5334_v7 = vsel %vm142_vm0, %v1420_v55, 2147483647 }
 0x285   :  { %vm1358_vm5 = vcmp.eq.f32.partialorder %v6507_v45, %v5225_v59  ;;  %6509 = vst [vmem:[#allocation4_spill] sm:$0xff] %v5334_v7  ;;  %v6511_v45 = vld [vmem:[#allocation5_spill] sm:$0xff]  ;;  %v2074_v55 = vshra.s32 %v5334_v7, 16 }
 0x286   :  { %v5315_v42 = vcvt.s32.f32 %v2209_v31  ;;  %v5330_v31 = vcvt.s32.f32 %v2014_v61  ;;  %vm1360_vm7 = vcmp.eq.f32.partialorder %v6511_v45, %v5254_v29  ;;  %v5346_v61 = vcvt.s32.f32 %v2044_v51 }
 0x287   :  { %v5358_v51 = vcvt.s32.f32 %v2074_v55 }
 0x288   :  { %6504 = vst [vmem:[#allocation3_spill] sm:$0xff] %v5315_v42  ;;  %v1281_v2 = vpop.xlane.xlu1 %1280  ;;  %2212 = vmin.xlane.f32.xlu1 %v5315_v42  ;;  %1987 = vmin.xlane.f32.xlu0 %v5317_v62  ;;  %v1422_v42 = vsel %vm1358_vm5, %v4859_v57, 32 }
 0x289   :  { %vm1367_vm6 = vcmp.eq.f32.partialorder %v6508_v20, %v1281_v2  ;;  %v5350_v20 = vsel %vm142_vm0, %v1422_v42, 2147483647 }
 0x28a   :  { %v1431_v63 = vsel %vm1367_vm6, %v4859_v57, 32  ;;  %6513 = vst [vmem:[#allocation65_spill] sm:$0xff] %v5350_v20 }
 0x28b   :  { %v5337_v53 = vsel %vm142_vm0, %v1431_v63, 2147483647  ;;  %v1424_v63 = vsel %vm1360_vm7, %v4859_v57, 32 }
 0x28c   :  { %6510 = vst [vmem:[#allocation9_spill] sm:$0xff] %v5337_v53  ;;  %v1278_v62 = vpop.xlane.xlu1 %1277  ;;  %2017 = vmin.xlane.f32.xlu0 %v5330_v31  ;;  %v2239_v59 = vshra.s32 %v5337_v53, 16  ;;  %v6514_v53 = vld [vmem:[#allocation6_spill] sm:$0xff]  ;;  %v5362_v42 = vsel %vm142_vm0, %v1424_v63, 2147483647 }
 0x28d   :  { %vm1362_vm8 = vcmp.eq.f32.partialorder %v6514_v53, %v1266_v58  ;;  %6515 = vst [vmem:[#allocation6_spill] sm:$0xff] %v5358_v51  ;;  %v2134_v55 = vshra.s32 %v5362_v42, 16 }
 0x28e   :  { %v5344_v2 = vcvt.s32.f32 %v2239_v59  ;;  %v2104_v59 = vshra.s32 %v5350_v20, 16 }
 0x290   :  { %6512 = vst [vmem:[#allocation5_spill] sm:$0xff] %v5344_v2  ;;  %v1287_v15 = vpop.xlane.xlu1 %1286  ;;  %2242 = vmin.xlane.f32.xlu1 %v5344_v2  ;;  %2047 = vmin.xlane.f32.xlu0 %v5346_v61  ;;  %v1426_v2 = vsel %vm1362_vm8, %v4859_v57, 32 }
 0x291   :  { %vm1369_vm9 = vcmp.eq.f32.partialorder %v4821_v3, %v1287_v15  ;;  %v6517_v3 = vld [vmem:[#allocation8_spill] sm:$0xff]  ;;  %v5373_v15 = vcvt.s32.f32 %v2104_v59  ;;  %v5377_v63 = vsel %vm142_vm0, %v1426_v2, 2147483647  ;;  %v5385_v59 = vcvt.s32.f32 %v2134_v55 }
 0x292   :  { %v1433_v29 = vsel %vm1369_vm9, %v4859_v57, 32  ;;  %vm1364_vm10 = vcmp.eq.f32.partialorder %v6517_v3, %v1272_v32  ;;  %6520 = vst [vmem:[#allocation68_spill] sm:$0xff] %v5377_v63 }
 0x293   :  { %v5365_v45 = vsel %vm142_vm0, %v1433_v29, 2147483647  ;;  %6519 = vst [vmem:[#allocation67_spill] sm:$0xff] %v5373_v15  ;;  %v1428_v29 = vsel %vm1364_vm10, %v4859_v57, 32 }
 0x294   :  { %6516 = vst [vmem:[#allocation66_spill] sm:$0xff] %v5365_v45  ;;  %v1284_v7 = vpop.xlane.xlu1 %1283  ;;  %2077 = vmin.xlane.f32.xlu0 %v5358_v51  ;;  %v2269_v58 = vshra.s32 %v5365_v45, 16  ;;  %v6521_v51 = vld [vmem:[#allocation10_spill] sm:$0xff]  ;;  %v5389_v2 = vsel %vm142_vm0, %v1428_v29, 2147483647 }
 0x295   :  { %vm1366_vm11 = vcmp.eq.f32.partialorder %v6521_v51, %v1278_v62  ;;  %v2194_v29 = vshra.s32 %v5389_v2, 16 }
 0x296   :  { %v5371_v53 = vcvt.s32.f32 %v2269_v58  ;;  %v2164_v58 = vshra.s32 %v5377_v63, 16 }
 0x298   :  { %6518 = vst [vmem:[#allocation8_spill] sm:$0xff] %v5371_v53  ;;  %v1293_v20 = vpop.xlane.xlu1 %1292  ;;  %2272 = vmin.xlane.f32.xlu1 %v5371_v53  ;;  %2107 = vmin.xlane.f32.xlu0 %v5373_v15  ;;  %v1430_v53 = vsel %vm1366_vm11, %v4859_v57, 32  ;;  %v5402_v55 = vcvt.s32.f32 %v2164_v58 }
 0x299   :  { %vm1371_vm12 = vcmp.eq.f32.partialorder %v4829_v38, %v1293_v20  ;;  %v6523_v38 = vld [vmem:[#allocation11_spill] sm:$0xff] }
 0x29a   :  { %v1435_v32 = vsel %vm1371_vm12, %v4859_v57, 32  ;;  %vm1368_vm13 = vcmp.eq.f32.partialorder %v6523_v38, %v1284_v7  ;;  %6526 = vst [vmem:[#allocation70_spill] sm:$0xff] %v5402_v55 }
 0x29b   :  { %v5392_v3 = vsel %vm142_vm0, %v1435_v32, 2147483647  ;;  %v5406_v32 = vsel %vm142_vm0, %v1430_v53, 2147483647  ;;  %v1432_v63 = vsel %vm1368_vm13, %v4859_v57, 32 }
 0x29c   :  { %6522 = vst [vmem:[#allocation10_spill] sm:$0xff] %v5392_v3  ;;  %v1290_v45 = vpop.xlane.xlu1 %1289  ;;  %2137 = vmin.xlane.f32.xlu0 %v5385_v59  ;;  %v2299_v62 = vshra.s32 %v5392_v3, 16  ;;  %6527 = vst [vmem:[#allocation71_spill] sm:$0xff] %v5406_v32  ;;  %v2224_v53 = vshra.s32 %v5406_v32, 16  ;;  %v5420_v38 = vsel %vm142_vm0, %v1432_v63, 2147483647 }
 0x29d   :  { %v5398_v20 = vpop.xlane.xlu0 %1462  ;;  %vm1370_vm14 = vcmp.eq.f32.partialorder %v4831_v44, %v1290_v45  ;;  %6528 = vst [vmem:[#allocation72_spill] sm:$0xff] %v5420_v38  ;;  %v2254_v63 = vshra.s32 %v5420_v38, 16 }
 0x29e   :  { %6524 = vst [vmem:[#allocation11_spill] sm:$0xff] %v5398_v20  ;;  %v5400_v51 = vcvt.s32.f32 %v2299_v62  ;;  %v5416_v62 = vcvt.s32.f32 %v2194_v29  ;;  %vm1464_vm6 = vcmp.eq.f32.partialorder %v4879_v10, %v5398_v20 }
 0x2a0   :  { %6525 = vst [vmem:[#allocation69_spill] sm:$0xff] %v5400_v51  ;;  %v1299_v15 = vpop.xlane.xlu1 %1298  ;;  %2302 = vmin.xlane.f32.xlu1 %v5400_v51  ;;  %2167 = vmin.xlane.f32.xlu0 %v5402_v55  ;;  %v1434_v51 = vsel %vm1370_vm14, %v4859_v57, 32 }
 0x2a1   :  { %vm1373_vm15 = vcmp.eq.f32.partialorder %v4833_v54, %v1299_v15  ;;  %v5413_v7 = vpop.xlane.xlu0 %1447  ;;  %v5433_v15 = vcvt.s32.f32 %v2224_v53  ;;  %v5437_v29 = vsel %vm142_vm0, %v1434_v51, 2147483647  ;;  %v5446_v53 = vcvt.s32.f32 %v2254_v63 }
 0x2a2   :  { %v1437_v58 = vsel %vm1373_vm15, %v4859_v57, 32  ;;  %6533 = vst [vmem:[#allocation77_spill] sm:$0xff] %v5437_v29 }
 0x2a3   :  { %v5423_v3 = vsel %vm142_vm0, %v1437_v58, 2147483647  ;;  %6532 = vst [vmem:[#allocation76_spill] sm:$0xff] %v5433_v15  ;;  %6534 = vst [vmem:[#allocation78_spill] sm:$0xff] %v5446_v53 }
 0x2a4   :  { %6529 = vst [vmem:[#allocation73_spill] sm:$0xff] %v5423_v3  ;;  %v1296_v55 = vpop.xlane.xlu1 %1295  ;;  %2197 = vmin.xlane.f32.xlu0 %v5416_v62  ;;  %v2329_v44 = vshra.s32 %v5423_v3, 16 }
 0x2a5   :  { %vm1372_vm1 = vcmp.eq.f32.partialorder %v4837_v50, %v1296_v55  ;;  %v5429_v54 = vpop.xlane.xlu0 %1492 }
 0x2a6   :  { %6530 = vst [vmem:[#allocation74_spill] sm:$0xff] %v5429_v54  ;;  %v5431_v45 = vcvt.s32.f32 %v2329_v44  ;;  %v1436_v58 = vsel %vm1372_vm1, %v4859_v57, 32  ;;  %v2284_v44 = vshra.s32 %v5437_v29, 16 }
 0x2a7   :  { %v5450_v51 = vsel %vm142_vm0, %v1436_v58, 2147483647 }
 0x2a8   :  { %6531 = vst [vmem:[#allocation75_spill] sm:$0xff] %v5431_v45  ;;  %v1305_v32 = vpop.xlane.xlu1 %1304  ;;  %2332 = vmin.xlane.f32.xlu1 %v5431_v45  ;;  %2227 = vmin.xlane.f32.xlu0 %v5433_v15  ;;  %6535 = vst [vmem:[#allocation79_spill] sm:$0xff] %v5450_v51  ;;  %v5463_v29 = vcvt.s32.f32 %v2284_v44  ;;  %v2314_v58 = vshra.s32 %v5450_v51, 16 }
 0x2a9   :  { %vm1375_vm2 = vcmp.eq.f32.partialorder %v4841_v16, %v1305_v32  ;;  %v5443_v50 = vpop.xlane.xlu0 %1477 }
 0x2aa   :  { %v1439_v55 = vsel %vm1375_vm2, %v4859_v57, 32  ;;  %6539 = vst [vmem:[#allocation83_spill] sm:$0xff] %v5463_v29 }
 0x2ab   :  { %v5453_v3 = vsel %vm142_vm0, %v1439_v55, 2147483647 }
 0x2ac   :  { %6536 = vst [vmem:[#allocation80_spill] sm:$0xff] %v5453_v3  ;;  %v1302_v38 = vpop.xlane.xlu1 %1301  ;;  %2257 = vmin.xlane.f32.xlu0 %v5446_v53  ;;  %v2359_v45 = vshra.s32 %v5453_v3, 16 }
 0x2ad   :  { %vm1374_vm3 = vcmp.eq.f32.partialorder %v4843_v39, %v1302_v38  ;;  %v5458_v16 = vpop.xlane.xlu0 %1522 }
 0x2ae   :  { %6537 = vst [vmem:[#allocation81_spill] sm:$0xff] %v5458_v16  ;;  %v1438_v32 = vsel %vm1374_vm3, %v4859_v57, 32  ;;  %v5461_v63 = vcvt.s32.f32 %v2359_v45  ;;  %v5475_v45 = vcvt.s32.f32 %v2314_v58 }
 0x2af   :  { %v5467_v55 = vsel %vm142_vm0, %v1438_v32, 2147483647 }
 0x2b0   :  { %6538 = vst [vmem:[#allocation82_spill] sm:$0xff] %v5461_v63  ;;  %6540 = vst [vmem:[#allocation84_spill] sm:$0xff] %v5467_v55  ;;  %v1311_v15 = vpop.xlane.xlu1 %1310  ;;  %2362 = vmin.xlane.f32.xlu1 %v5461_v63  ;;  %2287 = vmin.xlane.f32.xlu0 %v5463_v29  ;;  %v2344_v44 = vshra.s32 %v5467_v55, 16  ;;  %v6552_v55 = vld [vmem:[#allocation18_spill] sm:$0xff] }
 0x2b1   :  { %vm1377_vm4 = vcmp.eq.f32.partialorder %v4845_v22, %v1311_v15  ;;  %v5472_v39 = vpop.xlane.xlu0 %1507  ;;  %6541 = vst [vmem:[#allocation85_spill] sm:$0xff] %v5475_v45  ;;  %v6543_v22 = vld [vmem:[#allocation13_spill] sm:$0xff] }
 0x2b2   :  { %v1441_v38 = vsel %vm1377_vm4, %v4859_v57, 32  ;;  %v1458_v15 = vand.u32 65535, %v6543_v22  ;;  %v5490_v53 = vcvt.s32.f32 %v2344_v44  ;;  %v6547_v22 = vld [vmem:[#allocation14_spill] sm:$0xff]  ;;  %v1488_v44 = vand.u32 65535, %v4883_v23 }
 0x2b3   :  { %v5479_v51 = vsel %vm142_vm0, %v1441_v38, 2147483647  ;;  %v1518_v23 = vand.u32 65535, %v6552_v55 }
 0x2b4   :  { %6542 = vst [vmem:[#allocation86_spill] sm:$0xff] %v5479_v51  ;;  %v1308_v32 = vpop.xlane.xlu1 %1307  ;;  %2317 = vmin.xlane.f32.xlu0 %v5475_v45  ;;  %v2389_v63 = vshra.s32 %v5479_v51, 16  ;;  %6545 = vst [vmem:[#allocation87_spill] sm:$0xff] %v5490_v53 }
 0x2b5   :  { %vm1376_vm5 = vcmp.eq.f32.partialorder %v4849_v43, %v1308_v32  ;;  %v5484_v29 = vpop.xlane.xlu0 %1552  ;;  %v1460_v32 = vcvt.s32.f32 %v1458_v15  ;;  %v1490_v15 = vcvt.s32.f32 %v1488_v44 }
 0x2b6   :  { %v1440_v3 = vsel %vm1376_vm5, %v4859_v57, 32  ;;  %v5488_v58 = vcvt.s32.f32 %v2389_v63  ;;  %v1443_v63 = vand.u32 65535, %v6547_v22 }
 0x2b7   :  { %v5493_v38 = vsel %vm142_vm0, %v1440_v3, 2147483647  ;;  %v1465_v3 = vsel %vm1464_vm6, %v1460_v32, inf  ;;  %v6553_v32 = vld [vmem:[#allocation19_spill] sm:$0xff] }
 0x2b8   :  { %6544 = vst [vmem:[#allocation13_spill] sm:$0xff] %v5488_v58  ;;  %6546 = vst [vmem:[#allocation88_spill] sm:$0xff] %v5493_v38  ;;  %2392 = vmin.xlane.f32.xlu1 %v5488_v58  ;;  %2347 = vmin.xlane.f32.xlu0 %v5490_v53  ;;  %v2374_v45 = vshra.s32 %v5493_v38, 16  ;;  %v6549_v53 = vld [vmem:[#allocation15_spill] sm:$0xff]  ;;  %v6550_v58 = vld [vmem:[#allocation17_spill] sm:$0xff]  ;;  %v1445_v20 = vcvt.s32.f32 %v1443_v63  ;;  %vm1479_vm9 = vcmp.eq.f32.partialorder %v6553_v32, %v5443_v50 }
 0x2b9   :  { %v5500_v43 = vpop.xlane.xlu0 %1537  ;;  %vm1449_vm7 = vcmp.eq.f32.partialorder %v6549_v53, %v5413_v7  ;;  %vm1494_vm8 = vcmp.eq.f32.partialorder %v6550_v58, %v5429_v54  ;;  %v6551_v38 = vld [vmem:[#allocation16_spill] sm:$0xff]  ;;  %v6554_v53 = vld [vmem:[#allocation21_spill] sm:$0xff]  ;;  %v1520_v54 = vcvt.s32.f32 %v1518_v23 }
 0x2ba   :  { %v5504_v57 = vcvt.s32.f32 %v2374_v45  ;;  %v1473_v22 = vand.u32 65535, %v6551_v38  ;;  %v1450_v45 = vsel %vm1449_vm7, %v1445_v20, inf  ;;  %v1495_v51 = vsel %vm1494_vm8, %v1490_v15, inf  ;;  %v6555_v63 = vld [vmem:[#allocation20_spill] sm:$0xff]  ;;  %v6556_v20 = vld [vmem:[#allocation22_spill] sm:$0xff] }
 0x2bb   :  { %vm1524_vm10 = vcmp.eq.f32.partialorder %v6554_v53, %v5458_v16  ;;  %v1503_v44 = vand.u32 65535, %v6555_v63  ;;  %v1548_v38 = vand.u32 65535, %v4927_v13  ;;  %vm1509_vm11 = vcmp.eq.f32.partialorder %v6556_v20, %v5472_v39  ;;  %v6559_v53 = vld [vmem:[#allocation25_spill] sm:$0xff]  ;;  %v6562_v20 = vld [vmem:[#allocation28_spill] sm:$0xff] }
 0x2bc   :  { %6548 = vst [vmem:[#allocation14_spill] sm:$0xff] %v5504_v57  ;;  %2377 = vmin.xlane.f32.xlu0 %v5504_v57  ;;  %1466 = vmin.xlane.f32.xlu1 %v1465_v3  ;;  %v1475_v58 = vcvt.s32.f32 %v1473_v22  ;;  %v1525_v55 = vsel %vm1524_vm10, %v1520_v54, inf  ;;  %v6558_v22 = vld [vmem:[#allocation23_spill] sm:$0xff]  ;;  %v1578_v63 = vand.u32 65535, %v6559_v53  ;;  %vm1539_vm13 = vcmp.eq.f32.partialorder %v4956_v5, %v5500_v43 }
 0x2bd   :  { %v5511_v10 = vpop.xlane.xlu0 %1582  ;;  %v1550_v32 = vcvt.s32.f32 %v1548_v38  ;;  %v1533_v23 = vand.u32 65535, %v6558_v22  ;;  %v2595_v5 = vld [vmem:[%s6268_s2 + $0x8] sm:$0xff] }
 0x2be   :  { %v1480_v57 = vsel %vm1479_vm9, %v1475_v58, inf }
 0x2bf   :  { %v1535_v58 = vcvt.s32.f32 %v1533_v23 }
 0x2c0   :  { %1451 = vmin.xlane.f32.xlu0 %v1450_v45  ;;  %1496 = vmin.xlane.f32.xlu1 %v1495_v51  ;;  %v6557_v51 = vld [vmem:[#allocation24_spill] sm:$0xff]  ;;  %v1505_v45 = vcvt.s32.f32 %v1503_v44  ;;  %v6561_v44 = vld [vmem:[#allocation26_spill] sm:$0xff] }
 0x2c1   :  { %v5519_v3 = vpop.xlane.xlu0 %1567  ;;  %vm1554_vm12 = vcmp.eq.f32.partialorder %v6557_v51, %v5484_v29  ;;  %v1563_v38 = vand.u32 65535, %v6561_v44  ;;  %v1608_v51 = vand.u32 65535, %v6562_v20  ;;  %v1540_v22 = vsel %vm1539_vm13, %v1535_v58, inf }
 0x2c2   :  { %v1510_v16 = vsel %vm1509_vm11, %v1505_v45, inf  ;;  %v1555_v13 = vsel %vm1554_vm12, %v1550_v32, inf  ;;  %v6563_v45 = vld [vmem:[#allocation29_spill] sm:$0xff] }
 0x2c3   :  { %vm1569_vm15 = vcmp.eq.f32.partialorder %v6563_v45, %v5519_v3  ;;  %v1668_v45 = vand.u32 65535, %v5021_v25 }
 0x2c4   :  { %1481 = vmin.xlane.f32.xlu0 %v1480_v57  ;;  %1526 = vmin.xlane.f32.xlu1 %v1525_v55  ;;  %v6560_v57 = vld [vmem:[#allocation27_spill] sm:$0xff]  ;;  %v1580_v55 = vcvt.s32.f32 %v1578_v63  ;;  %v1565_v63 = vcvt.s32.f32 %v1563_v38 }
 0x2c5   :  { %v5527_v15 = vpop.xlane.xlu0 %1612  ;;  %vm1584_vm14 = vcmp.eq.f32.partialorder %v6560_v57, %v5511_v10  ;;  %v6564_v57 = vld [vmem:[#allocation30_spill] sm:$0xff]  ;;  %v6565_v38 = vld [vmem:[#allocation31_spill] sm:$0xff] }
 0x2c6   :  { %v1585_v53 = vsel %vm1584_vm14, %v1580_v55, inf  ;;  %vm1614_vm1 = vcmp.eq.f32.partialorder %v4989_v18, %v5527_v15  ;;  %v1593_v58 = vand.u32 65535, %v6564_v57  ;;  %v1638_v55 = vand.u32 65535, %v4993_v56  ;;  %v2597_v18 = vld [vmem:[%s6268_s2 + $0x18] sm:$0xff] }
 0x2c7   :  { %v1570_v44 = vsel %vm1569_vm15, %v1565_v63, inf  ;;  %v1670_v57 = vcvt.s32.f32 %v1668_v45 }
 0x2c8   :  { %1511 = vmin.xlane.f32.xlu0 %v1510_v16  ;;  %1556 = vmin.xlane.f32.xlu1 %v1555_v13  ;;  %v2594_v16 = vld [vmem:[%s6268_s2] sm:$0xff]  ;;  %v1610_v13 = vcvt.s32.f32 %v1608_v51 }
 0x2c9   :  { %v5535_v54 = vpop.xlane.xlu0 %1597  ;;  %v3795_v32 = vpack.c.bf16 %v2595_v5, %v2594_v16  ;;  %v1640_v16 = vcvt.s32.f32 %v1638_v55  ;;  %v1623_v5 = vand.u32 65535, %v5004_v9 }
 0x2ca   :  { %v1615_v20 = vsel %vm1614_vm1, %v1610_v13, inf  ;;  %vm1599_vm2 = vcmp.eq.f32.partialorder %v6565_v38, %v5535_v54 }
 0x2cb   :  { %3796 = vmatprep.subr.bf16.mxu1 %v3795_v32 }
 0x2cc   :  { %1541 = vmin.xlane.f32.xlu0 %v1540_v22  ;;  %1586 = vmin.xlane.f32.xlu1 %v1585_v53  ;;  %v2596_v22 = vld [vmem:[%s6268_s2 + $0x10] sm:$0xff]  ;;  %v1595_v53 = vcvt.s32.f32 %v1593_v58  ;;  %v1653_v58 = vand.u32 65535, %v5040_v14 }
 0x2cd   :  { %v5549_v23 = vpop.xlane.xlu0 %1642  ;;  %3798 = vmatpush3.bf16.msra.mxu1 %v3795_v32  ;;  %v3799_v56 = vpack.c.bf16 %v2597_v18, %v2596_v22  ;;  %v1683_v18 = vand.u32 65535, %v5081_v47 }
 0x2ce   :  { %vm1644_vm3 = vcmp.eq.f32.partialorder %v5017_v34, %v5549_v23  ;;  %v1600_v32 = vsel %vm1599_vm2, %v1595_v53, inf  ;;  %v1625_v34 = vcvt.s32.f32 %v1623_v5  ;;  %v5589_v53 = vpop.xlane.xlu1 %1822  ;;  %v1713_v5 = vand.u32 65535, %v5120_v48 }
 0x2cf   :  { %3800 = vmatprep.subr.bf16.mxu1 %v3799_v56  ;;  %v1645_v63 = vsel %vm1644_vm3, %v1640_v16, inf }
 0x2d0   :  { %1571 = vmin.xlane.f32.xlu0 %v1570_v44  ;;  %1616 = vmin.xlane.f32.xlu1 %v1615_v20  ;;  %v1655_v44 = vcvt.s32.f32 %v1653_v58  ;;  %v1698_v20 = vand.u32 65535, %v5060_v1  ;;  %v1728_v1 = vand.u32 65535, %v5099_v30  ;;  %v1715_v30 = vcvt.s32.f32 %v1713_v5  ;;  %v6569_v5 = vld [vmem:[#allocation35_spill] sm:$0xff] }
 0x2d1   :  { %v5563_v51 = vpop.xlane.xlu0 %1627  ;;  %3802 = vmatpush3.bf16.msra.mxu1 %v3799_v56  ;;  %v1685_v56 = vcvt.s32.f32 %v1683_v18 }
 0x2d2   :  { %vm1629_vm4 = vcmp.eq.f32.partialorder %v5036_v4, %v5563_v51  ;;  %v1700_v14 = vcvt.s32.f32 %v1698_v20  ;;  %v1730_v47 = vcvt.s32.f32 %v1728_v1  ;;  %v6566_v20 = vld [vmem:[#allocation32_spill] sm:$0xff]  ;;  %v6568_v1 = vld [vmem:[#allocation34_spill] sm:$0xff] }
 0x2d3   :  { %v1630_v9 = vsel %vm1629_vm4, %v1625_v34, inf }
 0x2d4   :  { %1601 = vmin.xlane.f32.xlu0 %v1600_v32  ;;  %1646 = vmin.xlane.f32.xlu1 %v1645_v63  ;;  %v1758_v32 = vand.u32 65535, %v5139_v8 }
 0x2d5   :  { %v5569_v13 = vpop.xlane.xlu0 %1672 }
 0x2d6   :  { %vm1674_vm5 = vcmp.eq.f32.partialorder %v5056_v12, %v5569_v13  ;;  %v1760_v48 = vcvt.s32.f32 %v1758_v32 }
 0x2d7   :  { %v1675_v25 = vsel %vm1674_vm5, %v1670_v57, inf  ;;  %v1743_v57 = vand.u32 65535, %v5158_v17 }
 0x2d8   :  { %1631 = vmin.xlane.f32.xlu0 %v1630_v9  ;;  %1676 = vmin.xlane.f32.xlu1 %v1675_v25 }
 0x2d9   :  { %v5574_v55 = vpop.xlane.xlu0 %1657  ;;  %v1745_v9 = vcvt.s32.f32 %v1743_v57 }
 0x2da   :  { %vm1659_vm6 = vcmp.eq.f32.partialorder %v5077_v26, %v5574_v55 }
 0x2db   :  { %v1660_v4 = vsel %vm1659_vm6, %v1655_v44, inf }
 0x2dc   :  { %1661 = vmin.xlane.f32.xlu0 %v1660_v4  ;;  %v1818_v4 = vand.u32 65535, %v6566_v20 }
 0x2dd   :  { %v5579_v22 = vpop.xlane.xlu0 %1702 }
 0x2de   :  { %vm1704_vm7 = vcmp.eq.f32.partialorder %v5095_v0, %v5579_v22 }
 0x2df   :  { %v1705_v12 = vsel %vm1704_vm7, %v1700_v14, inf }
 0x2e0   :  { %1706 = vmin.xlane.f32.xlu1 %v1705_v12  ;;  %v1820_v12 = vcvt.s32.f32 %v1818_v4  ;;  %v6573_v4 = vld [vmem:[#allocation38_spill] sm:$0xff] }
 0x2e1   :  { %v5584_v38 = vpop.xlane.xlu0 %1687 }
 0x2e2   :  { %vm1689_vm8 = vcmp.eq.f32.partialorder %v5116_v36, %v5584_v38  ;;  %v5601_v36 = vpop.xlane.xlu1 %1852 }
 0x2e3   :  { %v1690_v26 = vsel %vm1689_vm8, %v1685_v56, inf  ;;  %vm1854_vm1 = vcmp.eq.f32.partialorder %v6569_v5, %v5601_v36  ;;  %v6576_v5 = vld [vmem:[#allocation57_spill] sm:$0xff] }
 0x2e4   :  { %1691 = vmin.xlane.f32.xlu0 %v1690_v26  ;;  %v1848_v26 = vand.u32 65535, %v6568_v1 }
 0x2e5   :  { %v5591_v16 = vpop.xlane.xlu0 %1732 }
 0x2e6   :  { %vm1734_vm9 = vcmp.eq.f32.partialorder %v5135_v21, %v5591_v16  ;;  %v5608_v58 = vpop.xlane.xlu1 %1882  ;;  %v1850_v32 = vcvt.s32.f32 %v1848_v26 }
 0x2e7   :  { %v1735_v0 = vsel %vm1734_vm9, %v1730_v47, inf  ;;  %v1803_v47 = vand.u32 65535, %v5207_v35  ;;  %v1833_v35 = vand.u32 65535, %v5219_v6 }
 0x2e8   :  { %1736 = vmin.xlane.f32.xlu1 %v1735_v0 }
 0x2e9   :  { %v5596_v45 = vpop.xlane.xlu0 %1717  ;;  %v1835_v20 = vcvt.s32.f32 %v1833_v35 }
 0x2ea   :  { %vm1719_vm10 = vcmp.eq.f32.partialorder %v5154_v11, %v5596_v45  ;;  %v1788_v11 = vand.u32 65535, %v5177_v41  ;;  %v5621_v14 = vpop.xlane.xlu1 %1912  ;;  %v6567_v41 = vld [vmem:[#allocation33_spill] sm:$0xff] }
 0x2eb   :  { %v1720_v63 = vsel %vm1719_vm10, %v1715_v30, inf  ;;  %vm1824_vm14 = vcmp.eq.f32.partialorder %v6567_v41, %v5589_v53 }
 0x2ec   :  { %1721 = vmin.xlane.f32.xlu0 %v1720_v63  ;;  %v1790_v17 = vcvt.s32.f32 %v1788_v11  ;;  %v1805_v63 = vcvt.s32.f32 %v1803_v47  ;;  %v6572_v11 = vld [vmem:[#allocation37_spill] sm:$0xff] }
 0x2ed   :  { %v5603_v34 = vpop.xlane.xlu0 %1762  ;;  %vm1884_vm3 = vcmp.eq.f32.partialorder %v6572_v11, %v5608_v58 }
 0x2ee   :  { %vm1764_vm11 = vcmp.eq.f32.partialorder %v5173_v27, %v5603_v34  ;;  %v1773_v27 = vand.u32 65535, %v5190_v40  ;;  %v1825_v40 = vsel %vm1824_vm14, %v1820_v12, inf  ;;  %v5633_v0 = vpop.xlane.xlu1 %1942 }
 0x2ef   :  { %v1765_v21 = vsel %vm1764_vm11, %v1760_v48, inf  ;;  %v6570_v48 = vld [vmem:[#allocation36_spill] sm:$0xff] }
 0x2f0   :  { %1766 = vmin.xlane.f32.xlu1 %v1765_v21  ;;  %v1775_v56 = vcvt.s32.f32 %v1773_v27  ;;  %v1878_v57 = vand.u32 65535, %v6570_v48  ;;  %v6571_v21 = vld [vmem:[#allocation54_spill] sm:$0xff]  ;;  %v1908_v27 = vand.u32 65535, %v6573_v4 }
 0x2f1   :  { %v5610_v8 = vpop.xlane.xlu0 %1747 }
 0x2f2   :  { %vm1749_vm12 = vcmp.eq.f32.partialorder %v5186_v52, %v5610_v8  ;;  %v5649_v6 = vpop.xlane.xlu1 %1972  ;;  %v1910_v26 = vcvt.s32.f32 %v1908_v27 }
 0x2f3   :  { %v1750_v25 = vsel %vm1749_vm12, %v1745_v9, inf }
 0x2f4   :  { %1751 = vmin.xlane.f32.xlu0 %v1750_v25 }
 0x2f5   :  { %v5615_v44 = vpop.xlane.xlu0 %1792 }
 0x2f6   :  { %vm1794_vm13 = vcmp.eq.f32.partialorder %v5203_v49, %v5615_v44  ;;  %v5661_v48 = vpop.xlane.xlu1 %2002 }
 0x2f7   :  { %v1795_v18 = vsel %vm1794_vm13, %v1790_v17, inf  ;;  %v1880_v17 = vcvt.s32.f32 %v1878_v57 }
 0x2f8   :  { %1796 = vmin.xlane.f32.xlu1 %v1795_v18  ;;  %v1863_v18 = vand.u32 65535, %v5236_v19  ;;  %v1893_v19 = vand.u32 65535, %v5248_v24  ;;  %v1923_v24 = vand.u32 65535, %v5265_v33  ;;  %v6582_v33 = vld [vmem:[#allocation61_spill] sm:$0xff] }
 0x2f9   :  { %v5625_v52 = vpop.xlane.xlu0 %1777  ;;  %v1885_v41 = vsel %vm1884_vm3, %v1880_v17, inf }
 0x2fa   :  { %vm1779_vm15 = vcmp.eq.f32.partialorder %v5215_v37, %v5625_v52  ;;  %v1855_v37 = vsel %vm1854_vm1, %v1850_v32, inf  ;;  %v1865_v47 = vcvt.s32.f32 %v1863_v18  ;;  %v1925_v18 = vcvt.s32.f32 %v1923_v24  ;;  %v6586_v24 = vld [vmem:[#allocation47_spill] sm:$0xff] }
 0x2fb   :  { %v1780_v49 = vsel %vm1779_vm15, %v1775_v56, inf  ;;  %v6574_v56 = vld [vmem:[#allocation39_spill] sm:$0xff] }
 0x2fc   :  { %1826 = vmin.xlane.f32.xlu1 %v1825_v40  ;;  %1781 = vmin.xlane.f32.xlu0 %v1780_v49  ;;  %vm1914_vm5 = vcmp.eq.f32.partialorder %v6574_v56, %v5621_v14  ;;  %v6575_v40 = vld [vmem:[#allocation40_spill] sm:$0xff]  ;;  %v6581_v56 = vld [vmem:[#allocation58_spill] sm:$0xff] }
 0x2fd   :  { %v5635_v30 = vpop.xlane.xlu0 %1807  ;;  %v1938_v49 = vand.u32 65535, %v6575_v40 }
 0x2fe   :  { %vm1809_vm2 = vcmp.eq.f32.partialorder %v6571_v21, %v5635_v30  ;;  %v1895_v21 = vcvt.s32.f32 %v1893_v19 }
 0x2ff   :  { %v1810_v9 = vsel %vm1809_vm2, %v1805_v63, inf  ;;  %v6577_v63 = vld [vmem:[#allocation41_spill] sm:$0xff]  ;;  %v1940_v35 = vcvt.s32.f32 %v1938_v49 }
 0x300   :  { %1856 = vmin.xlane.f32.xlu1 %v1855_v37  ;;  %1811 = vmin.xlane.f32.xlu0 %v1810_v9  ;;  %vm1944_vm7 = vcmp.eq.f32.partialorder %v6577_v63, %v5633_v0  ;;  %v6578_v37 = vld [vmem:[#allocation42_spill] sm:$0xff]  ;;  %v6583_v49 = vld [vmem:[#allocation45_spill] sm:$0xff] }
 0x301   :  { %v5643_v25 = vpop.xlane.xlu0 %1837  ;;  %v1968_v9 = vand.u32 65535, %v6578_v37  ;;  %v1945_v11 = vsel %vm1944_vm7, %v1940_v35, inf  ;;  %vm2004_vm11 = vcmp.eq.f32.partialorder %v6583_v49, %v5661_v48  ;;  %v6585_v35 = vld [vmem:[#allocation62_spill] sm:$0xff] }
 0x302   :  { %vm1839_vm4 = vcmp.eq.f32.partialorder %v5244_v60, %v5643_v25  ;;  %v1915_v60 = vsel %vm1914_vm5, %v1910_v26, inf  ;;  %v1953_v26 = vand.u32 65535, %v6581_v56 }
 0x303   :  { %v1840_v12 = vsel %vm1839_vm4, %v1835_v20, inf  ;;  %v6579_v20 = vld [vmem:[#allocation43_spill] sm:$0xff]  ;;  %v1970_v27 = vcvt.s32.f32 %v1968_v9 }
 0x304   :  { %1886 = vmin.xlane.f32.xlu1 %v1885_v41  ;;  %1841 = vmin.xlane.f32.xlu0 %v1840_v12  ;;  %vm1974_vm9 = vcmp.eq.f32.partialorder %v6579_v20, %v5649_v6  ;;  %v6580_v41 = vld [vmem:[#allocation44_spill] sm:$0xff] }
 0x305   :  { %v5653_v1 = vpop.xlane.xlu0 %1867  ;;  %v1998_v12 = vand.u32 65535, %v6580_v41 }
 0x306   :  { %vm1869_vm6 = vcmp.eq.f32.partialorder %v6576_v5, %v5653_v1 }
 0x307   :  { %v1870_v32 = vsel %vm1869_vm6, %v1865_v47, inf  ;;  %v5677_v47 = vpop.xlane.xlu1 %2032  ;;  %v2000_v5 = vcvt.s32.f32 %v1998_v12  ;;  %v6588_v12 = vld [vmem:[#allocation2_spill] sm:$0xff] }
 0x308   :  { %1916 = vmin.xlane.f32.xlu1 %v1915_v60  ;;  %1871 = vmin.xlane.f32.xlu0 %v1870_v32  ;;  %v1955_v60 = vcvt.s32.f32 %v1953_v26  ;;  %v6584_v32 = vld [vmem:[#allocation46_spill] sm:$0xff]  ;;  %vm2034_vm13 = vcmp.eq.f32.partialorder %v6586_v24, %v5677_v47  ;;  %v2013_v56 = vand.u32 65535, %v6588_v12  ;;  %v6589_v26 = vld [vmem:[#allocation63_spill] sm:$0xff]  ;;  %v6594_v12 = vld [vmem:[#allocation52_spill] sm:$0xff] }
 0x309   :  { %v5663_v57 = vpop.xlane.xlu0 %1897  ;;  %v2028_v63 = vand.u32 65535, %v6584_v32  ;;  %v2005_v37 = vsel %vm2004_vm11, %v2000_v5, inf  ;;  %v6591_v32 = vld [vmem:[#allocation50_spill] sm:$0xff]  ;;  %v6593_v24 = vld [vmem:[#allocation51_spill] sm:$0xff] }
 0x30a   :  { %vm1899_vm8 = vcmp.eq.f32.partialorder %v5273_v46, %v5663_v57  ;;  %v1975_v46 = vsel %vm1974_vm9, %v1970_v27, inf }
 0x30b   :  { %v1900_v17 = vsel %vm1899_vm8, %v1895_v21, inf  ;;  %v1983_v21 = vand.u32 65535, %v6585_v35  ;;  %v2030_v20 = vcvt.s32.f32 %v2028_v63  ;;  %v2088_v63 = vand.u32 65535, %v6591_v32  ;;  %v6592_v35 = vld [vmem:[#allocation64_spill] sm:$0xff] }
 0x30c   :  { %1946 = vmin.xlane.f32.xlu1 %v1945_v11  ;;  %1901 = vmin.xlane.f32.xlu0 %v1900_v17  ;;  %v5689_v11 = vpop.xlane.xlu1 %2062 }
 0x30d   :  { %v5671_v4 = vpop.xlane.xlu0 %1927  ;;  %v1985_v27 = vcvt.s32.f32 %v1983_v21  ;;  %v2043_v21 = vand.u32 65535, %v6592_v35  ;;  %v6598_v35 = vld [vmem:[#allocation55_spill] sm:$0xff] }
 0x30e   :  { %vm1929_vm10 = vcmp.eq.f32.partialorder %v6582_v33, %v5671_v4 }
 0x30f   :  { %v1930_v40 = vsel %vm1929_vm10, %v1925_v18, inf  ;;  %v6587_v18 = vld [vmem:[#allocation48_spill] sm:$0xff] }
 0x310   :  { %1976 = vmin.xlane.f32.xlu1 %v1975_v46  ;;  %1931 = vmin.xlane.f32.xlu0 %v1930_v40  ;;  %v2058_v41 = vand.u32 65535, %v6587_v18  ;;  %v6590_v46 = vld [vmem:[#allocation49_spill] sm:$0xff]  ;;  %v5699_v40 = vpop.xlane.xlu1 %2092  ;;  %v2090_v18 = vcvt.s32.f32 %v2088_v63 }
 0x311   :  { %v5681_v19 = vpop.xlane.xlu0 %1957  ;;  %vm2064_vm15 = vcmp.eq.f32.partialorder %v6590_v46, %v5689_v11  ;;  %vm2094_vm2 = vcmp.eq.f32.partialorder %v6593_v24, %v5699_v40  ;;  %v6596_v46 = vld [vmem:[#allocation53_spill] sm:$0xff]  ;;  %v6600_v24 = vld [vmem:[#allocation6_spill] sm:$0xff] }
 0x312   :  { %vm1959_vm12 = vcmp.eq.f32.partialorder %v5301_v28, %v5681_v19  ;;  %v2035_v28 = vsel %vm2034_vm13, %v2030_v20, inf  ;;  %v2060_v5 = vcvt.s32.f32 %v2058_v41  ;;  %v2045_v41 = vcvt.s32.f32 %v2043_v21 }
 0x313   :  { %v1960_v9 = vsel %vm1959_vm12, %v1955_v60, inf  ;;  %v2015_v60 = vcvt.s32.f32 %v2013_v56  ;;  %v2118_v56 = vand.u32 65535, %v6594_v12  ;;  %v2148_v21 = vand.u32 65535, %v6598_v35  ;;  %v6604_v35 = vld [vmem:[#allocation67_spill] sm:$0xff] }
 0x314   :  { %2006 = vmin.xlane.f32.xlu1 %v2005_v37  ;;  %1961 = vmin.xlane.f32.xlu0 %v1960_v9  ;;  %v2065_v37 = vsel %vm2064_vm15, %v2060_v5, inf  ;;  %v5709_v20 = vpop.xlane.xlu1 %2122 }
 0x315   :  { %v5691_v17 = vpop.xlane.xlu0 %1987  ;;  %vm2124_vm4 = vcmp.eq.f32.partialorder %v6596_v46, %v5709_v20  ;;  %v2120_v32 = vcvt.s32.f32 %v2118_v56  ;;  %v2150_v56 = vcvt.s32.f32 %v2148_v21  ;;  %v2133_v46 = vand.u32 65535, %v5362_v42 }
 0x316   :  { %vm1989_vm14 = vcmp.eq.f32.partialorder %v6589_v26, %v5691_v17  ;;  %v6595_v26 = vld [vmem:[#allocation4_spill] sm:$0xff] }
 0x317   :  { %v1990_v33 = vsel %vm1989_vm14, %v1985_v27, inf }
 0x318   :  { %2036 = vmin.xlane.f32.xlu1 %v2035_v28  ;;  %1991 = vmin.xlane.f32.xlu0 %v1990_v33  ;;  %v2073_v28 = vand.u32 65535, %v6595_v26  ;;  %v5719_v5 = vpop.xlane.xlu1 %2152 }
 0x319   :  { %v5701_v49 = vpop.xlane.xlu0 %2017  ;;  %6597 = vst [vmem:[#allocation15_spill] sm:$0xff] %v5719_v5 }
 0x31a   :  { %vm2019_vm1 = vcmp.eq.f32.partialorder %v5330_v31, %v5701_v49  ;;  %v2095_v31 = vsel %vm2094_vm2, %v2090_v18, inf  ;;  %v2075_v63 = vcvt.s32.f32 %v2073_v28 }
 0x31b   :  { %v2020_v9 = vsel %vm2019_vm1, %v2015_v60, inf }
 0x31c   :  { %2066 = vmin.xlane.f32.xlu1 %v2065_v37  ;;  %2021 = vmin.xlane.f32.xlu0 %v2020_v9  ;;  %v6599_v37 = vld [vmem:[#allocation65_spill] sm:$0xff]  ;;  %v5729_v12 = vpop.xlane.xlu1 %2182 }
 0x31d   :  { %v5711_v27 = vpop.xlane.xlu0 %2047  ;;  %v2103_v9 = vand.u32 65535, %v6599_v37  ;;  %6602 = vst [vmem:[#allocation17_spill] sm:$0xff] %v5729_v12  ;;  %v6605_v37 = vld [vmem:[#allocation60_spill] sm:$0xff] }
 0x31e   :  { %vm2049_vm3 = vcmp.eq.f32.partialorder %v5346_v61, %v5711_v27  ;;  %v2125_v61 = vsel %vm2124_vm4, %v2120_v32, inf  ;;  %vm2184_vm8 = vcmp.eq.f32.partialorder %v6605_v37, %v5729_v12  ;;  %v6613_v37 = vld [vmem:[#allocation9_spill] sm:$0xff]  ;;  %v6614_v12 = vld [vmem:[#allocation70_spill] sm:$0xff] }
 0x31f   :  { %v2050_v33 = vsel %vm2049_vm3, %v2045_v41, inf  ;;  %v6601_v41 = vld [vmem:[#allocation56_spill] sm:$0xff]  ;;  %v2105_v28 = vcvt.s32.f32 %v2103_v9  ;;  %v2135_v9 = vcvt.s32.f32 %v2133_v46 }
 0x320   :  { %2096 = vmin.xlane.f32.xlu1 %v2095_v31  ;;  %2051 = vmin.xlane.f32.xlu0 %v2050_v33  ;;  %vm2154_vm6 = vcmp.eq.f32.partialorder %v6601_v41, %v5719_v5  ;;  %v6603_v31 = vld [vmem:[#allocation59_spill] sm:$0xff]  ;;  %v1514_v5 = vcvt.f32.s32 %v5472_v39 }
 0x321   :  { %v5721_v60 = vpop.xlane.xlu0 %2077  ;;  %v2178_v33 = vand.u32 65535, %v6603_v31  ;;  %v2155_v32 = vsel %vm2154_vm6, %v2150_v56, inf  ;;  %v6609_v31 = vld [vmem:[#allocation68_spill] sm:$0xff] }
 0x322   :  { %vm2079_vm5 = vcmp.eq.f32.partialorder %v6600_v24, %v5721_v60  ;;  %v5739_v24 = vpop.xlane.xlu1 %2212  ;;  %v2163_v42 = vand.u32 65535, %v6609_v31  ;;  %v2193_v31 = vand.u32 65535, %v5389_v2 }
 0x323   :  { %v2080_v18 = vsel %vm2079_vm5, %v2075_v63, inf  ;;  %6606 = vst [vmem:[#allocation16_spill] sm:$0xff] %v5739_v24  ;;  %v2180_v21 = vcvt.s32.f32 %v2178_v33 }
 0x324   :  { %2126 = vmin.xlane.f32.xlu1 %v2125_v61  ;;  %2081 = vmin.xlane.f32.xlu0 %v2080_v18  ;;  %v6608_v18 = vld [vmem:[#allocation7_spill] sm:$0xff]  ;;  %v2165_v46 = vcvt.s32.f32 %v2163_v42  ;;  %v2195_v42 = vcvt.s32.f32 %v2193_v31 }
 0x325   :  { %v5731_v26 = vpop.xlane.xlu0 %2107  ;;  %v2208_v41 = vand.u32 65535, %v6608_v18  ;;  %v2185_v56 = vsel %vm2184_vm8, %v2180_v21, inf  ;;  %v2238_v18 = vand.u32 65535, %v6613_v37 }
 0x326   :  { %vm2109_vm7 = vcmp.eq.f32.partialorder %v6604_v35, %v5731_v26  ;;  %v6610_v35 = vld [vmem:[#allocation3_spill] sm:$0xff] }
 0x327   :  { %v2110_v63 = vsel %vm2109_vm7, %v2105_v28, inf  ;;  %vm2214_vm10 = vcmp.eq.f32.partialorder %v6610_v35, %v5739_v24  ;;  %v2210_v33 = vcvt.s32.f32 %v2208_v41  ;;  %v2240_v41 = vcvt.s32.f32 %v2238_v18  ;;  %v6618_v35 = vld [vmem:[#allocation66_spill] sm:$0xff]  ;;  %v6619_v24 = vld [vmem:[#allocation71_spill] sm:$0xff] }
 0x328   :  { %2156 = vmin.xlane.f32.xlu1 %v2155_v32  ;;  %2111 = vmin.xlane.f32.xlu0 %v2110_v63  ;;  %v5749_v32 = vpop.xlane.xlu1 %2242  ;;  %v2268_v37 = vand.u32 65535, %v6618_v35  ;;  %v2223_v2 = vand.u32 65535, %v6619_v24 }
 0x329   :  { %v5741_v61 = vpop.xlane.xlu0 %2137  ;;  %6611 = vst [vmem:[#allocation19_spill] sm:$0xff] %v5749_v32 }
 0x32a   :  { %6607 = vst [vmem:[#allocation18_spill] sm:$0xff] %v5741_v61  ;;  %vm2139_vm9 = vcmp.eq.f32.partialorder %v5385_v59, %v5741_v61  ;;  %v2215_v59 = vsel %vm2214_vm10, %v2210_v33, inf  ;;  %v2270_v18 = vcvt.s32.f32 %v2268_v37  ;;  %v2225_v31 = vcvt.s32.f32 %v2223_v2  ;;  %v6652_v61 = vld [vmem:[#allocation81_spill] sm:$0xff] }
 0x32b   :  { %v2140_v28 = vsel %vm2139_vm9, %v2135_v9, inf  ;;  %v6615_v9 = vld [vmem:[#allocation5_spill] sm:$0xff] }
 0x32c   :  { %2186 = vmin.xlane.f32.xlu1 %v2185_v56  ;;  %2141 = vmin.xlane.f32.xlu0 %v2140_v28  ;;  %vm2244_vm12 = vcmp.eq.f32.partialorder %v6615_v9, %v5749_v32  ;;  %v5759_v56 = vpop.xlane.xlu1 %2272  ;;  %v6623_v9 = vld [vmem:[#allocation10_spill] sm:$0xff]  ;;  %v6624_v32 = vld [vmem:[#allocation72_spill] sm:$0xff] }
 0x32d   :  { %v5751_v63 = vpop.xlane.xlu0 %2167  ;;  %6616 = vst [vmem:[#allocation20_spill] sm:$0xff] %v5759_v56  ;;  %v2298_v35 = vand.u32 65535, %v6623_v9  ;;  %v2253_v24 = vand.u32 65535, %v6624_v32 }
 0x32e   :  { %6612 = vst [vmem:[#allocation21_spill] sm:$0xff] %v5751_v63  ;;  %vm2169_vm11 = vcmp.eq.f32.partialorder %v6614_v12, %v5751_v63  ;;  %v2245_v12 = vsel %vm2244_vm12, %v2240_v41, inf  ;;  %v6625_v63 = vld [vmem:[#allocation76_spill] sm:$0xff] }
 0x32f   :  { %v2170_v21 = vsel %vm2169_vm11, %v2165_v46, inf  ;;  %v6620_v46 = vld [vmem:[#allocation8_spill] sm:$0xff]  ;;  %v2300_v37 = vcvt.s32.f32 %v2298_v35  ;;  %v2255_v2 = vcvt.s32.f32 %v2253_v24 }
 0x330   :  { %2216 = vmin.xlane.f32.xlu1 %v2215_v59  ;;  %2171 = vmin.xlane.f32.xlu0 %v2170_v21  ;;  %vm2274_vm14 = vcmp.eq.f32.partialorder %v6620_v46, %v5759_v56  ;;  %v5769_v59 = vpop.xlane.xlu1 %2302  ;;  %v6629_v46 = vld [vmem:[#allocation73_spill] sm:$0xff] }
 0x331   :  { %v5761_v28 = vpop.xlane.xlu0 %2197  ;;  %6621 = vst [vmem:[#allocation24_spill] sm:$0xff] %v5769_v59  ;;  %v2328_v9 = vand.u32 65535, %v6629_v46  ;;  %v6630_v56 = vld [vmem:[#allocation77_spill] sm:$0xff] }
 0x332   :  { %6617 = vst [vmem:[#allocation22_spill] sm:$0xff] %v5761_v28  ;;  %vm2199_vm13 = vcmp.eq.f32.partialorder %v5416_v62, %v5761_v28  ;;  %v2275_v62 = vsel %vm2274_vm14, %v2270_v18, inf  ;;  %v2283_v32 = vand.u32 65535, %v6630_v56  ;;  %v6631_v28 = vld [vmem:[#allocation78_spill] sm:$0xff] }
 0x333   :  { %v2200_v33 = vsel %vm2199_vm13, %v2195_v42, inf  ;;  %v6626_v42 = vld [vmem:[#allocation69_spill] sm:$0xff]  ;;  %v2330_v35 = vcvt.s32.f32 %v2328_v9  ;;  %v6640_v9 = vld [vmem:[#allocation86_spill] sm:$0xff] }
 0x334   :  { %2246 = vmin.xlane.f32.xlu1 %v2245_v12  ;;  %2201 = vmin.xlane.f32.xlu0 %v2200_v33  ;;  %vm2304_vm1 = vcmp.eq.f32.partialorder %v6626_v42, %v5769_v59  ;;  %v2285_v24 = vcvt.s32.f32 %v2283_v32  ;;  %v6635_v42 = vld [vmem:[#allocation80_spill] sm:$0xff]  ;;  %v6636_v59 = vld [vmem:[#allocation79_spill] sm:$0xff]  ;;  %v2388_v32 = vand.u32 65535, %v6640_v9 }
 0x335   :  { %v5771_v21 = vpop.xlane.xlu0 %2227  ;;  %v5779_v12 = vpop.xlane.xlu1 %2332  ;;  %v2358_v46 = vand.u32 65535, %v6635_v42  ;;  %v2313_v56 = vand.u32 65535, %v6636_v59  ;;  %v6642_v59 = vld [vmem:[#allocation85_spill] sm:$0xff]  ;;  %v6648_v9 = vld [vmem:[#allocation11_spill] sm:$0xff] }
 0x336   :  { %6622 = vst [vmem:[#allocation23_spill] sm:$0xff] %v5771_v21  ;;  %vm2229_vm15 = vcmp.eq.f32.partialorder %v6625_v63, %v5771_v21  ;;  %6627 = vst [vmem:[#allocation25_spill] sm:$0xff] %v5779_v12  ;;  %v2305_v63 = vsel %vm2304_vm1, %v2300_v37, inf  ;;  %v6637_v21 = vld [vmem:[#allocation83_spill] sm:$0xff] }
 0x337   :  { %v2230_v41 = vsel %vm2229_vm15, %v2225_v31, inf  ;;  %v6632_v31 = vld [vmem:[#allocation75_spill] sm:$0xff] }
 0x338   :  { %2276 = vmin.xlane.f32.xlu1 %v2275_v62  ;;  %2231 = vmin.xlane.f32.xlu0 %v2230_v41  ;;  %vm2334_vm3 = vcmp.eq.f32.partialorder %v6632_v31, %v5779_v12  ;;  %v2315_v31 = vcvt.s32.f32 %v2313_v56  ;;  %v6641_v12 = vld [vmem:[#allocation84_spill] sm:$0xff]  ;;  %v6646_v56 = vld [vmem:[#allocation13_spill] sm:$0xff] }
 0x339   :  { %v5781_v33 = vpop.xlane.xlu0 %2257  ;;  %v2343_v42 = vand.u32 65535, %v6641_v12  ;;  %v6647_v12 = vld [vmem:[#allocation87_spill] sm:$0xff] }
 0x33a   :  { %6628 = vst [vmem:[#allocation27_spill] sm:$0xff] %v5781_v33  ;;  %vm2259_vm2 = vcmp.eq.f32.partialorder %v6631_v28, %v5781_v33  ;;  %v2335_v28 = vsel %vm2334_vm3, %v2330_v35, inf }
 0x33b   :  { %v2260_v18 = vsel %vm2259_vm2, %v2255_v2, inf  ;;  %v6638_v2 = vld [vmem:[#allocation82_spill] sm:$0xff] }
 0x33c   :  { %2306 = vmin.xlane.f32.xlu1 %v2305_v63  ;;  %2261 = vmin.xlane.f32.xlu0 %v2260_v18  ;;  %v2360_v18 = vcvt.s32.f32 %v2358_v46 }
 0x33d   :  { %v5789_v62 = vpop.xlane.xlu1 %2362  ;;  %v5791_v41 = vpop.xlane.xlu0 %2287 }
 0x33e   :  { %6633 = vst [vmem:[#allocation26_spill] sm:$0xff] %v5789_v62  ;;  %6634 = vst [vmem:[#allocation28_spill] sm:$0xff] %v5791_v41  ;;  %vm2289_vm4 = vcmp.eq.f32.partialorder %v6637_v21, %v5791_v41  ;;  %vm2364_vm5 = vcmp.eq.f32.partialorder %v6638_v2, %v5789_v62  ;;  %v6645_v2 = vld [vmem:[#allocation88_spill] sm:$0xff] }
 0x33f   :  { %v2290_v37 = vsel %vm2289_vm4, %v2285_v24, inf  ;;  %v2365_v33 = vsel %vm2364_vm5, %v2360_v18, inf  ;;  %v2373_v46 = vand.u32 65535, %v6645_v2  ;;  %v6650_v2 = vld [vmem:[#allocation14_spill] sm:$0xff] }
 0x340   :  { %2336 = vmin.xlane.f32.xlu1 %v2335_v28  ;;  %2291 = vmin.xlane.f32.xlu0 %v2290_v37  ;;  %v2390_v28 = vcvt.s32.f32 %v2388_v32  ;;  %v2345_v37 = vcvt.s32.f32 %v2343_v42  ;;  %v1454_v32 = vcvt.f32.s32 %v5413_v7  ;;  %v1529_v7 = vcvt.f32.s32 %v6652_v61 }
 0x341   :  { %v5799_v63 = vpop.xlane.xlu0 %2317  ;;  %v2375_v62 = vcvt.s32.f32 %v2373_v46 }
 0x342   :  { %6639 = vst [vmem:[#allocation29_spill] sm:$0xff] %v5799_v63  ;;  %vm2319_vm6 = vcmp.eq.f32.partialorder %v6642_v59, %v5799_v63  ;;  %v1469_v59 = vcvt.f32.s32 %v6648_v9 }
 0x343   :  { %v2320_v21 = vsel %vm2319_vm6, %v2315_v31, inf }
 0x344   :  { %2366 = vmin.xlane.f32.xlu1 %v2365_v33  ;;  %2321 = vmin.xlane.f32.xlu0 %v2320_v21 }
 0x345   :  { %v5805_v35 = vpop.xlane.xlu1 %2392  ;;  %v5807_v24 = vpop.xlane.xlu0 %2347 }
 0x346   :  { %6643 = vst [vmem:[#allocation30_spill] sm:$0xff] %v5805_v35  ;;  %6644 = vst [vmem:[#allocation31_spill] sm:$0xff] %v5807_v24  ;;  %vm2394_vm7 = vcmp.eq.f32.partialorder %v6646_v56, %v5805_v35  ;;  %vm2349_vm8 = vcmp.eq.f32.partialorder %v6647_v12, %v5807_v24  ;;  %v1470_v56 = vshll.u32 %v1469_v59, 16  ;;  %v6651_v35 = vld [vmem:[#allocation74_spill] sm:$0xff] }
 0x347   :  { %v2395_v18 = vsel %vm2394_vm7, %v2390_v28, inf  ;;  %v2350_v31 = vsel %vm2349_vm8, %v2345_v37, inf  ;;  %v1499_v63 = vcvt.f32.s32 %v6651_v35  ;;  %v6653_v35 = vld [vmem:[#allocation12_spill] sm:$0xff] }
 0x348   :  { %2396 = vmin.xlane.f32.xlu1 %v2395_v18  ;;  %2351 = vmin.xlane.f32.xlu0 %v2350_v31  ;;  %v1455_v18 = vshll.u32 %v1454_v32, 16  ;;  %v1484_v31 = vcvt.f32.s32 %v5443_v50  ;;  %v1530_v32 = vshll.u32 %v1529_v7, 16  ;;  %v1559_v50 = vcvt.f32.s32 %v5484_v29 }
 0x349   :  { %v1467_v33 = vpop.xlane.xlu1 %1466  ;;  %v5815_v21 = vpop.xlane.xlu0 %2377  ;;  %v1500_v46 = vshll.u32 %v1499_v63, 16 }
 0x34a   :  { %6649 = vst [vmem:[#allocation32_spill] sm:$0xff] %v5815_v21  ;;  %v1468_v42 = vcvt.f32.s32 %v1467_v33  ;;  %vm2379_vm9 = vcmp.eq.f32.partialorder %v6650_v2, %v5815_v21 }
 0x34b   :  { %v2380_v12 = vsel %vm2379_vm9, %v2375_v62, inf  ;;  %v1485_v62 = vshll.u32 %v1484_v31, 16  ;;  %v1589_v31 = vcvt.f32.s32 %v5511_v10 }
 0x34c   :  { %2381 = vmin.xlane.f32.xlu0 %v2380_v12  ;;  %v1471_v9 = vadd.s32 %v1470_v56, %v1468_v42  ;;  %v3932_v12 = vmov 0.0  }
 0x34d   :  { %v1497_v28 = vpop.xlane.xlu1 %1496  ;;  %v1452_v37 = vpop.xlane.xlu0 %1451  ;;  %v1590_v10 = vshll.u32 %v1589_v31, 16 }
 0x34e   :  { %v1498_v24 = vcvt.f32.s32 %v1497_v28  ;;  %v1453_v41 = vcvt.f32.s32 %v1452_v37  ;;  %vm2403_vm10 = vcmp.eq.s32.totalorder %v6653_v35, %v1471_v9 }
 0x34f   :  { %v3312_v39 = vsel %vm2403_vm10, 1.0, %v3932_v12 }
 0x350   :  { %v1456_v33 = vadd.s32 %v1455_v18, %v1453_v41  ;;  %v1501_v2 = vadd.s32 %v1500_v46, %v1498_v24  ;;  %v1515_v41 = vshll.u32 %v1514_v5, 16  ;;  %v1560_v18 = vshll.u32 %v1559_v50, 16 }
 0x351   :  { %v1527_v59 = vpop.xlane.xlu1 %1526  ;;  %v1482_v21 = vpop.xlane.xlu0 %1481 }
 0x352   :  { %v1528_v42 = vcvt.f32.s32 %v1527_v59  ;;  %v1483_v56 = vcvt.f32.s32 %v1482_v21  ;;  %vm2402_vm11 = vcmp.eq.s32.totalorder %v6653_v35, %v1456_v33  ;;  %vm2405_vm12 = vcmp.eq.s32.totalorder %v6653_v35, %v1501_v2 }
 0x353   :  { %v3311_v63 = vsel %vm2402_vm11, 1.0, %v3932_v12  ;;  %v1544_v21 = vcvt.f32.s32 %v5500_v43  ;;  %v3314_v5 = vsel %vm2405_vm12, 1.0, %v3932_v12  ;;  %v1574_v33 = vcvt.f32.s32 %v5519_v3 }
 0x354   :  { %v1486_v61 = vadd.s32 %v1485_v62, %v1483_v56  ;;  %3687 = vmatprep.mubr.msk.f32.mxu1 %vm142_vm0, %v3311_v63  ;;  %v1531_v24 = vadd.s32 %v1530_v32, %v1528_v42  ;;  %v1619_v32 = vcvt.f32.s32 %v5527_v15 }
 0x355   :  { %v1557_v28 = vpop.xlane.xlu1 %1556  ;;  %3688 = vmatmul.mubr.msk.f32.vlgmr.msra.gmra.mrb[0].mxu1 %vm142_vm0, %v3312_v39  ;;  %v1512_v9 = vpop.xlane.xlu0 %1511  ;;  %v1545_v62 = vshll.u32 %v1544_v21, 16 }
 0x356   :  { %v1558_v37 = vcvt.f32.s32 %v1557_v28  ;;  %v1513_v29 = vcvt.f32.s32 %v1512_v9  ;;  %vm2404_vm13 = vcmp.eq.s32.totalorder %v6653_v35, %v1486_v61  ;;  %vm2407_vm14 = vcmp.eq.s32.totalorder %v6653_v35, %v1531_v24 }
 0x357   :  { %v3313_v46 = vsel %vm2404_vm13, 1.0, %v3932_v12  ;;  %v3316_v3 = vsel %vm2407_vm14, 1.0, %v3932_v12  ;;  %v1575_v61 = vshll.u32 %v1574_v33, 16  ;;  %v1604_v28 = vcvt.f32.s32 %v5535_v54 }
 0x358   :  { %v1516_v7 = vadd.s32 %v1515_v41, %v1513_v29  ;;  %3690 = vmatprep.mubr.msk.f32.mxu1 %vm142_vm0, %v3313_v46  ;;  %v1561_v59 = vadd.s32 %v1560_v18, %v1558_v37  ;;  %v1620_v15 = vshll.u32 %v1619_v32, 16  ;;  %v1649_v37 = vcvt.f32.s32 %v5549_v23 }
 0x359   :  { %v1587_v2 = vpop.xlane.xlu1 %1586  ;;  %3691 = vmatmul.mubr.msk.f32.gmra.mrb[2].mxu1 %vm142_vm0, %v3314_v5  ;;  %v1542_v43 = vpop.xlane.xlu0 %1541  ;;  %v1634_v46 = vcvt.f32.s32 %v5563_v51  ;;  %v1605_v33 = vshll.u32 %v1604_v28, 16 }
 0x35a   :  { %v1588_v42 = vcvt.f32.s32 %v1587_v2  ;;  %v1543_v56 = vcvt.f32.s32 %v1542_v43  ;;  %vm2406_vm15 = vcmp.eq.s32.totalorder %v6653_v35, %v1516_v7  ;;  %vm2409_vm1 = vcmp.eq.s32.totalorder %v6653_v35, %v1561_v59 }
 0x35b   :  { %v3315_v50 = vsel %vm2406_vm15, 1.0, %v3932_v12  ;;  %v3318_v31 = vsel %vm2409_vm1, 1.0, %v3932_v12  ;;  %v1650_v23 = vshll.u32 %v1649_v37, 16  ;;  %v1679_v43 = vcvt.f32.s32 %v5569_v13 }
 0x35c   :  { %v1546_v63 = vadd.s32 %v1545_v62, %v1543_v56  ;;  %3693 = vmatprep.mubr.msk.f32.mxu1 %vm142_vm0, %v3315_v50  ;;  %v1591_v39 = vadd.s32 %v1590_v10, %v1588_v42  ;;  %v1635_v56 = vshll.u32 %v1634_v46, 16  ;;  %v1694_v46 = vcvt.f32.s32 %v5584_v38 }
 0x35d   :  { %v1617_v41 = vpop.xlane.xlu1 %1616  ;;  %3694 = vmatmul.mubr.msk.f32.gmra.mrb[4].mxu1 %vm142_vm0, %v3316_v3  ;;  %v1572_v24 = vpop.xlane.xlu0 %1571  ;;  %v1680_v13 = vshll.u32 %v1679_v43, 16  ;;  %v1739_v43 = vcvt.f32.s32 %v5591_v16 }
 0x35e   :  { %v1618_v9 = vcvt.f32.s32 %v1617_v41  ;;  %v1573_v21 = vcvt.f32.s32 %v1572_v24  ;;  %vm2408_vm2 = vcmp.eq.s32.totalorder %v6653_v35, %v1546_v63  ;;  %vm2411_vm3 = vcmp.eq.s32.totalorder %v6653_v35, %v1591_v39 }
 0x35f   :  { %v3317_v29 = vsel %vm2408_vm2, 1.0, %v3932_v12  ;;  %v3320_v51 = vsel %vm2411_vm3, 1.0, %v3932_v12  ;;  %v1664_v63 = vcvt.f32.s32 %v5574_v55 }
 0x360   :  { %v1576_v18 = vadd.s32 %v1575_v61, %v1573_v21  ;;  %3696 = vmatprep.mubr.msk.f32.mxu1 %vm142_vm0, %v3317_v29  ;;  %v1621_v7 = vadd.s32 %v1620_v15, %v1618_v9  ;;  %v1709_v15 = vcvt.f32.s32 %v5579_v22 }
 0x361   :  { %v1647_v5 = vpop.xlane.xlu1 %1646  ;;  %3697 = vmatmul.mubr.msk.f32.gmra.mrb[6].mxu1 %vm142_vm0, %v3318_v31  ;;  %v1602_v54 = vpop.xlane.xlu0 %1601  ;;  %v1665_v21 = vshll.u32 %v1664_v63, 16 }
 0x362   :  { %v1648_v59 = vcvt.f32.s32 %v1647_v5  ;;  %v1603_v2 = vcvt.f32.s32 %v1602_v54  ;;  %vm2410_vm4 = vcmp.eq.s32.totalorder %v6653_v35, %v1576_v18  ;;  %vm2413_vm5 = vcmp.eq.s32.totalorder %v6653_v35, %v1621_v7 }
 0x363   :  { %v3319_v62 = vsel %vm2410_vm4, 1.0, %v3932_v12  ;;  %v3322_v24 = vsel %vm2413_vm5, 1.0, %v3932_v12  ;;  %v1710_v5 = vshll.u32 %v1709_v15, 16 }
 0x364   :  { %v1606_v42 = vadd.s32 %v1605_v33, %v1603_v2  ;;  %3699 = vmatprep.mubr.msk.f32.mxu1 %vm142_vm0, %v3319_v62  ;;  %v1651_v10 = vadd.s32 %v1650_v23, %v1648_v59  ;;  %v1695_v2 = vshll.u32 %v1694_v46, 16  ;;  %v1829_v46 = vcvt.f32.s32 %v5589_v53 }
 0x365   :  { %v1677_v32 = vpop.xlane.xlu1 %1676  ;;  %3700 = vmatmul.mubr.msk.f32.gmra.mrb[8].mxu1 %vm142_vm0, %v3320_v51  ;;  %v1632_v50 = vpop.xlane.xlu0 %1631  ;;  %v1859_v53 = vcvt.f32.s32 %v5601_v36 }
 0x366   :  { %v1678_v3 = vcvt.f32.s32 %v1677_v32  ;;  %v1633_v61 = vcvt.f32.s32 %v1632_v50  ;;  %vm2412_vm6 = vcmp.eq.s32.totalorder %v6653_v35, %v1606_v42  ;;  %vm2415_vm7 = vcmp.eq.s32.totalorder %v6653_v35, %v1651_v10 }
 0x367   :  { %v3321_v39 = vsel %vm2412_vm6, 1.0, %v3932_v12  ;;  %v3324_v18 = vsel %vm2415_vm7, 1.0, %v3932_v12  ;;  %v1724_v42 = vcvt.f32.s32 %v5596_v45 }
 0x368   :  { %v1636_v41 = vadd.s32 %v1635_v56, %v1633_v61  ;;  %3702 = vmatprep.mubr.msk.f32.mxu1 %vm142_vm0, %v3321_v39  ;;  %v1681_v28 = vadd.s32 %v1680_v13, %v1678_v3  ;;  %v1740_v56 = vshll.u32 %v1739_v43, 16  ;;  %v1769_v61 = vcvt.f32.s32 %v5603_v34 }
 0x369   :  { %3703 = vmatmul.mubr.msk.f32.gmra.mrb[10].mxu1 %vm142_vm0, %v3322_v24  ;;  %v1662_v9 = vpop.xlane.xlu0 %1661  ;;  %v1725_v63 = vshll.u32 %v1724_v42, 16  ;;  %v1754_v39 = vcvt.f32.s32 %v5610_v8  ;;  %v1830_v43 = vshll.u32 %v1829_v46, 16 }
 0x36a   :  { %v1663_v55 = vcvt.f32.s32 %v1662_v9  ;;  %vm2414_vm8 = vcmp.eq.s32.totalorder %v6653_v35, %v1636_v41  ;;  %vm2417_vm9 = vcmp.eq.s32.totalorder %v6653_v35, %v1681_v28  ;;  %v1770_v24 = vshll.u32 %v1769_v61, 16 }
 0x36b   :  { %v3323_v37 = vsel %vm2414_vm8, 1.0, %v3932_v12  ;;  %v3326_v54 = vsel %vm2417_vm9, 1.0, %v3932_v12  ;;  %v1874_v61 = vcvt.f32.s32 %v5653_v1 }
 0x36c   :  { %v1666_v29 = vadd.s32 %v1665_v21, %v1663_v55  ;;  %3705 = vmatprep.mubr.msk.f32.mxu1 %vm142_vm0, %v3323_v37  ;;  %v1755_v55 = vshll.u32 %v1754_v39, 16  ;;  %v1799_v37 = vcvt.f32.s32 %v5615_v44  ;;  %v1814_v44 = vcvt.f32.s32 %v5635_v30 }
 0x36d   :  { %v1707_v31 = vpop.xlane.xlu1 %1706  ;;  %3706 = vmatmul.mubr.msk.f32.gmra.mrb[12].mxu1 %vm142_vm0, %v3324_v18  ;;  %v1784_v18 = vcvt.f32.s32 %v5625_v52  ;;  %v1844_v30 = vcvt.f32.s32 %v5643_v25 }
 0x36e   :  { %v1708_v7 = vcvt.f32.s32 %v1707_v31  ;;  %vm2416_vm10 = vcmp.eq.s32.totalorder %v6653_v35, %v1666_v29 }
 0x36f   :  { %v3325_v22 = vsel %vm2416_vm10, 1.0, %v3932_v12  ;;  %v1785_v52 = vshll.u32 %v1784_v18, 16  ;;  %v1845_v39 = vshll.u32 %v1844_v30, 16 }
 0x370   :  { %3708 = vmatprep.mubr.msk.f32.mxu1 %vm142_vm0, %v3325_v22  ;;  %v1711_v33 = vadd.s32 %v1710_v5, %v1708_v7  ;;  %v1800_v7 = vshll.u32 %v1799_v37, 16 }
 0x371   :  { %3709 = vmatmul.mubr.msk.f32.gmra.mrb[14].mxu1 %vm142_vm0, %v3326_v54  ;;  %v1692_v59 = vpop.xlane.xlu0 %1691 }
 0x372   :  { %v1693_v23 = vcvt.f32.s32 %v1692_v59  ;;  %vm2419_vm11 = vcmp.eq.s32.totalorder %v6653_v35, %v1711_v33 }
 0x373   :  { %v3328_v32 = vsel %vm2419_vm11, 1.0, %v3932_v12 }
 0x374   :  { %v1696_v62 = vadd.s32 %v1695_v2, %v1693_v23 }
 0x375   :  { %v1737_v38 = vpop.xlane.xlu1 %1736 }
 0x376   :  { %v1738_v51 = vcvt.f32.s32 %v1737_v38  ;;  %vm2418_vm12 = vcmp.eq.s32.totalorder %v6653_v35, %v1696_v62  ;;  %v1815_v38 = vshll.u32 %v1814_v44, 16 }
 0x377   :  { %v3327_v10 = vsel %vm2418_vm12, 1.0, %v3932_v12 }
 0x378   :  { %3711 = vmatprep.mubr.msk.f32.mxu1 %vm142_vm0, %v3327_v10  ;;  %v1741_v50 = vadd.s32 %v1740_v56, %v1738_v51 }
 0x379   :  { %3712 = vmatmul.mubr.msk.f32.gmra.mrb[16].mxu1 %vm142_vm0, %v3328_v32  ;;  %v1722_v16 = vpop.xlane.xlu0 %1721 }
 0x37a   :  { %v1723_v3 = vcvt.f32.s32 %v1722_v16  ;;  %vm2421_vm13 = vcmp.eq.s32.totalorder %v6653_v35, %v1741_v50  ;;  %v1860_v50 = vshll.u32 %v1859_v53, 16  ;;  %v1889_v16 = vcvt.f32.s32 %v5608_v58 }
 0x37b   :  { %v3330_v9 = vsel %vm2421_vm13, 1.0, %v3932_v12 }
 0x37c   :  { %v1726_v13 = vadd.s32 %v1725_v63, %v1723_v3  ;;  %v1890_v58 = vshll.u32 %v1889_v16, 16 }
 0x37d   :  { %v1767_v45 = vpop.xlane.xlu1 %1766 }
 0x37e   :  { %v1768_v41 = vcvt.f32.s32 %v1767_v45  ;;  %vm2420_vm14 = vcmp.eq.s32.totalorder %v6653_v35, %v1726_v13 }
 0x37f   :  { %v3329_v28 = vsel %vm2420_vm14, 1.0, %v3932_v12 }
 0x380   :  { %3714 = vmatprep.mubr.msk.f32.mxu1 %vm142_vm0, %v3329_v28  ;;  %v1771_v21 = vadd.s32 %v1770_v24, %v1768_v41  ;;  %v1919_v28 = vcvt.f32.s32 %v5621_v14 }
 0x381   :  { %3715 = vmatmul.mubr.msk.f32.gmra.mrb[18].mxu1 %vm142_vm0, %v3330_v9  ;;  %v1752_v34 = vpop.xlane.xlu0 %1751 }
 0x382   :  { %v1753_v15 = vcvt.f32.s32 %v1752_v34  ;;  %vm2423_vm15 = vcmp.eq.s32.totalorder %v6653_v35, %v1771_v21  ;;  %v1875_v34 = vshll.u32 %v1874_v61, 16  ;;  %v1920_v14 = vshll.u32 %v1919_v28, 16 }
 0x383   :  { %v3332_v22 = vsel %vm2423_vm15, 1.0, %v3932_v12 }
 0x384   :  { %v1756_v29 = vadd.s32 %v1755_v55, %v1753_v15 }
 0x385   :  { %v1797_v8 = vpop.xlane.xlu1 %1796 }
 0x386   :  { %v1798_v31 = vcvt.f32.s32 %v1797_v8  ;;  %vm2422_vm1 = vcmp.eq.s32.totalorder %v6653_v35, %v1756_v29  ;;  %v1904_v29 = vcvt.f32.s32 %v5663_v57 }
 0x387   :  { %v3331_v5 = vsel %vm2422_vm1, 1.0, %v3932_v12 }
 0x388   :  { %3717 = vmatprep.mubr.msk.f32.mxu1 %vm142_vm0, %v3331_v5  ;;  %v1801_v54 = vadd.s32 %v1800_v7, %v1798_v31  ;;  %v1949_v31 = vcvt.f32.s32 %v5633_v0 }
 0x389   :  { %v1827_v33 = vpop.xlane.xlu1 %1826  ;;  %3718 = vmatmul.mubr.msk.f32.gmra.mrb[20].mxu1 %vm142_vm0, %v3332_v22  ;;  %v1782_v59 = vpop.xlane.xlu0 %1781  ;;  %v1934_v22 = vcvt.f32.s32 %v5671_v4 }
 0x38a   :  { %v1828_v2 = vcvt.f32.s32 %v1827_v33  ;;  %v1783_v23 = vcvt.f32.s32 %v1782_v59  ;;  %vm2425_vm2 = vcmp.eq.s32.totalorder %v6653_v35, %v1801_v54  ;;  %v1905_v33 = vshll.u32 %v1904_v29, 16 }
 0x38b   :  { %v3334_v36 = vsel %vm2425_vm2, 1.0, %v3932_v12  ;;  %v1950_v0 = vshll.u32 %v1949_v31, 16  ;;  %v1935_v53 = vshll.u32 %v1934_v22, 16 }
 0x38c   :  { %v1786_v62 = vadd.s32 %v1785_v52, %v1783_v23  ;;  %v1831_v42 = vadd.s32 %v1830_v43, %v1828_v2  ;;  %v1979_v2 = vcvt.f32.s32 %v5649_v6 }
 0x38d   :  { %v1857_v51 = vpop.xlane.xlu1 %1856  ;;  %v1812_v56 = vpop.xlane.xlu0 %1811 }
 0x38e   :  { %v1858_v10 = vcvt.f32.s32 %v1857_v51  ;;  %v1813_v32 = vcvt.f32.s32 %v1812_v56  ;;  %vm2424_vm3 = vcmp.eq.s32.totalorder %v6653_v35, %v1786_v62  ;;  %vm2427_vm4 = vcmp.eq.s32.totalorder %v6653_v35, %v1831_v42 }
 0x38f   :  { %v3333_v63 = vsel %vm2424_vm3, 1.0, %v3932_v12  ;;  %v3336_v1 = vsel %vm2427_vm4, 1.0, %v3932_v12  ;;  %v1964_v51 = vcvt.f32.s32 %v5681_v19  ;;  %v1980_v6 = vshll.u32 %v1979_v2, 16 }
 0x390   :  { %v1816_v3 = vadd.s32 %v1815_v38, %v1813_v32  ;;  %3720 = vmatprep.mubr.msk.f32.mxu1 %vm142_vm0, %v3333_v63  ;;  %v1861_v13 = vadd.s32 %v1860_v50, %v1858_v10  ;;  %v2009_v10 = vcvt.f32.s32 %v5661_v48  ;;  %v1994_v63 = vcvt.f32.s32 %v5691_v17 }
 0x391   :  { %v1887_v45 = vpop.xlane.xlu1 %1886  ;;  %3721 = vmatmul.mubr.msk.f32.gmra.mrb[22].mxu1 %vm142_vm0, %v3334_v36  ;;  %v1842_v25 = vpop.xlane.xlu0 %1841  ;;  %v1965_v61 = vshll.u32 %v1964_v51, 16 }
 0x392   :  { %v1888_v41 = vcvt.f32.s32 %v1887_v45  ;;  %v1843_v24 = vcvt.f32.s32 %v1842_v25  ;;  %vm2426_vm5 = vcmp.eq.s32.totalorder %v6653_v35, %v1816_v3  ;;  %vm2429_vm6 = vcmp.eq.s32.totalorder %v6653_v35, %v1861_v13 }
 0x393   :  { %v3335_v9 = vsel %vm2426_vm5, 1.0, %v3932_v12  ;;  %v3338_v5 = vsel %vm2429_vm6, 1.0, %v3932_v12  ;;  %v2010_v48 = vshll.u32 %v2009_v10, 16  ;;  %v2039_v25 = vcvt.f32.s32 %v5677_v47 }
 0x394   :  { %v1846_v21 = vadd.s32 %v1845_v39, %v1843_v24  ;;  %3723 = vmatprep.mubr.msk.f32.mxu1 %vm142_vm0, %v3335_v9  ;;  %v1891_v55 = vadd.s32 %v1890_v58, %v1888_v41  ;;  %v1995_v24 = vshll.u32 %v1994_v63, 16 }
 0x395   :  { %v1917_v15 = vpop.xlane.xlu1 %1916  ;;  %3724 = vmatmul.mubr.msk.f32.gmra.mrb[24].mxu1 %vm142_vm0, %v3336_v1  ;;  %v1872_v37 = vpop.xlane.xlu0 %1871  ;;  %v2040_v47 = vshll.u32 %v2039_v25, 16  ;;  %v6656_v25 = vld [vmem:[#allocation17_spill] sm:$0xff] }
 0x396   :  { %v1918_v8 = vcvt.f32.s32 %v1917_v15  ;;  %v1873_v18 = vcvt.f32.s32 %v1872_v37  ;;  %vm2428_vm7 = vcmp.eq.s32.totalorder %v6653_v35, %v1846_v21  ;;  %vm2431_vm8 = vcmp.eq.s32.totalorder %v6653_v35, %v1891_v55 }
 0x397   :  { %v3337_v46 = vsel %vm2428_vm7, 1.0, %v3932_v12  ;;  %v3340_v4 = vsel %vm2431_vm8, 1.0, %v3932_v12  ;;  %v2024_v21 = vcvt.f32.s32 %v5701_v49  ;;  %v2069_v55 = vcvt.f32.s32 %v5689_v11 }
 0x398   :  { %v1876_v7 = vadd.s32 %v1875_v34, %v1873_v18  ;;  %3726 = vmatprep.mubr.msk.f32.mxu1 %vm142_vm0, %v3337_v46  ;;  %v1921_v44 = vadd.s32 %v1920_v14, %v1918_v8  ;;  %v2054_v8 = vcvt.f32.s32 %v5711_v27 }
 0x399   :  { %v1947_v54 = vpop.xlane.xlu1 %1946  ;;  %3727 = vmatmul.mubr.msk.f32.gmra.mrb[26].mxu1 %vm142_vm0, %v3338_v5  ;;  %v1902_v57 = vpop.xlane.xlu0 %1901  ;;  %v2025_v31 = vshll.u32 %v2024_v21, 16  ;;  %v2070_v11 = vshll.u32 %v2069_v55, 16  ;;  %v2099_v5 = vcvt.f32.s32 %v5699_v40 }
 0x39a   :  { %v1948_v59 = vcvt.f32.s32 %v1947_v54  ;;  %v1903_v52 = vcvt.f32.s32 %v1902_v57  ;;  %vm2430_vm9 = vcmp.eq.s32.totalorder %v6653_v35, %v1876_v7  ;;  %vm2433_vm10 = vcmp.eq.s32.totalorder %v6653_v35, %v1921_v44 }
 0x39b   :  { %v3339_v23 = vsel %vm2430_vm9, 1.0, %v3932_v12  ;;  %v3342_v16 = vsel %vm2433_vm10, 1.0, %v3932_v12  ;;  %v2055_v54 = vshll.u32 %v2054_v8, 16  ;;  %v2100_v40 = vshll.u32 %v2099_v5, 16 }
 0x39c   :  { %v1906_v43 = vadd.s32 %v1905_v33, %v1903_v52  ;;  %3729 = vmatprep.mubr.msk.f32.mxu1 %vm142_vm0, %v3339_v23  ;;  %v1951_v62 = vadd.s32 %v1950_v0, %v1948_v59  ;;  %v2084_v52 = vcvt.f32.s32 %v5721_v60  ;;  %v2129_v23 = vcvt.f32.s32 %v5709_v20 }
 0x39d   :  { %v1977_v38 = vpop.xlane.xlu1 %1976  ;;  %3730 = vmatmul.mubr.msk.f32.gmra.mrb[28].mxu1 %vm142_vm0, %v3340_v4  ;;  %v1932_v42 = vpop.xlane.xlu0 %1931 }
 0x39e   :  { %v1978_v56 = vcvt.f32.s32 %v1977_v38  ;;  %v1933_v30 = vcvt.f32.s32 %v1932_v42  ;;  %vm2432_vm11 = vcmp.eq.s32.totalorder %v6653_v35, %v1906_v43  ;;  %vm2435_vm12 = vcmp.eq.s32.totalorder %v6653_v35, %v1951_v62 }
 0x39f   :  { %v3341_v32 = vsel %vm2432_vm11, 1.0, %v3932_v12  ;;  %v3344_v17 = vsel %vm2435_vm12, 1.0, %v3932_v12  ;;  %v2114_v62 = vcvt.f32.s32 %v5731_v26  ;;  %v2085_v51 = vshll.u32 %v2084_v52, 16 }
 0x3a0   :  { %v1936_v50 = vadd.s32 %v1935_v53, %v1933_v30  ;;  %3732 = vmatprep.mubr.msk.f32.mxu1 %vm142_vm0, %v3341_v32  ;;  %v1981_v3 = vadd.s32 %v1980_v6, %v1978_v56  ;;  %v2130_v20 = vshll.u32 %v2129_v23, 16  ;;  %v6654_v6 = vld [vmem:[#allocation15_spill] sm:$0xff] }
 0x3a1   :  { %v2007_v36 = vpop.xlane.xlu1 %2006  ;;  %3733 = vmatmul.mubr.msk.f32.gmra.mrb[30].mxu1 %vm142_vm0, %v3342_v16  ;;  %v1962_v19 = vpop.xlane.xlu0 %1961  ;;  %v2159_v10 = vcvt.f32.s32 %v6654_v6  ;;  %v2115_v16 = vshll.u32 %v2114_v62, 16 }
 0x3a2   :  { %v2008_v13 = vcvt.f32.s32 %v2007_v36  ;;  %v1963_v45 = vcvt.f32.s32 %v1962_v19  ;;  %vm2434_vm13 = vcmp.eq.s32.totalorder %v6653_v35, %v1936_v50  ;;  %vm2437_vm14 = vcmp.eq.s32.totalorder %v6653_v35, %v1981_v3  ;;  %v6655_v19 = vld [vmem:[#allocation18_spill] sm:$0xff] }
 0x3a3   :  { %v3343_v39 = vsel %vm2434_vm13, 1.0, %v3932_v12  ;;  %v3346_v29 = vsel %vm2437_vm14, 1.0, %v3932_v12 }
 0x3a4   :  { %v1966_v41 = vadd.s32 %v1965_v61, %v1963_v45  ;;  %3735 = vmatprep.mubr.msk.f32.mxu1 %vm142_vm0, %v3343_v39  ;;  %v2011_v58 = vadd.s32 %v2010_v48, %v2008_v13  ;;  %v2144_v61 = vcvt.f32.s32 %v6655_v19  ;;  %v2160_v48 = vshll.u32 %v2159_v10, 16 }
 0x3a5   :  { %v2037_v28 = vpop.xlane.xlu1 %2036  ;;  %3736 = vmatmul.mubr.msk.f32.gmra.mrb[32].mxu1 %vm142_vm0, %v3344_v17  ;;  %v1992_v9 = vpop.xlane.xlu0 %1991  ;;  %v2189_v39 = vcvt.f32.s32 %v6656_v25 }
 0x3a6   :  { %v2038_v1 = vcvt.f32.s32 %v2037_v28  ;;  %v1993_v34 = vcvt.f32.s32 %v1992_v9  ;;  %vm2436_vm15 = vcmp.eq.s32.totalorder %v6653_v35, %v1966_v41  ;;  %vm2439_vm1 = vcmp.eq.s32.totalorder %v6653_v35, %v2011_v58  ;;  %v6657_v58 = vld [vmem:[#allocation21_spill] sm:$0xff] }
 0x3a7   :  { %v3345_v15 = vsel %vm2436_vm15, 1.0, %v3932_v12  ;;  %v3348_v27 = vsel %vm2439_vm1, 1.0, %v3932_v12  ;;  %v2174_v28 = vcvt.f32.s32 %v6657_v58 }
 0x3a8   :  { %v1996_v37 = vadd.s32 %v1995_v24, %v1993_v34  ;;  %3738 = vmatprep.mubr.msk.f32.mxu1 %vm142_vm0, %v3345_v15  ;;  %v2041_v18 = vadd.s32 %v2040_v47, %v2038_v1  ;;  %v2145_v34 = vshll.u32 %v2144_v61, 16  ;;  %v2190_v15 = vshll.u32 %v2189_v39, 16 }
 0x3a9   :  { %v2067_v14 = vpop.xlane.xlu1 %2066  ;;  %3739 = vmatmul.mubr.msk.f32.gmra.mrb[34].mxu1 %vm142_vm0, %v3346_v29  ;;  %v2022_v49 = vpop.xlane.xlu0 %2021 }
 0x3aa   :  { %v2068_v46 = vcvt.f32.s32 %v2067_v14  ;;  %v2023_v7 = vcvt.f32.s32 %v2022_v49  ;;  %vm2438_vm2 = vcmp.eq.s32.totalorder %v6653_v35, %v1996_v37  ;;  %vm2441_vm3 = vcmp.eq.s32.totalorder %v6653_v35, %v2041_v18  ;;  %v6658_v37 = vld [vmem:[#allocation16_spill] sm:$0xff] }
 0x3ab   :  { %v3347_v22 = vsel %vm2438_vm2, 1.0, %v3932_v12  ;;  %v3350_v53 = vsel %vm2441_vm3, 1.0, %v3932_v12  ;;  %v2219_v29 = vcvt.f32.s32 %v6658_v37  ;;  %v2175_v49 = vshll.u32 %v2174_v28, 16 }
 0x3ac   :  { %v2026_v44 = vadd.s32 %v2025_v31, %v2023_v7  ;;  %3741 = vmatprep.mubr.msk.f32.mxu1 %vm142_vm0, %v3347_v22  ;;  %v2071_v57 = vadd.s32 %v2070_v11, %v2068_v46  ;;  %v6659_v11 = vld [vmem:[#allocation22_spill] sm:$0xff] }
 0x3ad   :  { %v2097_v33 = vpop.xlane.xlu1 %2096  ;;  %3742 = vmatmul.mubr.msk.f32.gmra.mrb[36].mxu1 %vm142_vm0, %v3348_v27  ;;  %v2052_v59 = vpop.xlane.xlu0 %2051  ;;  %v2204_v5 = vcvt.f32.s32 %v6659_v11  ;;  %v2220_v27 = vshll.u32 %v2219_v29, 16 }
 0x3ae   :  { %v2098_v0 = vcvt.f32.s32 %v2097_v33  ;;  %v2053_v2 = vcvt.f32.s32 %v2052_v59  ;;  %vm2440_vm4 = vcmp.eq.s32.totalorder %v6653_v35, %v2026_v44  ;;  %vm2443_vm5 = vcmp.eq.s32.totalorder %v6653_v35, %v2071_v57 }
 0x3af   :  { %v3349_v43 = vsel %vm2440_vm4, 1.0, %v3932_v12  ;;  %v3352_v26 = vsel %vm2443_vm5, 1.0, %v3932_v12 }
 0x3b0   :  { %v2056_v4 = vadd.s32 %v2055_v54, %v2053_v2  ;;  %3744 = vmatprep.mubr.msk.f32.mxu1 %vm142_vm0, %v3349_v43  ;;  %v2101_v38 = vadd.s32 %v2100_v40, %v2098_v0  ;;  %v6660_v54 = vld [vmem:[#allocation19_spill] sm:$0xff] }
 0x3b1   :  { %v2127_v42 = vpop.xlane.xlu1 %2126  ;;  %3745 = vmatmul.mubr.msk.f32.gmra.mrb[38].mxu1 %vm142_vm0, %v3350_v53  ;;  %v2082_v60 = vpop.xlane.xlu0 %2081  ;;  %v2249_v57 = vcvt.f32.s32 %v6660_v54  ;;  %v6661_v0 = vld [vmem:[#allocation23_spill] sm:$0xff] }
 0x3b2   :  { %v2128_v56 = vcvt.f32.s32 %v2127_v42  ;;  %v2083_v30 = vcvt.f32.s32 %v2082_v60  ;;  %vm2442_vm6 = vcmp.eq.s32.totalorder %v6653_v35, %v2056_v4  ;;  %vm2445_vm7 = vcmp.eq.s32.totalorder %v6653_v35, %v2101_v38  ;;  %v6662_v42 = vld [vmem:[#allocation20_spill] sm:$0xff] }
 0x3b3   :  { %v3351_v32 = vsel %vm2442_vm6, 1.0, %v3932_v12  ;;  %v3354_v24 = vsel %vm2445_vm7, 1.0, %v3932_v12  ;;  %v2234_v2 = vcvt.f32.s32 %v6661_v0  ;;  %v2205_v4 = vshll.u32 %v2204_v5, 16 }
 0x3b4   :  { %v2086_v50 = vadd.s32 %v2085_v51, %v2083_v30  ;;  %3747 = vmatprep.mubr.msk.f32.mxu1 %vm142_vm0, %v3351_v32  ;;  %v2131_v63 = vadd.s32 %v2130_v20, %v2128_v56  ;;  %v2250_v38 = vshll.u32 %v2249_v57, 16  ;;  %v2279_v60 = vcvt.f32.s32 %v6662_v42 }
 0x3b5   :  { %v2157_v3 = vpop.xlane.xlu1 %2156  ;;  %3748 = vmatmul.mubr.msk.f32.gmra.mrb[40].mxu1 %vm142_vm0, %v3352_v26  ;;  %v2112_v36 = vpop.xlane.xlu0 %2111  ;;  %v2235_v20 = vshll.u32 %v2234_v2, 16 }
 0x3b6   :  { %v2158_v13 = vcvt.f32.s32 %v2157_v3  ;;  %v2113_v45 = vcvt.f32.s32 %v2112_v36  ;;  %vm2444_vm8 = vcmp.eq.s32.totalorder %v6653_v35, %v2086_v50  ;;  %vm2447_vm9 = vcmp.eq.s32.totalorder %v6653_v35, %v2131_v63  ;;  %v6663_v50 = vld [vmem:[#allocation27_spill] sm:$0xff]  ;;  %v6664_v36 = vld [vmem:[#allocation24_spill] sm:$0xff] }
 0x3b7   :  { %v3353_v41 = vsel %vm2444_vm8, 1.0, %v3932_v12  ;;  %v3356_v14 = vsel %vm2447_vm9, 1.0, %v3932_v12  ;;  %v2264_v26 = vcvt.f32.s32 %v6663_v50  ;;  %v2280_v3 = vshll.u32 %v2279_v60, 16 }
 0x3b8   :  { %v2116_v17 = vadd.s32 %v2115_v16, %v2113_v45  ;;  %3750 = vmatprep.mubr.msk.f32.mxu1 %vm142_vm0, %v3353_v41  ;;  %v2161_v9 = vadd.s32 %v2160_v48, %v2158_v13  ;;  %v2309_v19 = vcvt.f32.s32 %v6664_v36  ;;  %v6665_v48 = vld [vmem:[#allocation28_spill] sm:$0xff] }
 0x3b9   :  { %v2187_v21 = vpop.xlane.xlu1 %2186  ;;  %3751 = vmatmul.mubr.msk.f32.gmra.mrb[42].mxu1 %vm142_vm0, %v3354_v24  ;;  %v2142_v1 = vpop.xlane.xlu0 %2141  ;;  %v2294_v25 = vcvt.f32.s32 %v6665_v48  ;;  %v2265_v24 = vshll.u32 %v2264_v26, 16 }
 0x3ba   :  { %v2188_v47 = vcvt.f32.s32 %v2187_v21  ;;  %v2143_v55 = vcvt.f32.s32 %v2142_v1  ;;  %vm2446_vm10 = vcmp.eq.s32.totalorder %v6653_v35, %v2116_v17  ;;  %vm2449_vm11 = vcmp.eq.s32.totalorder %v6653_v35, %v2161_v9  ;;  %v6666_v21 = vld [vmem:[#allocation25_spill] sm:$0xff] }
 0x3bb   :  { %v3355_v8 = vsel %vm2446_vm10, 1.0, %v3932_v12  ;;  %v3358_v52 = vsel %vm2449_vm11, 1.0, %v3932_v12  ;;  %v2310_v9 = vshll.u32 %v2309_v19, 16  ;;  %v2339_v1 = vcvt.f32.s32 %v6666_v21 }
 0x3bc   :  { %v2146_v18 = vadd.s32 %v2145_v34, %v2143_v55  ;;  %3753 = vmatprep.mubr.msk.f32.mxu1 %vm142_vm0, %v3355_v8  ;;  %v2191_v31 = vadd.s32 %v2190_v15, %v2188_v47  ;;  %v2295_v15 = vshll.u32 %v2294_v25, 16 }
 0x3bd   :  { %v2217_v46 = vpop.xlane.xlu1 %2216  ;;  %3754 = vmatmul.mubr.msk.f32.gmra.mrb[44].mxu1 %vm142_vm0, %v3356_v14  ;;  %v2172_v7 = vpop.xlane.xlu0 %2171 }
 0x3be   :  { %v2218_v22 = vcvt.f32.s32 %v2217_v46  ;;  %v2173_v44 = vcvt.f32.s32 %v2172_v7  ;;  %vm2448_vm12 = vcmp.eq.s32.totalorder %v6653_v35, %v2146_v18  ;;  %vm2451_vm13 = vcmp.eq.s32.totalorder %v6653_v35, %v2191_v31  ;;  %v6667_v18 = vld [vmem:[#allocation29_spill] sm:$0xff]  ;;  %v6668_v7 = vld [vmem:[#allocation26_spill] sm:$0xff] }
 0x3bf   :  { %v3357_v33 = vsel %vm2448_vm12, 1.0, %v3932_v12  ;;  %v3360_v30 = vsel %vm2451_vm13, 1.0, %v3932_v12  ;;  %v2324_v14 = vcvt.f32.s32 %v6667_v18  ;;  %v2340_v46 = vshll.u32 %v2339_v1, 16 }
 0x3c0   :  { %v2176_v59 = vadd.s32 %v2175_v49, %v2173_v44  ;;  %3756 = vmatprep.mubr.msk.f32.mxu1 %vm142_vm0, %v3357_v33  ;;  %v2221_v40 = vadd.s32 %v2220_v27, %v2218_v22  ;;  %v2369_v11 = vcvt.f32.s32 %v6668_v7  ;;  %v6669_v27 = vld [vmem:[#allocation31_spill] sm:$0xff] }
 0x3c1   :  { %v2247_v23 = vpop.xlane.xlu1 %2246  ;;  %3757 = vmatmul.mubr.msk.f32.gmra.mrb[46].mxu1 %vm142_vm0, %v3358_v52  ;;  %v2202_v43 = vpop.xlane.xlu0 %2201  ;;  %v2354_v54 = vcvt.f32.s32 %v6669_v27  ;;  %v2325_v52 = vshll.u32 %v2324_v14, 16 }
 0x3c2   :  { %v2248_v53 = vcvt.f32.s32 %v2247_v23  ;;  %v2203_v62 = vcvt.f32.s32 %v2202_v43  ;;  %vm2450_vm14 = vcmp.eq.s32.totalorder %v6653_v35, %v2176_v59  ;;  %vm2453_vm15 = vcmp.eq.s32.totalorder %v6653_v35, %v2221_v40  ;;  %v6670_v23 = vld [vmem:[#allocation30_spill] sm:$0xff] }
 0x3c3   :  { %v3359_v51 = vsel %vm2450_vm14, 1.0, %v3932_v12  ;;  %v3362_v45 = vsel %vm2453_vm15, 1.0, %v3932_v12  ;;  %v2370_v40 = vshll.u32 %v2369_v11, 16  ;;  %v2399_v43 = vcvt.f32.s32 %v6670_v23 }
 0x3c4   :  { %v2206_v56 = vadd.s32 %v2205_v4, %v2203_v62  ;;  %3759 = vmatprep.mubr.msk.f32.mxu1 %vm142_vm0, %v3359_v51  ;;  %v2251_v6 = vadd.s32 %v2250_v38, %v2248_v53  ;;  %v2355_v38 = vshll.u32 %v2354_v54, 16 }
 0x3c5   :  { %v2277_v10 = vpop.xlane.xlu1 %2276  ;;  %3760 = vmatmul.mubr.msk.f32.gmra.mrb[48].mxu1 %vm142_vm0, %v3360_v30  ;;  %v2232_v32 = vpop.xlane.xlu0 %2231 }
 0x3c6   :  { %v2278_v16 = vcvt.f32.s32 %v2277_v10  ;;  %v2233_v63 = vcvt.f32.s32 %v2232_v32  ;;  %vm2452_vm1 = vcmp.eq.s32.totalorder %v6653_v35, %v2206_v56  ;;  %vm2455_vm2 = vcmp.eq.s32.totalorder %v6653_v35, %v2251_v6  ;;  %v6671_v56 = vld [vmem:[#allocation32_spill] sm:$0xff] }
 0x3c7   :  { %v3361_v61 = vsel %vm2452_vm1, 1.0, %v3932_v12  ;;  %v3364_v55 = vsel %vm2455_vm2, 1.0, %v3932_v12  ;;  %v2384_v30 = vcvt.f32.s32 %v6671_v56  ;;  %v2400_v10 = vshll.u32 %v2399_v43, 16 }
 0x3c8   :  { %v2236_v13 = vadd.s32 %v2235_v20, %v2233_v63  ;;  %3762 = vmatprep.mubr.msk.f32.mxu1 %vm142_vm0, %v3361_v61  ;;  %v2281_v39 = vadd.s32 %v2280_v3, %v2278_v16 }
 0x3c9   :  { %v2307_v41 = vpop.xlane.xlu1 %2306  ;;  %3763 = vmatmul.mubr.msk.f32.gmra.mrb[50].mxu1 %vm142_vm0, %v3362_v45  ;;  %v2262_v17 = vpop.xlane.xlu0 %2261  ;;  %v2385_v3 = vshll.u32 %v2384_v30, 16 }
 0x3ca   :  { %v2308_v58 = vcvt.f32.s32 %v2307_v41  ;;  %v2263_v28 = vcvt.f32.s32 %v2262_v17  ;;  %vm2454_vm3 = vcmp.eq.s32.totalorder %v6653_v35, %v2236_v13  ;;  %vm2457_vm4 = vcmp.eq.s32.totalorder %v6653_v35, %v2281_v39 }
 0x3cb   :  { %v3363_v34 = vsel %vm2454_vm3, 1.0, %v3932_v12  ;;  %v3366_v44 = vsel %vm2457_vm4, 1.0, %v3932_v12 }
 0x3cc   :  { %v2266_v47 = vadd.s32 %v2265_v24, %v2263_v28  ;;  %3765 = vmatprep.mubr.msk.f32.mxu1 %vm142_vm0, %v3363_v34  ;;  %v2311_v37 = vadd.s32 %v2310_v9, %v2308_v58 }
 0x3cd   :  { %v2337_v29 = vpop.xlane.xlu1 %2336  ;;  %3766 = vmatmul.mubr.msk.f32.gmra.mrb[52].mxu1 %vm142_vm0, %v3364_v55  ;;  %v2292_v8 = vpop.xlane.xlu0 %2291 }
 0x3ce   :  { %v2338_v49 = vcvt.f32.s32 %v2337_v29  ;;  %v2293_v31 = vcvt.f32.s32 %v2292_v8  ;;  %vm2456_vm5 = vcmp.eq.s32.totalorder %v6653_v35, %v2266_v47  ;;  %vm2459_vm6 = vcmp.eq.s32.totalorder %v6653_v35, %v2311_v37 }
 0x3cf   :  { %v3365_v5 = vsel %vm2456_vm5, 1.0, %v3932_v12  ;;  %v3368_v62 = vsel %vm2459_vm6, 1.0, %v3932_v12 }
 0x3d0   :  { %v2296_v22 = vadd.s32 %v2295_v15, %v2293_v31  ;;  %3768 = vmatprep.mubr.msk.f32.mxu1 %vm142_vm0, %v3365_v5  ;;  %v2341_v57 = vadd.s32 %v2340_v46, %v2338_v49 }
 0x3d1   :  { %v2367_v33 = vpop.xlane.xlu1 %2366  ;;  %3769 = vmatmul.mubr.msk.f32.gmra.mrb[54].mxu1 %vm142_vm0, %v3366_v44  ;;  %v2322_v59 = vpop.xlane.xlu0 %2321 }
 0x3d2   :  { %v2368_v0 = vcvt.f32.s32 %v2367_v33  ;;  %v2323_v2 = vcvt.f32.s32 %v2322_v59  ;;  %vm2458_vm7 = vcmp.eq.s32.totalorder %v6653_v35, %v2296_v22  ;;  %vm2461_vm8 = vcmp.eq.s32.totalorder %v6653_v35, %v2341_v57 }
 0x3d3   :  { %v3367_v4 = vsel %vm2458_vm7, 1.0, %v3932_v12  ;;  %v3370_v26 = vsel %vm2461_vm8, 1.0, %v3932_v12 }
 0x3d4   :  { %v2326_v53 = vadd.s32 %v2325_v52, %v2323_v2  ;;  %3771 = vmatprep.mubr.msk.f32.mxu1 %vm142_vm0, %v3367_v4  ;;  %v2371_v42 = vadd.s32 %v2370_v40, %v2368_v0 }
 0x3d5   :  { %v2397_v60 = vpop.xlane.xlu1 %2396  ;;  %3772 = vmatmul.mubr.msk.f32.gmra.mrb[56].mxu1 %vm142_vm0, %v3368_v62  ;;  %v2352_v51 = vpop.xlane.xlu0 %2351 }
 0x3d6   :  { %v2398_v20 = vcvt.f32.s32 %v2397_v60  ;;  %v2353_v6 = vcvt.f32.s32 %v2352_v51  ;;  %vm2460_vm9 = vcmp.eq.s32.totalorder %v6653_v35, %v2326_v53  ;;  %vm2463_vm10 = vcmp.eq.s32.totalorder %v6653_v35, %v2371_v42 }
 0x3d7   :  { %v3369_v32 = vsel %vm2460_vm9, 1.0, %v3932_v12  ;;  %v3372_v13 = vsel %vm2463_vm10, 1.0, %v3932_v12 }
 0x3d8   :  { %v2356_v50 = vadd.s32 %v2355_v38, %v2353_v6  ;;  %3774 = vmatprep.mubr.msk.f32.mxu1 %vm142_vm0, %v3369_v32  ;;  %v2401_v16 = vadd.s32 %v2400_v10, %v2398_v20 }
 0x3d9   :  { %3775 = vmatmul.mubr.msk.f32.gmra.mrb[58].mxu1 %vm142_vm0, %v3370_v26  ;;  %v2382_v63 = vpop.xlane.xlu0 %2381 }
 0x3da   :  { %v2383_v36 = vcvt.f32.s32 %v2382_v63  ;;  %vm2462_vm11 = vcmp.eq.s32.totalorder %v6653_v35, %v2356_v50  ;;  %vm2465_vm12 = vcmp.eq.s32.totalorder %v6653_v35, %v2401_v16 }
 0x3db   :  { %v3371_v19 = vsel %vm2462_vm11, 1.0, %v3932_v12  ;;  %v3374_v48 = vsel %vm2465_vm12, 1.0, %v3932_v12 }
 0x3dc   :  { %v2386_v61 = vadd.s32 %v2385_v3, %v2383_v36  ;;  %3777 = vmatprep.mubr.msk.f32.mxu1 %vm142_vm0, %v3371_v19 }
 0x3dd   :  { %3778 = vmatmul.mubr.msk.f32.gmra.mrb[60].mxu1 %vm142_vm0, %v3372_v13 }
 0x3de   :  { %vm2464_vm13 = vcmp.eq.s32.totalorder %v6653_v35, %v2386_v61 }
 0x3df   :  { %v3373_v45 = vsel %vm2464_vm13, 1.0, %v3932_v12 }
 0x3e0   :  { %3780 = vmatprep.mubr.msk.f32.mxu1 %vm142_vm0, %v3373_v45 }
 0x3e1   :  { %3781 = vmatmul.mubr.msk.f32.gmra.mrb[62].mxu1 %vm142_vm0, %v3374_v48 }
 0x428   :  { %v3689_v25 = vpop.f32.mrb[0].mxu1 }
 0x429   :  { %3176 = vst [vmem:[%s6269_s3 + $0x8] sm:$0xff] %v3689_v25  ;;  %v2856_v39 = vpop.f32.mrb[1].mxu1 }
 0x42a   :  { %3175 = vst [vmem:[%s6269_s3] sm:$0xff] %v2856_v39 }
 0x42c   :  { %v3692_v41 = vpop.f32.mrb[2].mxu1 }
 0x42d   :  { %3178 = vst [vmem:[%s6269_s3 + $0x18] sm:$0xff] %v3692_v41  ;;  %v2866_v35 = vpop.f32.mrb[3].mxu1 }
 0x42e   :  { %3177 = vst [vmem:[%s6269_s3 + $0x10] sm:$0xff] %v2866_v35 }
 0x430   :  { %v3695_v12 = vpop.f32.mrb[4].mxu1 }
 0x431   :  { %3180 = vst [vmem:[%s6269_s3 + $0x28] sm:$0xff] %v3695_v12  ;;  %v2876_v17 = vpop.f32.mrb[5].mxu1 }
 0x432   :  { %3179 = vst [vmem:[%s6269_s3 + $0x20] sm:$0xff] %v2876_v17 }
 0x434   :  { %v3698_v24 = vpop.f32.mrb[6].mxu1 }
 0x435   :  { %3182 = vst [vmem:[%s6269_s3 + $0x38] sm:$0xff] %v3698_v24  ;;  %v2886_v58 = vpop.f32.mrb[7].mxu1 }
 0x436   :  { %3181 = vst [vmem:[%s6269_s3 + $0x30] sm:$0xff] %v2886_v58 }
 0x438   :  { %v3701_v28 = vpop.f32.mrb[8].mxu1 }
 0x439   :  { %3184 = vst [vmem:[%s6269_s3 + $0x48] sm:$0xff] %v3701_v28  ;;  %v2896_v9 = vpop.f32.mrb[9].mxu1 }
 0x43a   :  { %3183 = vst [vmem:[%s6269_s3 + $0x40] sm:$0xff] %v2896_v9 }
 0x43c   :  { %v3704_v21 = vpop.f32.mrb[10].mxu1 }
 0x43d   :  { %3186 = vst [vmem:[%s6269_s3 + $0x58] sm:$0xff] %v3704_v21  ;;  %v2906_v1 = vpop.f32.mrb[11].mxu1 }
 0x43e   :  { %3185 = vst [vmem:[%s6269_s3 + $0x50] sm:$0xff] %v2906_v1 }
 0x440   :  { %v3707_v34 = vpop.f32.mrb[12].mxu1 }
 0x441   :  { %3188 = vst [vmem:[%s6269_s3 + $0x68] sm:$0xff] %v3707_v34  ;;  %v2916_v47 = vpop.f32.mrb[13].mxu1 }
 0x442   :  { %3187 = vst [vmem:[%s6269_s3 + $0x60] sm:$0xff] %v2916_v47 }
 0x444   :  { %v3710_v55 = vpop.f32.mrb[14].mxu1 }
 0x445   :  { %3190 = vst [vmem:[%s6269_s3 + $0x78] sm:$0xff] %v3710_v55  ;;  %v2926_v15 = vpop.f32.mrb[15].mxu1 }
 0x446   :  { %3189 = vst [vmem:[%s6269_s3 + $0x70] sm:$0xff] %v2926_v15 }
 0x44c   :  { %v3713_v37 = vpop.f32.mrb[16].mxu1 }
 0x44d   :  { %3192 = vst [vmem:[%s6269_s3 + $0x88] sm:$0xff] %v3713_v37  ;;  %v2936_v29 = vpop.f32.mrb[17].mxu1 }
 0x44e   :  { %3191 = vst [vmem:[%s6269_s3 + $0x80] sm:$0xff] %v2936_v29 }
 0x454   :  { %v3716_v8 = vpop.f32.mrb[18].mxu1 }
 0x455   :  { %3194 = vst [vmem:[%s6269_s3 + $0x98] sm:$0xff] %v3716_v8  ;;  %v2946_v18 = vpop.f32.mrb[19].mxu1 }
 0x456   :  { %3193 = vst [vmem:[%s6269_s3 + $0x90] sm:$0xff] %v2946_v18 }
 0x45c   :  { %v3719_v14 = vpop.f32.mrb[20].mxu1 }
 0x45d   :  { %3196 = vst [vmem:[%s6269_s3 + $0xa8] sm:$0xff] %v3719_v14  ;;  %v2956_v49 = vpop.f32.mrb[21].mxu1 }
 0x45e   :  { %3195 = vst [vmem:[%s6269_s3 + $0xa0] sm:$0xff] %v2956_v49 }
 0x464   :  { %v3722_v31 = vpop.f32.mrb[22].mxu1 }
 0x465   :  { %3198 = vst [vmem:[%s6269_s3 + $0xb8] sm:$0xff] %v3722_v31  ;;  %v2966_v46 = vpop.f32.mrb[23].mxu1 }
 0x466   :  { %3197 = vst [vmem:[%s6269_s3 + $0xb0] sm:$0xff] %v2966_v46 }
 0x468   :  { %v3725_v7 = vpop.f32.mrb[24].mxu1 }
 0x469   :  { %3200 = vst [vmem:[%s6269_s3 + $0xc8] sm:$0xff] %v3725_v7  ;;  %v2976_v11 = vpop.f32.mrb[25].mxu1 }
 0x46a   :  { %3199 = vst [vmem:[%s6269_s3 + $0xc0] sm:$0xff] %v2976_v11 }
 0x46c   :  { %v3728_v5 = vpop.f32.mrb[26].mxu1 }
 0x46d   :  { %3202 = vst [vmem:[%s6269_s3 + $0xd8] sm:$0xff] %v3728_v5  ;;  %v2986_v22 = vpop.f32.mrb[27].mxu1 }
 0x46e   :  { %3201 = vst [vmem:[%s6269_s3 + $0xd0] sm:$0xff] %v2986_v22 }
 0x470   :  { %v3731_v44 = vpop.f32.mrb[28].mxu1 }
 0x471   :  { %3204 = vst [vmem:[%s6269_s3 + $0xe8] sm:$0xff] %v3731_v44  ;;  %v2996_v27 = vpop.f32.mrb[29].mxu1 }
 0x472   :  { %3203 = vst [vmem:[%s6269_s3 + $0xe0] sm:$0xff] %v2996_v27 }
 0x474   :  { %v3734_v54 = vpop.f32.mrb[30].mxu1 }
 0x475   :  { %3206 = vst [vmem:[%s6269_s3 + $0xf8] sm:$0xff] %v3734_v54  ;;  %v3006_v57 = vpop.f32.mrb[31].mxu1 }
 0x476   :  { %3205 = vst [vmem:[%s6269_s3 + $0xf0] sm:$0xff] %v3006_v57 }
 0x478   :  { %v3737_v33 = vpop.f32.mrb[32].mxu1 }
 0x479   :  { %3208 = vst [vmem:[%s6269_s3 + $0x108] sm:$0xff] %v3737_v33  ;;  %v3016_v59 = vpop.f32.mrb[33].mxu1 }
 0x47a   :  { %3207 = vst [vmem:[%s6269_s3 + $0x100] sm:$0xff] %v3016_v59 }
 0x47c   :  { %v3740_v52 = vpop.f32.mrb[34].mxu1 }
 0x47d   :  { %3210 = vst [vmem:[%s6269_s3 + $0x118] sm:$0xff] %v3740_v52  ;;  %v3026_v0 = vpop.f32.mrb[35].mxu1 }
 0x47e   :  { %3209 = vst [vmem:[%s6269_s3 + $0x110] sm:$0xff] %v3026_v0 }
 0x480   :  { %v3743_v2 = vpop.f32.mrb[36].mxu1 }
 0x481   :  { %3212 = vst [vmem:[%s6269_s3 + $0x128] sm:$0xff] %v3743_v2  ;;  %v3036_v40 = vpop.f32.mrb[37].mxu1 }
 0x482   :  { %3211 = vst [vmem:[%s6269_s3 + $0x120] sm:$0xff] %v3036_v40 }
 0x484   :  { %v3746_v23 = vpop.f32.mrb[38].mxu1 }
 0x485   :  { %3214 = vst [vmem:[%s6269_s3 + $0x138] sm:$0xff] %v3746_v23  ;;  %v3046_v43 = vpop.f32.mrb[39].mxu1 }
 0x486   :  { %3213 = vst [vmem:[%s6269_s3 + $0x130] sm:$0xff] %v3046_v43 }
 0x488   :  { %v3749_v4 = vpop.f32.mrb[40].mxu1 }
 0x489   :  { %3216 = vst [vmem:[%s6269_s3 + $0x148] sm:$0xff] %v3749_v4  ;;  %v3056_v53 = vpop.f32.mrb[41].mxu1 }
 0x48a   :  { %3215 = vst [vmem:[%s6269_s3 + $0x140] sm:$0xff] %v3056_v53 }
 0x48c   :  { %v3752_v62 = vpop.f32.mrb[42].mxu1 }
 0x48d   :  { %3218 = vst [vmem:[%s6269_s3 + $0x158] sm:$0xff] %v3752_v62  ;;  %v3066_v38 = vpop.f32.mrb[43].mxu1 }
 0x48e   :  { %3217 = vst [vmem:[%s6269_s3 + $0x150] sm:$0xff] %v3066_v38 }
 0x490   :  { %v3755_v42 = vpop.f32.mrb[44].mxu1 }
 0x491   :  { %3220 = vst [vmem:[%s6269_s3 + $0x168] sm:$0xff] %v3755_v42  ;;  %v3076_v60 = vpop.f32.mrb[45].mxu1 }
 0x492   :  { %3219 = vst [vmem:[%s6269_s3 + $0x160] sm:$0xff] %v3076_v60 }
 0x494   :  { %v3758_v51 = vpop.f32.mrb[46].mxu1 }
 0x495   :  { %3222 = vst [vmem:[%s6269_s3 + $0x178] sm:$0xff] %v3758_v51  ;;  %v3086_v56 = vpop.f32.mrb[47].mxu1 }
 0x496   :  { %3221 = vst [vmem:[%s6269_s3 + $0x170] sm:$0xff] %v3086_v56 }
 0x498   :  { %v3761_v30 = vpop.f32.mrb[48].mxu1 }
 0x499   :  { %3224 = vst [vmem:[%s6269_s3 + $0x188] sm:$0xff] %v3761_v30  ;;  %v3096_v20 = vpop.f32.mrb[49].mxu1 }
 0x49a   :  { %3223 = vst [vmem:[%s6269_s3 + $0x180] sm:$0xff] %v3096_v20 }
 0x49c   :  { %v3764_v6 = vpop.f32.mrb[50].mxu1 }
 0x49d   :  { %3226 = vst [vmem:[%s6269_s3 + $0x198] sm:$0xff] %v3764_v6  ;;  %v3106_v10 = vpop.f32.mrb[51].mxu1 }
 0x49e   :  { %3225 = vst [vmem:[%s6269_s3 + $0x190] sm:$0xff] %v3106_v10 }
 0x4a0   :  { %v3767_v32 = vpop.f32.mrb[52].mxu1 }
 0x4a1   :  { %3228 = vst [vmem:[%s6269_s3 + $0x1a8] sm:$0xff] %v3767_v32  ;;  %v3116_v50 = vpop.f32.mrb[53].mxu1 }
 0x4a2   :  { %3227 = vst [vmem:[%s6269_s3 + $0x1a0] sm:$0xff] %v3116_v50 }
 0x4a4   :  { %v3770_v26 = vpop.f32.mrb[54].mxu1 }
 0x4a5   :  { %3230 = vst [vmem:[%s6269_s3 + $0x1b8] sm:$0xff] %v3770_v26  ;;  %v3126_v16 = vpop.f32.mrb[55].mxu1 }
 0x4a6   :  { %3229 = vst [vmem:[%s6269_s3 + $0x1b0] sm:$0xff] %v3126_v16 }
 0x4a8   :  { %v3773_v63 = vpop.f32.mrb[56].mxu1 }
 0x4a9   :  { %3232 = vst [vmem:[%s6269_s3 + $0x1c8] sm:$0xff] %v3773_v63  ;;  %v3136_v3 = vpop.f32.mrb[57].mxu1 }
 0x4aa   :  { %3231 = vst [vmem:[%s6269_s3 + $0x1c0] sm:$0xff] %v3136_v3 }
 0x4ac   :  { %v3776_v36 = vpop.f32.mrb[58].mxu1 }
 0x4ad   :  { %3234 = vst [vmem:[%s6269_s3 + $0x1d8] sm:$0xff] %v3776_v36  ;;  %v3146_v19 = vpop.f32.mrb[59].mxu1 }
 0x4ae   :  { %3233 = vst [vmem:[%s6269_s3 + $0x1d0] sm:$0xff] %v3146_v19 }
 0x4b0   :  { %v3779_v61 = vpop.f32.mrb[60].mxu1 }
 0x4b1   :  { %3236 = vst [vmem:[%s6269_s3 + $0x1e8] sm:$0xff] %v3779_v61  ;;  %v3156_v13 = vpop.f32.mrb[61].mxu1 }
 0x4b2   :  { %3235 = vst [vmem:[%s6269_s3 + $0x1e0] sm:$0xff] %v3156_v13 }
 0x4b4   :  { %v3782_v45 = vpop.f32.mrb[62].mxu1 }
 0x4b5   :  { %3238 = vst [vmem:[%s6269_s3 + $0x1f8] sm:$0xff] %v3782_v45  ;;  %v3166_v48 = vpop.f32.mrb[63].mxu1 }
 0x4b6   :  { %3237 = vst [vmem:[%s6269_s3 + $0x1f0] sm:$0xff] %v3166_v48 }

</bundles_post_ra>
